<compile_context>
chip_gen: v6e
topology: v6e:2x2x1
jax: 0.10.0
libtpu: 0.0.40
codegen_flags: <defaults>
</compile_context>

<pallas_src>
import jax
import jax.numpy as jnp
from jax import lax
from jax.experimental import pallas as pl
from jax.experimental.pallas import tpu as pltpu

# ---- "config" values (synthetic, small) ----
HIDDEN = 32            # config.hidden_size
EMB = 32               # config.embedding_dim
REDUCE_OUT = 256       # ReduceHidden output dim
INIT_NORMAL_STD = 0.01
INIT_UNIFORM_MAG = 0.1

NGATES = 3             # GRU gates r, z, n (PyTorch order)
NDIR = 2               # bidirectional
GATE_BLOCK = 128       # lanes per (gate, direction) slot -> every gate slice is vreg-aligned
GRU_WIDTH = NGATES * NDIR * GATE_BLOCK      # 768 fused gate lanes: [r_f|r_b|z_f|z_b|n_f|n_b]
HSTATE = NDIR * GATE_BLOCK                  # 256 packed hidden lanes: [h_fwd(128) | h_bwd(128)]


def _round_up(n, m):
    return ((n + m - 1) // m) * m


# ----------------- fused 3-encoder bidirectional GRU: one pallas_call, grid=(3,) -----------------
def _encoders_gru_kernel(x_ref, len_ref, wih_ref, whh_ref, bi_ref, bh_ref,
                         out_ref, hsum_ref, a_scr):
    T, Bm, _ = out_ref.shape
    GB = GATE_BLOCK

    # Hoisted input projection: one MXU push for all timesteps, both directions, all gates.
    a_scr[...] = (jnp.dot(x_ref[...], wih_ref[...], preferred_element_type=jnp.float32)
                  + bi_ref[...])                               # (T*Bm, 768) in VMEM scratch

    whh = whh_ref[...]                 # (256, 768) block matrix: rows [h_f | h_b] -> gate lanes
    bh = bh_ref[...]                   # (1, 768)
    seq_len = len_ref[...]             # (Bm, 1) int32 -> masks generated in-kernel

    lane = lax.broadcasted_iota(jnp.int32, (1, GRU_WIDTH), 1)
    is_fwd_gate = (lane & GB) == 0                              # forward-direction lanes of 768
    lane_h = lax.broadcasted_iota(jnp.int32, (1, HSTATE), 1)
    is_fwd_h = lane_h < GB                                      # forward half of packed hidden

    out_ref[...] = jnp.zeros_like(out_ref)                      # direction-summed accumulator
    h = jnp.zeros((Bm, HSTATE), jnp.float32)                    # [h_fwd | h_bwd], 128 lanes each

    # Both directions advance together; all time indices are static (fully unrolled).
    for s in range(T):
        tf, tb = s, T - 1 - s
        a = jnp.where(is_fwd_gate,
                      a_scr[tf * Bm:(tf + 1) * Bm],             # fwd gates read time tf
                      a_scr[tb * Bm:(tb + 1) * Bm])             # bwd gates read time tb
        c = jnp.dot(h, whh, preferred_element_type=jnp.float32) + bh   # the only serial matmul
        rz = jax.nn.sigmoid(a[:, :4 * GB] + c[:, :4 * GB])      # r,z for both dirs in one pass
        r = rz[:, :2 * GB]
        z = rz[:, 2 * GB:]
        n = jnp.tanh(a[:, 4 * GB:] + r * c[:, 4 * GB:])
        h_new = (1.0 - z) * n + z * h
        m_f = (seq_len > tf).astype(jnp.float32)                # (Bm, 1)
        m_b = (seq_len > tb).astype(jnp.float32)
        m = jnp.where(is_fwd_h, m_f, m_b)                       # per-direction mask, packed lanes
        h = m * h_new + (1.0 - m) * h                           # freeze state past seq_len
        out_ref[tf] = out_ref[tf] + m_f * h_new[:, :HIDDEN]               # fwd output at tf
        out_ref[tb] = out_ref[tb] + m_b * h_new[:, GB:GB + HIDDEN]        # bwd output at tb
    hsum_ref[...] = h[:, :HIDDEN] + h[:, GB:GB + HIDDEN]        # direction-summed final hidden


def encoders_gru(x_all, len_all, wih_all, whh_all, bi_all, bh_all, T, Bm):
    """x_all: [3, T*Bm, E] f32 (flattened, padded), len_all: [3, Bm, 1] int32.
    Weights per encoder with the per-gate 128-lane layout.
    Returns out [3, T, Bm, H] (fwd+bwd summed, zero-padded) and hsum [3, Bm, H]."""
    NE = x_all.shape[0]
    E = x_all.shape[2]
    W = wih_all.shape[2]
    out, hsum = pl.pallas_call(
        _encoders_gru_kernel,
        out_shape=(jax.ShapeDtypeStruct((NE, T, Bm, HIDDEN), jnp.float32),
                   jax.ShapeDtypeStruct((NE, Bm, HIDDEN), jnp.float32)),
        grid=(NE,),
        in_specs=[
            pl.BlockSpec((None, T * Bm, E), lambda e: (e, 0, 0)),
            pl.BlockSpec((None, Bm, 1), lambda e: (e, 0, 0)),
            pl.BlockSpec((None, E, W), lambda e: (e, 0, 0)),
            pl.BlockSpec((None, HSTATE, W), lambda e: (e, 0, 0)),
            pl.BlockSpec((None, 1, W), lambda e: (e, 0, 0)),
            pl.BlockSpec((None, 1, W), lambda e: (e, 0, 0)),
        ],
        out_specs=(
            pl.BlockSpec((None, T, Bm, HIDDEN), lambda e: (e, 0, 0, 0)),
            pl.BlockSpec((None, Bm, HIDDEN), lambda e: (e, 0, 0)),
        ),
        scratch_shapes=[pltpu.VMEM((T * Bm, W), jnp.float32)],
        compiler_params=pltpu.CompilerParams(dimension_semantics=("parallel",)),
    )(x_all, len_all, wih_all, whh_all, bi_all, bh_all)
    return out, hsum


# -------- fused LinearAttention + weighted-sum + ReduceHidden kernel --------
def _fuse_kernel(guide_ref, ast_h_ref, amask_ref, code_h_ref, name_h_ref,
                 w1_ref, w2_ref, batt_ref, wred_ref, bred_ref, out_ref):
    B, N, H = ast_h_ref.shape
    ast_h = ast_h_ref[...]                                               # (B,5,H)
    # LinearAttention: score = tanh(x.w1 + y.w2 + b)
    s1 = jnp.sum(guide_ref[...] * w1_ref[...], axis=1, keepdims=True)    # (1,1)
    s2 = jnp.sum(ast_h * w2_ref[...], axis=2)                            # (B,5) lane reduce
    scores = jnp.tanh(s2 + s1 + batt_ref[...])                           # (B,5)
    # masked softmax.  NOTE: an all-zero mask row yields a uniform distribution here
    # (allennlp masked_softmax would return zeros); no all-zero rows occur in practice.
    amask = amask_ref[...]
    scores = jnp.where(amask > 0.0, scores, jnp.float32(-1e30))
    scores = scores - jnp.max(scores, axis=1, keepdims=True)
    e = jnp.exp(scores)
    probs = e / jnp.sum(e, axis=1, keepdims=True)                        # (B,5)
    weighted = jnp.sum(ast_h * probs[:, :, None], axis=1)                # (B,H)
    # ReduceHidden: relu(cat(code,ast,name) @ W + b) as 3 matmul-accumulates (no concat)
    wred = wred_ref[...]                                                 # (3H, 256)
    out = (jnp.dot(code_h_ref[...], wred[:H], preferred_element_type=jnp.float32)
           + jnp.dot(weighted, wred[H:2 * H], preferred_element_type=jnp.float32)
           + jnp.dot(name_h_ref[...], wred[2 * H:], preferred_element_type=jnp.float32)
           + bred_ref[...])
    out_ref[...] = jnp.maximum(out, 0.0)


# ----------------------------- Model forward -----------------------------
def model_forward(params, code_batch, code_lens, ast_batch, ast_lens,
                  attention_mask, name_batch, name_lens):
    B = code_batch.shape[1]
    Tc, Tn, Ta = code_batch.shape[0], name_batch.shape[0], ast_batch[0].shape[0]
    Tm = max(Tc, Tn, Ta)
    Bm = _round_up(5 * B, 8)                    # AST streams batched on the batch axis

    # Embedding gathers (XLA glue).
    code_emb = params["emb_code"][code_batch]                     # (Tc, B, E)
    name_emb = params["emb_name"][name_batch]                     # (Tn, B, E)
    ast_tok = jnp.concatenate(ast_batch, axis=1)                  # (Ta, 5B) stream-major batch
    ast_emb = params["emb_ast"][ast_tok]                          # (Ta, 5B, E)

    def pad_x(x):
        t, b, _ = x.shape
        return jnp.pad(x, ((0, Tm - t), (0, Bm - b), (0, 0)))

    def pad_len(l):
        return jnp.pad(l.astype(jnp.int32), (0, Bm - l.shape[0]))

    x_all = jnp.stack([pad_x(code_emb), pad_x(name_emb), pad_x(ast_emb)]
                      ).reshape(3, Tm * Bm, EMB)                  # flattened for the hoisted matmul
    len_all = jnp.stack([pad_len(code_lens), pad_len(name_lens),
                         pad_len(jnp.concatenate(ast_lens, axis=0))])[..., None]   # (3, Bm, 1)

    out, hsum = encoders_gru(x_all, len_all, params["gru_wih"], params["gru_whh"],
                             params["gru_bi"], params["gru_bh"], Tm, Bm)

    code_outputs = out[0, :Tc, :B]                                # (Tc, B, H)
    # torch.cat((out_0,...,out_4), dim=0) -> [5*Ta, B, H]
    ast_outputs = (out[2, :Ta, :5 * B].reshape(Ta, 5, B, HIDDEN)
                   .transpose(1, 0, 2, 3).reshape(5 * Ta, B, HIDDEN))

    code_h = hsum[0, :B]                                          # (B,H)  fwd+bwd already summed
    name_h = hsum[1, :B]
    ast_h = hsum[2, :5 * B].reshape(5, B, HIDDEN).transpose(1, 0, 2)   # (B,5,H) = torch.stack dim=1

    vmem = pl.BlockSpec(memory_space=pltpu.MemorySpace.VMEM)
    dec = pl.pallas_call(
        _fuse_kernel,
        out_shape=jax.ShapeDtypeStruct((B, REDUCE_OUT), jnp.float32),
        in_specs=[vmem] * 10,
        out_specs=vmem,
    )(params["atten_guide"], ast_h, attention_mask.astype(jnp.float32),
      code_h, name_h,
      params["att_w1"], params["att_w2"], params["att_b"],
      params["red_w"], params["red_b"])
    decoder_hidden = dec[None]                                    # (1, B, 256)
    return code_outputs, ast_outputs, decoder_hidden


# ------------------------- deterministic params -------------------------
def _place_gates(w_f, w_b):
    """Scatter per-direction fused (K, 3H) weights (torch r,z,n order) into the
    per-(gate,direction) 128-lane layout (K, 768) = [r_f|r_b|z_f|z_b|n_f|n_b]."""
    K = w_f.shape[0]
    out = jnp.zeros((K, GRU_WIDTH), jnp.float32)
    for g in range(NGATES):
        out = out.at[:, (2 * g) * GATE_BLOCK:(2 * g) * GATE_BLOCK + HIDDEN].set(
            w_f[:, g * HIDDEN:(g + 1) * HIDDEN])
        out = out.at[:, (2 * g + 1) * GATE_BLOCK:(2 * g + 1) * GATE_BLOCK + HIDDEN].set(
            w_b[:, g * HIDDEN:(g + 1) * HIDDEN])
    return out


def _place_hidden_weights(w_f, w_b):
    """Block matrix (256, 768): rows 0:H drive forward gates, rows 128:128+H drive backward."""
    out = jnp.zeros((HSTATE, GRU_WIDTH), jnp.float32)
    for g in range(NGATES):
        out = out.at[:HIDDEN, (2 * g) * GATE_BLOCK:(2 * g) * GATE_BLOCK + HIDDEN].set(
            w_f[:, g * HIDDEN:(g + 1) * HIDDEN])
        out = out.at[GATE_BLOCK:GATE_BLOCK + HIDDEN,
                     (2 * g + 1) * GATE_BLOCK:(2 * g + 1) * GATE_BLOCK + HIDDEN].set(
            w_b[:, g * HIDDEN:(g + 1) * HIDDEN])
    return out


def _init_gru_direction(key):
    k1, k2 = jax.random.split(key)
    wih = jax.random.uniform(k1, (EMB, 3 * HIDDEN), jnp.float32,
                             -INIT_UNIFORM_MAG, INIT_UNIFORM_MAG)
    whh = jax.random.uniform(k2, (HIDDEN, 3 * HIDDEN), jnp.float32,
                             -INIT_UNIFORM_MAG, INIT_UNIFORM_MAG)
    n = 3 * HIDDEN
    bias = jnp.zeros((n,), jnp.float32).at[n // 4:n // 2].set(1.0)   # matches init_rnn_wt exactly
    return wih, whh, bias, bias


def init_encoder_params(key, vocab_size):
    k_emb, k_f, k_b = jax.random.split(key, 3)
    emb = INIT_NORMAL_STD * jax.random.normal(k_emb, (vocab_size, EMB), jnp.float32)
    wih_f, whh_f, bi_f, bh_f = _init_gru_direction(k_f)
    wih_b, whh_b, bi_b, bh_b = _init_gru_direction(k_b)
    return {
        "emb": emb,
        "wih": _place_gates(wih_f, wih_b),                          # (E, 768)
        "whh": _place_hidden_weights(whh_f, whh_b),                 # (256, 768)
        "bi": _place_gates(bi_f[None], bi_b[None]),                 # (1, 768)
        "bh": _place_gates(bh_f[None], bh_b[None]),                 # (1, 768)
    }


def init_model_params(key, code_vocab, ast_vocab):
    ks = jax.random.split(key, 8)
    enc_code = init_encoder_params(ks[0], code_vocab)
    enc_name = init_encoder_params(ks[1], code_vocab)
    enc_ast = init_encoder_params(ks[2], ast_vocab)       # ast_encoder_0 weights (shared by streams)

    def stack(name):
        return jnp.stack([enc_code[name], enc_name[name], enc_ast[name]])

    return {
        "emb_code": enc_code["emb"], "emb_name": enc_name["emb"], "emb_ast": enc_ast["emb"],
        "gru_wih": stack("wih"), "gru_whh": stack("whh"),
        "gru_bi": stack("bi"), "gru_bh": stack("bh"),
        "atten_guide": jax.random.normal(ks[3], (1, HIDDEN), jnp.float32),
        "att_w1": jax.random.uniform(ks[4], (1, HIDDEN), jnp.float32, -0.3, 0.3),
        "att_w2": jax.random.uniform(ks[5], (1, HIDDEN), jnp.float32, -0.3, 0.3),
        "att_b": jnp.zeros((1, 1), jnp.float32),
        "red_w": INIT_NORMAL_STD * jax.random.normal(ks[6], (3 * HIDDEN, REDUCE_OUT), jnp.float32),
        "red_b": INIT_NORMAL_STD * jax.random.normal(ks[7], (1, REDUCE_OUT), jnp.float32),
    }
    # TODO(synk): reference Model also defines an MLP (with Dropout/BatchNorm) that is never
    # called in forward(); it is intentionally not implemented.


if __name__ == "__main__":
    key = jax.random.PRNGKey(0)
    kp, kd = jax.random.split(key)
    CODE_VOCAB, AST_VOCAB = 50, 40
    params = init_model_params(kp, CODE_VOCAB, AST_VOCAB)

    B, T_CODE, T_NAME, T_AST = 2, 8, 6, 8
    kc, kn, *ka = jax.random.split(kd, 7)
    code_batch = jax.random.randint(kc, (T_CODE, B), 0, CODE_VOCAB, jnp.int32)
    code_lens = jnp.array([8, 5], jnp.int32)
    name_batch = jax.random.randint(kn, (T_NAME, B), 0, CODE_VOCAB, jnp.int32)
    name_lens = jnp.array([6, 3], jnp.int32)
    ast_batch = tuple(jax.random.randint(ka[i], (T_AST, B), 0, AST_VOCAB, jnp.int32)
                      for i in range(5))
    ast_lens = (jnp.array([8, 6], jnp.int32), jnp.array([7, 5], jnp.int32),
                jnp.array([8, 8], jnp.int32), jnp.array([5, 4], jnp.int32),
                jnp.array([6, 6], jnp.int32))
    attention_mask = jnp.array([[1, 1, 1, 1, 1], [1, 1, 1, 0, 0]], jnp.int32)

    fwd = jax.jit(model_forward)
    code_outputs, ast_outputs, decoder_hidden = fwd(
        params, code_batch, code_lens, ast_batch, ast_lens,
        attention_mask, name_batch, name_lens)
    jax.block_until_ready((code_outputs, ast_outputs, decoder_hidden))

    assert code_outputs.shape == (T_CODE, B, HIDDEN)
    assert ast_outputs.shape == (5 * T_AST, B, HIDDEN)
    assert decoder_hidden.shape == (1, B, REDUCE_OUT)
    assert bool(jnp.all(jnp.isfinite(code_outputs)))
    assert bool(jnp.all(jnp.isfinite(ast_outputs)))
    assert bool(jnp.all(jnp.isfinite(decoder_hidden)))
    print("KERNEL_OK")
</pallas_src>

<mosaic_0001>
module attributes {stable_mosaic.version = 11 : i64} {
  func.func @_fuse_kernel(%arg0: memref<1x32xf32, #tpu.memory_space<vmem>>, %arg1: memref<2x5x32xf32, #tpu.memory_space<vmem>>, %arg2: memref<2x5xf32, #tpu.memory_space<vmem>>, %arg3: memref<2x32xf32, #tpu.memory_space<vmem>>, %arg4: memref<2x32xf32, #tpu.memory_space<vmem>>, %arg5: memref<1x32xf32, #tpu.memory_space<vmem>>, %arg6: memref<1x32xf32, #tpu.memory_space<vmem>>, %arg7: memref<1x1xf32, #tpu.memory_space<vmem>>, %arg8: memref<96x256xf32, #tpu.memory_space<vmem>>, %arg9: memref<1x256xf32, #tpu.memory_space<vmem>>, %arg10: memref<2x256xf32, #tpu.memory_space<vmem>>) attributes {dimension_semantics = [], scalar_prefetch = 0 : i64, scratch_operands = 0 : i64, tpu.core_type = #tpu.core_type<tc>} {
    %c0 = arith.constant 0 : index
    %c0_0 = arith.constant 0 : index
    %c0_1 = arith.constant 0 : index
    %0 = vector.load %arg1[%c0, %c0_0, %c0_1] : memref<2x5x32xf32, #tpu.memory_space<vmem>>, vector<2x5x32xf32>
    %c0_2 = arith.constant 0 : index
    %c0_3 = arith.constant 0 : index
    %1 = vector.load %arg0[%c0_2, %c0_3] : memref<1x32xf32, #tpu.memory_space<vmem>>, vector<1x32xf32>
    %c0_4 = arith.constant 0 : index
    %c0_5 = arith.constant 0 : index
    %2 = vector.load %arg5[%c0_4, %c0_5] : memref<1x32xf32, #tpu.memory_space<vmem>>, vector<1x32xf32>
    %3 = arith.mulf %1, %2 : vector<1x32xf32>
    %cst = arith.constant dense<0.000000e+00> : vector<1xf32>
    %4 = vector.multi_reduction <add>, %3, %cst [1] : vector<1x32xf32> to vector<1xf32>
    %5 = vector.shape_cast %4 : vector<1xf32> to vector<1x1xf32>
    %c0_6 = arith.constant 0 : index
    %c0_7 = arith.constant 0 : index
    %6 = vector.load %arg6[%c0_6, %c0_7] : memref<1x32xf32, #tpu.memory_space<vmem>>, vector<1x32xf32>
    %7 = vector.shape_cast %6 : vector<1x32xf32> to vector<1x1x32xf32>
    %8 = vector.broadcast %7 : vector<1x1x32xf32> to vector<2x5x32xf32>
    %9 = arith.mulf %0, %8 : vector<2x5x32xf32>
    %cst_8 = arith.constant dense<0.000000e+00> : vector<2x5xf32>
    %10 = vector.multi_reduction <add>, %9, %cst_8 [2] : vector<2x5x32xf32> to vector<2x5xf32>
    %11 = vector.broadcast %5 : vector<1x1xf32> to vector<2x5xf32>
    %12 = arith.addf %10, %11 : vector<2x5xf32>
    %c0_9 = arith.constant 0 : index
    %c0_10 = arith.constant 0 : index
    %13 = vector.load %arg7[%c0_9, %c0_10] : memref<1x1xf32, #tpu.memory_space<vmem>>, vector<1x1xf32>
    %14 = vector.broadcast %13 : vector<1x1xf32> to vector<2x5xf32>
    %15 = arith.addf %12, %14 : vector<2x5xf32>
    %16 = math.tanh %15 : vector<2x5xf32>
    %c0_11 = arith.constant 0 : index
    %c0_12 = arith.constant 0 : index
    %17 = vector.load %arg2[%c0_11, %c0_12] : memref<2x5xf32, #tpu.memory_space<vmem>>, vector<2x5xf32>
    %cst_13 = arith.constant 0.000000e+00 : f32
    %18 = vector.broadcast %cst_13 : f32 to vector<2x5xf32>
    %19 = arith.cmpf ogt, %17, %18 : vector<2x5xf32>
    %cst_14 = arith.constant -1.000000e+30 : f32
    %20 = vector.broadcast %cst_14 : f32 to vector<2x5xf32>
    %21 = arith.select %19, %16, %20 : vector<2x5xi1>, vector<2x5xf32>
    %cst_15 = arith.constant dense<0xFF800000> : vector<2xf32>
    %22 = vector.multi_reduction <maximumf>, %21, %cst_15 [1] : vector<2x5xf32> to vector<2xf32>
    %23 = vector.shape_cast %22 : vector<2xf32> to vector<2x1xf32>
    %24 = vector.broadcast %23 : vector<2x1xf32> to vector<2x5xf32>
    %25 = arith.subf %21, %24 : vector<2x5xf32>
    %26 = math.exp %25 : vector<2x5xf32>
    %cst_16 = arith.constant dense<0.000000e+00> : vector<2xf32>
    %27 = vector.multi_reduction <add>, %26, %cst_16 [1] : vector<2x5xf32> to vector<2xf32>
    %28 = vector.shape_cast %27 : vector<2xf32> to vector<2x1xf32>
    %29 = vector.broadcast %28 : vector<2x1xf32> to vector<2x5xf32>
    %30 = arith.divf %26, %29 : vector<2x5xf32>
    %31 = vector.shape_cast %30 : vector<2x5xf32> to vector<2x5x1xf32>
    %32 = vector.broadcast %31 : vector<2x5x1xf32> to vector<2x5x32xf32>
    %33 = arith.mulf %0, %32 : vector<2x5x32xf32>
    %cst_17 = arith.constant dense<0.000000e+00> : vector<2x32xf32>
    %34 = vector.multi_reduction <add>, %33, %cst_17 [1] : vector<2x5x32xf32> to vector<2x32xf32>
    %c0_18 = arith.constant 0 : index
    %c0_19 = arith.constant 0 : index
    %35 = vector.load %arg8[%c0_18, %c0_19] : memref<96x256xf32, #tpu.memory_space<vmem>>, vector<96x256xf32>
    %c0_20 = arith.constant 0 : index
    %c0_21 = arith.constant 0 : index
    %36 = vector.load %arg3[%c0_20, %c0_21] : memref<2x32xf32, #tpu.memory_space<vmem>>, vector<2x32xf32>
    %37 = vector.extract_strided_slice %35 {offsets = [0, 0], sizes = [32, 256], strides = [1, 1]} : vector<96x256xf32> to vector<32x256xf32>
    %cst_22 = arith.constant dense<0.000000e+00> : vector<2x256xf32>
    %38 = tpu.matmul %36, %37, %cst_22 {dimension_numbers = #tpu.dot_dimension_numbers<[1], [0], [0], [1], [0, 0, 1, 1], [], []>} : vector<2x32xf32>, vector<32x256xf32>, vector<2x256xf32> -> vector<2x256xf32>
    %39 = vector.extract_strided_slice %35 {offsets = [32, 0], sizes = [32, 256], strides = [1, 1]} : vector<96x256xf32> to vector<32x256xf32>
    %cst_23 = arith.constant dense<0.000000e+00> : vector<2x256xf32>
    %40 = tpu.matmul %34, %39, %cst_23 {dimension_numbers = #tpu.dot_dimension_numbers<[1], [0], [0], [1], [0, 0, 1, 1], [], []>} : vector<2x32xf32>, vector<32x256xf32>, vector<2x256xf32> -> vector<2x256xf32>
    %41 = arith.addf %38, %40 : vector<2x256xf32>
    %c0_24 = arith.constant 0 : index
    %c0_25 = arith.constant 0 : index
    %42 = vector.load %arg4[%c0_24, %c0_25] : memref<2x32xf32, #tpu.memory_space<vmem>>, vector<2x32xf32>
    %43 = vector.extract_strided_slice %35 {offsets = [64, 0], sizes = [32, 256], strides = [1, 1]} : vector<96x256xf32> to vector<32x256xf32>
    %cst_26 = arith.constant dense<0.000000e+00> : vector<2x256xf32>
    %44 = tpu.matmul %42, %43, %cst_26 {dimension_numbers = #tpu.dot_dimension_numbers<[1], [0], [0], [1], [0, 0, 1, 1], [], []>} : vector<2x32xf32>, vector<32x256xf32>, vector<2x256xf32> -> vector<2x256xf32>
    %45 = arith.addf %41, %44 : vector<2x256xf32>
    %c0_27 = arith.constant 0 : index
    %c0_28 = arith.constant 0 : index
    %46 = vector.load %arg9[%c0_27, %c0_28] : memref<1x256xf32, #tpu.memory_space<vmem>>, vector<1x256xf32>
    %47 = vector.broadcast %46 : vector<1x256xf32> to vector<2x256xf32>
    %48 = arith.addf %45, %47 : vector<2x256xf32>
    %cst_29 = arith.constant 0.000000e+00 : f32
    %49 = vector.broadcast %cst_29 : f32 to vector<2x256xf32>
    %50 = arith.maximumf %48, %49 : vector<2x256xf32>
    %c0_30 = arith.constant 0 : index
    %c0_31 = arith.constant 0 : index
    %51 = vector.load %arg10[%c0_30, %c0_31] : memref<2x256xf32, #tpu.memory_space<vmem>>, vector<2x256xf32>
    tpu.vector_store %arg10[%c0_30, %c0_31], %50 {strides = array<i32>} : memref<2x256xf32, #tpu.memory_space<vmem>>, vector<2x256xf32>,
    return
  }
}

module attributes {stable_mosaic.version = 11 : i64} {
  func.func @_encoders_gru_kernel(%arg0: i32, %arg1: memref<1x128x32xf32, #tpu.memory_space<vmem>>, %arg2: memref<1x16x1xi32, #tpu.memory_space<vmem>>, %arg3: memref<1x32x768xf32, #tpu.memory_space<vmem>>, %arg4: memref<1x256x768xf32, #tpu.memory_space<vmem>>, %arg5: memref<1x1x768xf32, #tpu.memory_space<vmem>>, %arg6: memref<1x1x768xf32, #tpu.memory_space<vmem>>, %arg7: memref<1x8x16x32xf32, #tpu.memory_space<vmem>>, %arg8: memref<1x16x32xf32, #tpu.memory_space<vmem>>, %arg9: memref<128x768xf32, #tpu.memory_space<vmem>>) attributes {dimension_semantics = [#tpu.dimension_semantics<parallel>], iteration_bounds = array<i64: 3>, scalar_prefetch = 0 : i64, scratch_operands = 1 : i64, tpu.core_type = #tpu.core_type<tc>, window_params = [{transform_indices = @transform_0, window_bounds = array<i64: 1, 128, 32>}, {transform_indices = @transform_1, window_bounds = array<i64: 1, 16, 1>}, {transform_indices = @transform_2, window_bounds = array<i64: 1, 32, 768>}, {transform_indices = @transform_3, window_bounds = array<i64: 1, 256, 768>}, {transform_indices = @transform_4, window_bounds = array<i64: 1, 1, 768>}, {transform_indices = @transform_5, window_bounds = array<i64: 1, 1, 768>}, {transform_indices = @transform_6, window_bounds = array<i64: 1, 8, 16, 32>}, {transform_indices = @transform_7, window_bounds = array<i64: 1, 16, 32>}]} {
    %c0 = arith.constant 0 : index
    %c0_0 = arith.constant 0 : index
    %c0_1 = arith.constant 0 : index
    %0 = vector.load %arg1[%c0, %c0_0, %c0_1] : memref<1x128x32xf32, #tpu.memory_space<vmem>>, vector<1x128x32xf32>
    %1 = vector.shape_cast %0 : vector<1x128x32xf32> to vector<128x32xf32>
    %c0_2 = arith.constant 0 : index
    %c0_3 = arith.constant 0 : index
    %c0_4 = arith.constant 0 : index
    %2 = vector.load %arg3[%c0_2, %c0_3, %c0_4] : memref<1x32x768xf32, #tpu.memory_space<vmem>>, vector<1x32x768xf32>
    %3 = vector.shape_cast %2 : vector<1x32x768xf32> to vector<32x768xf32>
    %cst = arith.constant dense<0.000000e+00> : vector<128x768xf32>
    %4 = tpu.matmul %1, %3, %cst {dimension_numbers = #tpu.dot_dimension_numbers<[1], [0], [0], [1], [0, 0, 1, 1], [], []>} : vector<128x32xf32>, vector<32x768xf32>, vector<128x768xf32> -> vector<128x768xf32>
    %c0_5 = arith.constant 0 : index
    %c0_6 = arith.constant 0 : index
    %c0_7 = arith.constant 0 : index
    %5 = vector.load %arg5[%c0_5, %c0_6, %c0_7] : memref<1x1x768xf32, #tpu.memory_space<vmem>>, vector<1x1x768xf32>
    %6 = vector.shape_cast %5 : vector<1x1x768xf32> to vector<1x768xf32>
    %7 = vector.broadcast %6 : vector<1x768xf32> to vector<128x768xf32>
    %8 = arith.addf %4, %7 : vector<128x768xf32>
    %c0_8 = arith.constant 0 : index
    %c0_9 = arith.constant 0 : index
    %9 = vector.load %arg9[%c0_8, %c0_9] : memref<128x768xf32, #tpu.memory_space<vmem>>, vector<128x768xf32>
    tpu.vector_store %arg9[%c0_8, %c0_9], %8 {strides = array<i32>} : memref<128x768xf32, #tpu.memory_space<vmem>>, vector<128x768xf32>,
    %c0_10 = arith.constant 0 : index
    %c0_11 = arith.constant 0 : index
    %c0_12 = arith.constant 0 : index
    %10 = vector.load %arg4[%c0_10, %c0_11, %c0_12] : memref<1x256x768xf32, #tpu.memory_space<vmem>>, vector<1x256x768xf32>
    %11 = vector.shape_cast %10 : vector<1x256x768xf32> to vector<256x768xf32>
    %c0_13 = arith.constant 0 : index
    %c0_14 = arith.constant 0 : index
    %c0_15 = arith.constant 0 : index
    %12 = vector.load %arg6[%c0_13, %c0_14, %c0_15] : memref<1x1x768xf32, #tpu.memory_space<vmem>>, vector<1x1x768xf32>
    %13 = vector.shape_cast %12 : vector<1x1x768xf32> to vector<1x768xf32>
    %c0_16 = arith.constant 0 : index
    %c0_17 = arith.constant 0 : index
    %c0_18 = arith.constant 0 : index
    %14 = vector.load %arg2[%c0_16, %c0_17, %c0_18] : memref<1x16x1xi32, #tpu.memory_space<vmem>>, vector<1x16x1xi32>
    %15 = vector.shape_cast %14 : vector<1x16x1xi32> to vector<16x1xi32>
    %16 = tpu.iota {dimensions = array<i32: 1>} : vector<1x768xi32>
    %c128_i32 = arith.constant 128 : i32
    %17 = vector.broadcast %c128_i32 : i32 to vector<1x768xi32>
    %18 = arith.andi %16, %17 : vector<1x768xi32>
    %c0_i32 = arith.constant 0 : i32
    %19 = vector.broadcast %c0_i32 : i32 to vector<1x768xi32>
    %20 = arith.cmpi eq, %18, %19 : vector<1x768xi32>
    %21 = tpu.iota {dimensions = array<i32: 1>} : vector<1x256xi32>
    %c128_i32_19 = arith.constant 128 : i32
    %22 = vector.broadcast %c128_i32_19 : i32 to vector<1x256xi32>
    %23 = arith.cmpi slt, %21, %22 : vector<1x256xi32>
    %cst_20 = arith.constant 0.000000e+00 : f32
    %24 = vector.broadcast %cst_20 : f32 to vector<8x16x32xf32>
    %c0_21 = arith.constant 0 : index
    %c0_22 = arith.constant 0 : index
    %c0_23 = arith.constant 0 : index
    %c0_24 = arith.constant 0 : index
    %25 = vector.load %arg7[%c0_21, %c0_22, %c0_23, %c0_24] : memref<1x8x16x32xf32, #tpu.memory_space<vmem>>, vector<1x8x16x32xf32>
    %26 = vector.shape_cast %25 : vector<1x8x16x32xf32> to vector<8x16x32xf32>
    %27 = vector.shape_cast %24 : vector<8x16x32xf32> to vector<1x8x16x32xf32>
    tpu.vector_store %arg7[%c0_21, %c0_22, %c0_23, %c0_24], %27 {strides = array<i32>} : memref<1x8x16x32xf32, #tpu.memory_space<vmem>>, vector<1x8x16x32xf32>,
    %cst_25 = arith.constant 0.000000e+00 : f32
    %28 = vector.broadcast %cst_25 : f32 to vector<16x256xf32>
    %c0_26 = arith.constant 0 : index
    %c0_27 = arith.constant 0 : index
    %29 = vector.load %arg9[%c0_26, %c0_27] : memref<128x768xf32, #tpu.memory_space<vmem>>, vector<16x768xf32>
    %c112 = arith.constant 112 : index
    %c0_28 = arith.constant 0 : index
    %30 = vector.load %arg9[%c112, %c0_28] : memref<128x768xf32, #tpu.memory_space<vmem>>, vector<16x768xf32>
    %31 = vector.shape_cast %20 : vector<1x768xi1> to vector<1x768xi1>
    %32 = vector.broadcast %31 : vector<1x768xi1> to vector<16x768xi1>
    %33 = arith.select %32, %29, %30 : vector<16x768xi1>, vector<16x768xf32>
    %cst_29 = arith.constant dense<0.000000e+00> : vector<16x768xf32>
    %34 = tpu.matmul %28, %11, %cst_29 {dimension_numbers = #tpu.dot_dimension_numbers<[1], [0], [0], [1], [0, 0, 1, 1], [], []>} : vector<16x256xf32>, vector<256x768xf32>, vector<16x768xf32> -> vector<16x768xf32>
    %35 = vector.broadcast %13 : vector<1x768xf32> to vector<16x768xf32>
    %36 = arith.addf %34, %35 : vector<16x768xf32>
    %37 = vector.extract_strided_slice %33 {offsets = [0, 0], sizes = [16, 512], strides = [1, 1]} : vector<16x768xf32> to vector<16x512xf32>
    %38 = vector.extract_strided_slice %36 {offsets = [0, 0], sizes = [16, 512], strides = [1, 1]} : vector<16x768xf32> to vector<16x512xf32>
    %39 = arith.addf %37, %38 : vector<16x512xf32>
    %40 = arith.negf %39 : vector<16x512xf32>
    %41 = math.exp %40 : vector<16x512xf32>
    %cst_30 = arith.constant 1.000000e+00 : f32
    %42 = vector.broadcast %cst_30 : f32 to vector<16x512xf32>
    %43 = arith.addf %42, %41 : vector<16x512xf32>
    %44 = arith.divf %42, %43 : vector<16x512xf32>
    %45 = vector.extract_strided_slice %44 {offsets = [0, 0], sizes = [16, 256], strides = [1, 1]} : vector<16x512xf32> to vector<16x256xf32>
    %46 = vector.extract_strided_slice %44 {offsets = [0, 256], sizes = [16, 256], strides = [1, 1]} : vector<16x512xf32> to vector<16x256xf32>
    %47 = vector.extract_strided_slice %33 {offsets = [0, 512], sizes = [16, 256], strides = [1, 1]} : vector<16x768xf32> to vector<16x256xf32>
    %48 = vector.extract_strided_slice %36 {offsets = [0, 512], sizes = [16, 256], strides = [1, 1]} : vector<16x768xf32> to vector<16x256xf32>
    %49 = arith.mulf %45, %48 : vector<16x256xf32>
    %50 = arith.addf %47, %49 : vector<16x256xf32>
    %51 = math.tanh %50 : vector<16x256xf32>
    %cst_31 = arith.constant 1.000000e+00 : f32
    %52 = vector.broadcast %cst_31 : f32 to vector<16x256xf32>
    %53 = arith.subf %52, %46 : vector<16x256xf32>
    %54 = arith.mulf %53, %51 : vector<16x256xf32>
    %55 = arith.mulf %46, %28 : vector<16x256xf32>
    %56 = arith.addf %54, %55 : vector<16x256xf32>
    %c0_i32_32 = arith.constant 0 : i32
    %57 = vector.broadcast %c0_i32_32 : i32 to vector<16x1xi32>
    %58 = arith.cmpi sgt, %15, %57 : vector<16x1xi32>
    %59 = arith.extui %58 : vector<16x1xi1> to vector<16x1xi32>
    %60 = arith.sitofp %59 : vector<16x1xi32> to vector<16x1xf32>
    %c7_i32 = arith.constant 7 : i32
    %61 = vector.broadcast %c7_i32 : i32 to vector<16x1xi32>
    %62 = arith.cmpi sgt, %15, %61 : vector<16x1xi32>
    %63 = arith.extui %62 : vector<16x1xi1> to vector<16x1xi32>
    %64 = arith.sitofp %63 : vector<16x1xi32> to vector<16x1xf32>
    %65 = vector.shape_cast %23 : vector<1x256xi1> to vector<1x256xi1>
    %66 = vector.broadcast %65 : vector<1x256xi1> to vector<16x256xi1>
    %67 = vector.shape_cast %60 : vector<16x1xf32> to vector<16x1xf32>
    %68 = vector.broadcast %67 : vector<16x1xf32> to vector<16x256xf32>
    %69 = vector.shape_cast %64 : vector<16x1xf32> to vector<16x1xf32>
    %70 = vector.broadcast %69 : vector<16x1xf32> to vector<16x256xf32>
    %71 = arith.select %66, %68, %70 : vector<16x256xi1>, vector<16x256xf32>
    %72 = arith.mulf %71, %56 : vector<16x256xf32>
    %cst_33 = arith.constant 1.000000e+00 : f32
    %73 = vector.broadcast %cst_33 : f32 to vector<16x256xf32>
    %74 = arith.subf %73, %71 : vector<16x256xf32>
    %75 = arith.mulf %74, %28 : vector<16x256xf32>
    %76 = arith.addf %72, %75 : vector<16x256xf32>
    %c0_34 = arith.constant 0 : index
    %c0_35 = arith.constant 0 : index
    %c0_36 = arith.constant 0 : index
    %c0_37 = arith.constant 0 : index
    %77 = vector.load %arg7[%c0_34, %c0_35, %c0_36, %c0_37] : memref<1x8x16x32xf32, #tpu.memory_space<vmem>>, vector<1x1x16x32xf32>
    %78 = vector.shape_cast %77 : vector<1x1x16x32xf32> to vector<16x32xf32>
    %79 = vector.extract_strided_slice %56 {offsets = [0, 0], sizes = [16, 32], strides = [1, 1]} : vector<16x256xf32> to vector<16x32xf32>
    %80 = vector.broadcast %60 : vector<16x1xf32> to vector<16x32xf32>
    %81 = arith.mulf %80, %79 : vector<16x32xf32>
    %82 = arith.addf %78, %81 : vector<16x32xf32>
    %c0_38 = arith.constant 0 : index
    %c0_39 = arith.constant 0 : index
    %c0_40 = arith.constant 0 : index
    %c0_41 = arith.constant 0 : index
    %83 = vector.load %arg7[%c0_38, %c0_39, %c0_40, %c0_41] : memref<1x8x16x32xf32, #tpu.memory_space<vmem>>, vector<1x1x16x32xf32>
    %84 = vector.shape_cast %83 : vector<1x1x16x32xf32> to vector<16x32xf32>
    %85 = vector.shape_cast %82 : vector<16x32xf32> to vector<1x1x16x32xf32>
    tpu.vector_store %arg7[%c0_38, %c0_39, %c0_40, %c0_41], %85 {strides = array<i32>} : memref<1x8x16x32xf32, #tpu.memory_space<vmem>>, vector<1x1x16x32xf32>,
    %c0_42 = arith.constant 0 : index
    %c7 = arith.constant 7 : index
    %c0_43 = arith.constant 0 : index
    %c0_44 = arith.constant 0 : index
    %86 = vector.load %arg7[%c0_42, %c7, %c0_43, %c0_44] : memref<1x8x16x32xf32, #tpu.memory_space<vmem>>, vector<1x1x16x32xf32>
    %87 = vector.shape_cast %86 : vector<1x1x16x32xf32> to vector<16x32xf32>
    %88 = vector.extract_strided_slice %56 {offsets = [0, 128], sizes = [16, 32], strides = [1, 1]} : vector<16x256xf32> to vector<16x32xf32>
    %89 = vector.broadcast %64 : vector<16x1xf32> to vector<16x32xf32>
    %90 = arith.mulf %89, %88 : vector<16x32xf32>
    %91 = arith.addf %87, %90 : vector<16x32xf32>
    %c0_45 = arith.constant 0 : index
    %c7_46 = arith.constant 7 : index
    %c0_47 = arith.constant 0 : index
    %c0_48 = arith.constant 0 : index
    %92 = vector.load %arg7[%c0_45, %c7_46, %c0_47, %c0_48] : memref<1x8x16x32xf32, #tpu.memory_space<vmem>>, vector<1x1x16x32xf32>
    %93 = vector.shape_cast %92 : vector<1x1x16x32xf32> to vector<16x32xf32>
    %94 = vector.shape_cast %91 : vector<16x32xf32> to vector<1x1x16x32xf32>
    tpu.vector_store %arg7[%c0_45, %c7_46, %c0_47, %c0_48], %94 {strides = array<i32>} : memref<1x8x16x32xf32, #tpu.memory_space<vmem>>, vector<1x1x16x32xf32>,
    %c16 = arith.constant 16 : index
    %c0_49 = arith.constant 0 : index
    %95 = vector.load %arg9[%c16, %c0_49] : memref<128x768xf32, #tpu.memory_space<vmem>>, vector<16x768xf32>
    %c96 = arith.constant 96 : index
    %c0_50 = arith.constant 0 : index
    %96 = vector.load %arg9[%c96, %c0_50] : memref<128x768xf32, #tpu.memory_space<vmem>>, vector<16x768xf32>
    %97 = vector.shape_cast %20 : vector<1x768xi1> to vector<1x768xi1>
    %98 = vector.broadcast %97 : vector<1x768xi1> to vector<16x768xi1>
    %99 = arith.select %98, %95, %96 : vector<16x768xi1>, vector<16x768xf32>
    %cst_51 = arith.constant dense<0.000000e+00> : vector<16x768xf32>
    %100 = tpu.matmul %76, %11, %cst_51 {dimension_numbers = #tpu.dot_dimension_numbers<[1], [0], [0], [1], [0, 0, 1, 1], [], []>} : vector<16x256xf32>, vector<256x768xf32>, vector<16x768xf32> -> vector<16x768xf32>
    %101 = vector.broadcast %13 : vector<1x768xf32> to vector<16x768xf32>
    %102 = arith.addf %100, %101 : vector<16x768xf32>
    %103 = vector.extract_strided_slice %99 {offsets = [0, 0], sizes = [16, 512], strides = [1, 1]} : vector<16x768xf32> to vector<16x512xf32>
    %104 = vector.extract_strided_slice %102 {offsets = [0, 0], sizes = [16, 512], strides = [1, 1]} : vector<16x768xf32> to vector<16x512xf32>
    %105 = arith.addf %103, %104 : vector<16x512xf32>
    %106 = arith.negf %105 : vector<16x512xf32>
    %107 = math.exp %106 : vector<16x512xf32>
    %cst_52 = arith.constant 1.000000e+00 : f32
    %108 = vector.broadcast %cst_52 : f32 to vector<16x512xf32>
    %109 = arith.addf %108, %107 : vector<16x512xf32>
    %110 = arith.divf %108, %109 : vector<16x512xf32>
    %111 = vector.extract_strided_slice %110 {offsets = [0, 0], sizes = [16, 256], strides = [1, 1]} : vector<16x512xf32> to vector<16x256xf32>
    %112 = vector.extract_strided_slice %110 {offsets = [0, 256], sizes = [16, 256], strides = [1, 1]} : vector<16x512xf32> to vector<16x256xf32>
    %113 = vector.extract_strided_slice %99 {offsets = [0, 512], sizes = [16, 256], strides = [1, 1]} : vector<16x768xf32> to vector<16x256xf32>
    %114 = vector.extract_strided_slice %102 {offsets = [0, 512], sizes = [16, 256], strides = [1, 1]} : vector<16x768xf32> to vector<16x256xf32>
    %115 = arith.mulf %111, %114 : vector<16x256xf32>
    %116 = arith.addf %113, %115 : vector<16x256xf32>
    %117 = math.tanh %116 : vector<16x256xf32>
    %cst_53 = arith.constant 1.000000e+00 : f32
    %118 = vector.broadcast %cst_53 : f32 to vector<16x256xf32>
    %119 = arith.subf %118, %112 : vector<16x256xf32>
    %120 = arith.mulf %119, %117 : vector<16x256xf32>
    %121 = arith.mulf %112, %76 : vector<16x256xf32>
    %122 = arith.addf %120, %121 : vector<16x256xf32>
    %c1_i32 = arith.constant 1 : i32
    %123 = vector.broadcast %c1_i32 : i32 to vector<16x1xi32>
    %124 = arith.cmpi sgt, %15, %123 : vector<16x1xi32>
    %125 = arith.extui %124 : vector<16x1xi1> to vector<16x1xi32>
    %126 = arith.sitofp %125 : vector<16x1xi32> to vector<16x1xf32>
    %c6_i32 = arith.constant 6 : i32
    %127 = vector.broadcast %c6_i32 : i32 to vector<16x1xi32>
    %128 = arith.cmpi sgt, %15, %127 : vector<16x1xi32>
    %129 = arith.extui %128 : vector<16x1xi1> to vector<16x1xi32>
    %130 = arith.sitofp %129 : vector<16x1xi32> to vector<16x1xf32>
    %131 = vector.shape_cast %23 : vector<1x256xi1> to vector<1x256xi1>
    %132 = vector.broadcast %131 : vector<1x256xi1> to vector<16x256xi1>
    %133 = vector.shape_cast %126 : vector<16x1xf32> to vector<16x1xf32>
    %134 = vector.broadcast %133 : vector<16x1xf32> to vector<16x256xf32>
    %135 = vector.shape_cast %130 : vector<16x1xf32> to vector<16x1xf32>
    %136 = vector.broadcast %135 : vector<16x1xf32> to vector<16x256xf32>
    %137 = arith.select %132, %134, %136 : vector<16x256xi1>, vector<16x256xf32>
    %138 = arith.mulf %137, %122 : vector<16x256xf32>
    %cst_54 = arith.constant 1.000000e+00 : f32
    %139 = vector.broadcast %cst_54 : f32 to vector<16x256xf32>
    %140 = arith.subf %139, %137 : vector<16x256xf32>
    %141 = arith.mulf %140, %76 : vector<16x256xf32>
    %142 = arith.addf %138, %141 : vector<16x256xf32>
    %c0_55 = arith.constant 0 : index
    %c1 = arith.constant 1 : index
    %c0_56 = arith.constant 0 : index
    %c0_57 = arith.constant 0 : index
    %143 = vector.load %arg7[%c0_55, %c1, %c0_56, %c0_57] : memref<1x8x16x32xf32, #tpu.memory_space<vmem>>, vector<1x1x16x32xf32>
    %144 = vector.shape_cast %143 : vector<1x1x16x32xf32> to vector<16x32xf32>
    %145 = vector.extract_strided_slice %122 {offsets = [0, 0], sizes = [16, 32], strides = [1, 1]} : vector<16x256xf32> to vector<16x32xf32>
    %146 = vector.broadcast %126 : vector<16x1xf32> to vector<16x32xf32>
    %147 = arith.mulf %146, %145 : vector<16x32xf32>
    %148 = arith.addf %144, %147 : vector<16x32xf32>
    %c0_58 = arith.constant 0 : index
    %c1_59 = arith.constant 1 : index
    %c0_60 = arith.constant 0 : index
    %c0_61 = arith.constant 0 : index
    %149 = vector.load %arg7[%c0_58, %c1_59, %c0_60, %c0_61] : memref<1x8x16x32xf32, #tpu.memory_space<vmem>>, vector<1x1x16x32xf32>
    %150 = vector.shape_cast %149 : vector<1x1x16x32xf32> to vector<16x32xf32>
    %151 = vector.shape_cast %148 : vector<16x32xf32> to vector<1x1x16x32xf32>
    tpu.vector_store %arg7[%c0_58, %c1_59, %c0_60, %c0_61], %151 {strides = array<i32>} : memref<1x8x16x32xf32, #tpu.memory_space<vmem>>, vector<1x1x16x32xf32>,
    %c0_62 = arith.constant 0 : index
    %c6 = arith.constant 6 : index
    %c0_63 = arith.constant 0 : index
    %c0_64 = arith.constant 0 : index
    %152 = vector.load %arg7[%c0_62, %c6, %c0_63, %c0_64] : memref<1x8x16x32xf32, #tpu.memory_space<vmem>>, vector<1x1x16x32xf32>
    %153 = vector.shape_cast %152 : vector<1x1x16x32xf32> to vector<16x32xf32>
    %154 = vector.extract_strided_slice %122 {offsets = [0, 128], sizes = [16, 32], strides = [1, 1]} : vector<16x256xf32> to vector<16x32xf32>
    %155 = vector.broadcast %130 : vector<16x1xf32> to vector<16x32xf32>
    %156 = arith.mulf %155, %154 : vector<16x32xf32>
    %157 = arith.addf %153, %156 : vector<16x32xf32>
    %c0_65 = arith.constant 0 : index
    %c6_66 = arith.constant 6 : index
    %c0_67 = arith.constant 0 : index
    %c0_68 = arith.constant 0 : index
    %158 = vector.load %arg7[%c0_65, %c6_66, %c0_67, %c0_68] : memref<1x8x16x32xf32, #tpu.memory_space<vmem>>, vector<1x1x16x32xf32>
    %159 = vector.shape_cast %158 : vector<1x1x16x32xf32> to vector<16x32xf32>
    %160 = vector.shape_cast %157 : vector<16x32xf32> to vector<1x1x16x32xf32>
    tpu.vector_store %arg7[%c0_65, %c6_66, %c0_67, %c0_68], %160 {strides = array<i32>} : memref<1x8x16x32xf32, #tpu.memory_space<vmem>>, vector<1x1x16x32xf32>,
    %c32 = arith.constant 32 : index
    %c0_69 = arith.constant 0 : index
    %161 = vector.load %arg9[%c32, %c0_69] : memref<128x768xf32, #tpu.memory_space<vmem>>, vector<16x768xf32>
    %c80 = arith.constant 80 : index
    %c0_70 = arith.constant 0 : index
    %162 = vector.load %arg9[%c80, %c0_70] : memref<128x768xf32, #tpu.memory_space<vmem>>, vector<16x768xf32>
    %163 = vector.shape_cast %20 : vector<1x768xi1> to vector<1x768xi1>
    %164 = vector.broadcast %163 : vector<1x768xi1> to vector<16x768xi1>
    %165 = arith.select %164, %161, %162 : vector<16x768xi1>, vector<16x768xf32>
    %cst_71 = arith.constant dense<0.000000e+00> : vector<16x768xf32>
    %166 = tpu.matmul %142, %11, %cst_71 {dimension_numbers = #tpu.dot_dimension_numbers<[1], [0], [0], [1], [0, 0, 1, 1], [], []>} : vector<16x256xf32>, vector<256x768xf32>, vector<16x768xf32> -> vector<16x768xf32>
    %167 = vector.broadcast %13 : vector<1x768xf32> to vector<16x768xf32>
    %168 = arith.addf %166, %167 : vector<16x768xf32>
    %169 = vector.extract_strided_slice %165 {offsets = [0, 0], sizes = [16, 512], strides = [1, 1]} : vector<16x768xf32> to vector<16x512xf32>
    %170 = vector.extract_strided_slice %168 {offsets = [0, 0], sizes = [16, 512], strides = [1, 1]} : vector<16x768xf32> to vector<16x512xf32>
    %171 = arith.addf %169, %170 : vector<16x512xf32>
    %172 = arith.negf %171 : vector<16x512xf32>
    %173 = math.exp %172 : vector<16x512xf32>
    %cst_72 = arith.constant 1.000000e+00 : f32
    %174 = vector.broadcast %cst_72 : f32 to vector<16x512xf32>
    %175 = arith.addf %174, %173 : vector<16x512xf32>
    %176 = arith.divf %174, %175 : vector<16x512xf32>
    %177 = vector.extract_strided_slice %176 {offsets = [0, 0], sizes = [16, 256], strides = [1, 1]} : vector<16x512xf32> to vector<16x256xf32>
    %178 = vector.extract_strided_slice %176 {offsets = [0, 256], sizes = [16, 256], strides = [1, 1]} : vector<16x512xf32> to vector<16x256xf32>
    %179 = vector.extract_strided_slice %165 {offsets = [0, 512], sizes = [16, 256], strides = [1, 1]} : vector<16x768xf32> to vector<16x256xf32>
    %180 = vector.extract_strided_slice %168 {offsets = [0, 512], sizes = [16, 256], strides = [1, 1]} : vector<16x768xf32> to vector<16x256xf32>
    %181 = arith.mulf %177, %180 : vector<16x256xf32>
    %182 = arith.addf %179, %181 : vector<16x256xf32>
    %183 = math.tanh %182 : vector<16x256xf32>
    %cst_73 = arith.constant 1.000000e+00 : f32
    %184 = vector.broadcast %cst_73 : f32 to vector<16x256xf32>
    %185 = arith.subf %184, %178 : vector<16x256xf32>
    %186 = arith.mulf %185, %183 : vector<16x256xf32>
    %187 = arith.mulf %178, %142 : vector<16x256xf32>
    %188 = arith.addf %186, %187 : vector<16x256xf32>
    %c2_i32 = arith.constant 2 : i32
    %189 = vector.broadcast %c2_i32 : i32 to vector<16x1xi32>
    %190 = arith.cmpi sgt, %15, %189 : vector<16x1xi32>
    %191 = arith.extui %190 : vector<16x1xi1> to vector<16x1xi32>
    %192 = arith.sitofp %191 : vector<16x1xi32> to vector<16x1xf32>
    %c5_i32 = arith.constant 5 : i32
    %193 = vector.broadcast %c5_i32 : i32 to vector<16x1xi32>
    %194 = arith.cmpi sgt, %15, %193 : vector<16x1xi32>
    %195 = arith.extui %194 : vector<16x1xi1> to vector<16x1xi32>
    %196 = arith.sitofp %195 : vector<16x1xi32> to vector<16x1xf32>
    %197 = vector.shape_cast %23 : vector<1x256xi1> to vector<1x256xi1>
    %198 = vector.broadcast %197 : vector<1x256xi1> to vector<16x256xi1>
    %199 = vector.shape_cast %192 : vector<16x1xf32> to vector<16x1xf32>
    %200 = vector.broadcast %199 : vector<16x1xf32> to vector<16x256xf32>
    %201 = vector.shape_cast %196 : vector<16x1xf32> to vector<16x1xf32>
    %202 = vector.broadcast %201 : vector<16x1xf32> to vector<16x256xf32>
    %203 = arith.select %198, %200, %202 : vector<16x256xi1>, vector<16x256xf32>
    %204 = arith.mulf %203, %188 : vector<16x256xf32>
    %cst_74 = arith.constant 1.000000e+00 : f32
    %205 = vector.broadcast %cst_74 : f32 to vector<16x256xf32>
    %206 = arith.subf %205, %203 : vector<16x256xf32>
    %207 = arith.mulf %206, %142 : vector<16x256xf32>
    %208 = arith.addf %204, %207 : vector<16x256xf32>
    %c0_75 = arith.constant 0 : index
    %c2 = arith.constant 2 : index
    %c0_76 = arith.constant 0 : index
    %c0_77 = arith.constant 0 : index
    %209 = vector.load %arg7[%c0_75, %c2, %c0_76, %c0_77] : memref<1x8x16x32xf32, #tpu.memory_space<vmem>>, vector<1x1x16x32xf32>
    %210 = vector.shape_cast %209 : vector<1x1x16x32xf32> to vector<16x32xf32>
    %211 = vector.extract_strided_slice %188 {offsets = [0, 0], sizes = [16, 32], strides = [1, 1]} : vector<16x256xf32> to vector<16x32xf32>
    %212 = vector.broadcast %192 : vector<16x1xf32> to vector<16x32xf32>
    %213 = arith.mulf %212, %211 : vector<16x32xf32>
    %214 = arith.addf %210, %213 : vector<16x32xf32>
    %c0_78 = arith.constant 0 : index
    %c2_79 = arith.constant 2 : index
    %c0_80 = arith.constant 0 : index
    %c0_81 = arith.constant 0 : index
    %215 = vector.load %arg7[%c0_78, %c2_79, %c0_80, %c0_81] : memref<1x8x16x32xf32, #tpu.memory_space<vmem>>, vector<1x1x16x32xf32>
    %216 = vector.shape_cast %215 : vector<1x1x16x32xf32> to vector<16x32xf32>
    %217 = vector.shape_cast %214 : vector<16x32xf32> to vector<1x1x16x32xf32>
    tpu.vector_store %arg7[%c0_78, %c2_79, %c0_80, %c0_81], %217 {strides = array<i32>} : memref<1x8x16x32xf32, #tpu.memory_space<vmem>>, vector<1x1x16x32xf32>,
    %c0_82 = arith.constant 0 : index
    %c5 = arith.constant 5 : index
    %c0_83 = arith.constant 0 : index
    %c0_84 = arith.constant 0 : index
    %218 = vector.load %arg7[%c0_82, %c5, %c0_83, %c0_84] : memref<1x8x16x32xf32, #tpu.memory_space<vmem>>, vector<1x1x16x32xf32>
    %219 = vector.shape_cast %218 : vector<1x1x16x32xf32> to vector<16x32xf32>
    %220 = vector.extract_strided_slice %188 {offsets = [0, 128], sizes = [16, 32], strides = [1, 1]} : vector<16x256xf32> to vector<16x32xf32>
    %221 = vector.broadcast %196 : vector<16x1xf32> to vector<16x32xf32>
    %222 = arith.mulf %221, %220 : vector<16x32xf32>
    %223 = arith.addf %219, %222 : vector<16x32xf32>
    %c0_85 = arith.constant 0 : index
    %c5_86 = arith.constant 5 : index
    %c0_87 = arith.constant 0 : index
    %c0_88 = arith.constant 0 : index
    %224 = vector.load %arg7[%c0_85, %c5_86, %c0_87, %c0_88] : memref<1x8x16x32xf32, #tpu.memory_space<vmem>>, vector<1x1x16x32xf32>
    %225 = vector.shape_cast %224 : vector<1x1x16x32xf32> to vector<16x32xf32>
    %226 = vector.shape_cast %223 : vector<16x32xf32> to vector<1x1x16x32xf32>
    tpu.vector_store %arg7[%c0_85, %c5_86, %c0_87, %c0_88], %226 {strides = array<i32>} : memref<1x8x16x32xf32, #tpu.memory_space<vmem>>, vector<1x1x16x32xf32>,
    %c48 = arith.constant 48 : index
    %c0_89 = arith.constant 0 : index
    %227 = vector.load %arg9[%c48, %c0_89] : memref<128x768xf32, #tpu.memory_space<vmem>>, vector<16x768xf32>
    %c64 = arith.constant 64 : index
    %c0_90 = arith.constant 0 : index
    %228 = vector.load %arg9[%c64, %c0_90] : memref<128x768xf32, #tpu.memory_space<vmem>>, vector<16x768xf32>
    %229 = vector.shape_cast %20 : vector<1x768xi1> to vector<1x768xi1>
    %230 = vector.broadcast %229 : vector<1x768xi1> to vector<16x768xi1>
    %231 = arith.select %230, %227, %228 : vector<16x768xi1>, vector<16x768xf32>
    %cst_91 = arith.constant dense<0.000000e+00> : vector<16x768xf32>
    %232 = tpu.matmul %208, %11, %cst_91 {dimension_numbers = #tpu.dot_dimension_numbers<[1], [0], [0], [1], [0, 0, 1, 1], [], []>} : vector<16x256xf32>, vector<256x768xf32>, vector<16x768xf32> -> vector<16x768xf32>
    %233 = vector.broadcast %13 : vector<1x768xf32> to vector<16x768xf32>
    %234 = arith.addf %232, %233 : vector<16x768xf32>
    %235 = vector.extract_strided_slice %231 {offsets = [0, 0], sizes = [16, 512], strides = [1, 1]} : vector<16x768xf32> to vector<16x512xf32>
    %236 = vector.extract_strided_slice %234 {offsets = [0, 0], sizes = [16, 512], strides = [1, 1]} : vector<16x768xf32> to vector<16x512xf32>
    %237 = arith.addf %235, %236 : vector<16x512xf32>
    %238 = arith.negf %237 : vector<16x512xf32>
    %239 = math.exp %238 : vector<16x512xf32>
    %cst_92 = arith.constant 1.000000e+00 : f32
    %240 = vector.broadcast %cst_92 : f32 to vector<16x512xf32>
    %241 = arith.addf %240, %239 : vector<16x512xf32>
    %242 = arith.divf %240, %241 : vector<16x512xf32>
    %243 = vector.extract_strided_slice %242 {offsets = [0, 0], sizes = [16, 256], strides = [1, 1]} : vector<16x512xf32> to vector<16x256xf32>
    %244 = vector.extract_strided_slice %242 {offsets = [0, 256], sizes = [16, 256], strides = [1, 1]} : vector<16x512xf32> to vector<16x256xf32>
    %245 = vector.extract_strided_slice %231 {offsets = [0, 512], sizes = [16, 256], strides = [1, 1]} : vector<16x768xf32> to vector<16x256xf32>
    %246 = vector.extract_strided_slice %234 {offsets = [0, 512], sizes = [16, 256], strides = [1, 1]} : vector<16x768xf32> to vector<16x256xf32>
    %247 = arith.mulf %243, %246 : vector<16x256xf32>
    %248 = arith.addf %245, %247 : vector<16x256xf32>
    %249 = math.tanh %248 : vector<16x256xf32>
    %cst_93 = arith.constant 1.000000e+00 : f32
    %250 = vector.broadcast %cst_93 : f32 to vector<16x256xf32>
    %251 = arith.subf %250, %244 : vector<16x256xf32>
    %252 = arith.mulf %251, %249 : vector<16x256xf32>
    %253 = arith.mulf %244, %208 : vector<16x256xf32>
    %254 = arith.addf %252, %253 : vector<16x256xf32>
    %c3_i32 = arith.constant 3 : i32
    %255 = vector.broadcast %c3_i32 : i32 to vector<16x1xi32>
    %256 = arith.cmpi sgt, %15, %255 : vector<16x1xi32>
    %257 = arith.extui %256 : vector<16x1xi1> to vector<16x1xi32>
    %258 = arith.sitofp %257 : vector<16x1xi32> to vector<16x1xf32>
    %c4_i32 = arith.constant 4 : i32
    %259 = vector.broadcast %c4_i32 : i32 to vector<16x1xi32>
    %260 = arith.cmpi sgt, %15, %259 : vector<16x1xi32>
    %261 = arith.extui %260 : vector<16x1xi1> to vector<16x1xi32>
    %262 = arith.sitofp %261 : vector<16x1xi32> to vector<16x1xf32>
    %263 = vector.shape_cast %23 : vector<1x256xi1> to vector<1x256xi1>
    %264 = vector.broadcast %263 : vector<1x256xi1> to vector<16x256xi1>
    %265 = vector.shape_cast %258 : vector<16x1xf32> to vector<16x1xf32>
    %266 = vector.broadcast %265 : vector<16x1xf32> to vector<16x256xf32>
    %267 = vector.shape_cast %262 : vector<16x1xf32> to vector<16x1xf32>
    %268 = vector.broadcast %267 : vector<16x1xf32> to vector<16x256xf32>
    %269 = arith.select %264, %266, %268 : vector<16x256xi1>, vector<16x256xf32>
    %270 = arith.mulf %269, %254 : vector<16x256xf32>
    %cst_94 = arith.constant 1.000000e+00 : f32
    %271 = vector.broadcast %cst_94 : f32 to vector<16x256xf32>
    %272 = arith.subf %271, %269 : vector<16x256xf32>
    %273 = arith.mulf %272, %208 : vector<16x256xf32>
    %274 = arith.addf %270, %273 : vector<16x256xf32>
    %c0_95 = arith.constant 0 : index
    %c3 = arith.constant 3 : index
    %c0_96 = arith.constant 0 : index
    %c0_97 = arith.constant 0 : index
    %275 = vector.load %arg7[%c0_95, %c3, %c0_96, %c0_97] : memref<1x8x16x32xf32, #tpu.memory_space<vmem>>, vector<1x1x16x32xf32>
    %276 = vector.shape_cast %275 : vector<1x1x16x32xf32> to vector<16x32xf32>
    %277 = vector.extract_strided_slice %254 {offsets = [0, 0], sizes = [16, 32], strides = [1, 1]} : vector<16x256xf32> to vector<16x32xf32>
    %278 = vector.broadcast %258 : vector<16x1xf32> to vector<16x32xf32>
    %279 = arith.mulf %278, %277 : vector<16x32xf32>
    %280 = arith.addf %276, %279 : vector<16x32xf32>
    %c0_98 = arith.constant 0 : index
    %c3_99 = arith.constant 3 : index
    %c0_100 = arith.constant 0 : index
    %c0_101 = arith.constant 0 : index
    %281 = vector.load %arg7[%c0_98, %c3_99, %c0_100, %c0_101] : memref<1x8x16x32xf32, #tpu.memory_space<vmem>>, vector<1x1x16x32xf32>
    %282 = vector.shape_cast %281 : vector<1x1x16x32xf32> to vector<16x32xf32>
    %283 = vector.shape_cast %280 : vector<16x32xf32> to vector<1x1x16x32xf32>
    tpu.vector_store %arg7[%c0_98, %c3_99, %c0_100, %c0_101], %283 {strides = array<i32>} : memref<1x8x16x32xf32, #tpu.memory_space<vmem>>, vector<1x1x16x32xf32>,
    %c0_102 = arith.constant 0 : index
    %c4 = arith.constant 4 : index
    %c0_103 = arith.constant 0 : index
    %c0_104 = arith.constant 0 : index
    %284 = vector.load %arg7[%c0_102, %c4, %c0_103, %c0_104] : memref<1x8x16x32xf32, #tpu.memory_space<vmem>>, vector<1x1x16x32xf32>
    %285 = vector.shape_cast %284 : vector<1x1x16x32xf32> to vector<16x32xf32>
    %286 = vector.extract_strided_slice %254 {offsets = [0, 128], sizes = [16, 32], strides = [1, 1]} : vector<16x256xf32> to vector<16x32xf32>
    %287 = vector.broadcast %262 : vector<16x1xf32> to vector<16x32xf32>
    %288 = arith.mulf %287, %286 : vector<16x32xf32>
    %289 = arith.addf %285, %288 : vector<16x32xf32>
    %c0_105 = arith.constant 0 : index
    %c4_106 = arith.constant 4 : index
    %c0_107 = arith.constant 0 : index
    %c0_108 = arith.constant 0 : index
    %290 = vector.load %arg7[%c0_105, %c4_106, %c0_107, %c0_108] : memref<1x8x16x32xf32, #tpu.memory_space<vmem>>, vector<1x1x16x32xf32>
    %291 = vector.shape_cast %290 : vector<1x1x16x32xf32> to vector<16x32xf32>
    %292 = vector.shape_cast %289 : vector<16x32xf32> to vector<1x1x16x32xf32>
    tpu.vector_store %arg7[%c0_105, %c4_106, %c0_107, %c0_108], %292 {strides = array<i32>} : memref<1x8x16x32xf32, #tpu.memory_space<vmem>>, vector<1x1x16x32xf32>,
    %c64_109 = arith.constant 64 : index
    %c0_110 = arith.constant 0 : index
    %293 = vector.load %arg9[%c64_109, %c0_110] : memref<128x768xf32, #tpu.memory_space<vmem>>, vector<16x768xf32>
    %c48_111 = arith.constant 48 : index
    %c0_112 = arith.constant 0 : index
    %294 = vector.load %arg9[%c48_111, %c0_112] : memref<128x768xf32, #tpu.memory_space<vmem>>, vector<16x768xf32>
    %295 = vector.shape_cast %20 : vector<1x768xi1> to vector<1x768xi1>
    %296 = vector.broadcast %295 : vector<1x768xi1> to vector<16x768xi1>
    %297 = arith.select %296, %293, %294 : vector<16x768xi1>, vector<16x768xf32>
    %cst_113 = arith.constant dense<0.000000e+00> : vector<16x768xf32>
    %298 = tpu.matmul %274, %11, %cst_113 {dimension_numbers = #tpu.dot_dimension_numbers<[1], [0], [0], [1], [0, 0, 1, 1], [], []>} : vector<16x256xf32>, vector<256x768xf32>, vector<16x768xf32> -> vector<16x768xf32>
    %299 = vector.broadcast %13 : vector<1x768xf32> to vector<16x768xf32>
    %300 = arith.addf %298, %299 : vector<16x768xf32>
    %301 = vector.extract_strided_slice %297 {offsets = [0, 0], sizes = [16, 512], strides = [1, 1]} : vector<16x768xf32> to vector<16x512xf32>
    %302 = vector.extract_strided_slice %300 {offsets = [0, 0], sizes = [16, 512], strides = [1, 1]} : vector<16x768xf32> to vector<16x512xf32>
    %303 = arith.addf %301, %302 : vector<16x512xf32>
    %304 = arith.negf %303 : vector<16x512xf32>
    %305 = math.exp %304 : vector<16x512xf32>
    %cst_114 = arith.constant 1.000000e+00 : f32
    %306 = vector.broadcast %cst_114 : f32 to vector<16x512xf32>
    %307 = arith.addf %306, %305 : vector<16x512xf32>
    %308 = arith.divf %306, %307 : vector<16x512xf32>
    %309 = vector.extract_strided_slice %308 {offsets = [0, 0], sizes = [16, 256], strides = [1, 1]} : vector<16x512xf32> to vector<16x256xf32>
    %310 = vector.extract_strided_slice %308 {offsets = [0, 256], sizes = [16, 256], strides = [1, 1]} : vector<16x512xf32> to vector<16x256xf32>
    %311 = vector.extract_strided_slice %297 {offsets = [0, 512], sizes = [16, 256], strides = [1, 1]} : vector<16x768xf32> to vector<16x256xf32>
    %312 = vector.extract_strided_slice %300 {offsets = [0, 512], sizes = [16, 256], strides = [1, 1]} : vector<16x768xf32> to vector<16x256xf32>
    %313 = arith.mulf %309, %312 : vector<16x256xf32>
    %314 = arith.addf %311, %313 : vector<16x256xf32>
    %315 = math.tanh %314 : vector<16x256xf32>
    %cst_115 = arith.constant 1.000000e+00 : f32
    %316 = vector.broadcast %cst_115 : f32 to vector<16x256xf32>
    %317 = arith.subf %316, %310 : vector<16x256xf32>
    %318 = arith.mulf %317, %315 : vector<16x256xf32>
    %319 = arith.mulf %310, %274 : vector<16x256xf32>
    %320 = arith.addf %318, %319 : vector<16x256xf32>
    %c4_i32_116 = arith.constant 4 : i32
    %321 = vector.broadcast %c4_i32_116 : i32 to vector<16x1xi32>
    %322 = arith.cmpi sgt, %15, %321 : vector<16x1xi32>
    %323 = arith.extui %322 : vector<16x1xi1> to vector<16x1xi32>
    %324 = arith.sitofp %323 : vector<16x1xi32> to vector<16x1xf32>
    %c3_i32_117 = arith.constant 3 : i32
    %325 = vector.broadcast %c3_i32_117 : i32 to vector<16x1xi32>
    %326 = arith.cmpi sgt, %15, %325 : vector<16x1xi32>
    %327 = arith.extui %326 : vector<16x1xi1> to vector<16x1xi32>
    %328 = arith.sitofp %327 : vector<16x1xi32> to vector<16x1xf32>
    %329 = vector.shape_cast %23 : vector<1x256xi1> to vector<1x256xi1>
    %330 = vector.broadcast %329 : vector<1x256xi1> to vector<16x256xi1>
    %331 = vector.shape_cast %324 : vector<16x1xf32> to vector<16x1xf32>
    %332 = vector.broadcast %331 : vector<16x1xf32> to vector<16x256xf32>
    %333 = vector.shape_cast %328 : vector<16x1xf32> to vector<16x1xf32>
    %334 = vector.broadcast %333 : vector<16x1xf32> to vector<16x256xf32>
    %335 = arith.select %330, %332, %334 : vector<16x256xi1>, vector<16x256xf32>
    %336 = arith.mulf %335, %320 : vector<16x256xf32>
    %cst_118 = arith.constant 1.000000e+00 : f32
    %337 = vector.broadcast %cst_118 : f32 to vector<16x256xf32>
    %338 = arith.subf %337, %335 : vector<16x256xf32>
    %339 = arith.mulf %338, %274 : vector<16x256xf32>
    %340 = arith.addf %336, %339 : vector<16x256xf32>
    %c0_119 = arith.constant 0 : index
    %c4_120 = arith.constant 4 : index
    %c0_121 = arith.constant 0 : index
    %c0_122 = arith.constant 0 : index
    %341 = vector.load %arg7[%c0_119, %c4_120, %c0_121, %c0_122] : memref<1x8x16x32xf32, #tpu.memory_space<vmem>>, vector<1x1x16x32xf32>
    %342 = vector.shape_cast %341 : vector<1x1x16x32xf32> to vector<16x32xf32>
    %343 = vector.extract_strided_slice %320 {offsets = [0, 0], sizes = [16, 32], strides = [1, 1]} : vector<16x256xf32> to vector<16x32xf32>
    %344 = vector.broadcast %324 : vector<16x1xf32> to vector<16x32xf32>
    %345 = arith.mulf %344, %343 : vector<16x32xf32>
    %346 = arith.addf %342, %345 : vector<16x32xf32>
    %c0_123 = arith.constant 0 : index
    %c4_124 = arith.constant 4 : index
    %c0_125 = arith.constant 0 : index
    %c0_126 = arith.constant 0 : index
    %347 = vector.load %arg7[%c0_123, %c4_124, %c0_125, %c0_126] : memref<1x8x16x32xf32, #tpu.memory_space<vmem>>, vector<1x1x16x32xf32>
    %348 = vector.shape_cast %347 : vector<1x1x16x32xf32> to vector<16x32xf32>
    %349 = vector.shape_cast %346 : vector<16x32xf32> to vector<1x1x16x32xf32>
    tpu.vector_store %arg7[%c0_123, %c4_124, %c0_125, %c0_126], %349 {strides = array<i32>} : memref<1x8x16x32xf32, #tpu.memory_space<vmem>>, vector<1x1x16x32xf32>,
    %c0_127 = arith.constant 0 : index
    %c3_128 = arith.constant 3 : index
    %c0_129 = arith.constant 0 : index
    %c0_130 = arith.constant 0 : index
    %350 = vector.load %arg7[%c0_127, %c3_128, %c0_129, %c0_130] : memref<1x8x16x32xf32, #tpu.memory_space<vmem>>, vector<1x1x16x32xf32>
    %351 = vector.shape_cast %350 : vector<1x1x16x32xf32> to vector<16x32xf32>
    %352 = vector.extract_strided_slice %320 {offsets = [0, 128], sizes = [16, 32], strides = [1, 1]} : vector<16x256xf32> to vector<16x32xf32>
    %353 = vector.broadcast %328 : vector<16x1xf32> to vector<16x32xf32>
    %354 = arith.mulf %353, %352 : vector<16x32xf32>
    %355 = arith.addf %351, %354 : vector<16x32xf32>
    %c0_131 = arith.constant 0 : index
    %c3_132 = arith.constant 3 : index
    %c0_133 = arith.constant 0 : index
    %c0_134 = arith.constant 0 : index
    %356 = vector.load %arg7[%c0_131, %c3_132, %c0_133, %c0_134] : memref<1x8x16x32xf32, #tpu.memory_space<vmem>>, vector<1x1x16x32xf32>
    %357 = vector.shape_cast %356 : vector<1x1x16x32xf32> to vector<16x32xf32>
    %358 = vector.shape_cast %355 : vector<16x32xf32> to vector<1x1x16x32xf32>
    tpu.vector_store %arg7[%c0_131, %c3_132, %c0_133, %c0_134], %358 {strides = array<i32>} : memref<1x8x16x32xf32, #tpu.memory_space<vmem>>, vector<1x1x16x32xf32>,
    %c80_135 = arith.constant 80 : index
    %c0_136 = arith.constant 0 : index
    %359 = vector.load %arg9[%c80_135, %c0_136] : memref<128x768xf32, #tpu.memory_space<vmem>>, vector<16x768xf32>
    %c32_137 = arith.constant 32 : index
    %c0_138 = arith.constant 0 : index
    %360 = vector.load %arg9[%c32_137, %c0_138] : memref<128x768xf32, #tpu.memory_space<vmem>>, vector<16x768xf32>
    %361 = vector.shape_cast %20 : vector<1x768xi1> to vector<1x768xi1>
    %362 = vector.broadcast %361 : vector<1x768xi1> to vector<16x768xi1>
    %363 = arith.select %362, %359, %360 : vector<16x768xi1>, vector<16x768xf32>
    %cst_139 = arith.constant dense<0.000000e+00> : vector<16x768xf32>
    %364 = tpu.matmul %340, %11, %cst_139 {dimension_numbers = #tpu.dot_dimension_numbers<[1], [0], [0], [1], [0, 0, 1, 1], [], []>} : vector<16x256xf32>, vector<256x768xf32>, vector<16x768xf32> -> vector<16x768xf32>
    %365 = vector.broadcast %13 : vector<1x768xf32> to vector<16x768xf32>
    %366 = arith.addf %364, %365 : vector<16x768xf32>
    %367 = vector.extract_strided_slice %363 {offsets = [0, 0], sizes = [16, 512], strides = [1, 1]} : vector<16x768xf32> to vector<16x512xf32>
    %368 = vector.extract_strided_slice %366 {offsets = [0, 0], sizes = [16, 512], strides = [1, 1]} : vector<16x768xf32> to vector<16x512xf32>
    %369 = arith.addf %367, %368 : vector<16x512xf32>
    %370 = arith.negf %369 : vector<16x512xf32>
    %371 = math.exp %370 : vector<16x512xf32>
    %cst_140 = arith.constant 1.000000e+00 : f32
    %372 = vector.broadcast %cst_140 : f32 to vector<16x512xf32>
    %373 = arith.addf %372, %371 : vector<16x512xf32>
    %374 = arith.divf %372, %373 : vector<16x512xf32>
    %375 = vector.extract_strided_slice %374 {offsets = [0, 0], sizes = [16, 256], strides = [1, 1]} : vector<16x512xf32> to vector<16x256xf32>
    %376 = vector.extract_strided_slice %374 {offsets = [0, 256], sizes = [16, 256], strides = [1, 1]} : vector<16x512xf32> to vector<16x256xf32>
    %377 = vector.extract_strided_slice %363 {offsets = [0, 512], sizes = [16, 256], strides = [1, 1]} : vector<16x768xf32> to vector<16x256xf32>
    %378 = vector.extract_strided_slice %366 {offsets = [0, 512], sizes = [16, 256], strides = [1, 1]} : vector<16x768xf32> to vector<16x256xf32>
    %379 = arith.mulf %375, %378 : vector<16x256xf32>
    %380 = arith.addf %377, %379 : vector<16x256xf32>
    %381 = math.tanh %380 : vector<16x256xf32>
    %cst_141 = arith.constant 1.000000e+00 : f32
    %382 = vector.broadcast %cst_141 : f32 to vector<16x256xf32>
    %383 = arith.subf %382, %376 : vector<16x256xf32>
    %384 = arith.mulf %383, %381 : vector<16x256xf32>
    %385 = arith.mulf %376, %340 : vector<16x256xf32>
    %386 = arith.addf %384, %385 : vector<16x256xf32>
    %c5_i32_142 = arith.constant 5 : i32
    %387 = vector.broadcast %c5_i32_142 : i32 to vector<16x1xi32>
    %388 = arith.cmpi sgt, %15, %387 : vector<16x1xi32>
    %389 = arith.extui %388 : vector<16x1xi1> to vector<16x1xi32>
    %390 = arith.sitofp %389 : vector<16x1xi32> to vector<16x1xf32>
    %c2_i32_143 = arith.constant 2 : i32
    %391 = vector.broadcast %c2_i32_143 : i32 to vector<16x1xi32>
    %392 = arith.cmpi sgt, %15, %391 : vector<16x1xi32>
    %393 = arith.extui %392 : vector<16x1xi1> to vector<16x1xi32>
    %394 = arith.sitofp %393 : vector<16x1xi32> to vector<16x1xf32>
    %395 = vector.shape_cast %23 : vector<1x256xi1> to vector<1x256xi1>
    %396 = vector.broadcast %395 : vector<1x256xi1> to vector<16x256xi1>
    %397 = vector.shape_cast %390 : vector<16x1xf32> to vector<16x1xf32>
    %398 = vector.broadcast %397 : vector<16x1xf32> to vector<16x256xf32>
    %399 = vector.shape_cast %394 : vector<16x1xf32> to vector<16x1xf32>
    %400 = vector.broadcast %399 : vector<16x1xf32> to vector<16x256xf32>
    %401 = arith.select %396, %398, %400 : vector<16x256xi1>, vector<16x256xf32>
    %402 = arith.mulf %401, %386 : vector<16x256xf32>
    %cst_144 = arith.constant 1.000000e+00 : f32
    %403 = vector.broadcast %cst_144 : f32 to vector<16x256xf32>
    %404 = arith.subf %403, %401 : vector<16x256xf32>
    %405 = arith.mulf %404, %340 : vector<16x256xf32>
    %406 = arith.addf %402, %405 : vector<16x256xf32>
    %c0_145 = arith.constant 0 : index
    %c5_146 = arith.constant 5 : index
    %c0_147 = arith.constant 0 : index
    %c0_148 = arith.constant 0 : index
    %407 = vector.load %arg7[%c0_145, %c5_146, %c0_147, %c0_148] : memref<1x8x16x32xf32, #tpu.memory_space<vmem>>, vector<1x1x16x32xf32>
    %408 = vector.shape_cast %407 : vector<1x1x16x32xf32> to vector<16x32xf32>
    %409 = vector.extract_strided_slice %386 {offsets = [0, 0], sizes = [16, 32], strides = [1, 1]} : vector<16x256xf32> to vector<16x32xf32>
    %410 = vector.broadcast %390 : vector<16x1xf32> to vector<16x32xf32>
    %411 = arith.mulf %410, %409 : vector<16x32xf32>
    %412 = arith.addf %408, %411 : vector<16x32xf32>
    %c0_149 = arith.constant 0 : index
    %c5_150 = arith.constant 5 : index
    %c0_151 = arith.constant 0 : index
    %c0_152 = arith.constant 0 : index
    %413 = vector.load %arg7[%c0_149, %c5_150, %c0_151, %c0_152] : memref<1x8x16x32xf32, #tpu.memory_space<vmem>>, vector<1x1x16x32xf32>
    %414 = vector.shape_cast %413 : vector<1x1x16x32xf32> to vector<16x32xf32>
    %415 = vector.shape_cast %412 : vector<16x32xf32> to vector<1x1x16x32xf32>
    tpu.vector_store %arg7[%c0_149, %c5_150, %c0_151, %c0_152], %415 {strides = array<i32>} : memref<1x8x16x32xf32, #tpu.memory_space<vmem>>, vector<1x1x16x32xf32>,
    %c0_153 = arith.constant 0 : index
    %c2_154 = arith.constant 2 : index
    %c0_155 = arith.constant 0 : index
    %c0_156 = arith.constant 0 : index
    %416 = vector.load %arg7[%c0_153, %c2_154, %c0_155, %c0_156] : memref<1x8x16x32xf32, #tpu.memory_space<vmem>>, vector<1x1x16x32xf32>
    %417 = vector.shape_cast %416 : vector<1x1x16x32xf32> to vector<16x32xf32>
    %418 = vector.extract_strided_slice %386 {offsets = [0, 128], sizes = [16, 32], strides = [1, 1]} : vector<16x256xf32> to vector<16x32xf32>
    %419 = vector.broadcast %394 : vector<16x1xf32> to vector<16x32xf32>
    %420 = arith.mulf %419, %418 : vector<16x32xf32>
    %421 = arith.addf %417, %420 : vector<16x32xf32>
    %c0_157 = arith.constant 0 : index
    %c2_158 = arith.constant 2 : index
    %c0_159 = arith.constant 0 : index
    %c0_160 = arith.constant 0 : index
    %422 = vector.load %arg7[%c0_157, %c2_158, %c0_159, %c0_160] : memref<1x8x16x32xf32, #tpu.memory_space<vmem>>, vector<1x1x16x32xf32>
    %423 = vector.shape_cast %422 : vector<1x1x16x32xf32> to vector<16x32xf32>
    %424 = vector.shape_cast %421 : vector<16x32xf32> to vector<1x1x16x32xf32>
    tpu.vector_store %arg7[%c0_157, %c2_158, %c0_159, %c0_160], %424 {strides = array<i32>} : memref<1x8x16x32xf32, #tpu.memory_space<vmem>>, vector<1x1x16x32xf32>,
    %c96_161 = arith.constant 96 : index
    %c0_162 = arith.constant 0 : index
    %425 = vector.load %arg9[%c96_161, %c0_162] : memref<128x768xf32, #tpu.memory_space<vmem>>, vector<16x768xf32>
    %c16_163 = arith.constant 16 : index
    %c0_164 = arith.constant 0 : index
    %426 = vector.load %arg9[%c16_163, %c0_164] : memref<128x768xf32, #tpu.memory_space<vmem>>, vector<16x768xf32>
    %427 = vector.shape_cast %20 : vector<1x768xi1> to vector<1x768xi1>
    %428 = vector.broadcast %427 : vector<1x768xi1> to vector<16x768xi1>
    %429 = arith.select %428, %425, %426 : vector<16x768xi1>, vector<16x768xf32>
    %cst_165 = arith.constant dense<0.000000e+00> : vector<16x768xf32>
    %430 = tpu.matmul %406, %11, %cst_165 {dimension_numbers = #tpu.dot_dimension_numbers<[1], [0], [0], [1], [0, 0, 1, 1], [], []>} : vector<16x256xf32>, vector<256x768xf32>, vector<16x768xf32> -> vector<16x768xf32>
    %431 = vector.broadcast %13 : vector<1x768xf32> to vector<16x768xf32>
    %432 = arith.addf %430, %431 : vector<16x768xf32>
    %433 = vector.extract_strided_slice %429 {offsets = [0, 0], sizes = [16, 512], strides = [1, 1]} : vector<16x768xf32> to vector<16x512xf32>
    %434 = vector.extract_strided_slice %432 {offsets = [0, 0], sizes = [16, 512], strides = [1, 1]} : vector<16x768xf32> to vector<16x512xf32>
    %435 = arith.addf %433, %434 : vector<16x512xf32>
    %436 = arith.negf %435 : vector<16x512xf32>
    %437 = math.exp %436 : vector<16x512xf32>
    %cst_166 = arith.constant 1.000000e+00 : f32
    %438 = vector.broadcast %cst_166 : f32 to vector<16x512xf32>
    %439 = arith.addf %438, %437 : vector<16x512xf32>
    %440 = arith.divf %438, %439 : vector<16x512xf32>
    %441 = vector.extract_strided_slice %440 {offsets = [0, 0], sizes = [16, 256], strides = [1, 1]} : vector<16x512xf32> to vector<16x256xf32>
    %442 = vector.extract_strided_slice %440 {offsets = [0, 256], sizes = [16, 256], strides = [1, 1]} : vector<16x512xf32> to vector<16x256xf32>
    %443 = vector.extract_strided_slice %429 {offsets = [0, 512], sizes = [16, 256], strides = [1, 1]} : vector<16x768xf32> to vector<16x256xf32>
    %444 = vector.extract_strided_slice %432 {offsets = [0, 512], sizes = [16, 256], strides = [1, 1]} : vector<16x768xf32> to vector<16x256xf32>
    %445 = arith.mulf %441, %444 : vector<16x256xf32>
    %446 = arith.addf %443, %445 : vector<16x256xf32>
    %447 = math.tanh %446 : vector<16x256xf32>
    %cst_167 = arith.constant 1.000000e+00 : f32
    %448 = vector.broadcast %cst_167 : f32 to vector<16x256xf32>
    %449 = arith.subf %448, %442 : vector<16x256xf32>
    %450 = arith.mulf %449, %447 : vector<16x256xf32>
    %451 = arith.mulf %442, %406 : vector<16x256xf32>
    %452 = arith.addf %450, %451 : vector<16x256xf32>
    %c6_i32_168 = arith.constant 6 : i32
    %453 = vector.broadcast %c6_i32_168 : i32 to vector<16x1xi32>
    %454 = arith.cmpi sgt, %15, %453 : vector<16x1xi32>
    %455 = arith.extui %454 : vector<16x1xi1> to vector<16x1xi32>
    %456 = arith.sitofp %455 : vector<16x1xi32> to vector<16x1xf32>
    %c1_i32_169 = arith.constant 1 : i32
    %457 = vector.broadcast %c1_i32_169 : i32 to vector<16x1xi32>
    %458 = arith.cmpi sgt, %15, %457 : vector<16x1xi32>
    %459 = arith.extui %458 : vector<16x1xi1> to vector<16x1xi32>
    %460 = arith.sitofp %459 : vector<16x1xi32> to vector<16x1xf32>
    %461 = vector.shape_cast %23 : vector<1x256xi1> to vector<1x256xi1>
    %462 = vector.broadcast %461 : vector<1x256xi1> to vector<16x256xi1>
    %463 = vector.shape_cast %456 : vector<16x1xf32> to vector<16x1xf32>
    %464 = vector.broadcast %463 : vector<16x1xf32> to vector<16x256xf32>
    %465 = vector.shape_cast %460 : vector<16x1xf32> to vector<16x1xf32>
    %466 = vector.broadcast %465 : vector<16x1xf32> to vector<16x256xf32>
    %467 = arith.select %462, %464, %466 : vector<16x256xi1>, vector<16x256xf32>
    %468 = arith.mulf %467, %452 : vector<16x256xf32>
    %cst_170 = arith.constant 1.000000e+00 : f32
    %469 = vector.broadcast %cst_170 : f32 to vector<16x256xf32>
    %470 = arith.subf %469, %467 : vector<16x256xf32>
    %471 = arith.mulf %470, %406 : vector<16x256xf32>
    %472 = arith.addf %468, %471 : vector<16x256xf32>
    %c0_171 = arith.constant 0 : index
    %c6_172 = arith.constant 6 : index
    %c0_173 = arith.constant 0 : index
    %c0_174 = arith.constant 0 : index
    %473 = vector.load %arg7[%c0_171, %c6_172, %c0_173, %c0_174] : memref<1x8x16x32xf32, #tpu.memory_space<vmem>>, vector<1x1x16x32xf32>
    %474 = vector.shape_cast %473 : vector<1x1x16x32xf32> to vector<16x32xf32>
    %475 = vector.extract_strided_slice %452 {offsets = [0, 0], sizes = [16, 32], strides = [1, 1]} : vector<16x256xf32> to vector<16x32xf32>
    %476 = vector.broadcast %456 : vector<16x1xf32> to vector<16x32xf32>
    %477 = arith.mulf %476, %475 : vector<16x32xf32>
    %478 = arith.addf %474, %477 : vector<16x32xf32>
    %c0_175 = arith.constant 0 : index
    %c6_176 = arith.constant 6 : index
    %c0_177 = arith.constant 0 : index
    %c0_178 = arith.constant 0 : index
    %479 = vector.load %arg7[%c0_175, %c6_176, %c0_177, %c0_178] : memref<1x8x16x32xf32, #tpu.memory_space<vmem>>, vector<1x1x16x32xf32>
    %480 = vector.shape_cast %479 : vector<1x1x16x32xf32> to vector<16x32xf32>
    %481 = vector.shape_cast %478 : vector<16x32xf32> to vector<1x1x16x32xf32>
    tpu.vector_store %arg7[%c0_175, %c6_176, %c0_177, %c0_178], %481 {strides = array<i32>} : memref<1x8x16x32xf32, #tpu.memory_space<vmem>>, vector<1x1x16x32xf32>,
    %c0_179 = arith.constant 0 : index
    %c1_180 = arith.constant 1 : index
    %c0_181 = arith.constant 0 : index
    %c0_182 = arith.constant 0 : index
    %482 = vector.load %arg7[%c0_179, %c1_180, %c0_181, %c0_182] : memref<1x8x16x32xf32, #tpu.memory_space<vmem>>, vector<1x1x16x32xf32>
    %483 = vector.shape_cast %482 : vector<1x1x16x32xf32> to vector<16x32xf32>
    %484 = vector.extract_strided_slice %452 {offsets = [0, 128], sizes = [16, 32], strides = [1, 1]} : vector<16x256xf32> to vector<16x32xf32>
    %485 = vector.broadcast %460 : vector<16x1xf32> to vector<16x32xf32>
    %486 = arith.mulf %485, %484 : vector<16x32xf32>
    %487 = arith.addf %483, %486 : vector<16x32xf32>
    %c0_183 = arith.constant 0 : index
    %c1_184 = arith.constant 1 : index
    %c0_185 = arith.constant 0 : index
    %c0_186 = arith.constant 0 : index
    %488 = vector.load %arg7[%c0_183, %c1_184, %c0_185, %c0_186] : memref<1x8x16x32xf32, #tpu.memory_space<vmem>>, vector<1x1x16x32xf32>
    %489 = vector.shape_cast %488 : vector<1x1x16x32xf32> to vector<16x32xf32>
    %490 = vector.shape_cast %487 : vector<16x32xf32> to vector<1x1x16x32xf32>
    tpu.vector_store %arg7[%c0_183, %c1_184, %c0_185, %c0_186], %490 {strides = array<i32>} : memref<1x8x16x32xf32, #tpu.memory_space<vmem>>, vector<1x1x16x32xf32>,
    %c112_187 = arith.constant 112 : index
    %c0_188 = arith.constant 0 : index
    %491 = vector.load %arg9[%c112_187, %c0_188] : memref<128x768xf32, #tpu.memory_space<vmem>>, vector<16x768xf32>
    %c0_189 = arith.constant 0 : index
    %c0_190 = arith.constant 0 : index
    %492 = vector.load %arg9[%c0_189, %c0_190] : memref<128x768xf32, #tpu.memory_space<vmem>>, vector<16x768xf32>
    %493 = vector.shape_cast %20 : vector<1x768xi1> to vector<1x768xi1>
    %494 = vector.broadcast %493 : vector<1x768xi1> to vector<16x768xi1>
    %495 = arith.select %494, %491, %492 : vector<16x768xi1>, vector<16x768xf32>
    %cst_191 = arith.constant dense<0.000000e+00> : vector<16x768xf32>
    %496 = tpu.matmul %472, %11, %cst_191 {dimension_numbers = #tpu.dot_dimension_numbers<[1], [0], [0], [1], [0, 0, 1, 1], [], []>} : vector<16x256xf32>, vector<256x768xf32>, vector<16x768xf32> -> vector<16x768xf32>
    %497 = vector.broadcast %13 : vector<1x768xf32> to vector<16x768xf32>
    %498 = arith.addf %496, %497 : vector<16x768xf32>
    %499 = vector.extract_strided_slice %495 {offsets = [0, 0], sizes = [16, 512], strides = [1, 1]} : vector<16x768xf32> to vector<16x512xf32>
    %500 = vector.extract_strided_slice %498 {offsets = [0, 0], sizes = [16, 512], strides = [1, 1]} : vector<16x768xf32> to vector<16x512xf32>
    %501 = arith.addf %499, %500 : vector<16x512xf32>
    %502 = arith.negf %501 : vector<16x512xf32>
    %503 = math.exp %502 : vector<16x512xf32>
    %cst_192 = arith.constant 1.000000e+00 : f32
    %504 = vector.broadcast %cst_192 : f32 to vector<16x512xf32>
    %505 = arith.addf %504, %503 : vector<16x512xf32>
    %506 = arith.divf %504, %505 : vector<16x512xf32>
    %507 = vector.extract_strided_slice %506 {offsets = [0, 0], sizes = [16, 256], strides = [1, 1]} : vector<16x512xf32> to vector<16x256xf32>
    %508 = vector.extract_strided_slice %506 {offsets = [0, 256], sizes = [16, 256], strides = [1, 1]} : vector<16x512xf32> to vector<16x256xf32>
    %509 = vector.extract_strided_slice %495 {offsets = [0, 512], sizes = [16, 256], strides = [1, 1]} : vector<16x768xf32> to vector<16x256xf32>
    %510 = vector.extract_strided_slice %498 {offsets = [0, 512], sizes = [16, 256], strides = [1, 1]} : vector<16x768xf32> to vector<16x256xf32>
    %511 = arith.mulf %507, %510 : vector<16x256xf32>
    %512 = arith.addf %509, %511 : vector<16x256xf32>
    %513 = math.tanh %512 : vector<16x256xf32>
    %cst_193 = arith.constant 1.000000e+00 : f32
    %514 = vector.broadcast %cst_193 : f32 to vector<16x256xf32>
    %515 = arith.subf %514, %508 : vector<16x256xf32>
    %516 = arith.mulf %515, %513 : vector<16x256xf32>
    %517 = arith.mulf %508, %472 : vector<16x256xf32>
    %518 = arith.addf %516, %517 : vector<16x256xf32>
    %c7_i32_194 = arith.constant 7 : i32
    %519 = vector.broadcast %c7_i32_194 : i32 to vector<16x1xi32>
    %520 = arith.cmpi sgt, %15, %519 : vector<16x1xi32>
    %521 = arith.extui %520 : vector<16x1xi1> to vector<16x1xi32>
    %522 = arith.sitofp %521 : vector<16x1xi32> to vector<16x1xf32>
    %c0_i32_195 = arith.constant 0 : i32
    %523 = vector.broadcast %c0_i32_195 : i32 to vector<16x1xi32>
    %524 = arith.cmpi sgt, %15, %523 : vector<16x1xi32>
    %525 = arith.extui %524 : vector<16x1xi1> to vector<16x1xi32>
    %526 = arith.sitofp %525 : vector<16x1xi32> to vector<16x1xf32>
    %527 = vector.shape_cast %23 : vector<1x256xi1> to vector<1x256xi1>
    %528 = vector.broadcast %527 : vector<1x256xi1> to vector<16x256xi1>
    %529 = vector.shape_cast %522 : vector<16x1xf32> to vector<16x1xf32>
    %530 = vector.broadcast %529 : vector<16x1xf32> to vector<16x256xf32>
    %531 = vector.shape_cast %526 : vector<16x1xf32> to vector<16x1xf32>
    %532 = vector.broadcast %531 : vector<16x1xf32> to vector<16x256xf32>
    %533 = arith.select %528, %530, %532 : vector<16x256xi1>, vector<16x256xf32>
    %534 = arith.mulf %533, %518 : vector<16x256xf32>
    %cst_196 = arith.constant 1.000000e+00 : f32
    %535 = vector.broadcast %cst_196 : f32 to vector<16x256xf32>
    %536 = arith.subf %535, %533 : vector<16x256xf32>
    %537 = arith.mulf %536, %472 : vector<16x256xf32>
    %538 = arith.addf %534, %537 : vector<16x256xf32>
    %c0_197 = arith.constant 0 : index
    %c7_198 = arith.constant 7 : index
    %c0_199 = arith.constant 0 : index
    %c0_200 = arith.constant 0 : index
    %539 = vector.load %arg7[%c0_197, %c7_198, %c0_199, %c0_200] : memref<1x8x16x32xf32, #tpu.memory_space<vmem>>, vector<1x1x16x32xf32>
    %540 = vector.shape_cast %539 : vector<1x1x16x32xf32> to vector<16x32xf32>
    %541 = vector.extract_strided_slice %518 {offsets = [0, 0], sizes = [16, 32], strides = [1, 1]} : vector<16x256xf32> to vector<16x32xf32>
    %542 = vector.broadcast %522 : vector<16x1xf32> to vector<16x32xf32>
    %543 = arith.mulf %542, %541 : vector<16x32xf32>
    %544 = arith.addf %540, %543 : vector<16x32xf32>
    %c0_201 = arith.constant 0 : index
    %c7_202 = arith.constant 7 : index
    %c0_203 = arith.constant 0 : index
    %c0_204 = arith.constant 0 : index
    %545 = vector.load %arg7[%c0_201, %c7_202, %c0_203, %c0_204] : memref<1x8x16x32xf32, #tpu.memory_space<vmem>>, vector<1x1x16x32xf32>
    %546 = vector.shape_cast %545 : vector<1x1x16x32xf32> to vector<16x32xf32>
    %547 = vector.shape_cast %544 : vector<16x32xf32> to vector<1x1x16x32xf32>
    tpu.vector_store %arg7[%c0_201, %c7_202, %c0_203, %c0_204], %547 {strides = array<i32>} : memref<1x8x16x32xf32, #tpu.memory_space<vmem>>, vector<1x1x16x32xf32>,
    %c0_205 = arith.constant 0 : index
    %c0_206 = arith.constant 0 : index
    %c0_207 = arith.constant 0 : index
    %c0_208 = arith.constant 0 : index
    %548 = vector.load %arg7[%c0_205, %c0_206, %c0_207, %c0_208] : memref<1x8x16x32xf32, #tpu.memory_space<vmem>>, vector<1x1x16x32xf32>
    %549 = vector.shape_cast %548 : vector<1x1x16x32xf32> to vector<16x32xf32>
    %550 = vector.extract_strided_slice %518 {offsets = [0, 128], sizes = [16, 32], strides = [1, 1]} : vector<16x256xf32> to vector<16x32xf32>
    %551 = vector.broadcast %526 : vector<16x1xf32> to vector<16x32xf32>
    %552 = arith.mulf %551, %550 : vector<16x32xf32>
    %553 = arith.addf %549, %552 : vector<16x32xf32>
    %c0_209 = arith.constant 0 : index
    %c0_210 = arith.constant 0 : index
    %c0_211 = arith.constant 0 : index
    %c0_212 = arith.constant 0 : index
    %554 = vector.load %arg7[%c0_209, %c0_210, %c0_211, %c0_212] : memref<1x8x16x32xf32, #tpu.memory_space<vmem>>, vector<1x1x16x32xf32>
    %555 = vector.shape_cast %554 : vector<1x1x16x32xf32> to vector<16x32xf32>
    %556 = vector.shape_cast %553 : vector<16x32xf32> to vector<1x1x16x32xf32>
    tpu.vector_store %arg7[%c0_209, %c0_210, %c0_211, %c0_212], %556 {strides = array<i32>} : memref<1x8x16x32xf32, #tpu.memory_space<vmem>>, vector<1x1x16x32xf32>,
    %557 = vector.extract_strided_slice %538 {offsets = [0, 0], sizes = [16, 32], strides = [1, 1]} : vector<16x256xf32> to vector<16x32xf32>
    %558 = vector.extract_strided_slice %538 {offsets = [0, 128], sizes = [16, 32], strides = [1, 1]} : vector<16x256xf32> to vector<16x32xf32>
    %559 = arith.addf %557, %558 : vector<16x32xf32>
    %c0_213 = arith.constant 0 : index
    %c0_214 = arith.constant 0 : index
    %c0_215 = arith.constant 0 : index
    %560 = vector.load %arg8[%c0_213, %c0_214, %c0_215] : memref<1x16x32xf32, #tpu.memory_space<vmem>>, vector<1x16x32xf32>
    %561 = vector.shape_cast %560 : vector<1x16x32xf32> to vector<16x32xf32>
    %562 = vector.shape_cast %559 : vector<16x32xf32> to vector<1x16x32xf32>
    tpu.vector_store %arg8[%c0_213, %c0_214, %c0_215], %562 {strides = array<i32>} : memref<1x16x32xf32, #tpu.memory_space<vmem>>, vector<1x16x32xf32>,
    return
  }
  func.func @transform_0(%arg0: i32) -> (i32, i32, i32) {
    %c0_i32 = arith.constant 0 : i32
    %c0_i32_0 = arith.constant 0 : i32
    %c0_i32_1 = arith.constant 0 : i32
    return %arg0, %c0_i32, %c0_i32_0 : i32, i32, i32
  }
  func.func @transform_1(%arg0: i32) -> (i32, i32, i32) {
    %c0_i32 = arith.constant 0 : i32
    %c0_i32_0 = arith.constant 0 : i32
    %c0_i32_1 = arith.constant 0 : i32
    return %arg0, %c0_i32, %c0_i32_0 : i32, i32, i32
  }
  func.func @transform_2(%arg0: i32) -> (i32, i32, i32) {
    %c0_i32 = arith.constant 0 : i32
    %c0_i32_0 = arith.constant 0 : i32
    %c0_i32_1 = arith.constant 0 : i32
    return %arg0, %c0_i32, %c0_i32_0 : i32, i32, i32
  }
  func.func @transform_3(%arg0: i32) -> (i32, i32, i32) {
    %c0_i32 = arith.constant 0 : i32
    %c0_i32_0 = arith.constant 0 : i32
    %c0_i32_1 = arith.constant 0 : i32
    return %arg0, %c0_i32, %c0_i32_0 : i32, i32, i32
  }
  func.func @transform_4(%arg0: i32) -> (i32, i32, i32) {
    %c0_i32 = arith.constant 0 : i32
    %c0_i32_0 = arith.constant 0 : i32
    %c0_i32_1 = arith.constant 0 : i32
    return %arg0, %c0_i32, %c0_i32_0 : i32, i32, i32
  }
  func.func @transform_5(%arg0: i32) -> (i32, i32, i32) {
    %c0_i32 = arith.constant 0 : i32
    %c0_i32_0 = arith.constant 0 : i32
    %c0_i32_1 = arith.constant 0 : i32
    return %arg0, %c0_i32, %c0_i32_0 : i32, i32, i32
  }
  func.func @transform_6(%arg0: i32) -> (i32, i32, i32, i32) {
    %c0_i32 = arith.constant 0 : i32
    %c0_i32_0 = arith.constant 0 : i32
    %c0_i32_1 = arith.constant 0 : i32
    %c0_i32_2 = arith.constant 0 : i32
    return %arg0, %c0_i32, %c0_i32_0, %c0_i32_1 : i32, i32, i32, i32
  }
  func.func @transform_7(%arg0: i32) -> (i32, i32, i32) {
    %c0_i32 = arith.constant 0 : i32
    %c0_i32_0 = arith.constant 0 : i32
    %c0_i32_1 = arith.constant 0 : i32
    return %arg0, %c0_i32, %c0_i32_0 : i32, i32, i32
  }
}

</mosaic_0001>

<bundles_post_ra>
// kernel: squeeze.9
= control target key start
LH: loop header
LB: loop body
LE: loop exit
PB: predicated region body
PF: predicated region fallthrough
CT: control target
= control target key end

     0   :  { %vm3_vm0 = vcmask 261120   ;;  %s90_s0 = inlined_call_operand.vmem [shape: f32[1,10,32], index: 0, kind: input, shape index: {}]   ;;  %s91_s1 = inlined_call_operand.vmem [shape: f32[5,2,32], index: 1, kind: output, shape index: {}]  }
   0x1   :  { %v2_v0 = vld [vmem:[%s90_s0] sm:$0xff]   ;;  %v54_v1 = vld [vmem:[%s90_s0 + $0x8] sm:$0x3]  }
   0x2   :  { %4 = vst.msk [vmem:[#allocation0] sm:$0x3] %vm3_vm0, %v2_v0   ;;  %6 = vst.msk [vmem:[#allocation0 + $0x6] sm:$0xc] %vm3_vm0, %v2_v0  }
   0x3   :  { %8 = vst.msk [vmem:[#allocation0 + $0xc] sm:$0x30] %vm3_vm0, %v2_v0   ;;  %10 = vst.msk [vmem:[#allocation0 + $0x12] sm:$0xc0] %vm3_vm0, %v2_v0  }
   0x4   :  { %15 = vst.msk [vmem:[#allocation0 + $0x20] sm:$0x3] %vm3_vm0, %v54_v1  }
   0x9   :  { %v20_v2 = vld [vmem:[#allocation0] sm:$0x3]  ;;  %v25_v3 = vld [vmem:[#allocation0 + $0x8] sm:$0x3] }
   0xa   :  { %v31_v4 = vld [vmem:[#allocation0 + $0x10] sm:$0x3]  ;;  %23 = vst [vmem:[%s91_s1] sm:$0x3] %v20_v2  ;;  %55 = vst [vmem:[%s91_s1 + $0x2] sm:$0x3] %v25_v3 }
   0xb   :  { %56 = vst [vmem:[%s91_s1 + $0x4] sm:$0x3] %v31_v4  ;;  %v38_v5 = vld [vmem:[#allocation0 + $0x18] sm:$0x3]  ;;  %v45_v6 = vld [vmem:[#allocation0 + $0x20] sm:$0x3] }
   0xc   :  { %57 = vst [vmem:[%s91_s1 + $0x6] sm:$0x3] %v38_v5  ;;  %58 = vst [vmem:[%s91_s1 + $0x8] sm:$0x3] %v45_v6 }

// kernel: model_forward.3
= control target key start
LH: loop header
LB: loop body
LE: loop exit
PB: predicated region body
PF: predicated region fallthrough
CT: control target
= control target key end

     0   :  { %s673_s0 = inlined_call_operand.vmem [shape: f32[1,32], index: 0, kind: input, shape index: {}]   ;;  %s674_s1 = inlined_call_operand.vmem [shape: f32[2,5,32], index: 1, kind: input, shape index: {}]   ;;  %s675_s2 = inlined_call_operand.vmem [shape: f32[2,5], index: 2, kind: input, shape index: {}]   ;;  %s676_s3 = inlined_call_operand.vmem [shape: f32[2,32], index: 3, kind: input, shape index: {}]   ;;  %s677_s4 = inlined_call_operand.vmem [shape: f32[2,32], index: 4, kind: input, shape index: {}]   ;;  %s678_s5 = inlined_call_operand.vmem [shape: f32[1,32], index: 5, kind: input, shape index: {}]   ;;  %s679_s6 = inlined_call_operand.vmem [shape: f32[1,32], index: 6, kind: input, shape index: {}]   ;;  %s680_s7 = inlined_call_operand.<no memory space> [shape: f32[1,1], index: 7, kind: input, shape index: {}]   ;;  %s681_s8 = inlined_call_operand.vmem [shape: f32[96,256], index: 8, kind: input, shape index: {}]   ;;  %s682_s9 = inlined_call_operand.vmem [shape: f32[1,256], index: 9, kind: input, shape index: {}]   ;;  %s683_s10 = inlined_call_operand.hbm [shape: f32[2,256], index: 10, kind: output, shape index: {}]  }
   0x1   :  { %v15_v0 = vstv %s680_s7 }
   0x2   :  { %16 = vst [vmem:[#allocation2] sm:$0x1] %v15_v0 }
   0x3   :  { %v40_v1 = vld [vmem:[%s673_s0] sm:$0x1]  ;;  %vm43_vm0 = vcmask 253952   ;;  %vm56_vm1 = vcmask 258048   ;;  %v549_v4 = vld [vmem:[%s674_s1 + $0x8] sm:$0x1f] }
   0x4   :  { %v41_v2 = vld [vmem:[%s678_s5] sm:$0x1] }
   0x5   :  { %v42_v3 = vmul.f32 %v41_v2, %v40_v1  ;;  %v438_v5 = vld [vmem:[%s679_s6] ss:$0 sm:$0xff] }
   0x6   :  { %v557_v6 = vld [vmem:[%s674_s1] sm:$0x1f]  ;;  %v55_v7 = vmul.f32 %v438_v5, %v549_v4 }
   0x7   :  { %v54_v8 = vmul.f32 %v438_v5, %v557_v6 }
   0x8   :  { %17 = vsyncpa [#allocation4], 0  ;;  %v44_v9 = vsel %vm43_vm0, %v42_v3, 0.0  ;;  %v479_v10 = vmov 0   ;;  %v60_v11 = vsel %vm56_vm1, %v55_v7, 0.0  ;;  %v63_v14 = vlaneseq  ;;  %v158_v43 = vld [vmem:[%s681_s8 + $0x78] sm:$0xff] }
   0x9   :  { %447 = vset.pattern.permute.xlu1 %v479_v10  ;;  %448 = vset.pattern.permute.xlu0 %v479_v10  ;;  %v57_v12 = vsel %vm56_vm1, %v54_v8, 0.0  ;;  %v439_v13 = vld [vmem:[#allocation2] ss:$0 sm:$0xff]  ;;  %vm97_vm2 = vcmask 1041409   ;;  %vm101_vm4 = vcmask 33792   ;;  %v157_v45 = vld [vmem:[%s681_s8 + $0x70] sm:$0xff] }
   0xa   :  { %45 = vadd.xlane.f32.xlu0 %v44_v9  ;;  %61 = vadd.xlane.f32.xlu1 %v60_v11  ;;  %v563_v15 = vshrl.u32 %v63_v14, 7  ;;  %v88_v26 = vand.u32 127, %v63_v14  ;;  %v83_v28 = vld [vmem:[%s675_s2] sm:$0x3]  ;;  %v150_v46 = vld [vmem:[%s681_s8 + $0x38] sm:$0xff]  ;;  %v156_v48 = vld [vmem:[%s681_s8 + $0x68] sm:$0xff] }
   0xb   :  { %vm84_vm3 = vcmp.gt.f32.partialorder %v83_v28, 0.0  ;;  %198 = vmatprep.subr.mxu0 %v158_v43  ;;  %272 = vmatprep.subr.mxu1 %v150_v46  ;;  %v149_v49 = vld [vmem:[%s681_s8 + $0x30] sm:$0xff]  ;;  %v155_v50 = vld [vmem:[%s681_s8 + $0x60] sm:$0xff]  ;;  %v148_v51 = vld [vmem:[%s681_s8 + $0x28] sm:$0xff]  ;;  %vm171_vm5 = vcmask 261120   ;;  %v480_v1 = vmov 0.0  }
   0xc   :  { %v566_v16 = vsub.s32 0, %v563_v15  ;;  %v91_v27 = vsub.s32 %v88_v26, %v563_v15  ;;  %v122_v42 = vsub.s32 1, %v563_v15  ;;  %199 = vmatpush1.msra.mxu0 %v157_v45  ;;  %273 = vmatpush1.msra.mxu1 %v149_v49  ;;  %v154_v54 = vld [vmem:[%s681_s8 + $0x58] sm:$0xff]  ;;  %v147_v55 = vld [vmem:[%s681_s8 + $0x20] sm:$0xff]  ;;  %v153_v56 = vld [vmem:[%s681_s8 + $0x50] sm:$0xff] }
   0xd   :  { %200 = vmatprep.subr.mxu0 %v156_v48  ;;  %274 = vmatprep.subr.mxu1 %v148_v51  ;;  %v146_v57 = vld [vmem:[%s681_s8 + $0x18] sm:$0xff]  ;;  %v152_v58 = vld [vmem:[%s681_s8 + $0x48] sm:$0xff]  ;;  %v145_v59 = vld [vmem:[%s681_s8 + $0x10] sm:$0xff] }
   0xe   :  { %58 = vadd.xlane.f32.xlu0 %v57_v12  ;;  %201 = vmatpush1.msra.mxu0 %v155_v50  ;;  %v151_v60 = vld [vmem:[%s681_s8 + $0x40] sm:$0xff]  ;;  %v144_v61 = vld [vmem:[%s681_s8 + $0x8] sm:$0xff]  ;;  %v166_v63 = vld [vmem:[%s681_s8 + $0xb8] sm:$0xff] }
   0xf   :  { %202 = vmatprep.subr.mxu0 %v154_v54  ;;  %275 = vmatpush1.msra.mxu1 %v147_v55  ;;  %v143_v62 = vld [vmem:[%s681_s8] sm:$0xff]  ;;  %v162_v26 = vld [vmem:[%s681_s8 + $0x98] sm:$0xff]  ;;  %v160_v28 = vld [vmem:[%s681_s8 + $0x88] sm:$0xff] }
  0x10   :  { %203 = vmatpush1.msra.mxu0 %v153_v56  ;;  %276 = vmatprep.subr.mxu1 %v146_v57  ;;  %v167_v0 = vld [vmem:[%s676_s3] sm:$0x3] }
  0x11   :  { %204 = vmatprep.subr.mxu0 %v152_v58  ;;  %277 = vmatpush1.msra.mxu1 %v145_v59 }
  0x12   :  { %205 = vmatpush1.msra.mxu0 %v151_v60  ;;  %278 = vmatprep.subr.mxu1 %v144_v61 }
  0x13   :  { %238 = vmatprep.mubr.f32.mxu0 %v480_v1  ;;  %279 = vmatpush1.msra.mxu1 %v143_v62 }
  0x14   :  { %312 = vmatprep.mubr.f32.mxu1 %v480_v1  ;;  %347 = vmatprep.subr.mxu0 %v166_v63 }
  0x15   :  { %441 = vmatmul.mubr.msk.f32.vlgmr.msra.gmra.mxu1 %vm171_vm5, %v167_v0 }
  0x1b   :  { %76 = vperm.xlu1 %447, %v439_v13  }
  0x93   :  { %v46_v17 = vpop.xlane.xlu0 %45  ;;  %v62_v19 = vpop.xlane.xlu1 %61 }
  0x94   :  { %v66_v18 = vrot.slane %v46_v17, %v566_v16 }
  0x96   :  { %v68_v20 = vadd.f32 %v66_v18, %v62_v19 }
  0x97   :  { %v59_v21 = vpop.xlane.xlu0 %58  ;;  %v77_v22 = vpop.permute.xlu1 %76 }
  0x98   :  { %v67_v23 = vadd.f32 %v66_v18, %v59_v21  ;;  %v80_v24 = vadd.f32 %v77_v22, %v68_v20 }
  0x9a   :  { %v79_v25 = vadd.f32 %v77_v22, %v67_v23  ;;  %449 = vtanh.f32 %v80_v24  ;;  %v164_v24 = vld [vmem:[%s681_s8 + $0xa8] sm:$0xff] }
  0x9c   :  { %451 = vtanh.f32 %v79_v25  ;;  %v163_v25 = vld [vmem:[%s681_s8 + $0xa0] sm:$0xff] }
  0xa7   :  { %v450_v29 = vpop.eup %449 }
  0xa8   :  { %v96_v32 = vrot.slane %v450_v29, %v91_v27  ;;  %v159_v29 = vld [vmem:[%s681_s8 + $0x80] sm:$0xff] }
  0xa9   :  { %v452_v30 = vpop.eup %451 }
  0xaa   :  { %v92_v31 = vrot.slane %v452_v30, %v91_v27  ;;  %v161_v27 = vld [vmem:[%s681_s8 + $0x90] sm:$0xff]  ;;  %v319_v30 = vld [vmem:[%s677_s4] sm:$0x3]  ;;  %s481_s4 = smov [#allocation3]  }
  0xac   :  { %v98_v33 = vsel %vm97_vm2, %v96_v32, %v92_v31 }
  0xad   :  { %v100_v34 = vsel %vm84_vm3, %v98_v33, -1e+30  ;;  %v396_v33 = vld [vmem:[%s682_s9] sm:$0x3] }
  0xae   :  { %v102_v35 = vsel %vm101_vm4, %v100_v34, -inf }
  0xaf   :  { %103 = vmax.xlane.f32.xlu0 %v102_v35 }
  0xd5   :  { %v314_v32 = vpop.f32.mrf.mxu1 }
  0xd7   :  { %v316_v35 = vpop.f32.mrf.mxu1 }
 0x138   :  { %v104_v36 = vpop.xlane.xlu0 %103 }
 0x139   :  { %v105_v37 = vsub.f32 %v100_v34, %v104_v36 }
 0x13b   :  { %v106_v38 = vmul.f32 1.442695, %v105_v37  ;;  %v401_v37 = vrot.slane %v396_v33, %v566_v16 }
 0x13d   :  { %453 = vpow2.f32 %v106_v38 }
 0x14a   :  { %v454_v39 = vpop.eup %453 }
 0x14b   :  { %v108_v40 = vsel %vm101_vm4, %v454_v39, 0.0 }
 0x14c   :  { %109 = vadd.xlane.f32.xlu0 %v108_v40 }
 0x1d5   :  { %v110_v41 = vpop.xlane.xlu0 %109 }
 0x1d6   :  { %455 = vrcp.f32 %v110_v41  ;;  %v405_v41 = vrot.slane %v396_v33, %v122_v42 }
 0x1e3   :  { %v456_v44 = vpop.eup %455 }
 0x1e4   :  { %v112_v47 = vmul.f32 %v456_v44, %v454_v39 }
 0x1e6   :  { %v123_v52 = vrot.slane %v112_v47, %v122_v42  ;;  %v116_v53 = vrot.slane %v112_v47, %v566_v16 }
 0x1e8   :  { %125 = vbcast.lane.b32.xlu1 %v123_v52, 256  ;;  %118 = vbcast.lane.b32.xlu0 %v116_v53, 256 }
 0x25a   :  { %v126_v2 = vpop.permute.xlu1 %125  ;;  %v119_v3 = vpop.permute.xlu0 %118 }
 0x25b   :  { %v128_v5 = vmul.f32 %v126_v2, %v549_v4  ;;  %v127_v7 = vmul.f32 %v119_v3, %v557_v6  ;;  %v165_v4 = vld [vmem:[%s681_s8 + $0xb0] sm:$0xff]  ;;  %s430_s8 = sshll.u32 %s481_s4, 4  ;;  %s431_s8 = int_to_ptr.vmem [resolvable:$true] %s430_s8 }
 0x25c   :  { %s457_s9 = scalar_lea.vmem %s431_s8, 64  ;;  %p462_p1 = scmp.lt.s32.totalorder %s431_s8, %s431_s8 }
 0x25d   :  { %v136_v8 = vsel %vm56_vm1, %v128_v5, 0.0  ;;  %v129_v9 = vsel %vm56_vm1, %v127_v7, 0.0  ;;  %p458_p0 = scmp.ne.s32.totalorder %s431_s8, %s457_s9  ;;  %p463_p2 = scmp.lt.s32.totalorder %s457_s9, %s457_s9 }
 0x25e   :  { %v137_v10 = vrot.slane %v136_v8, 4  ;;  %v130_v11 = vrot.slane %v129_v9, 4 }
 0x25f   :  { %p464_p3 = por %p463_p2, %p462_p1 }
 0x260   :  { %v138_v12 = vadd.f32 %v137_v10, %v136_v8  ;;  %v131_v13 = vadd.f32 %v130_v11, %v129_v9 }
 0x261   :  { %p465_p4 = pnand %p464_p3, %p458_p0 }
 0x262   :  { %v139_v14 = vrot.slane %v138_v12, 2  ;;  %v132_v17 = vrot.slane %v131_v13, 2 }
 0x264   :  { %v140_v18 = vadd.f32 %v139_v14, %v138_v12  ;;  %v133_v19 = vadd.f32 %v132_v17, %v131_v13 }
 0x266   :  { %v141_v20 = vrot.slane %v140_v18, 1  ;;  %v134_v21 = vrot.slane %v133_v19, 1 }
 0x268   :  { %v142_v22 = vadd.f32 %v141_v20, %v140_v18  ;;  %v135_v23 = vadd.f32 %v134_v21, %v133_v19 }
 0x26a   :  { %v170_v6 = vsel %vm97_vm2, %v142_v22, %v135_v23 }
 0x26b   :  { %440 = vmatmul.mubr.msk.f32.vlgmr.msra.gmra.mxu0 %vm171_vm5, %v170_v6 }
 0x26c   :  { %348 = vmatpush1.msra.mxu0 %v165_v4  ;;  %387 = vmatprep.mubr.f32.mxu0 %v480_v1 }
 0x26d   :  { %349 = vmatprep.subr.mxu0 %v164_v24 }
 0x26e   :  { %350 = vmatpush1.msra.mxu0 %v163_v25 }
 0x26f   :  { %351 = vmatprep.subr.mxu0 %v162_v26 }
 0x270   :  { %352 = vmatpush1.msra.mxu0 %v161_v27 }
 0x271   :  { %353 = vmatprep.subr.mxu0 %v160_v28 }
 0x272   :  { %354 = vmatpush1.msra.mxu0 %v159_v29 }
 0x273   :  { %442 = vmatmul.mubr.msk.f32.vlgmr.msra.gmra.mxu0 %vm171_vm5, %v319_v30 }
 0x32b   :  { %v240_v31 = vpop.f32.mrf.mxu0 }
 0x32c   :  { %v315_v36 = vadd.f32 %v314_v32, %v240_v31 }
 0x32d   :  { %v242_v34 = vpop.f32.mrf.mxu0 }
 0x32e   :  { %v317_v39 = vadd.f32 %v316_v35, %v242_v34 }
 0x333   :  { %v389_v38 = vpop.f32.mrf.mxu0 }
 0x334   :  { %v394_v40 = vadd.f32 %v389_v38, %v315_v36 }
 0x335   :  { %v391_v43 = vpop.f32.mrf.mxu0 }
 0x336   :  { %v408_v44 = vadd.f32 %v401_v37, %v394_v40  ;;  %v395_v45 = vadd.f32 %v391_v43, %v317_v39 }
 0x338   :  { %v409_v46 = vadd.f32 %v405_v41, %v395_v45  ;;  %v410_v47 = vmax.f32 %v408_v44, 0.0 }
 0x33a   :  { %v411_v48 = vmax.f32 %v409_v46, 0.0 }
 0x33c   :  { %v414_v49 = vcombine.low %v410_v47, %v411_v48 }
 0x33e   :  { %443 = vst.sshfl [vmem:[#allocation3] sm:$0x33 pattern:$0x76325410] %v414_v49 }
 0x33f   :  { %468 = shalt.err (!%p465_p4)
}
 0x340   :  { %433 = dma.vmem_to_hbm [thread:$0]  %s431_s8, 64, %s683_s10, [#allocation4]  }
 0x341   :  { %477 = dma.done.wait [#allocation4], 64  }
 0x342   :  { %478 = vsyncadd [#allocation4], 4294967232 }
 0x343   :  { %437 = vsyncpa [#allocation4], 1 }

// kernel: model_forward.2
= control target key start
LH: loop header
LB: loop body
LE: loop exit
PB: predicated region body
PF: predicated region fallthrough
CT: control target
= control target key end

     0   :  { %s11471_s0 = inlined_call_operand.vmem [shape: f32[3,128,32], index: 0, kind: input, shape index: {}]   ;;  %s11472_s1 = inlined_call_operand.vmem [shape: s32[3,16,1], index: 1, kind: input, shape index: {}]   ;;  %s11473_s2 = inlined_call_operand.hbm [shape: f32[3,32,768], index: 2, kind: input, shape index: {}]   ;;  %s11474_s3 = inlined_call_operand.hbm [shape: f32[3,256,768], index: 3, kind: input, shape index: {}]   ;;  %s11475_s4 = inlined_call_operand.hbm [shape: f32[3,1,768], index: 4, kind: input, shape index: {}]   ;;  %s11476_s5 = inlined_call_operand.hbm [shape: f32[3,1,768], index: 5, kind: input, shape index: {}]   ;;  %s11477_s6 = inlined_call_operand.vmem [shape: f32[3,8,16,32], index: 6, kind: output, shape index: {0}]   ;;  %s11478_s7 = inlined_call_operand.vmem [shape: f32[3,16,32], index: 7, kind: output, shape index: {1}]  }
   0x1   :  { %12013 = sst [smem:[#allocation245_spill]] %s11473_s2 }
   0x2   :  { %12014 = sst [smem:[#allocation246_spill]] %s11474_s3 }
   0x3   :  { %13 = vsyncpa [#allocation4], 0 }
   0x4   :  { %15 = vsyncpa [#allocation4 + $0x1], 0 }
   0x5   :  { %16 = vsyncpa [#allocation6], 0 }
   0x6   :  { %18 = vsyncpa [#allocation6 + $0x1], 0 }
   0x7   :  { %19 = vsyncpa [#allocation9], 0 }
   0x8   :  { %21 = vsyncpa [#allocation9 + $0x1], 0  ;;  %s6386_s24 = smov 0   ;;  %s6388_s25 = smov 0  }
   0x9   :  { %s6390_s26 = smov 0   ;;  %s6392_s27 = smov 0  }
   0xa LB: > { %12015 = sst [smem:[#allocation13_spill]] %s6332_s26  ;;  %s6405_s28 = sadd.s32 4294967295, %s6336_s27   ;;  %s6336_s27 = sphi %s6392_s27, %s13197_s27   ;;  %s6332_s26 = sphi %s6390_s26, %s13199_s26   ;;  %s6328_s25 = sphi %s6388_s25, %s13201_s25   ;;  %s6324_s24 = sphi %s6386_s24, %s13200_s24  }
   0xb   : > { %s6408_s29 = sadd.s32 1, %s6336_s27   ;;  %s86_s8 = sadd.s32 1, %s6332_s26 }
   0xc   : > { %12016 = sst [smem:[#allocation14_spill]] %s6408_s29  ;;  %s83_s30 = ssub.s32 %s6336_s27, %s6408_s29 }
   0xd   : > { %p84_p0 = scmp.eq.s32.totalorder %s83_s30, 0  ;;  %p93_p1 = scmp.ne.s32.totalorder %s6332_s26, %s6328_s25 }
   0xe   : > { %p94_p2 = scmp.eq.s32.totalorder %s6336_s27, 0  ;;  %p99_p3 = scmp.ne.s32.totalorder %s6328_s25, %s6324_s24 }
   0xf   : > { %s6418_s9 = scalar_select %p84_p0, %s6332_s26, %s86_s8  }
  0x10   : > { %p95_p4 = por %p94_p2, %p93_p1  ;;  %p100_p5 = scmp.eq.s32.totalorder %s6405_s28, 0 }
  0x11   : > { %12017 = sst [smem:[#allocation15_spill]] %s6418_s9  ;;  %p5115_p6 = scmp.lt.s32.totalorder %s6336_s27, 3 }
  0x12   : > { %p6422_p7 = por %p100_p5, %p99_p3  ;;  %s6427_s11 = sand.u32 1, %s6332_s26  }
  0x13   : > { %p6429_p8 = pnand %p5115_p6, %p95_p4  ;;  %s290_s13 = sand.u32 1, %s6336_s27  }
  0x14   : > { %s12018_s10 = scalar_select %p6422_p7, 1, 0 }
  0x15   : > { %s5085_s14 = smul.u32 1536, %s6427_s11  ;;  %p4876_p9 = scmp.ge.s32.totalorder %s6336_s27, 1 }
  0x16   : > { %s5086_s15 = smul.u32 24576, %s6336_s27  ;;  %p347_p10 = scmp.lt.s32.totalorder %s6336_s27, 4 }
  0x17   : > { %s12020_s3 = sld [smem:[#allocation246_spill]]  ;;  %s294_s19 = scalar_lea.vmem [#allocation5], %s5085_s14 }
  0x18   : > { %s301_s20 = sshll.u32 %s294_s19, 4  ;;  %p6445_p11 = pnand %p4876_p9, %p347_p10  ;;  %s6443_s20 = int_to_ptr.vmem [resolvable:$true] %s301_s20 }
  0x19   : > { %s6449_s22 = scalar_lea.sflag [#allocation6], %s290_s13  ;;  %p6455_p13 = pneg %p6429_p8 }
  0x1a   : > { %s12021_s21 = scalar_select %p6445_p11, 1, 0 }
  0x1d   : > { %s6441_s18 = scalar_lea.hbm %s12020_s3, %s5086_s15  ;;  %s6187_s14 = scalar_lea.hbm %s12020_s3, 73728 }
  0x1e   : > { %s6182_s23 = scalar_lea.hbm %s6441_s18, 24576  ;;  %p6188_p2 = scmp.lt.s32.totalorder %s6441_s18, %s12020_s3 }
  0x1f   : > { %p6183_p12 = scmp.ne.s32.totalorder %s6441_s18, %s6182_s23  ;;  %p6189_p3 = scmp.lt.s32.totalorder %s6187_s14, %s6182_s23 }
  0x21   : > { %p6185_p0 = pnand %p6455_p13, %p6183_p12  ;;  %p6190_p4 = por %p6189_p3, %p6188_p2 }
  0x23   : > { %p6186_p1 = pneg %p6185_p0 }
  0x25   : > { %p6191_p5 = pnand %p6190_p4, %p6186_p1 }
  0x27   : > { %6194 = shalt.err (!%p6191_p5)
}
  0x28   : > { %s6195_s13 = scalar_lea.vmem %s6443_s20, 24576  ;;  %s6338_s17 = smov [#allocation5]  }
  0x29   : > { %p6196_p6 = scmp.ne.s32.totalorder %s6443_s20, %s6195_s13  ;;  %s6200_s19 = sshll.u32 %s6338_s17, 4  ;;  %s6201_s19 = int_to_ptr.vmem [resolvable:$false] %s6200_s19 }
  0x2a   : > { %s6202_s30 = scalar_lea.vmem %s6201_s19, 49152  ;;  %p6203_p12 = scmp.lt.s32.totalorder %s6443_s20, %s6201_s19 }
  0x2b   : > { %p6198_p9 = pnand %p6196_p6, %p6455_p13  ;;  %p6204_p0 = scmp.lt.s32.totalorder %s6202_s30, %s6195_s13 }
  0x2d   : > { %p6199_p10 = pneg %p6198_p9  ;;  %p6205_p7 = por %p6204_p0, %p6203_p12 }
  0x2f   : > { %p6206_p11 = pnand %p6205_p7, %p6199_p10 }
  0x31   : > { %6209 = shalt.err (!%p6206_p11)
}
  0x32   : > { %s6339_s23 = smov 768   ;;  %s6340_s8 = smov 48  }
  0x33   : > { %5108 = dma.hbm_to_vmem [thread:$0]  (!%p6429_p8), %s6441_s18, 24576, %s6443_s20, %s6449_s22, %s6339_s23, %s6339_s23, %s6340_s8  }
  0x34   : > { %s5083_s14 = smul.u32 192, %s6427_s11  ;;  %s12023_s2 = sld [smem:[#allocation245_spill]] }
  0x35   : > { %s5084_s15 = smul.u32 3072, %s6336_s27  ;;  %s270_s9 = scalar_lea.sflag [#allocation4], %s6427_s11 }
  0x36   : > { %s273_s30 = scalar_lea.vmem [#allocation3], %s5083_s14 }
  0x37   : > { %s280_s3 = sshll.u32 %s273_s30, 4  ;;  %s6489_s3 = int_to_ptr.vmem [resolvable:$true] %s280_s3 }
  0x3a   : > { %s6487_s19 = scalar_lea.hbm %s12023_s2, %s5084_s15  ;;  %s6215_s16 = scalar_lea.hbm %s12023_s2, 9216 }
  0x3b   : > { %s6210_s26 = scalar_lea.hbm %s6487_s19, 3072  ;;  %p6216_p2 = scmp.lt.s32.totalorder %s6487_s19, %s12023_s2 }
  0x3c   : > { %p6211_p7 = scmp.ne.s32.totalorder %s6487_s19, %s6210_s26  ;;  %p6217_p3 = scmp.lt.s32.totalorder %s6215_s16, %s6210_s26 }
  0x3e   : > { %p6213_p11 = pnand %p6211_p7, %p6455_p13  ;;  %p6218_p4 = por %p6217_p3, %p6216_p2 }
  0x40   : > { %p6214_p1 = pneg %p6213_p11 }
  0x42   : > { %p6219_p5 = pnand %p6218_p4, %p6214_p1 }
  0x44   : > { %6222 = shalt.err (!%p6219_p5)
}
  0x45   : > { %s6223_s14 = scalar_lea.vmem %s6489_s3, 3072  ;;  %s6341_s17 = smov [#allocation3]  }
  0x46   : > { %p6224_p6 = scmp.ne.s32.totalorder %s6489_s3, %s6223_s14  ;;  %s6228_s30 = sshll.u32 %s6341_s17, 4  ;;  %s6229_s30 = int_to_ptr.vmem [resolvable:$false] %s6228_s30 }
  0x47   : > { %s6230_s18 = scalar_lea.vmem %s6229_s30, 6144  ;;  %p6231_p12 = scmp.lt.s32.totalorder %s6489_s3, %s6229_s30 }
  0x48   : > { %p6226_p9 = pnand %p6224_p6, %p6455_p13  ;;  %p6232_p0 = scmp.lt.s32.totalorder %s6230_s18, %s6223_s14 }
  0x4a   : > { %p6227_p10 = pneg %p6226_p9  ;;  %p6233_p7 = por %p6232_p0, %p6231_p12 }
  0x4c   : > { %p6234_p11 = pnand %p6233_p7, %p6227_p10 }
  0x4e   : > { %6237 = shalt.err (!%p6234_p11)
}
  0x4f   : > { %5105 = dma.hbm_to_vmem [thread:$0]  (!%p6429_p8), %s6487_s19, 3072, %s6489_s3, %s270_s9, %s6339_s23, %s6339_s23, %s6340_s8  }
  0x50   : > { %s5088_s26 = smul.u32 96, %s6336_s27  ;;  %s6243_s9 = scalar_lea.hbm %s11475_s4, 288 }
  0x51   : > { %s12024_s16 = smul.u32 6, %s6427_s11 }
  0x52   : > { %s321_s17 = scalar_lea.hbm %s11475_s4, %s5088_s26  ;;  %s6524_s2 = scalar_lea.hbm %s11476_s5, %s5088_s26 }
  0x53   : > { %s315_s20 = scalar_lea.vmem [#allocation7], %s12024_s16  ;;  %s6238_s29 = scalar_lea.hbm %s321_s17, 96 }
  0x54   : > { %s323_s13 = sshll.u32 %s315_s20, 4  ;;  %p6239_p1 = scmp.ne.s32.totalorder %s321_s17, %s6238_s29  ;;  %s324_s13 = int_to_ptr.vmem [resolvable:$true] %s323_s13 }
  0x55   : > { %p6244_p4 = scmp.lt.s32.totalorder %s321_s17, %s11475_s4  ;;  %p6245_p5 = scmp.lt.s32.totalorder %s6243_s9, %s6238_s29 }
  0x56   : > { %p6241_p2 = pnand %p6239_p1, %p6455_p13 }
  0x57   : > { %p6246_p6 = por %p6245_p5, %p6244_p4 }
  0x58   : > { %p6242_p3 = pneg %p6241_p2 }
  0x5a   : > { %p6247_p9 = pnand %p6246_p6, %p6242_p3 }
  0x5c   : > { %6250 = shalt.err (!%p6247_p9)
}
  0x5d   : > { %s6251_s19 = scalar_lea.vmem %s324_s13, 96  ;;  %s6342_s26 = smov [#allocation7]  }
  0x5e   : > { %p6252_p10 = scmp.ne.s32.totalorder %s324_s13, %s6251_s19  ;;  %s6256_s16 = sshll.u32 %s6342_s26, 4  ;;  %s6257_s16 = int_to_ptr.vmem [resolvable:$false] %s6256_s16 }
  0x5f   : > { %s6258_s20 = scalar_lea.vmem %s6257_s16, 192  ;;  %p6259_p7 = scmp.lt.s32.totalorder %s324_s13, %s6257_s16 }
  0x60   : > { %p6254_p12 = pnand %p6252_p10, %p6455_p13  ;;  %p6260_p11 = scmp.lt.s32.totalorder %s6258_s20, %s6251_s19 }
  0x62   : > { %p6255_p0 = pneg %p6254_p12  ;;  %p6261_p1 = por %p6260_p11, %p6259_p7 }
  0x64   : > { %p6262_p2 = pnand %p6261_p1, %p6255_p0 }
  0x66   : > { %6265 = shalt.err (!%p6262_p2)
}
  0x67   : > { %5111 = dma.hbm_to_vmem [thread:$0]  (!%p6429_p8), %s321_s17, 96, %s324_s13, %s6449_s22  }
  0x68   : > { %s12025_s29 = smul.u32 6, %s6427_s11  ;;  %s331_s30 = scalar_lea.sflag [#allocation9], %s6427_s11 }
  0x69   : > { %s6266_s18 = scalar_lea.hbm %s6524_s2, 96  ;;  %s6271_s9 = scalar_lea.hbm %s11476_s5, 288 }
  0x6a   : > { %s334_s15 = scalar_lea.vmem [#allocation8], %s12025_s29  ;;  %p6267_p3 = scmp.ne.s32.totalorder %s6524_s2, %s6266_s18 }
  0x6b   : > { %s342_s14 = sshll.u32 %s334_s15, 4  ;;  %p6272_p6 = scmp.lt.s32.totalorder %s6524_s2, %s11476_s5  ;;  %s343_s14 = int_to_ptr.vmem [resolvable:$true] %s342_s14 }
  0x6c   : > { %p6269_p4 = pnand %p6267_p3, %p6455_p13  ;;  %p6273_p9 = scmp.lt.s32.totalorder %s6271_s9, %s6266_s18 }
  0x6e   : > { %p6270_p5 = pneg %p6269_p4  ;;  %p6274_p10 = por %p6273_p9, %p6272_p6 }
  0x70   : > { %p6275_p12 = pnand %p6274_p10, %p6270_p5 }
  0x72   : > { %6278 = shalt.err (!%p6275_p12)
}
  0x73   : > { %s6279_s22 = scalar_lea.vmem %s343_s14, 96  ;;  %s6343_s11 = smov [#allocation8]  }
  0x74   : > { %p6280_p0 = scmp.ne.s32.totalorder %s343_s14, %s6279_s22  ;;  %s6284_s13 = sshll.u32 %s6343_s11, 4  ;;  %s6285_s13 = int_to_ptr.vmem [resolvable:$false] %s6284_s13 }
  0x75   : > { %s6286_s17 = scalar_lea.vmem %s6285_s13, 192  ;;  %p6287_p1 = scmp.lt.s32.totalorder %s343_s14, %s6285_s13 }
  0x76   : > { %p6282_p7 = pnand %p6280_p0, %p6455_p13  ;;  %p6288_p2 = scmp.lt.s32.totalorder %s6286_s17, %s6279_s22 }
  0x78   : > { %p6283_p11 = pneg %p6282_p7  ;;  %p6289_p3 = por %p6288_p2, %p6287_p1 }
  0x7a   : > { %p6290_p4 = pnand %p6289_p3, %p6283_p11 }
  0x7c   : > { %6293 = shalt.err (!%p6290_p4)
}
  0x7d   : > { %5114 = dma.hbm_to_vmem [thread:$0]  (!%p6429_p8), %s6524_s2, 96, %s343_s14, %s331_s30  }
  0x7e   : > { %p12026_p5 = scmp.ne.s32.totalorder %s12021_s21, 0 }
  0x80   : > { %351 = sbr.rel (%p12026_p5) target bundleno = 2600 (0xa28), region = 44 }
  0x85   : > { %s353_s24 = sand.u32 1, %s6328_s25   ;;  %p12027_p13 = scmp.ne.s32.totalorder %s12018_s10, 0 }
  0x86   : > { %s5091_s19 = smul.u32 192, %s353_s24  ;;  %s354_s26 = scalar_lea.sflag [#allocation4], %s353_s24 }
  0x88   : > { %s6561_s16 = scalar_lea.vmem [#allocation3], %s5091_s19 }
  0x89   : > { %6311 = dma.done.wait (%p12027_p13), %s354_s26, 3072  }
  0x8a   : > { %6313 = vsyncadd (%p12027_p13), %s354_s26, 4294964224  ;;  %s362_s12 = sand.u32 1, %s6405_s28   ;;  %s5092_s20 = smul.u32 1536, %s353_s24 }
  0x8b   : > { %s363_s2 = scalar_lea.sflag [#allocation6], %s362_s12 }
  0x8c   : > { %s6568_s29 = scalar_lea.vmem [#allocation5], %s5092_s20 }
  0x8d   : > { %6315 = dma.done.wait (%p12027_p13), %s363_s2, 24672  }
  0x8e   : > { %6317 = vsyncadd (%p12027_p13), %s363_s2, 4294942624  ;;  %s5093_s21 = smul.u32 6, %s353_s24  ;;  %s381_s14 = scalar_lea.sflag [#allocation9], %s353_s24 }
  0x90   : > { %s6574_s15 = scalar_lea.vmem [#allocation7], %s5093_s21  ;;  %s6576_s30 = scalar_lea.vmem [#allocation8], %s5093_s21 }
  0x91   : > { %6319 = dma.done.wait (%p12027_p13), %s381_s14, 96  }
  0x92   : > { %6321 = vsyncadd (%p12027_p13), %s381_s14, 4294967200  ;;  %p445_p8 = scmp.lt.s32.totalorder %s6405_s28, 2  ;;  %v11483_v0 = vmov 0.0   ;;  %vm537_vm0 = vcmask 261120   ;;  %v500_v1 = vld [vmem:[%s6561_s16 + $0x98] sm:$0xff]  ;;  %v499_v2 = vld [vmem:[%s6561_s16 + $0x90] sm:$0xff] }
  0x93   : > { %650 = vmatprep.mubr.f32.mxu0 %v11483_v0  ;;  %698 = vmatprep.mubr.f32.mxu1 %v11483_v0  ;;  %v494_v3 = vld [vmem:[%s6561_s16 + $0x68] sm:$0xff]  ;;  %v493_v4 = vld [vmem:[%s6561_s16 + $0x60] sm:$0xff]  ;;  %v488_v5 = vld [vmem:[%s6561_s16 + $0x38] sm:$0xff] }
  0x94   : > { %s13203_s28 = smov (!%p445_p8, %s6405_s28), 2  ;;  %610 = vmatprep.subr.mxu0 %v500_v1  ;;  %5075 = vmatprep.subr.mxu1 %v500_v1  ;;  %v487_v6 = vld [vmem:[%s6561_s16 + $0x30] sm:$0xff]  ;;  %v482_v7 = vld [vmem:[%s6561_s16 + $0x8] sm:$0xff]  ;;  %v481_v8 = vld [vmem:[%s6561_s16] sm:$0xff] }
  0x95   : > { %s5071_s18 = sshll.u32 %s13203_s28, 7  ;;  %611 = vmatpush1.msra.mxu0 %v499_v2  ;;  %5079 = vmatpush1.msra.mxu1 %v499_v2  ;;  %v502_v11 = vld [vmem:[%s6561_s16 + $0xa8] sm:$0xff]  ;;  %v501_v12 = vld [vmem:[%s6561_s16 + $0xa0] sm:$0xff]  ;;  %v496_v13 = vld [vmem:[%s6561_s16 + $0x78] sm:$0xff]  ;;  %s5072_s22 = sshll.u32 %s13203_s28, 4 }
  0x96   : > { %s6594_s9 = scalar_lea.vmem %s11477_s6, %s5071_s18  ;;  %612 = vmatprep.subr.mxu0 %v494_v3  ;;  %5076 = vmatprep.subr.mxu1 %v494_v3  ;;  %s6655_s8 = scalar_lea.vmem %s11471_s0, %s5071_s18  ;;  %v504_v14 = vld [vmem:[%s6561_s16 + $0xb8] sm:$0xff]  ;;  %v495_v17 = vld [vmem:[%s6561_s16 + $0x70] sm:$0xff]  ;;  %v490_v19 = vld [vmem:[%s6561_s16 + $0x48] sm:$0xff] }
  0x97   : > { %1381 = vst.msk [vmem:[%s6594_s9] sm:$0xff] %vm537_vm0, %v11483_v0  ;;  %1382 = vst.msk [vmem:[%s6594_s9 + $0x8] sm:$0xff] %vm537_vm0, %v11483_v0  ;;  %613 = vmatpush1.msra.mxu0 %v493_v4  ;;  %5080 = vmatpush1.msra.mxu1 %v493_v4  ;;  %v6660_v9 = vld [vmem:[%s6655_s8] sm:$0xff]  ;;  %v6675_v15 = vld [vmem:[%s6655_s8 + $0x8] sm:$0xff]  ;;  %s454_s17 = scalar_lea.vmem %s11472_s1, %s5072_s22  ;;  %s464_s26 = scalar_lea.vmem %s11478_s7, %s5072_s22 }
  0x98   : > { %1383 = vst.msk [vmem:[%s6594_s9 + $0x10] sm:$0xff] %vm537_vm0, %v11483_v0  ;;  %1384 = vst.msk [vmem:[%s6594_s9 + $0x18] sm:$0xff] %vm537_vm0, %v11483_v0  ;;  %614 = vmatprep.subr.mxu0 %v488_v5  ;;  %5077 = vmatprep.subr.mxu1 %v488_v5  ;;  %v6663_v10 = vld [vmem:[%s6655_s8 + $0x40] sm:$0xff]  ;;  %v6678_v16 = vld [vmem:[%s6655_s8 + $0x48] sm:$0xff] }
  0x99   : > { %1385 = vst.msk [vmem:[%s6594_s9 + $0x20] sm:$0xff] %vm537_vm0, %v11483_v0  ;;  %1386 = vst.msk [vmem:[%s6594_s9 + $0x28] sm:$0xff] %vm537_vm0, %v11483_v0  ;;  %615 = vmatpush1.msra.mxu0 %v487_v6  ;;  %5081 = vmatpush1.msra.mxu1 %v487_v6  ;;  %v503_v18 = vld [vmem:[%s6561_s16 + $0xb0] sm:$0xff]  ;;  %v498_v20 = vld [vmem:[%s6561_s16 + $0x88] sm:$0xff] }
  0x9a   : > { %1387 = vst.msk [vmem:[%s6594_s9 + $0x30] sm:$0xff] %vm537_vm0, %v11483_v0  ;;  %1388 = vst.msk [vmem:[%s6594_s9 + $0x38] sm:$0xff] %vm537_vm0, %v11483_v0  ;;  %616 = vmatprep.subr.mxu0 %v482_v7  ;;  %5078 = vmatprep.subr.mxu1 %v482_v7  ;;  %v6692_v21 = vld [vmem:[%s6655_s8 + $0x10] sm:$0xff]  ;;  %v489_v23 = vld [vmem:[%s6561_s16 + $0x40] sm:$0xff] }
  0x9b   : > { %1389 = vst.msk [vmem:[%s6594_s9 + $0x40] sm:$0xff] %vm537_vm0, %v11483_v0  ;;  %1390 = vst.msk [vmem:[%s6594_s9 + $0x48] sm:$0xff] %vm537_vm0, %v11483_v0  ;;  %617 = vmatpush1.msra.mxu0 %v481_v8  ;;  %5082 = vmatpush1.msra.mxu1 %v481_v8  ;;  %v6695_v22 = vld [vmem:[%s6655_s8 + $0x50] sm:$0xff]  ;;  %v497_v24 = vld [vmem:[%s6561_s16 + $0x80] sm:$0xff] }
  0x9c   : > { %1391 = vst.msk [vmem:[%s6594_s9 + $0x50] sm:$0xff] %vm537_vm0, %v11483_v0  ;;  %1392 = vst.msk [vmem:[%s6594_s9 + $0x58] sm:$0xff] %vm537_vm0, %v11483_v0  ;;  %4885 = vmatmul.mubr.msk.f32.vlgmr.msra.gmra.mxu0 %vm537_vm0, %v6660_v9  ;;  %4893 = vmatmul.mubr.msk.f32.vlgmr.msra.gmra.mxu1 %vm537_vm0, %v6663_v10  ;;  %v484_v25 = vld [vmem:[%s6561_s16 + $0x18] sm:$0xff]  ;;  %v483_v29 = vld [vmem:[%s6561_s16 + $0x10] sm:$0xff] }
  0x9d   : > { %1393 = vst.msk [vmem:[%s6594_s9 + $0x60] sm:$0xff] %vm537_vm0, %v11483_v0  ;;  %1394 = vst.msk [vmem:[%s6594_s9 + $0x68] sm:$0xff] %vm537_vm0, %v11483_v0  ;;  %771 = vmatprep.subr.mxu1 %v502_v11  ;;  %656 = vmatprep.mubr.f32.mxu0 %v11483_v0  ;;  %v492_v26 = vld [vmem:[%s6561_s16 + $0x58] sm:$0xff]  ;;  %v491_v30 = vld [vmem:[%s6561_s16 + $0x50] sm:$0xff] }
  0x9e   : > { %1395 = vst.msk [vmem:[%s6594_s9 + $0x70] sm:$0xff] %vm537_vm0, %v11483_v0  ;;  %1396 = vst.msk [vmem:[%s6594_s9 + $0x78] sm:$0xff] %vm537_vm0, %v11483_v0  ;;  %772 = vmatpush1.msra.mxu1 %v501_v12  ;;  %704 = vmatprep.mubr.f32.mxu1 %v11483_v0  ;;  %v6708_v27 = vld [vmem:[%s6655_s8 + $0x18] sm:$0xff]  ;;  %v486_v31 = vld [vmem:[%s6561_s16 + $0x28] sm:$0xff] }
  0x9f   : > { %773 = vmatprep.subr.mxu1 %v496_v13  ;;  %932 = vmatprep.subr.mxu0 %v504_v14  ;;  %v6711_v28 = vld [vmem:[%s6655_s8 + $0x58] sm:$0xff]  ;;  %v6726_v33 = vld [vmem:[%s6655_s8 + $0x20] sm:$0xff]  ;;  %v1258_v36 = vld [vmem:[%s6568_s29 + $0x2e8] sm:$0xff] }
  0xa0   : > { %4886 = vmatmul.mubr.msk.f32.gmra.mxu0 %vm537_vm0, %v6675_v15  ;;  %4894 = vmatmul.mubr.msk.f32.gmra.mxu1 %vm537_vm0, %v6678_v16  ;;  %v6721_v32 = vld [vmem:[%s6568_s29 + $0x2d8] sm:$0xff]  ;;  %v6729_v34 = vld [vmem:[%s6655_s8 + $0x60] sm:$0xff]  ;;  %v6741_v37 = vld [vmem:[%s6655_s8 + $0x28] sm:$0xff] }
  0xa1   : > { %662 = vmatprep.mubr.f32.mxu0 %v11483_v0  ;;  %710 = vmatprep.mubr.f32.mxu1 %v11483_v0  ;;  %v485_v35 = vld [vmem:[%s6561_s16 + $0x20] sm:$0xff]  ;;  %v6744_v38 = vld [vmem:[%s6655_s8 + $0x68] sm:$0xff]  ;;  %v6753_v39 = vld [vmem:[%s6655_s8 + $0x30] sm:$0xff] }
  0xa2   : > { %774 = vmatpush1.msra.mxu1 %v495_v17  ;;  %933 = vmatpush1.msra.mxu0 %v503_v18  ;;  %v6756_v40 = vld [vmem:[%s6655_s8 + $0x70] sm:$0xff]  ;;  %v6765_v41 = vld [vmem:[%s6655_s8 + $0x38] sm:$0xff]  ;;  %v1257_v44 = vld [vmem:[%s6568_s29 + $0x2e0] sm:$0xff] }
  0xa3   : > { %775 = vmatprep.subr.mxu1 %v490_v19  ;;  %934 = vmatprep.subr.mxu0 %v498_v20  ;;  %v6768_v42 = vld [vmem:[%s6655_s8 + $0x78] sm:$0xff]  ;;  %v6777_v43 = vld [vmem:[%s6568_s29 + $0x2d0] sm:$0xff]  ;;  %v6781_v45 = vld [vmem:[%s6568_s29 + $0x2a8] sm:$0xff] }
  0xa4   : > { %4887 = vmatmul.mubr.msk.f32.gmra.mxu0 %vm537_vm0, %v6692_v21  ;;  %4895 = vmatmul.mubr.msk.f32.gmra.mxu1 %vm537_vm0, %v6695_v22  ;;  %v1252_v46 = vld [vmem:[%s6568_s29 + $0x2b8] sm:$0xff]  ;;  %v6789_v47 = vld [vmem:[%s6568_s29 + $0x2a0] sm:$0xff]  ;;  %v1251_v49 = vld [vmem:[%s6568_s29 + $0x2b0] sm:$0xff] }
  0xa5   : > { %668 = vmatprep.mubr.f32.mxu0 %v11483_v0  ;;  %716 = vmatprep.mubr.f32.mxu1 %v11483_v0  ;;  %v6793_v48 = vld [vmem:[%s6568_s29 + $0x278] sm:$0xff]  ;;  %v6800_v50 = vld [vmem:[%s6568_s29 + $0x270] sm:$0xff]  ;;  %v1246_v51 = vld [vmem:[%s6568_s29 + $0x288] sm:$0xff] }
  0xa6   : > { %776 = vmatpush1.msra.mxu1 %v489_v23  ;;  %935 = vmatpush1.msra.mxu0 %v497_v24  ;;  %v6806_v52 = vld [vmem:[%s6568_s29 + $0x248] sm:$0xff]  ;;  %v1245_v53 = vld [vmem:[%s6568_s29 + $0x280] sm:$0xff]  ;;  %v1240_v55 = vld [vmem:[%s6568_s29 + $0x258] sm:$0xff] }
  0xa7   : > { %777 = vmatprep.subr.mxu1 %v484_v25  ;;  %936 = vmatprep.subr.mxu0 %v492_v26  ;;  %v6812_v54 = vld [vmem:[%s6568_s29 + $0x240] sm:$0xff]  ;;  %v6820_v56 = vld [vmem:[%s6568_s29 + $0x218] sm:$0xff]  ;;  %v1239_v57 = vld [vmem:[%s6568_s29 + $0x250] sm:$0xff] }
  0xa8   : > { %4888 = vmatmul.mubr.msk.f32.gmra.mxu0 %vm537_vm0, %v6708_v27  ;;  %4896 = vmatmul.mubr.msk.f32.gmra.mxu1 %vm537_vm0, %v6711_v28  ;;  %v6826_v58 = vld [vmem:[%s6568_s29 + $0x210] sm:$0xff]  ;;  %v1234_v59 = vld [vmem:[%s6568_s29 + $0x228] sm:$0xff]  ;;  %v1233_v61 = vld [vmem:[%s6568_s29 + $0x220] sm:$0xff] }
  0xa9   : > { %674 = vmatprep.mubr.f32.mxu0 %v11483_v0  ;;  %722 = vmatprep.mubr.f32.mxu1 %v11483_v0  ;;  %v6832_v60 = vld [vmem:[%s6568_s29 + $0x1e8] sm:$0xff]  ;;  %v6838_v62 = vld [vmem:[%s6568_s29 + $0x1e0] sm:$0xff]  ;;  %v1228_v63 = vld [vmem:[%s6568_s29 + $0x1f8] sm:$0xff] }
  0xaa   : > { %778 = vmatpush1.msra.mxu1 %v483_v29  ;;  %937 = vmatpush1.msra.mxu0 %v491_v30  ;;  %v6846_v1 = vld [vmem:[%s6568_s29 + $0x1b8] sm:$0xff]  ;;  %v1227_v2 = vld [vmem:[%s6568_s29 + $0x1f0] sm:$0xff]  ;;  %v1222_v4 = vld [vmem:[%s6568_s29 + $0x1c8] sm:$0xff] }
  0xab   : > { %938 = vmatprep.subr.mxu0 %v486_v31  ;;  %1476 = vmatprep.subr.mxu1 %v6721_v32  ;;  %v6852_v3 = vld [vmem:[%s6568_s29 + $0x1b0] sm:$0xff]  ;;  %v6858_v5 = vld [vmem:[%s6568_s29 + $0x188] sm:$0xff]  ;;  %v1221_v6 = vld [vmem:[%s6568_s29 + $0x1c0] sm:$0xff] }
  0xac   : > { %4889 = vmatmul.mubr.msk.f32.gmra.mxu0 %vm537_vm0, %v6726_v33  ;;  %4897 = vmatmul.mubr.msk.f32.gmra.mxu1 %vm537_vm0, %v6729_v34  ;;  %v6864_v7 = vld [vmem:[%s6568_s29 + $0x180] sm:$0xff]  ;;  %v1216_v8 = vld [vmem:[%s6568_s29 + $0x198] sm:$0xff]  ;;  %v1215_v11 = vld [vmem:[%s6568_s29 + $0x190] sm:$0xff] }
  0xad   : > { %680 = vmatprep.mubr.f32.mxu0 %v11483_v0  ;;  %728 = vmatprep.mubr.f32.mxu1 %v11483_v0  ;;  %v6878_v12 = vld [vmem:[%s6568_s29 + $0x150] sm:$0xff]  ;;  %v1210_v13 = vld [vmem:[%s6568_s29 + $0x168] sm:$0xff]  ;;  %v6890_v17 = vld [vmem:[%s6568_s29 + $0x120] sm:$0xff] }
  0xae   : > { %939 = vmatpush1.msra.mxu0 %v485_v35  ;;  %v6884_v14 = vld [vmem:[%s6568_s29 + $0x128] sm:$0xff]  ;;  %v1204_v18 = vld [vmem:[%s6568_s29 + $0x138] sm:$0xff]  ;;  %v1203_v20 = vld [vmem:[%s6568_s29 + $0x130] sm:$0xff] }
  0xaf   : > { %1553 = vmatprep.subr.mxu0 %v1258_v36  ;;  %v6898_v19 = vld [vmem:[%s6568_s29 + $0xf8] sm:$0xff]  ;;  %v1198_v23 = vld [vmem:[%s6568_s29 + $0x108] sm:$0xff]  ;;  %v1197_v25 = vld [vmem:[%s6568_s29 + $0x100] sm:$0xff] }
  0xb0   : > { %4890 = vmatmul.mubr.msk.f32.gmra.mxu0 %vm537_vm0, %v6741_v37  ;;  %4898 = vmatmul.mubr.msk.f32.gmra.mxu1 %vm537_vm0, %v6744_v38  ;;  %v6910_v24 = vld [vmem:[%s6568_s29 + $0xc8] sm:$0xff]  ;;  %v6916_v26 = vld [vmem:[%s6568_s29 + $0xc0] sm:$0xff]  ;;  %v6924_v29 = vld [vmem:[%s6568_s29 + $0x98] sm:$0xff] }
  0xb1   : > { %686 = vmatprep.mubr.f32.mxu0 %v11483_v0  ;;  %734 = vmatprep.mubr.f32.mxu1 %v11483_v0  ;;  %v1191_v30 = vld [vmem:[%s6568_s29 + $0xd0] sm:$0xff]  ;;  %v6936_v35 = vld [vmem:[%s6568_s29 + $0x68] sm:$0xff]  ;;  %v1185_v36 = vld [vmem:[%s6568_s29 + $0xa0] sm:$0xff] }
  0xb2   : > { %v6930_v31 = vld [vmem:[%s6568_s29 + $0x90] sm:$0xff] }
  0xb4   : > { %4891 = vmatmul.mubr.msk.f32.gmra.mxu0 %vm537_vm0, %v6753_v39  ;;  %4899 = vmatmul.mubr.msk.f32.gmra.mxu1 %vm537_vm0, %v6756_v40 }
  0xb5   : > { %692 = vmatprep.mubr.f32.mxu0 %v11483_v0  ;;  %740 = vmatprep.mubr.f32.mxu1 %v11483_v0 }
  0xb8   : > { %4892 = vmatmul.mubr.msk.f32.gmra.mxu0 %vm537_vm0, %v6765_v41  ;;  %4900 = vmatmul.mubr.msk.f32.gmra.mxu1 %vm537_vm0, %v6768_v42 }
  0xb9   : > { %811 = vmatprep.mubr.f32.mxu1 %v11483_v0  ;;  %972 = vmatprep.mubr.f32.mxu0 %v11483_v0 }
  0xbc   : > { %4901 = vmatmul.mubr.msk.f32.vlgmr.msra.gmra.mxu1 %vm537_vm0, %v6660_v9  ;;  %4917 = vmatmul.mubr.msk.f32.vlgmr.msra.gmra.mxu0 %vm537_vm0, %v6660_v9  ;;  %v6872_v9 = vld [vmem:[%s6568_s29 + $0x158] sm:$0xff] }
  0xbd   : > { %1477 = vmatpush1.msra.mxu1 %v6777_v43  ;;  %1554 = vmatpush1.msra.mxu0 %v1257_v44  ;;  %v1180_v44 = vld [vmem:[%s6568_s29 + $0x78] sm:$0xff] }
  0xbe   : > { %1478 = vmatprep.subr.mxu1 %v6781_v45  ;;  %1555 = vmatprep.subr.mxu0 %v1252_v46  ;;  %v6950_v46 = vld [vmem:[%s6568_s29 + $0x38] sm:$0xff] }
  0xbf   : > { %1479 = vmatpush1.msra.mxu1 %v6789_v47  ;;  %817 = vmatprep.mubr.f32.mxu1 %v11483_v0 }
  0xc0   : > { %978 = vmatprep.mubr.f32.mxu0 %v11483_v0  ;;  %1480 = vmatprep.subr.mxu1 %v6793_v48 }
  0xc1   : > { %1556 = vmatpush1.msra.mxu0 %v1251_v49  ;;  %4902 = vmatmul.mubr.msk.f32.gmra.mxu1 %vm537_vm0, %v6675_v15  ;;  %v1179_v49 = vld [vmem:[%s6568_s29 + $0x70] sm:$0xff] }
  0xc2   : > { %4918 = vmatmul.mubr.msk.f32.gmra.mxu0 %vm537_vm0, %v6675_v15  ;;  %1481 = vmatpush1.msra.mxu1 %v6800_v50  ;;  %v1209_v15 = vld [vmem:[%s6568_s29 + $0x160] sm:$0xff] }
  0xc3   : > { %1557 = vmatprep.subr.mxu0 %v1246_v51  ;;  %1482 = vmatprep.subr.mxu1 %v6806_v52  ;;  %v1174_v51 = vld [vmem:[%s6568_s29 + $0x48] sm:$0xff] }
  0xc4   : > { %1558 = vmatpush1.msra.mxu0 %v1245_v53  ;;  %1483 = vmatpush1.msra.mxu1 %v6812_v54  ;;  %v6962_v53 = vld [vmem:[%s6568_s29 + $0x8] sm:$0xff] }
  0xc5   : > { %1559 = vmatprep.subr.mxu0 %v1240_v55  ;;  %823 = vmatprep.mubr.f32.mxu1 %v11483_v0  ;;  %v6967_v55 = vld [vmem:[%s6568_s29 + $0x40] sm:$0xff] }
  0xc6   : > { %984 = vmatprep.mubr.f32.mxu0 %v11483_v0  ;;  %1484 = vmatprep.subr.mxu1 %v6820_v56  ;;  %12028 = vst [vmem:[#allocation16_spill] sm:$0xff] %v6967_v55 }
  0xc7   : > { %1560 = vmatpush1.msra.mxu0 %v1239_v57  ;;  %4903 = vmatmul.mubr.msk.f32.gmra.mxu1 %vm537_vm0, %v6692_v21  ;;  %v6970_v57 = vld [vmem:[%s6568_s29] sm:$0xff] }
  0xc8   : > { %4919 = vmatmul.mubr.msk.f32.gmra.mxu0 %vm537_vm0, %v6692_v21  ;;  %1485 = vmatpush1.msra.mxu1 %v6826_v58  ;;  %v6904_v21 = vld [vmem:[%s6568_s29 + $0xf0] sm:$0xff] }
  0xc9   : > { %1561 = vmatprep.subr.mxu0 %v1234_v59  ;;  %1486 = vmatprep.subr.mxu1 %v6832_v60  ;;  %v6976_v59 = vld [vmem:[%s6568_s29 + $0x18] sm:$0xff] }
  0xca   : > { %1562 = vmatpush1.msra.mxu0 %v1233_v61  ;;  %1487 = vmatpush1.msra.mxu1 %v6838_v62  ;;  %12029 = vst [vmem:[#allocation17_spill] sm:$0xff] %v6976_v59  ;;  %v6980_v61 = vld [vmem:[%s6568_s29 + $0x5d8] sm:$0xff] }
  0xcb   : > { %1563 = vmatprep.subr.mxu0 %v1228_v63  ;;  %829 = vmatprep.mubr.f32.mxu1 %v11483_v0  ;;  %v6985_v63 = vld [vmem:[%s6568_s29 + $0x10] sm:$0xff] }
  0xcc   : > { %990 = vmatprep.mubr.f32.mxu0 %v11483_v0  ;;  %1488 = vmatprep.subr.mxu1 %v6846_v1  ;;  %12030 = vst [vmem:[#allocation18_spill] sm:$0xff] %v6985_v63 }
  0xcd   : > { %1564 = vmatpush1.msra.mxu0 %v1227_v2  ;;  %4904 = vmatmul.mubr.msk.f32.gmra.mxu1 %vm537_vm0, %v6708_v27  ;;  %v6995_v2 = vld [vmem:[%s6568_s29 + $0x5e8] sm:$0xff] }
  0xce   : > { %4920 = vmatmul.mubr.msk.f32.gmra.mxu0 %vm537_vm0, %v6708_v27  ;;  %1489 = vmatpush1.msra.mxu1 %v6852_v3  ;;  %v1192_v27 = vld [vmem:[%s6568_s29 + $0xd8] sm:$0xff]  ;;  %12031 = vst [vmem:[#allocation19_spill] sm:$0xff] %v6995_v2 }
  0xcf   : > { %1565 = vmatprep.subr.mxu0 %v1222_v4  ;;  %1490 = vmatprep.subr.mxu1 %v6858_v5  ;;  %v6998_v4 = vld [vmem:[%s6568_s29 + $0x5a8] sm:$0xff] }
  0xd0   : > { %1566 = vmatpush1.msra.mxu0 %v1221_v6  ;;  %1491 = vmatpush1.msra.mxu1 %v6864_v7  ;;  %v7004_v6 = vld [vmem:[%s6568_s29 + $0x5e0] sm:$0xff] }
  0xd1   : > { %1567 = vmatprep.subr.mxu0 %v1216_v8  ;;  %835 = vmatprep.mubr.f32.mxu1 %v11483_v0  ;;  %12032 = vst [vmem:[#allocation20_spill] sm:$0xff] %v7004_v6  ;;  %v7007_v8 = vld [vmem:[%s6568_s29 + $0x5a0] sm:$0xff] }
  0xd2   : > { %996 = vmatprep.mubr.f32.mxu0 %v11483_v0  ;;  %1492 = vmatprep.subr.mxu1 %v6872_v9 }
  0xd3   : > { %1568 = vmatpush1.msra.mxu0 %v1215_v11  ;;  %4905 = vmatmul.mubr.msk.f32.gmra.mxu1 %vm537_vm0, %v6726_v33  ;;  %v7013_v11 = vld [vmem:[%s6568_s29 + $0x5b8] sm:$0xff] }
  0xd4   : > { %4921 = vmatmul.mubr.msk.f32.gmra.mxu0 %vm537_vm0, %v6726_v33  ;;  %1493 = vmatpush1.msra.mxu1 %v6878_v12  ;;  %v1186_v33 = vld [vmem:[%s6568_s29 + $0xa8] sm:$0xff]  ;;  %12033 = vst [vmem:[#allocation21_spill] sm:$0xff] %v7013_v11 }
  0xd5   : > { %1569 = vmatprep.subr.mxu0 %v1210_v13  ;;  %1494 = vmatprep.subr.mxu1 %v6884_v14  ;;  %v7018_v13 = vld [vmem:[%s6568_s29 + $0x578] sm:$0xff] }
  0xd6   : > { %1570 = vmatpush1.msra.mxu0 %v1209_v15  ;;  %1495 = vmatpush1.msra.mxu1 %v6890_v17  ;;  %v7023_v15 = vld [vmem:[%s6568_s29 + $0x5b0] sm:$0xff] }
  0xd7   : > { %1571 = vmatprep.subr.mxu0 %v1204_v18  ;;  %841 = vmatprep.mubr.f32.mxu1 %v11483_v0  ;;  %12034 = vst [vmem:[#allocation22_spill] sm:$0xff] %v7023_v15  ;;  %v7033_v18 = vld [vmem:[%s6568_s29 + $0x588] sm:$0xff] }
  0xd8   : > { %1002 = vmatprep.mubr.f32.mxu0 %v11483_v0  ;;  %1496 = vmatprep.subr.mxu1 %v6898_v19  ;;  %12035 = vst [vmem:[#allocation23_spill] sm:$0xff] %v7033_v18 }
  0xd9   : > { %1572 = vmatpush1.msra.mxu0 %v1203_v20  ;;  %4906 = vmatmul.mubr.msk.f32.gmra.mxu1 %vm537_vm0, %v6741_v37  ;;  %v7036_v20 = vld [vmem:[%s6568_s29 + $0x548] sm:$0xff] }
  0xda   : > { %4922 = vmatmul.mubr.msk.f32.gmra.mxu0 %vm537_vm0, %v6741_v37  ;;  %1497 = vmatpush1.msra.mxu1 %v6904_v21  ;;  %v6942_v37 = vld [vmem:[%s6568_s29 + $0x60] sm:$0xff] }
  0xdb   : > { %1573 = vmatprep.subr.mxu0 %v1198_v23  ;;  %1498 = vmatprep.subr.mxu1 %v6910_v24  ;;  %v7042_v23 = vld [vmem:[%s6568_s29 + $0x580] sm:$0xff] }
  0xdc   : > { %1574 = vmatpush1.msra.mxu0 %v1197_v25  ;;  %1499 = vmatpush1.msra.mxu1 %v6916_v26  ;;  %12036 = vst [vmem:[#allocation24_spill] sm:$0xff] %v7042_v23  ;;  %v7045_v25 = vld [vmem:[%s6568_s29 + $0x540] sm:$0xff] }
  0xdd   : > { %1575 = vmatprep.subr.mxu0 %v1192_v27  ;;  %847 = vmatprep.mubr.f32.mxu1 %v11483_v0  ;;  %v7051_v27 = vld [vmem:[%s6568_s29 + $0x558] sm:$0xff] }
  0xde   : > { %1008 = vmatprep.mubr.f32.mxu0 %v11483_v0  ;;  %1500 = vmatprep.subr.mxu1 %v6924_v29  ;;  %12037 = vst [vmem:[#allocation25_spill] sm:$0xff] %v7051_v27 }
  0xdf   : > { %1576 = vmatpush1.msra.mxu0 %v1191_v30  ;;  %4907 = vmatmul.mubr.msk.f32.gmra.mxu1 %vm537_vm0, %v6753_v39  ;;  %v7056_v30 = vld [vmem:[%s6568_s29 + $0x518] sm:$0xff] }
  0xe0   : > { %4923 = vmatmul.mubr.msk.f32.gmra.mxu0 %vm537_vm0, %v6753_v39  ;;  %1501 = vmatpush1.msra.mxu1 %v6930_v31  ;;  %v6956_v39 = vld [vmem:[%s6568_s29 + $0x30] sm:$0xff] }
  0xe1   : > { %1577 = vmatprep.subr.mxu0 %v1186_v33  ;;  %1502 = vmatprep.subr.mxu1 %v6936_v35  ;;  %v7061_v33 = vld [vmem:[%s6568_s29 + $0x550] sm:$0xff] }
  0xe2   : > { %1578 = vmatpush1.msra.mxu0 %v1185_v36  ;;  %1503 = vmatpush1.msra.mxu1 %v6942_v37  ;;  %12038 = vst [vmem:[#allocation26_spill] sm:$0xff] %v7061_v33  ;;  %v7071_v36 = vld [vmem:[%s6568_s29 + $0x528] sm:$0xff] }
  0xe3   : > { %1579 = vmatprep.subr.mxu0 %v1180_v44  ;;  %853 = vmatprep.mubr.f32.mxu1 %v11483_v0  ;;  %12039 = vst [vmem:[#allocation27_spill] sm:$0xff] %v7071_v36  ;;  %v7074_v44 = vld [vmem:[%s6568_s29 + $0x4e8] sm:$0xff] }
  0xe4   : > { %1014 = vmatprep.mubr.f32.mxu0 %v11483_v0  ;;  %1504 = vmatprep.subr.mxu1 %v6950_v46 }
  0xe5   : > { %1580 = vmatpush1.msra.mxu0 %v1179_v49  ;;  %4908 = vmatmul.mubr.msk.f32.gmra.mxu1 %vm537_vm0, %v6765_v41  ;;  %v7080_v49 = vld [vmem:[%s6568_s29 + $0x520] sm:$0xff] }
  0xe6   : > { %4924 = vmatmul.mubr.msk.f32.gmra.mxu0 %vm537_vm0, %v6765_v41  ;;  %1505 = vmatpush1.msra.mxu1 %v6956_v39  ;;  %v6990_v41 = vld [vmem:[%s6568_s29 + $0x5d0] sm:$0xff]  ;;  %12040 = vst [vmem:[#allocation28_spill] sm:$0xff] %v7080_v49 }
  0xe7   : > { %1581 = vmatprep.subr.mxu0 %v1174_v51  ;;  %1506 = vmatprep.subr.mxu1 %v6962_v53  ;;  %v7083_v51 = vld [vmem:[%s6568_s29 + $0x4e0] sm:$0xff] }
  0xe8   : > { %1582 = vmatpush1.msra.mxu0 %v6967_v55  ;;  %1507 = vmatpush1.msra.mxu1 %v6970_v57  ;;  %v7203_v55 = vld [vmem:[%s6568_s29 + $0x3d8] sm:$0xff] }
  0xe9   : > { %1583 = vmatprep.subr.mxu0 %v6976_v59  ;;  %859 = vmatprep.mubr.f32.mxu1 %v11483_v0  ;;  %v7197_v59 = vld [vmem:[%s6568_s29 + $0x3c0] sm:$0xff]  ;;  %12063 = vst [vmem:[#allocation50_spill] sm:$0xff] %v7203_v55 }
  0xea   : > { %1020 = vmatprep.mubr.f32.mxu0 %v11483_v0  ;;  %1508 = vmatprep.subr.mxu1 %v6980_v61  ;;  %12062 = vst [vmem:[#allocation49_spill] sm:$0xff] %v7197_v59 }
  0xeb   : > { %1584 = vmatpush1.msra.mxu0 %v6985_v63  ;;  %4909 = vmatmul.mubr.msk.f32.gmra.mxu1 %vm537_vm0, %v6663_v10  ;;  %v7175_v63 = vld [vmem:[%s6568_s29 + $0x430] sm:$0xff] }
  0xec   : > { %4925 = vmatmul.mubr.msk.f32.gmra.mxu0 %vm537_vm0, %v6663_v10  ;;  %1509 = vmatpush2.msra.mxu1 %v6990_v41  ;;  %v7028_v10 = vld [vmem:[%s6568_s29 + $0x570] sm:$0xff]  ;;  %12057 = vst [vmem:[#allocation44_spill] sm:$0xff] %v7175_v63 }
  0xed   : > { %1585 = vmatprep.subr.mxu0 %v6995_v2  ;;  %1510 = vmatprep.subr.mxu1 %v6998_v4  ;;  %v7165_v2 = vld [vmem:[%s6568_s29 + $0x438] sm:$0xff] }
  0xee   : > { %1586 = vmatpush2.msra.mxu0 %v7004_v6  ;;  %1511 = vmatpush2.msra.mxu1 %v7007_v8  ;;  %v7159_v6 = vld [vmem:[%s6568_s29 + $0x420] sm:$0xff]  ;;  %12055 = vst [vmem:[#allocation42_spill] sm:$0xff] %v7165_v2 }
  0xef   : > { %1587 = vmatprep.subr.mxu0 %v7013_v11  ;;  %865 = vmatprep.mubr.f32.mxu1 %v11483_v0  ;;  %v7137_v11 = vld [vmem:[%s6568_s29 + $0x490] sm:$0xff]  ;;  %12054 = vst [vmem:[#allocation41_spill] sm:$0xff] %v7159_v6 }
  0xf0   : > { %1026 = vmatprep.mubr.f32.mxu0 %v11483_v0  ;;  %1512 = vmatprep.subr.mxu1 %v7018_v13  ;;  %12049 = vst [vmem:[#allocation36_spill] sm:$0xff] %v7137_v11 }
  0xf1   : > { %1588 = vmatpush2.msra.mxu0 %v7023_v15  ;;  %4910 = vmatmul.mubr.msk.f32.gmra.mxu1 %vm537_vm0, %v6678_v16  ;;  %v7127_v15 = vld [vmem:[%s6568_s29 + $0x498] sm:$0xff] }
  0xf2   : > { %4926 = vmatmul.mubr.msk.f32.gmra.mxu0 %vm537_vm0, %v6678_v16  ;;  %1513 = vmatpush2.msra.mxu1 %v7028_v10  ;;  %v7066_v16 = vld [vmem:[%s6568_s29 + $0x510] sm:$0xff]  ;;  %12047 = vst [vmem:[#allocation34_spill] sm:$0xff] %v7127_v15 }
  0xf3   : > { %1589 = vmatprep.subr.mxu0 %v7033_v18  ;;  %1514 = vmatprep.subr.mxu1 %v7036_v20  ;;  %v7121_v18 = vld [vmem:[%s6568_s29 + $0x480] sm:$0xff] }
  0xf4   : > { %1590 = vmatpush2.msra.mxu0 %v7042_v23  ;;  %1515 = vmatpush2.msra.mxu1 %v7045_v25  ;;  %v7104_v23 = vld [vmem:[%s6568_s29 + $0x4b0] sm:$0xff]  ;;  %12046 = vst [vmem:[#allocation33_spill] sm:$0xff] %v7121_v18 }
  0xf5   : > { %1591 = vmatprep.subr.mxu0 %v7051_v27  ;;  %871 = vmatprep.mubr.f32.mxu1 %v11483_v0  ;;  %v7099_v27 = vld [vmem:[%s6568_s29 + $0x4f0] sm:$0xff] }
  0xf6   : > { %1032 = vmatprep.mubr.f32.mxu0 %v11483_v0  ;;  %1516 = vmatprep.subr.mxu1 %v7056_v30  ;;  %v7089_v0 = vld [vmem:[%s6568_s29 + $0x4f8] sm:$0xff]  ;;  %12042 = vst [vmem:[#allocation30_spill] sm:$0xff] %v7099_v27 }
  0xf7   : > { %1592 = vmatpush2.msra.mxu0 %v7061_v33  ;;  %4911 = vmatmul.mubr.msk.f32.gmra.mxu1 %vm537_vm0, %v6695_v22  ;;  %12041 = vst [vmem:[#allocation29_spill] sm:$0xff] %v7089_v0  ;;  %v7094_v33 = vld [vmem:[%s6568_s29 + $0x4b8] sm:$0xff] }
  0xf8   : > { %4927 = vmatmul.mubr.msk.f32.gmra.mxu0 %vm537_vm0, %v6695_v22  ;;  %1517 = vmatpush2.msra.mxu1 %v7066_v16  ;;  %v12043_v22 = vmov 0.0  }
  0xf9   : > { %1593 = vmatprep.subr.mxu0 %v7071_v36  ;;  %1518 = vmatprep.subr.mxu1 %v7074_v44  ;;  %v7109_v36 = vld [vmem:[%s6568_s29 + $0x4c8] sm:$0xff] }
  0xfa   : > { %1594 = vmatpush2.msra.mxu0 %v7080_v49  ;;  %1519 = vmatpush2.msra.mxu1 %v7083_v51  ;;  %12044 = vst [vmem:[#allocation31_spill] sm:$0xff] %v7109_v36  ;;  %v7112_v49 = vld [vmem:[%s6568_s29 + $0x488] sm:$0xff] }
  0xfb   : > { %1595 = vmatprep.subr.mxu0 %v7089_v0  ;;  %877 = vmatprep.mubr.f32.mxu1 %v12043_v22  ;;  %v7118_v0 = vld [vmem:[%s6568_s29 + $0x4c0] sm:$0xff] }
  0xfc   : > { %1038 = vmatprep.mubr.f32.mxu0 %v12043_v22  ;;  %1520 = vmatprep.subr.mxu1 %v7094_v33  ;;  %12045 = vst [vmem:[#allocation32_spill] sm:$0xff] %v7118_v0 }
  0xfd   : > { %1596 = vmatpush2.msra.mxu0 %v7099_v27  ;;  %4912 = vmatmul.mubr.msk.f32.gmra.mxu1 %vm537_vm0, %v6711_v28  ;;  %v7132_v27 = vld [vmem:[%s6568_s29 + $0x458] sm:$0xff] }
  0xfe   : > { %4928 = vmatmul.mubr.msk.f32.gmra.mxu0 %vm537_vm0, %v6711_v28  ;;  %1521 = vmatpush2.msra.mxu1 %v7104_v23  ;;  %12048 = vst [vmem:[#allocation35_spill] sm:$0xff] %v7132_v27  ;;  %v7142_v28 = vld [vmem:[%s6568_s29 + $0x450] sm:$0xff] }
  0xff   : > { %1597 = vmatprep.subr.mxu0 %v7109_v36  ;;  %1522 = vmatprep.subr.mxu1 %v7112_v49  ;;  %12050 = vst [vmem:[#allocation37_spill] sm:$0xff] %v7142_v28  ;;  %v7147_v36 = vld [vmem:[%s6568_s29 + $0x468] sm:$0xff] }
 0x100   : > { %1598 = vmatpush2.msra.mxu0 %v7118_v0  ;;  %1523 = vmatpush2.msra.mxu1 %v7121_v18  ;;  %12051 = vst [vmem:[#allocation38_spill] sm:$0xff] %v7147_v36  ;;  %v7150_v0 = vld [vmem:[%s6568_s29 + $0x428] sm:$0xff] }
 0x101   : > { %1599 = vmatprep.subr.mxu0 %v7127_v15  ;;  %883 = vmatprep.mubr.f32.mxu1 %v12043_v22  ;;  %12052 = vst [vmem:[#allocation39_spill] sm:$0xff] %v7150_v0  ;;  %v7156_v15 = vld [vmem:[%s6568_s29 + $0x460] sm:$0xff] }
 0x102   : > { %1044 = vmatprep.mubr.f32.mxu0 %v12043_v22  ;;  %1524 = vmatprep.subr.mxu1 %v7132_v27  ;;  %12053 = vst [vmem:[#allocation40_spill] sm:$0xff] %v7156_v15 }
 0x103   : > { %1600 = vmatpush2.msra.mxu0 %v7137_v11  ;;  %4913 = vmatmul.mubr.msk.f32.gmra.mxu1 %vm537_vm0, %v6729_v34  ;;  %v7170_v11 = vld [vmem:[%s6568_s29 + $0x3f8] sm:$0xff] }
 0x104   : > { %4929 = vmatmul.mubr.msk.f32.gmra.mxu0 %vm537_vm0, %v6729_v34  ;;  %1525 = vmatpush2.msra.mxu1 %v7142_v28  ;;  %12056 = vst [vmem:[#allocation43_spill] sm:$0xff] %v7170_v11  ;;  %v7180_v34 = vld [vmem:[%s6568_s29 + $0x3f0] sm:$0xff] }
 0x105   : > { %1601 = vmatprep.subr.mxu0 %v7147_v36  ;;  %1526 = vmatprep.subr.mxu1 %v7150_v0  ;;  %12058 = vst [vmem:[#allocation45_spill] sm:$0xff] %v7180_v34  ;;  %v7185_v36 = vld [vmem:[%s6568_s29 + $0x408] sm:$0xff] }
 0x106   : > { %1602 = vmatpush2.msra.mxu0 %v7156_v15  ;;  %1527 = vmatpush2.msra.mxu1 %v7159_v6  ;;  %12059 = vst [vmem:[#allocation46_spill] sm:$0xff] %v7185_v36  ;;  %v7188_v15 = vld [vmem:[%s6568_s29 + $0x3c8] sm:$0xff] }
 0x107   : > { %1603 = vmatprep.subr.mxu0 %v7165_v2  ;;  %889 = vmatprep.mubr.f32.mxu1 %v12043_v22  ;;  %12060 = vst [vmem:[#allocation47_spill] sm:$0xff] %v7188_v15  ;;  %v7194_v2 = vld [vmem:[%s6568_s29 + $0x400] sm:$0xff] }
 0x108   : > { %1050 = vmatprep.mubr.f32.mxu0 %v12043_v22  ;;  %1528 = vmatprep.subr.mxu1 %v7170_v11  ;;  %12061 = vst [vmem:[#allocation48_spill] sm:$0xff] %v7194_v2  ;;  %v7213_v11 = vld [vmem:[%s6568_s29 + $0x3d0] sm:$0xff] }
 0x109   : > { %1604 = vmatpush2.msra.mxu0 %v7175_v63  ;;  %4914 = vmatmul.mubr.msk.f32.gmra.mxu1 %vm537_vm0, %v6744_v38  ;;  %v7208_v63 = vld [vmem:[%s6568_s29 + $0x398] sm:$0xff]  ;;  %12065 = vst [vmem:[#allocation52_spill] sm:$0xff] %v7213_v11 }
 0x10a   : > { %4930 = vmatmul.mubr.msk.f32.gmra.mxu0 %vm537_vm0, %v6744_v38  ;;  %1529 = vmatpush2.msra.mxu1 %v7180_v34  ;;  %12064 = vst [vmem:[#allocation51_spill] sm:$0xff] %v7208_v63  ;;  %v7218_v38 = vld [vmem:[%s6568_s29 + $0x390] sm:$0xff] }
 0x10b   : > { %1605 = vmatprep.subr.mxu0 %v7185_v36  ;;  %1530 = vmatprep.subr.mxu1 %v7188_v15  ;;  %12066 = vst [vmem:[#allocation53_spill] sm:$0xff] %v7218_v38  ;;  %v7223_v36 = vld [vmem:[%s6568_s29 + $0x3a8] sm:$0xff]  ;;  %v1247_v15 = vld [vmem:[%s6568_s29 + $0x290] sm:$0xff] }
 0x10c   : > { %1606 = vmatpush2.msra.mxu0 %v7194_v2  ;;  %1531 = vmatpush2.msra.mxu1 %v7197_v59  ;;  %12067 = vst [vmem:[#allocation54_spill] sm:$0xff] %v7223_v36  ;;  %v7226_v2 = vld [vmem:[%s6568_s29 + $0x368] sm:$0xff]  ;;  %v7235_v59 = vld [vmem:[%s6568_s29 + $0x360] sm:$0xff] }
 0x10d   : > { %1607 = vmatprep.subr.mxu0 %v7203_v55  ;;  %895 = vmatprep.mubr.f32.mxu1 %v12043_v22  ;;  %12068 = vst [vmem:[#allocation55_spill] sm:$0xff] %v7226_v2  ;;  %v7232_v55 = vld [vmem:[%s6568_s29 + $0x3a0] sm:$0xff]  ;;  %12070 = vst [vmem:[#allocation57_spill] sm:$0xff] %v7235_v59 }
 0x10e   : > { %1056 = vmatprep.mubr.f32.mxu0 %v12043_v22  ;;  %1532 = vmatprep.subr.mxu1 %v7208_v63  ;;  %12069 = vst [vmem:[#allocation56_spill] sm:$0xff] %v7232_v55  ;;  %v7241_v63 = vld [vmem:[%s6568_s29 + $0x378] sm:$0xff] }
 0x10f   : > { %1608 = vmatpush2.msra.mxu0 %v7213_v11  ;;  %4915 = vmatmul.mubr.msk.f32.gmra.mxu1 %vm537_vm0, %v6756_v40  ;;  %12071 = vst [vmem:[#allocation58_spill] sm:$0xff] %v7241_v63  ;;  %v7246_v11 = vld [vmem:[%s6568_s29 + $0x338] sm:$0xff] }
 0x110   : > { %4931 = vmatmul.mubr.msk.f32.gmra.mxu0 %vm537_vm0, %v6756_v40  ;;  %1533 = vmatpush2.msra.mxu1 %v7218_v38  ;;  %12072 = vst [vmem:[#allocation59_spill] sm:$0xff] %v7246_v11  ;;  %v7252_v40 = vld [vmem:[%s6568_s29 + $0x370] sm:$0xff] }
 0x111   : > { %1609 = vmatprep.subr.mxu0 %v7223_v36  ;;  %1534 = vmatprep.subr.mxu1 %v7226_v2  ;;  %12073 = vst [vmem:[#allocation60_spill] sm:$0xff] %v7252_v40  ;;  %v7257_v38 = vld [vmem:[%s6568_s29 + $0x330] sm:$0xff]  ;;  %v7270_v36 = vld [vmem:[%s6568_s29 + $0x308] sm:$0xff]  ;;  %v7287_v2 = vld [vmem:[%s454_s17] sm:$0xff] }
 0x112   : > { %1610 = vmatpush2.msra.mxu0 %v7232_v55  ;;  %1535 = vmatpush2.msra.mxu1 %v7235_v59  ;;  %12074 = vst [vmem:[#allocation61_spill] sm:$0xff] %v7257_v38  ;;  %v7267_v55 = vld [vmem:[%s6568_s29 + $0x348] sm:$0xff]  ;;  %12076 = vst [vmem:[#allocation63_spill] sm:$0xff] %v7270_v36  ;;  %v7279_v59 = vld [vmem:[%s6568_s29 + $0x300] sm:$0xff]  ;;  %vm1791_vm1 = vcmp.gt.s32.totalorder %v7287_v2, 0  ;;  %vm1797_vm2 = vcmp.gt.s32.totalorder %v7287_v2, 7 }
 0x113   : > { %1611 = vmatprep.subr.mxu0 %v7241_v63  ;;  %901 = vmatprep.mubr.f32.mxu1 %v12043_v22  ;;  %12075 = vst [vmem:[#allocation62_spill] sm:$0xff] %v7267_v55  ;;  %v7276_v63 = vld [vmem:[%s6568_s29 + $0x340] sm:$0xff]  ;;  %12078 = vst [vmem:[#allocation65_spill] sm:$0xff] %v7279_v59  ;;  %vm2636_vm5 = vcmp.gt.s32.totalorder %v7287_v2, 2  ;;  %vm2642_vm6 = vcmp.gt.s32.totalorder %v7287_v2, 5  ;;  %vm2215_vm7 = vcmp.gt.s32.totalorder %v7287_v2, 1 }
 0x114   : > { %1062 = vmatprep.mubr.f32.mxu0 %v12043_v22  ;;  %1536 = vmatprep.subr.mxu1 %v7246_v11  ;;  %12077 = vst [vmem:[#allocation64_spill] sm:$0xff] %v7276_v63  ;;  %v7285_v11 = vld [vmem:[%s6568_s29 + $0x318] sm:$0xff]  ;;  %vm2221_vm8 = vcmp.gt.s32.totalorder %v7287_v2, 6  ;;  %v4977_v28 = vsel %vm2636_vm5, 1.0, %v12043_v22  ;;  %v4957_v27 = vsel %vm2215_vm7, 1.0, %v12043_v22  ;;  %vm3057_vm9 = vcmp.gt.s32.totalorder %v7287_v2, 3 }
 0x115   : > { %1612 = vmatpush2.msra.mxu0 %v7252_v40  ;;  %4916 = vmatmul.mubr.msk.f32.gmra.mxu1 %vm537_vm0, %v6768_v42  ;;  %12079 = vst [vmem:[#allocation66_spill] sm:$0xff] %v7285_v11  ;;  %v7292_v40 = vld [vmem:[%s6568_s29 + $0x310] sm:$0xff]  ;;  %vm3063_vm10 = vcmp.gt.s32.totalorder %v7287_v2, 4  ;;  %v4997_v18 = vsel %vm3057_vm9, 1.0, %v12043_v22 }
 0x116   : > { %4932 = vmatmul.mubr.msk.f32.gmra.mxu0 %vm537_vm0, %v6768_v42  ;;  %1537 = vmatpush2.msra.mxu1 %v7257_v38  ;;  %12080 = vst [vmem:[#allocation67_spill] sm:$0xff] %v7292_v40  ;;  %v7297_v42 = vld [vmem:[%s6568_s29 + $0x2f8] sm:$0xff]  ;;  %v1259_v38 = vld [vmem:[%s6568_s29 + $0x2f0] sm:$0xff]  ;;  %v4999_v2 = vsel %vm3063_vm10, 1.0, %v12043_v22 }
 0x117   : > { %1613 = vmatprep.subr.mxu0 %v7267_v55  ;;  %1538 = vmatprep.subr.mxu1 %v7270_v36  ;;  %12081 = vst [vmem:[#allocation68_spill] sm:$0xff] %v7297_v42  ;;  %v7307_v55 = vld [vmem:[%s454_s17 + $0x8] sm:$0xff]  ;;  %v4941_v36 = vsel %vm1791_vm1, 1.0, %v12043_v22 }
 0x118   : > { %1614 = vmatpush2.msra.mxu0 %v7276_v63  ;;  %1539 = vmatpush2.msra.mxu1 %v7279_v59  ;;  %v1254_v63 = vld [vmem:[%s6568_s29 + $0x2c8] sm:$0xff]  ;;  %v1248_v59 = vld [vmem:[%s6568_s29 + $0x298] sm:$0xff]  ;;  %vm1792_vm3 = vcmp.gt.s32.totalorder %v7307_v55, 0  ;;  %vm1798_vm4 = vcmp.gt.s32.totalorder %v7307_v55, 7  ;;  %vm2216_vm11 = vcmp.gt.s32.totalorder %v7307_v55, 1  ;;  %vm2222_vm12 = vcmp.gt.s32.totalorder %v7307_v55, 6 }
 0x119   : > { %1615 = vmatprep.subr.mxu0 %v7285_v11  ;;  %1540 = vmatprep.mubr.f32.mxu1 %v12043_v22  ;;  %v1253_v11 = vld [vmem:[%s6568_s29 + $0x2c0] sm:$0xff]  ;;  %v4942_v6 = vsel %vm1792_vm3, 1.0, %v12043_v22  ;;  %v4944_v0 = vsel %vm1798_vm4, 1.0, %v12043_v22  ;;  %vm2637_vm13 = vcmp.gt.s32.totalorder %v7307_v55, 2  ;;  %vm2643_vm14 = vcmp.gt.s32.totalorder %v7307_v55, 5 }
 0x11a   : > { %1616 = vmatpush2.msra.mxu0 %v7292_v40  ;;  %1617 = vmatprep.mubr.f32.mxu0 %v12043_v22  ;;  %v4943_v40 = vsel %vm1797_vm2, 1.0, %v12043_v22  ;;  %vm3058_vm15 = vcmp.gt.s32.totalorder %v7307_v55, 3  ;;  %vm3064_vm1 = vcmp.gt.s32.totalorder %v7307_v55, 4 }
 0x11b   : > { %1630 = vmatprep.subr.mxu1 %v7297_v42  ;;  %1541 = vmatmul.mubr.f32.vlgmr.msra.gmra.mxu1 %v12043_v22  ;;  %v1242_v42 = vld [vmem:[%s6568_s29 + $0x268] sm:$0xff]  ;;  %v5153_v34 = vpack.i.bf16 %v4941_v36, %v4943_v40  ;;  %v6345_v36 = vmov 0   ;;  %v5158_v40 = vpack.i.bf16 %v4942_v6, %v4944_v0  ;;  %v1223_v0 = vld [vmem:[%s6568_s29 + $0x1d0] sm:$0xff] }
 0x11c   : > { %1618 = vmatmul.mubr.f32.vlgmr.msra.gmra.mxu0 %v12043_v22  ;;  %1631 = vmatpush1.msra.mxu1 %v1259_v38  ;;  %v1241_v38 = vld [vmem:[%s6568_s29 + $0x260] sm:$0xff] }
 0x11d   : > { %1632 = vmatprep.subr.mxu1 %v1254_v63  ;;  %1546 = vmatprep.mubr.f32.mxu1 %v12043_v22  ;;  %v1236_v63 = vld [vmem:[%s6568_s29 + $0x238] sm:$0xff] }
 0x11e   : > { %1633 = vmatpush1.msra.mxu1 %v1253_v11  ;;  %1623 = vmatprep.mubr.f32.mxu0 %v12043_v22  ;;  %v1235_v11 = vld [vmem:[%s6568_s29 + $0x230] sm:$0xff] }
 0x11f   : > { %1634 = vmatprep.subr.mxu1 %v1248_v59  ;;  %1547 = vmatmul.mubr.f32.gmra.mxu1 %v12043_v22  ;;  %v1230_v59 = vld [vmem:[%s6568_s29 + $0x208] sm:$0xff] }
 0x120   : > { %1624 = vmatmul.mubr.f32.gmra.mxu0 %v12043_v22  ;;  %1635 = vmatpush1.msra.mxu1 %v1247_v15  ;;  %v1229_v15 = vld [vmem:[%s6568_s29 + $0x200] sm:$0xff] }
 0x121   : > { %1636 = vmatprep.subr.mxu1 %v1242_v42  ;;  %1694 = vmatprep.mubr.f32.mxu1 %v12043_v22  ;;  %v1224_v42 = vld [vmem:[%s6568_s29 + $0x1d8] sm:$0xff] }
 0x122   : > { %1637 = vmatpush1.msra.mxu1 %v1241_v38  ;;  %5152 = vset.pattern.permute.xlu0 %v6345_v36  ;;  %v4979_v38 = vsel %vm2642_vm6, 1.0, %v12043_v22 }
 0x123   : > { %1638 = vmatprep.subr.mxu1 %v1236_v63  ;;  %5154 = vperm.xlu0 %5152, %v5153_v34   ;;  %v4959_v63 = vsel %vm2221_vm8, 1.0, %v12043_v22  ;;  %v1218_v34 = vld [vmem:[%s6568_s29 + $0x1a8] sm:$0xff] }
 0x124   : > { %1639 = vmatpush1.msra.mxu1 %v1235_v11  ;;  %5163 = vset.pattern.permute.xlu1 %v6345_v36  ;;  %v5164_v6 = vpack.i.bf16 %v4957_v27, %v4959_v63  ;;  %v1217_v11 = vld [vmem:[%s6568_s29 + $0x1a0] sm:$0xff]  ;;  %v5174_v36 = vpack.i.bf16 %v4977_v28, %v4979_v38  ;;  %v4958_v27 = vsel %vm2216_vm11, 1.0, %v12043_v22  ;;  %v4960_v28 = vsel %vm2222_vm12, 1.0, %v12043_v22  ;;  %v1200_v38 = vld [vmem:[%s6568_s29 + $0x118] sm:$0xff]  ;;  %v1194_v63 = vld [vmem:[%s6568_s29 + $0xe8] sm:$0xff] }
 0x125   : > { %1640 = vmatprep.subr.mxu1 %v1230_v59  ;;  %1900 = vmatprep.subr.mxu0 %v6721_v32  ;;  %v1212_v59 = vld [vmem:[%s6568_s29 + $0x178] sm:$0xff]  ;;  %v1211_v32 = vld [vmem:[%s6568_s29 + $0x170] sm:$0xff] }
 0x126   : > { %1641 = vmatpush1.msra.mxu1 %v1229_v15  ;;  %1901 = vmatpush1.msra.mxu0 %v6777_v43  ;;  %v1206_v43 = vld [vmem:[%s6568_s29 + $0x148] sm:$0xff]  ;;  %v1205_v15 = vld [vmem:[%s6568_s29 + $0x140] sm:$0xff] }
 0x127   : > { %1642 = vmatprep.subr.mxu1 %v1224_v42  ;;  %5159 = vperm.xlu0 %5152, %v5158_v40   ;;  %v5184_v40 = vpack.i.bf16 %v4997_v18, %v4999_v2  ;;  %v5169_v42 = vpack.i.bf16 %v4958_v27, %v4960_v28  ;;  %v1188_v18 = vld [vmem:[%s6568_s29 + $0xb8] sm:$0xff] }
 0x128   : > { %1643 = vmatpush1.msra.mxu1 %v1223_v0  ;;  %5165 = vperm.xlu1 %5163, %v5164_v6   ;;  %v1182_v0 = vld [vmem:[%s6568_s29 + $0x88] sm:$0xff]  ;;  %v1176_v6 = vld [vmem:[%s6568_s29 + $0x58] sm:$0xff] }
 0x129   : > { %1644 = vmatprep.subr.mxu1 %v1218_v34  ;;  %1902 = vmatprep.subr.mxu0 %v6781_v45  ;;  %v1199_v45 = vld [vmem:[%s6568_s29 + $0x110] sm:$0xff]  ;;  %v507_v34 = vlaneseq  ;;  %v5516_v28 = vld [vmem:[%s6568_s29 + $0x2b8] sm:$0xff] }
 0x12a   : > { %1645 = vmatpush1.msra.mxu1 %v1217_v11  ;;  %1903 = vmatpush1.msra.mxu0 %v6789_v47  ;;  %v1193_v47 = vld [vmem:[%s6568_s29 + $0xe0] sm:$0xff] }
 0x12b   : > { %1646 = vmatprep.subr.mxu1 %v1212_v59  ;;  %5175 = vperm.xlu0 %5152, %v5174_v36   ;;  %v7433_v11 = vshrl.u32 %v507_v34, 7  ;;  %v7447_v59 = vld [vmem:[%s6574_s15] sm:$0x3f] }
 0x12c   : > { %1647 = vmatpush1.msra.mxu1 %v1211_v32  ;;  %1904 = vmatprep.subr.mxu0 %v6793_v48  ;;  %v1187_v48 = vld [vmem:[%s6568_s29 + $0xb0] sm:$0xff]  ;;  %v12101_v34 = vld [vmem:[#allocation53_spill] sm:$0xff] }
 0x12d   : > { %1648 = vmatprep.subr.mxu1 %v1206_v43  ;;  %5170 = vperm.xlu1 %5163, %v5169_v42   ;;  %v11539_v36 = vsub.s32 0, %v7433_v11  ;;  %v5515_v43 = vld [vmem:[%s6568_s29 + $0x2e0] sm:$0xff]  ;;  %v5517_v42 = vld [vmem:[%s6568_s29 + $0x2b0] sm:$0xff] }
 0x12e   : > { %1649 = vmatpush1.msra.mxu1 %v1205_v15  ;;  %1905 = vmatpush1.msra.mxu0 %v6800_v50  ;;  %v1181_v50 = vld [vmem:[%s6568_s29 + $0x80] sm:$0xff] }
 0x12f   : > { %1650 = vmatprep.subr.mxu1 %v1200_v38  ;;  %5185 = vperm.xlu0 %5152, %v5184_v40   ;;  %v12085_v38 = vld [vmem:[#allocation37_spill] sm:$0xff] }
 0x130   : > { %1651 = vmatpush1.msra.mxu1 %v1199_v45  ;;  %1906 = vmatprep.subr.mxu0 %v6806_v52  ;;  %v1175_v52 = vld [vmem:[%s6568_s29 + $0x50] sm:$0xff] }
 0x131   : > { %1652 = vmatprep.subr.mxu1 %v1194_v63  ;;  %1907 = vmatpush1.msra.mxu0 %v6812_v54  ;;  %v1170_v54 = vld [vmem:[%s6568_s29 + $0x28] sm:$0xff] }
 0x132   : > { %1653 = vmatpush1.msra.mxu1 %v1193_v47  ;;  %1908 = vmatprep.subr.mxu0 %v6820_v56  ;;  %v1169_v56 = vld [vmem:[%s6568_s29 + $0x20] sm:$0xff]  ;;  %v5518_v47 = vld [vmem:[%s6568_s29 + $0x288] sm:$0xff] }
 0x133   : > { %1654 = vmatprep.subr.mxu1 %v1188_v18  ;;  %1909 = vmatpush1.msra.mxu0 %v6826_v58  ;;  %v1356_v58 = vld [vmem:[%s6568_s29 + $0x5f8] sm:$0xff] }
 0x134   : > { %1655 = vmatpush1.msra.mxu1 %v1187_v48  ;;  %1910 = vmatprep.subr.mxu0 %v6832_v60  ;;  %v1355_v60 = vld [vmem:[%s6568_s29 + $0x5f0] sm:$0xff] }
 0x135   : > { %1656 = vmatprep.subr.mxu1 %v1182_v0  ;;  %1911 = vmatpush1.msra.mxu0 %v6838_v62  ;;  %v1350_v62 = vld [vmem:[%s6568_s29 + $0x5c8] sm:$0xff]  ;;  %v5519_v0 = vld [vmem:[%s6568_s29 + $0x280] sm:$0xff] }
 0x136   : > { %1657 = vmatpush1.msra.mxu1 %v1181_v50  ;;  %1912 = vmatprep.subr.mxu0 %v6846_v1  ;;  %v1349_v1 = vld [vmem:[%s6568_s29 + $0x5c0] sm:$0xff]  ;;  %v12088_v50 = vld [vmem:[#allocation39_spill] sm:$0xff] }
 0x137   : > { %1658 = vmatprep.subr.mxu1 %v1176_v6  ;;  %1913 = vmatpush1.msra.mxu0 %v6852_v3  ;;  %v1344_v3 = vld [vmem:[%s6568_s29 + $0x598] sm:$0xff] }
 0x138   : > { %1659 = vmatpush1.msra.mxu1 %v1175_v52  ;;  %1914 = vmatprep.subr.mxu0 %v6858_v5  ;;  %v1343_v5 = vld [vmem:[%s6568_s29 + $0x590] sm:$0xff]  ;;  %v5520_v52 = vld [vmem:[%s6568_s29 + $0x258] sm:$0xff] }
 0x139   : > { %1660 = vmatprep.subr.mxu1 %v1170_v54  ;;  %1915 = vmatpush1.msra.mxu0 %v6864_v7  ;;  %v1338_v7 = vld [vmem:[%s6568_s29 + $0x568] sm:$0xff]  ;;  %v12090_v54 = vld [vmem:[#allocation41_spill] sm:$0xff] }
 0x13a   : > { %1661 = vmatpush1.msra.mxu1 %v1169_v56  ;;  %1916 = vmatprep.subr.mxu0 %v6872_v9  ;;  %v1337_v9 = vld [vmem:[%s6568_s29 + $0x560] sm:$0xff] }
 0x13b   : > { %1662 = vmatprep.subr.mxu1 %v1356_v58  ;;  %1917 = vmatpush1.msra.mxu0 %v6878_v12  ;;  %v1332_v12 = vld [vmem:[%s6568_s29 + $0x538] sm:$0xff] }
 0x13c   : > { %1663 = vmatpush2.msra.mxu1 %v1355_v60  ;;  %1918 = vmatprep.subr.mxu0 %v6884_v14  ;;  %v1331_v14 = vld [vmem:[%s6568_s29 + $0x530] sm:$0xff] }
 0x13d   : > { %1664 = vmatprep.subr.mxu1 %v1350_v62  ;;  %1919 = vmatpush1.msra.mxu0 %v6890_v17  ;;  %v1326_v17 = vld [vmem:[%s6568_s29 + $0x508] sm:$0xff]  ;;  %v5521_v60 = vld [vmem:[%s6568_s29 + $0x250] sm:$0xff] }
 0x13e   : > { %1665 = vmatpush2.msra.mxu1 %v1349_v1  ;;  %1920 = vmatprep.subr.mxu0 %v6898_v19  ;;  %v1325_v19 = vld [vmem:[%s6568_s29 + $0x500] sm:$0xff]  ;;  %v12091_v62 = vld [vmem:[#allocation43_spill] sm:$0xff] }
 0x13f   : > { %1666 = vmatprep.subr.mxu1 %v1344_v3  ;;  %1921 = vmatpush1.msra.mxu0 %v6904_v21  ;;  %v1320_v21 = vld [vmem:[%s6568_s29 + $0x4d8] sm:$0xff] }
 0x140   : > { %1667 = vmatpush2.msra.mxu1 %v1343_v5  ;;  %1922 = vmatprep.subr.mxu0 %v6910_v24  ;;  %v1319_v24 = vld [vmem:[%s6568_s29 + $0x4d0] sm:$0xff]  ;;  %v7504_v5 = vld [vmem:[%s6568_s29 + $0x228] sm:$0xff] }
 0x141   : > { %1668 = vmatprep.subr.mxu1 %v1338_v7  ;;  %1923 = vmatpush1.msra.mxu0 %v6916_v26  ;;  %v1314_v26 = vld [vmem:[%s6568_s29 + $0x4a8] sm:$0xff]  ;;  %v12094_v7 = vld [vmem:[#allocation45_spill] sm:$0xff] }
 0x142   : > { %1669 = vmatpush2.msra.mxu1 %v1337_v9  ;;  %1924 = vmatprep.subr.mxu0 %v6924_v29  ;;  %v1313_v29 = vld [vmem:[%s6568_s29 + $0x4a0] sm:$0xff] }
 0x143   : > { %1670 = vmatprep.subr.mxu1 %v1332_v12  ;;  %1925 = vmatpush1.msra.mxu0 %v6930_v31  ;;  %v1308_v31 = vld [vmem:[%s6568_s29 + $0x478] sm:$0xff] }
 0x144   : > { %1671 = vmatpush2.msra.mxu1 %v1331_v14  ;;  %1926 = vmatprep.subr.mxu0 %v6936_v35  ;;  %v1307_v35 = vld [vmem:[%s6568_s29 + $0x470] sm:$0xff]  ;;  %v7509_v14 = vld [vmem:[%s6568_s29 + $0x220] sm:$0xff] }
 0x145   : > { %1672 = vmatprep.subr.mxu1 %v1326_v17  ;;  %1927 = vmatpush1.msra.mxu0 %v6942_v37  ;;  %v1302_v37 = vld [vmem:[%s6568_s29 + $0x448] sm:$0xff]  ;;  %v12095_v17 = vld [vmem:[#allocation47_spill] sm:$0xff] }
 0x146   : > { %1673 = vmatpush2.msra.mxu1 %v1325_v19  ;;  %1928 = vmatprep.subr.mxu0 %v6950_v46  ;;  %v1301_v46 = vld [vmem:[%s6568_s29 + $0x440] sm:$0xff] }
 0x147   : > { %1674 = vmatprep.subr.mxu1 %v1320_v21  ;;  %1929 = vmatpush1.msra.mxu0 %v6956_v39  ;;  %v1296_v39 = vld [vmem:[%s6568_s29 + $0x418] sm:$0xff] }
 0x148   : > { %1675 = vmatpush2.msra.mxu1 %v1319_v24  ;;  %1930 = vmatprep.subr.mxu0 %v6962_v53  ;;  %v1295_v53 = vld [vmem:[%s6568_s29 + $0x410] sm:$0xff]  ;;  %v7520_v24 = vld [vmem:[%s6568_s29 + $0x1f8] sm:$0xff] }
 0x149   : > { %1676 = vmatprep.subr.mxu1 %v1314_v26  ;;  %1931 = vmatpush1.msra.mxu0 %v6970_v57  ;;  %v1290_v57 = vld [vmem:[%s6568_s29 + $0x3e8] sm:$0xff]  ;;  %v12097_v26 = vld [vmem:[#allocation49_spill] sm:$0xff] }
 0x14a   : > { %1677 = vmatpush2.msra.mxu1 %v1313_v29  ;;  %1932 = vmatprep.subr.mxu0 %v6980_v61  ;;  %v1289_v61 = vld [vmem:[%s6568_s29 + $0x3e0] sm:$0xff] }
 0x14b   : > { %1678 = vmatprep.subr.mxu1 %v1308_v31  ;;  %1933 = vmatpush2.msra.mxu0 %v6990_v41  ;;  %v1284_v41 = vld [vmem:[%s6568_s29 + $0x3b8] sm:$0xff] }
 0x14c   : > { %1679 = vmatpush2.msra.mxu1 %v1307_v35  ;;  %1934 = vmatprep.subr.mxu0 %v6998_v4  ;;  %v1283_v4 = vld [vmem:[%s6568_s29 + $0x3b0] sm:$0xff] }
 0x14d   : > { %1680 = vmatprep.subr.mxu1 %v1302_v37  ;;  %1935 = vmatpush2.msra.mxu0 %v7007_v8  ;;  %v1278_v8 = vld [vmem:[%s6568_s29 + $0x388] sm:$0xff]  ;;  %v7525_v35 = vld [vmem:[%s6568_s29 + $0x1f0] sm:$0xff] }
 0x14e   : > { %1681 = vmatpush2.msra.mxu1 %v1301_v46  ;;  %1936 = vmatprep.subr.mxu0 %v7018_v13  ;;  %v1277_v13 = vld [vmem:[%s6568_s29 + $0x380] sm:$0xff]  ;;  %v12098_v37 = vld [vmem:[#allocation51_spill] sm:$0xff] }
 0x14f   : > { %1682 = vmatprep.subr.mxu1 %v1296_v39  ;;  %1937 = vmatpush2.msra.mxu0 %v7028_v10  ;;  %v1272_v10 = vld [vmem:[%s6568_s29 + $0x358] sm:$0xff] }
 0x150   : > { %1683 = vmatpush2.msra.mxu1 %v1295_v53  ;;  %1938 = vmatprep.subr.mxu0 %v7036_v20  ;;  %v1271_v20 = vld [vmem:[%s6568_s29 + $0x350] sm:$0xff]  ;;  %v7536_v53 = vld [vmem:[%s6568_s29 + $0x1c8] sm:$0xff] }
 0x151   : > { %1684 = vmatprep.subr.mxu1 %v1290_v57  ;;  %1939 = vmatpush2.msra.mxu0 %v7045_v25  ;;  %v1266_v25 = vld [vmem:[%s6568_s29 + $0x328] sm:$0xff] }
 0x152   : > { %1685 = vmatpush2.msra.mxu1 %v1289_v61  ;;  %1940 = vmatprep.subr.mxu0 %v7056_v30  ;;  %v1265_v30 = vld [vmem:[%s6568_s29 + $0x320] sm:$0xff] }
 0x153   : > { %1686 = vmatprep.subr.mxu1 %v1284_v41  ;;  %1941 = vmatpush2.msra.mxu0 %v7066_v16  ;;  %v11538_v16 = vsub.s32 1, %v7433_v11  ;;  %v7541_v41 = vld [vmem:[%s6568_s29 + $0x1c0] sm:$0xff] }
 0x154   : > { %1687 = vmatpush2.msra.mxu1 %v1283_v4  ;;  %1942 = vmatprep.subr.mxu0 %v7074_v44  ;;  %v7457_v44 = vrot.slane %v7447_v59, %v11539_v36  ;;  %v12102_v4 = vld [vmem:[#allocation55_spill] sm:$0xff] }
 0x155   : > { %1688 = vmatprep.subr.mxu1 %v1278_v8  ;;  %1943 = vmatpush2.msra.mxu0 %v7083_v51  ;;  %v12082_v51 = vld [vmem:[#allocation33_spill] sm:$0xff] }
 0x156   : > { %1689 = vmatpush2.msra.mxu1 %v1277_v13  ;;  %1944 = vmatprep.subr.mxu0 %v7094_v33  ;;  %v12083_v33 = vld [vmem:[#allocation35_spill] sm:$0xff] }
 0x157   : > { %1690 = vmatprep.subr.mxu1 %v1272_v10  ;;  %1945 = vmatpush2.msra.mxu0 %v7104_v23  ;;  %v7465_v23 = vrot.slane %v7447_v59, %v11538_v16  ;;  %v7552_v10 = vld [vmem:[%s6568_s29 + $0x198] sm:$0xff] }
 0x158   : > { %1691 = vmatpush2.msra.mxu1 %v1271_v20  ;;  %1946 = vmatprep.subr.mxu0 %v7112_v49  ;;  %v5514_v49 = vld [vmem:[%s6568_s29 + $0x2e8] sm:$0xff]  ;;  %v12104_v20 = vld [vmem:[#allocation57_spill] sm:$0xff] }
 0x159   : > { %1692 = vmatprep.subr.mxu1 %v1266_v25  ;;  %1947 = vmatpush2.msra.mxu0 %v12082_v51  ;;  %v7557_v51 = vld [vmem:[%s6568_s29 + $0x190] sm:$0xff] }
 0x15a   : > { %1693 = vmatpush2.msra.mxu1 %v1265_v30  ;;  %1948 = vmatprep.subr.mxu0 %v12083_v33  ;;  %v12105_v33 = vld [vmem:[#allocation59_spill] sm:$0xff] }
 0x15b   : > { %1695 = vmatmul.mubr.f32.vlgmr.msra.gmra.mxu1 %v12043_v22  ;;  %1977 = vmatprep.subr.mxu1 %v5514_v49 }
 0x15c   : > { %1700 = vmatprep.mubr.f32.mxu1 %v12043_v22  ;;  %v7469_v2 = vpop.f32.mrf.mxu0  ;;  %v700_v32 = vpop.f32.mrf.mxu1  ;;  %1978 = vmatpush1.msra.mxu1 %v5515_v43  ;;  %v7568_v43 = vld [vmem:[%s6568_s29 + $0x168] sm:$0xff] }
 0x15d   : > { %v7473_v27 = vadd.f32 %v700_v32, %v7457_v44  ;;  %1979 = vmatprep.subr.mxu1 %v5516_v28  ;;  %1949 = vmatpush2.msra.mxu0 %v12085_v38  ;;  %v12108_v28 = vld [vmem:[#allocation61_spill] sm:$0xff]  ;;  %v12109_v38 = vld [vmem:[#allocation63_spill] sm:$0xff] }
 0x15e   : > { %v654_v15 = vpop.f32.mrf.mxu0  ;;  %v702_v40 = vpop.f32.mrf.mxu1  ;;  %1980 = vmatpush1.msra.mxu1 %v5517_v42  ;;  %1950 = vmatprep.subr.mxu0 %v12088_v50  ;;  %v7573_v42 = vld [vmem:[%s6568_s29 + $0x160] sm:$0xff] }
 0x15f   : > { %12084 = vst [vmem:[#allocation33_spill] sm:$0xff] %v7473_v27  ;;  %1701 = vmatmul.mubr.f32.gmra.mxu1 %v12043_v22  ;;  %v7480_v45 = vadd.f32 %v654_v15, %v7465_v23  ;;  %v7483_v63 = vadd.f32 %v702_v40, %v7465_v23  ;;  %1981 = vmatprep.subr.mxu1 %v5518_v47  ;;  %v12112_v50 = vld [vmem:[#allocation65_spill] sm:$0xff] }
 0x160   : > { %v7486_v18 = vpop.f32.mrf.mxu0  ;;  %v706_v48 = vpop.f32.mrf.mxu1  ;;  %1982 = vmatpush1.msra.mxu1 %v5519_v0  ;;  %1951 = vmatpush2.msra.mxu0 %v12090_v54  ;;  %v7584_v0 = vld [vmem:[%s6568_s29 + $0x138] sm:$0xff] }
 0x161   : > { %12086 = vst [vmem:[#allocation35_spill] sm:$0xff] %v7480_v45  ;;  %12087 = vst [vmem:[#allocation37_spill] sm:$0xff] %v7483_v63  ;;  %v7491_v6 = vadd.f32 %v706_v48, %v7457_v44  ;;  %1983 = vmatprep.subr.mxu1 %v5520_v52  ;;  %1952 = vmatprep.subr.mxu0 %v12091_v62  ;;  %v12127_v45 = vld [vmem:[#allocation19_spill] sm:$0xff] }
 0x162   : > { %v660_v56 = vpop.f32.mrf.mxu0  ;;  %v708_v58 = vpop.f32.mrf.mxu1  ;;  %1984 = vmatpush1.msra.mxu1 %v5521_v60  ;;  %1953 = vmatpush2.msra.mxu0 %v12094_v7  ;;  %v7600_v7 = vld [vmem:[%s6568_s29 + $0x108] sm:$0xff] }
 0x163   : > { %12089 = vst [vmem:[#allocation39_spill] sm:$0xff] %v7491_v6  ;;  %v7498_v1 = vadd.f32 %v660_v56, %v7465_v23  ;;  %v7501_v3 = vadd.f32 %v708_v58, %v7465_v23  ;;  %1985 = vmatprep.subr.mxu1 %v7504_v5  ;;  %1954 = vmatprep.subr.mxu0 %v12095_v17  ;;  %v7589_v56 = vld [vmem:[%s6568_s29 + $0x130] sm:$0xff]  ;;  %v12113_v58 = vld [vmem:[#allocation68_spill] sm:$0xff]  ;;  %v7604_v17 = vld [vmem:[%s6568_s29 + $0x100] sm:$0xff] }
 0x164   : > { %v664_v9 = vpop.f32.mrf.mxu0  ;;  %v712_v12 = vpop.f32.mrf.mxu1  ;;  %1986 = vmatpush1.msra.mxu1 %v7509_v14  ;;  %1955 = vmatpush2.msra.mxu0 %v12097_v26  ;;  %v12172_v6 = vld [vmem:[#allocation64_spill] sm:$0xff] }
 0x165   : > { %12092 = vst [vmem:[#allocation41_spill] sm:$0xff] %v7498_v1  ;;  %12093 = vst [vmem:[#allocation43_spill] sm:$0xff] %v7501_v3  ;;  %v7514_v19 = vadd.f32 %v664_v9, %v7457_v44  ;;  %v7517_v21 = vadd.f32 %v712_v12, %v7457_v44  ;;  %1987 = vmatprep.subr.mxu1 %v7520_v24  ;;  %1956 = vmatprep.subr.mxu0 %v12098_v37 }
 0x166   : > { %v666_v29 = vpop.f32.mrf.mxu0  ;;  %v714_v31 = vpop.f32.mrf.mxu1  ;;  %1988 = vmatpush1.msra.mxu1 %v7525_v35  ;;  %1957 = vmatpush2.msra.mxu0 %v12101_v34 }
 0x167   : > { %12096 = vst [vmem:[#allocation45_spill] sm:$0xff] %v7517_v21  ;;  %v7530_v46 = vadd.f32 %v666_v29, %v7465_v23  ;;  %v7533_v39 = vadd.f32 %v714_v31, %v7465_v23  ;;  %1989 = vmatprep.subr.mxu1 %v7536_v53  ;;  %1958 = vmatprep.subr.mxu0 %v12102_v4  ;;  %v7614_v31 = vld [vmem:[%s6568_s29 + $0xd8] sm:$0xff] }
 0x168   : > { %v670_v57 = vpop.f32.mrf.mxu0  ;;  %v718_v61 = vpop.f32.mrf.mxu1  ;;  %1990 = vmatpush1.msra.mxu1 %v7541_v41  ;;  %1959 = vmatpush2.msra.mxu0 %v12104_v20  ;;  %v7628_v20 = vld [vmem:[%s6568_s29 + $0xa8] sm:$0xff]  ;;  %v12156_v21 = vld [vmem:[#allocation44_spill] sm:$0xff] }
 0x169   : > { %12099 = vst [vmem:[#allocation47_spill] sm:$0xff] %v7530_v46  ;;  %12100 = vst [vmem:[#allocation49_spill] sm:$0xff] %v7533_v39  ;;  %v7546_v8 = vadd.f32 %v670_v57, %v7457_v44  ;;  %v7549_v13 = vadd.f32 %v718_v61, %v7457_v44  ;;  %1991 = vmatprep.subr.mxu1 %v7552_v10  ;;  %1960 = vmatprep.subr.mxu0 %v12105_v33  ;;  %v7618_v57 = vld [vmem:[%s6568_s29 + $0xd0] sm:$0xff]  ;;  %v7632_v33 = vld [vmem:[%s6568_s29 + $0xa0] sm:$0xff] }
 0x16a   : > { %v672_v25 = vpop.f32.mrf.mxu0  ;;  %v720_v30 = vpop.f32.mrf.mxu1  ;;  %1992 = vmatpush1.msra.mxu1 %v7557_v51  ;;  %1961 = vmatpush2.msra.mxu0 %v12108_v28  ;;  %v653_v39 = vadd.f32 %v7469_v2, %v7457_v44 }
 0x16b   : > { %12103 = vst [vmem:[#allocation51_spill] sm:$0xff] %v7549_v13  ;;  %v7562_v49 = vadd.f32 %v672_v25, %v7465_v23  ;;  %v7565_v32 = vadd.f32 %v720_v30, %v7465_v23  ;;  %1993 = vmatprep.subr.mxu1 %v7568_v43  ;;  %1962 = vmatprep.subr.mxu0 %v12109_v38  ;;  %v12146_v13 = vld [vmem:[#allocation32_spill] sm:$0xff] }
 0x16c   : > { %v676_v15 = vpop.f32.mrf.mxu0  ;;  %v724_v40 = vpop.f32.mrf.mxu1  ;;  %1994 = vmatpush1.msra.mxu1 %v7573_v42  ;;  %1963 = vmatpush2.msra.mxu0 %v12112_v50 }
 0x16d   : > { %12106 = vst [vmem:[#allocation53_spill] sm:$0xff] %v7562_v49  ;;  %12107 = vst [vmem:[#allocation55_spill] sm:$0xff] %v7565_v32  ;;  %v7578_v47 = vadd.f32 %v676_v15, %v7457_v44  ;;  %v7581_v48 = vadd.f32 %v724_v40, %v7457_v44  ;;  %1995 = vmatprep.subr.mxu1 %v7584_v0  ;;  %2054 = vmatprep.subr.mxu0 %v12113_v58  ;;  %v7642_v40 = vld [vmem:[%s6568_s29 + $0x78] sm:$0xff]  ;;  %v7655_v58 = vld [vmem:[%s6568_s29 + $0x48] sm:$0xff] }
 0x16e   : > { %v678_v52 = vpop.f32.mrf.mxu0  ;;  %v726_v54 = vpop.f32.mrf.mxu1  ;;  %1996 = vmatpush1.msra.mxu1 %v7589_v56  ;;  %v12132_v49 = vld [vmem:[#allocation22_spill] sm:$0xff] }
 0x16f   : > { %12110 = vst [vmem:[#allocation57_spill] sm:$0xff] %v7578_v47  ;;  %12111 = vst [vmem:[#allocation59_spill] sm:$0xff] %v7581_v48  ;;  %v7594_v60 = vadd.f32 %v678_v52, %v7465_v23  ;;  %v7597_v62 = vadd.f32 %v726_v54, %v7465_v23  ;;  %1997 = vmatprep.subr.mxu1 %v7600_v7  ;;  %v7648_v52 = vld [vmem:[%s6568_s29 + $0x70] sm:$0xff]  ;;  %v12136_v48 = vld [vmem:[#allocation26_spill] sm:$0xff] }
 0x170   : > { %v682_v9 = vpop.f32.mrf.mxu0  ;;  %v730_v12 = vpop.f32.mrf.mxu1  ;;  %1998 = vmatpush1.msra.mxu1 %v7604_v17 }
 0x171   : > { %12114 = vst [vmem:[#allocation61_spill] sm:$0xff] %v7594_v60  ;;  %v7608_v26 = vadd.f32 %v682_v9, %v7457_v44  ;;  %v7611_v29 = vadd.f32 %v730_v12, %v7457_v44  ;;  %1999 = vmatprep.subr.mxu1 %v7614_v31  ;;  %v12154_v60 = vld [vmem:[#allocation42_spill] sm:$0xff] }
 0x172   : > { %v684_v37 = vpop.f32.mrf.mxu0  ;;  %v732_v34 = vpop.f32.mrf.mxu1  ;;  %2000 = vmatpush1.msra.mxu1 %v7618_v57 }
 0x173   : > { %12115 = vst [vmem:[#allocation63_spill] sm:$0xff] %v7608_v26  ;;  %12116 = vst [vmem:[#allocation65_spill] sm:$0xff] %v7611_v29  ;;  %v7622_v61 = vadd.f32 %v684_v37, %v7465_v23  ;;  %v7625_v4 = vadd.f32 %v732_v34, %v7465_v23  ;;  %2001 = vmatprep.subr.mxu1 %v7628_v20  ;;  %v12121_v37 = vld [vmem:[#allocation16_spill] sm:$0xff] }
 0x174   : > { %v688_v25 = vpop.f32.mrf.mxu0  ;;  %v736_v30 = vpop.f32.mrf.mxu1  ;;  %2002 = vmatpush1.msra.mxu1 %v7632_v33 }
 0x175   : > { %12117 = vst [vmem:[#allocation68_spill] sm:$0xff] %v7622_v61  ;;  %v7636_v28 = vadd.f32 %v688_v25, %v7457_v44  ;;  %v7639_v15 = vadd.f32 %v736_v30, %v7457_v44  ;;  %2003 = vmatprep.subr.mxu1 %v7642_v40  ;;  %v12124_v30 = vld [vmem:[#allocation17_spill] sm:$0xff]  ;;  %v12144_v61 = vld [vmem:[#allocation31_spill] sm:$0xff] }
 0x176   : > { %v690_v38 = vpop.f32.mrf.mxu0  ;;  %v7645_v50 = vpop.f32.mrf.mxu1  ;;  %2004 = vmatpush1.msra.mxu1 %v7648_v52 }
 0x177   : > { %12118 = vst [vmem:[#allocation69_spill] sm:$0xff] %v7636_v28  ;;  %12119 = vst [vmem:[#allocation70_spill] sm:$0xff] %v7639_v15  ;;  %v7652_v54 = vadd.f32 %v690_v38, %v7465_v23  ;;  %2005 = vmatprep.subr.mxu1 %v7655_v58  ;;  %v12125_v38 = vld [vmem:[#allocation18_spill] sm:$0xff] }
 0x178   : > { %v694_v9 = vpop.f32.mrf.mxu0  ;;  %v742_v12 = vpop.f32.mrf.mxu1  ;;  %2006 = vmatpush1.msra.mxu1 %v12121_v37 }
 0x179   : > { %12120 = vst [vmem:[#allocation71_spill] sm:$0xff] %v7652_v54  ;;  %v7660_v34 = vadd.f32 %v694_v9, %v7457_v44  ;;  %v7663_v25 = vadd.f32 %v742_v12, %v7457_v44  ;;  %2007 = vmatprep.subr.mxu1 %v12124_v30  ;;  %v12128_v9 = vld [vmem:[#allocation20_spill] sm:$0xff]  ;;  %v12129_v12 = vld [vmem:[#allocation21_spill] sm:$0xff]  ;;  %v12174_v54 = vld [vmem:[#allocation66_spill] sm:$0xff] }
 0x17a   : > { %v696_v16 = vpop.f32.mrf.mxu0  ;;  %v7666_v36 = vpop.f32.mrf.mxu1  ;;  %2008 = vmatpush1.msra.mxu1 %v12125_v38  ;;  %v12133_v38 = vld [vmem:[#allocation23_spill] sm:$0xff] }
 0x17b   : > { %12122 = vst [vmem:[#allocation16_spill] sm:$0xff] %v7660_v34  ;;  %12123 = vst [vmem:[#allocation72_spill] sm:$0xff] %v7663_v25  ;;  %v7670_v1 = vadd.f32 %v696_v16, %v7465_v23  ;;  %2009 = vmatprep.subr.mxu1 %v12127_v45  ;;  %v12134_v16 = vld [vmem:[#allocation24_spill] sm:$0xff]  ;;  %v12135_v45 = vld [vmem:[#allocation25_spill] sm:$0xff]  ;;  %v745_v2 = vadd.f32 %v7666_v36, %v7465_v23 }
 0x17c   : > { %v7673_v15 = vpop.f32.mrf.mxu1  ;;  %v7675_v37 = vpop.f32.mrf.mxu0  ;;  %2010 = vmatpush2.msra.mxu1 %v12128_v9 }
 0x17d   : > { %12126 = vst [vmem:[#allocation17_spill] sm:$0xff] %v7670_v1  ;;  %2011 = vmatprep.subr.mxu1 %v12129_v12  ;;  %v12138_v12 = vld [vmem:[#allocation27_spill] sm:$0xff] }
 0x17e   : > { %v7679_v25 = vpop.f32.mrf.mxu1  ;;  %v7681_v30 = vpop.f32.mrf.mxu0  ;;  %2012 = vmatpush2.msra.mxu1 %v12132_v49  ;;  %v12141_v49 = vld [vmem:[#allocation29_spill] sm:$0xff] }
 0x17f   : > { %12130 = vst [vmem:[#allocation18_spill] sm:$0xff] %v7679_v25  ;;  %12131 = vst [vmem:[#allocation19_spill] sm:$0xff] %v7681_v30  ;;  %2013 = vmatprep.subr.mxu1 %v12133_v38  ;;  %v12140_v30 = vld [vmem:[#allocation28_spill] sm:$0xff]  ;;  %v12142_v38 = vld [vmem:[#allocation30_spill] sm:$0xff] }
 0x180   : > { %2014 = vmatpush2.msra.mxu1 %v12134_v16 }
 0x181   : > { %v7686_v29 = vpop.f32.mrf.mxu1  ;;  %2015 = vmatprep.subr.mxu1 %v12135_v45 }
 0x182   : > { %v7689_v46 = vpop.f32.mrf.mxu0  ;;  %2016 = vmatpush2.msra.mxu1 %v12136_v48 }
 0x183   : > { %v7692_v9 = vpop.f32.mrf.mxu1  ;;  %2017 = vmatprep.subr.mxu1 %v12138_v12 }
 0x184   : > { %12137 = vst [vmem:[#allocation20_spill] sm:$0xff] %v7692_v9  ;;  %v7695_v25 = vpop.f32.mrf.mxu0  ;;  %2018 = vmatpush2.msra.mxu1 %v12140_v30  ;;  %v12148_v9 = vld [vmem:[#allocation34_spill] sm:$0xff] }
 0x185   : > { %12139 = vst [vmem:[#allocation21_spill] sm:$0xff] %v7695_v25  ;;  %2019 = vmatprep.subr.mxu1 %v12141_v49  ;;  %v12150_v25 = vld [vmem:[#allocation36_spill] sm:$0xff]  ;;  %v12151_v30 = vld [vmem:[#allocation38_spill] sm:$0xff] }
 0x186   : > { %2020 = vmatpush2.msra.mxu1 %v12142_v38  ;;  %v12152_v49 = vld [vmem:[#allocation40_spill] sm:$0xff] }
 0x187   : > { %v7700_v16 = vpop.f32.mrf.mxu1  ;;  %2021 = vmatprep.subr.mxu1 %v12144_v61 }
 0x188   : > { %12143 = vst [vmem:[#allocation22_spill] sm:$0xff] %v7700_v16  ;;  %v7703_v45 = vpop.f32.mrf.mxu0  ;;  %2022 = vmatpush2.msra.mxu1 %v12146_v13 }
 0x189   : > { %12145 = vst [vmem:[#allocation23_spill] sm:$0xff] %v7703_v45  ;;  %v7706_v48 = vpop.f32.mrf.mxu1  ;;  %2023 = vmatprep.subr.mxu1 %v12148_v9 }
 0x18a   : > { %12147 = vst [vmem:[#allocation24_spill] sm:$0xff] %v7706_v48  ;;  %v7709_v12 = vpop.f32.mrf.mxu0  ;;  %2024 = vmatpush2.msra.mxu1 %v12150_v25  ;;  %v12158_v48 = vld [vmem:[#allocation46_spill] sm:$0xff] }
 0x18b   : > { %12149 = vst [vmem:[#allocation25_spill] sm:$0xff] %v7709_v12  ;;  %2025 = vmatprep.subr.mxu1 %v12151_v30  ;;  %v12160_v12 = vld [vmem:[#allocation48_spill] sm:$0xff]  ;;  %v12161_v25 = vld [vmem:[#allocation50_spill] sm:$0xff] }
 0x18c   : > { %2026 = vmatpush2.msra.mxu1 %v12152_v49  ;;  %v12162_v30 = vld [vmem:[#allocation52_spill] sm:$0xff] }
 0x18d   : > { %v7714_v38 = vpop.f32.mrf.mxu1  ;;  %2027 = vmatprep.subr.mxu1 %v12154_v60  ;;  %v12164_v60 = vld [vmem:[#allocation54_spill] sm:$0xff] }
 0x18e   : > { %12153 = vst [vmem:[#allocation26_spill] sm:$0xff] %v7714_v38  ;;  %v7717_v61 = vpop.f32.mrf.mxu0  ;;  %2028 = vmatpush2.msra.mxu1 %v12156_v21  ;;  %v12166_v21 = vld [vmem:[#allocation56_spill] sm:$0xff] }
 0x18f   : > { %12155 = vst [vmem:[#allocation27_spill] sm:$0xff] %v7717_v61  ;;  %v7720_v13 = vpop.f32.mrf.mxu1  ;;  %2029 = vmatprep.subr.mxu1 %v12158_v48  ;;  %v12168_v48 = vld [vmem:[#allocation58_spill] sm:$0xff] }
 0x190   : > { %12157 = vst [vmem:[#allocation28_spill] sm:$0xff] %v7720_v13  ;;  %v7723_v9 = vpop.f32.mrf.mxu0  ;;  %2030 = vmatpush2.msra.mxu1 %v12160_v12  ;;  %v12170_v12 = vld [vmem:[#allocation62_spill] sm:$0xff] }
 0x191   : > { %12159 = vst [vmem:[#allocation29_spill] sm:$0xff] %v7723_v9  ;;  %2031 = vmatprep.subr.mxu1 %v12161_v25  ;;  %v12169_v9 = vld [vmem:[#allocation60_spill] sm:$0xff] }
 0x192   : > { %2032 = vmatpush2.msra.mxu1 %v12162_v30 }
 0x193   : > { %v7728_v49 = vpop.f32.mrf.mxu1  ;;  %2033 = vmatprep.subr.mxu1 %v12164_v60  ;;  %v12175_v60 = vld [vmem:[#allocation67_spill] sm:$0xff] }
 0x194   : > { %12163 = vst [vmem:[#allocation30_spill] sm:$0xff] %v7728_v49  ;;  %v7731_v1 = vpop.f32.mrf.mxu0  ;;  %2034 = vmatpush2.msra.mxu1 %v12166_v21  ;;  %v7749_v21 = vld [vmem:[%s6568_s29 + $0x2d8] sm:$0xff] }
 0x195   : > { %12165 = vst [vmem:[#allocation31_spill] sm:$0xff] %v7731_v1  ;;  %v7734_v13 = vpop.f32.mrf.mxu1  ;;  %2035 = vmatprep.subr.mxu1 %v12168_v48 }
 0x196   : > { %12167 = vst [vmem:[#allocation32_spill] sm:$0xff] %v7734_v13  ;;  %2036 = vmatpush2.msra.mxu1 %v12169_v9  ;;  %v7739_v25 = vpop.f32.mrf.mxu0 }
 0x197   : > { %2037 = vmatprep.subr.mxu1 %v12170_v12  ;;  %12171 = vst [vmem:[#allocation34_spill] sm:$0xff] %v7739_v25 }
 0x198   : > { %2038 = vmatpush2.msra.mxu1 %v12172_v6 }
 0x199   : > { %v7742_v30 = vpop.f32.mrf.mxu1  ;;  %2039 = vmatprep.subr.mxu1 %v12174_v54 }
 0x19a   : > { %12173 = vst [vmem:[#allocation36_spill] sm:$0xff] %v7742_v30  ;;  %2040 = vmatpush2.msra.mxu1 %v12175_v60  ;;  %v7752_v48 = vpop.f32.mrf.mxu0  ;;  %v7829_v30 = vld [vmem:[%s6576_s30] sm:$0x3f] }
 0x19b   : > { %v7746_v27 = vpop.f32.mrf.mxu1  ;;  %2321 = vmatprep.subr.mxu1 %v7749_v21  ;;  %12177 = vst [vmem:[#allocation40_spill] sm:$0xff] %v7752_v48 }
 0x19c   : > { %12176 = vst [vmem:[#allocation38_spill] sm:$0xff] %v7746_v27  ;;  %v7756_v12 = vpop.f32.mrf.mxu0 }
 0x19d   : > { %12179 = vst [vmem:[#allocation44_spill] sm:$0xff] %v7756_v12 }
 0x19f   : > { %v7754_v9 = vpop.f32.mrf.mxu1 }
 0x1a0   : > { %12178 = vst [vmem:[#allocation42_spill] sm:$0xff] %v7754_v9  ;;  %v7760_v6 = vpop.f32.mrf.mxu0 }
 0x1a1   : > { %v7758_v25 = vpop.f32.mrf.mxu1  ;;  %12181 = vst [vmem:[#allocation48_spill] sm:$0xff] %v7760_v6 }
 0x1a2   : > { %12180 = vst [vmem:[#allocation46_spill] sm:$0xff] %v7758_v25  ;;  %v7766_v60 = vpop.f32.mrf.mxu0 }
 0x1a3   : > { %12184 = vst [vmem:[#allocation54_spill] sm:$0xff] %v7766_v60 }
 0x1a5   : > { %v7762_v13 = vpop.f32.mrf.mxu1 }
 0x1a6   : > { %12182 = vst [vmem:[#allocation50_spill] sm:$0xff] %v7762_v13  ;;  %v7770_v3 = vpop.f32.mrf.mxu0 }
 0x1a7   : > { %v7764_v54 = vpop.f32.mrf.mxu1  ;;  %12186 = vst [vmem:[#allocation58_spill] sm:$0xff] %v7770_v3 }
 0x1a8   : > { %12183 = vst [vmem:[#allocation52_spill] sm:$0xff] %v7764_v54  ;;  %v7774_v63 = vpop.f32.mrf.mxu0 }
 0x1a9   : > { %12188 = vst [vmem:[#allocation62_spill] sm:$0xff] %v7774_v63 }
 0x1ab   : > { %v7768_v27 = vpop.f32.mrf.mxu1 }
 0x1ac   : > { %12185 = vst [vmem:[#allocation56_spill] sm:$0xff] %v7768_v27  ;;  %v7780_v25 = vpop.f32.mrf.mxu0 }
 0x1ad   : > { %v7772_v34 = vpop.f32.mrf.mxu1  ;;  %12191 = vst [vmem:[#allocation67_spill] sm:$0xff] %v7780_v25 }
 0x1ae   : > { %12187 = vst [vmem:[#allocation60_spill] sm:$0xff] %v7772_v34  ;;  %v7784_v13 = vpop.f32.mrf.mxu0 }
 0x1af   : > { %12193 = vst [vmem:[#allocation74_spill] sm:$0xff] %v7784_v13 }
 0x1b1   : > { %v7776_v9 = vpop.f32.mrf.mxu1 }
 0x1b2   : > { %12189 = vst [vmem:[#allocation64_spill] sm:$0xff] %v7776_v9  ;;  %v7788_v60 = vpop.f32.mrf.mxu0 }
 0x1b3   : > { %v7778_v12 = vpop.f32.mrf.mxu1  ;;  %12195 = vst [vmem:[#allocation76_spill] sm:$0xff] %v7788_v60 }
 0x1b4   : > { %12190 = vst [vmem:[#allocation66_spill] sm:$0xff] %v7778_v12  ;;  %v7792_v3 = vpop.f32.mrf.mxu0 }
 0x1b5   : > { %12197 = vst [vmem:[#allocation78_spill] sm:$0xff] %v7792_v3 }
 0x1b7   : > { %v7782_v6 = vpop.f32.mrf.mxu1 }
 0x1b8   : > { %12192 = vst [vmem:[#allocation73_spill] sm:$0xff] %v7782_v6  ;;  %v7796_v63 = vpop.f32.mrf.mxu0 }
 0x1b9   : > { %v7786_v54 = vpop.f32.mrf.mxu1  ;;  %12199 = vst [vmem:[#allocation80_spill] sm:$0xff] %v7796_v63 }
 0x1ba   : > { %12194 = vst [vmem:[#allocation75_spill] sm:$0xff] %v7786_v54  ;;  %v7800_v12 = vpop.f32.mrf.mxu0 }
 0x1bb   : > { %12201 = vst [vmem:[#allocation82_spill] sm:$0xff] %v7800_v12 }
 0x1bd   : > { %v7790_v27 = vpop.f32.mrf.mxu1 }
 0x1be   : > { %12196 = vst [vmem:[#allocation77_spill] sm:$0xff] %v7790_v27  ;;  %v7804_v6 = vpop.f32.mrf.mxu0 }
 0x1bf   : > { %v7794_v34 = vpop.f32.mrf.mxu1  ;;  %12203 = vst [vmem:[#allocation84_spill] sm:$0xff] %v7804_v6 }
 0x1c0   : > { %12198 = vst [vmem:[#allocation79_spill] sm:$0xff] %v7794_v34  ;;  %v7808_v60 = vpop.f32.mrf.mxu0 }
 0x1c1   : > { %12205 = vst [vmem:[#allocation86_spill] sm:$0xff] %v7808_v60 }
 0x1c3   : > { %v7798_v9 = vpop.f32.mrf.mxu1 }
 0x1c4   : > { %12200 = vst [vmem:[#allocation81_spill] sm:$0xff] %v7798_v9  ;;  %v7812_v3 = vpop.f32.mrf.mxu0 }
 0x1c5   : > { %v7802_v25 = vpop.f32.mrf.mxu1  ;;  %12207 = vst [vmem:[#allocation88_spill] sm:$0xff] %v7812_v3 }
 0x1c6   : > { %12202 = vst [vmem:[#allocation83_spill] sm:$0xff] %v7802_v25  ;;  %v7816_v63 = vpop.f32.mrf.mxu0  ;;  %v521_v25 = vsub.s32 3, %v7433_v11 }
 0x1c7   : > { %12209 = vst [vmem:[#allocation90_spill] sm:$0xff] %v7816_v63 }
 0x1c8   : > { %v7869_v36 = vrot.slane %v7447_v59, %v521_v25 }
 0x1c9   : > { %v7806_v13 = vpop.f32.mrf.mxu1 }
 0x1ca   : > { %12204 = vst [vmem:[#allocation85_spill] sm:$0xff] %v7806_v13  ;;  %v7818_v48 = vpop.f32.mrf.mxu0 }
 0x1cb   : > { %v7810_v27 = vpop.f32.mrf.mxu1  ;;  %12210 = vst [vmem:[#allocation91_spill] sm:$0xff] %v7818_v48 }
 0x1cc   : > { %12206 = vst [vmem:[#allocation87_spill] sm:$0xff] %v7810_v27  ;;  %v7822_v1 = vpop.f32.mrf.mxu0 }
 0x1cd   : > { %12212 = vst [vmem:[#allocation93_spill] sm:$0xff] %v7822_v1 }
 0x1cf   : > { %v7814_v28 = vpop.f32.mrf.mxu1 }
 0x1d0   : > { %12208 = vst [vmem:[#allocation89_spill] sm:$0xff] %v7814_v28  ;;  %v7824_v34 = vpop.f32.mrf.mxu0  ;;  %v12215_v28 = vsub.s32 0, %v7433_v11 }
 0x1d1   : > { %v899_v9 = vpop.f32.mrf.mxu1  ;;  %12213 = vst [vmem:[#allocation94_spill] sm:$0xff] %v7824_v34 }
 0x1d2   : > { %v7826_v60 = vpop.f32.mrf.mxu0  ;;  %v7836_v49 = vrot.slane %v7829_v30, %v12215_v28  ;;  %v739_v28 = vadd.f32 %v7645_v50, %v7465_v23 }
 0x1d5   : > { %v7820_v12 = vpop.f32.mrf.mxu1 }
 0x1d6   : > { %12211 = vst [vmem:[#allocation92_spill] sm:$0xff] %v7820_v12  ;;  %v7831_v54 = vpop.f32.mrf.mxu0  ;;  %v12216_v12 = vsub.s32 1, %v7433_v11 }
 0x1d7   : > { %v905_v6 = vpop.f32.mrf.mxu1  ;;  %12214 = vst [vmem:[#allocation95_spill] sm:$0xff] %v7831_v54 }
 0x1d8   : > { %v7841_v48 = vrot.slane %v7829_v30, %v12216_v12  ;;  %v7843_v34 = vpop.f32.mrf.mxu0  ;;  %v659_v12 = vadd.f32 %v7486_v18, %v7457_v44  ;;  %v7866_v18 = vrot.slane %v7829_v30, %v521_v25  ;;  %v4978_v25 = vsel %vm2637_vm13, 1.0, %v12043_v22 }
 0x1db   : > { %v1542_v13 = vpop.f32.mrf.mxu1 }
 0x1dc   : > { %v1543_v26 = vadd.f32 %v1542_v13, %v7836_v49  ;;  %v1619_v63 = vpop.f32.mrf.mxu0  ;;  %v517_v13 = vsub.s32 2, %v7433_v11 }
 0x1dd   : > { %v1544_v3 = vpop.f32.mrf.mxu1 }
 0x1de   : > { %v1545_v54 = vadd.f32 %v1544_v3, %v7841_v48  ;;  %v1707_v61 = vadd.f32 %v1543_v26, %v653_v39  ;;  %v7860_v50 = vrot.slane %v7829_v30, %v517_v13  ;;  %v7863_v44 = vrot.slane %v7447_v59, %v517_v13 }
 0x1df   : > { %v1548_v32 = vpop.f32.mrf.mxu1  ;;  %v5000_v13 = vsel %vm3064_vm1, 1.0, %v12043_v22 }
 0x1e0   : > { %v1549_v47 = vadd.f32 %v1548_v32, %v7836_v49  ;;  %v1708_v45 = vadd.f32 %v1545_v54, %v739_v28  ;;  %v4933_v3 = vmul.f32 -1.442695, %v1707_v61  ;;  %v1621_v32 = vpop.f32.mrf.mxu0  ;;  %12217 = vst [vmem:[#allocation96_spill] sm:$0xff] %v7860_v50  ;;  %v1620_v23 = vadd.f32 %v1619_v63, %v7860_v50 }
 0x1e1   : > { %v1550_v1 = vpop.f32.mrf.mxu1  ;;  %v1622_v54 = vadd.f32 %v1621_v32, %v7866_v18 }
 0x1e2   : > { %v1551_v27 = vadd.f32 %v1550_v1, %v7841_v48  ;;  %v1711_v38 = vadd.f32 %v1549_v47, %v659_v12  ;;  %v4934_v39 = vmul.f32 -1.442695, %v1708_v45  ;;  %5194 = vpow2.f32 %v4933_v3  ;;  %v1625_v47 = vpop.f32.mrf.mxu0 }
 0x1e3   : > { %v814_v45 = vadd.f32 %v7673_v15, %v7863_v44  ;;  %v4980_v15 = vsel %vm2643_vm14, 1.0, %v12043_v22  ;;  %v4998_v12 = vsel %vm3058_vm15, 1.0, %v12043_v22 }
 0x1e4   : > { %v1712_v26 = vadd.f32 %v1551_v27, %v745_v2  ;;  %v4937_v1 = vmul.f32 -1.442695, %v1711_v38  ;;  %5196 = vpow2.f32 %v4934_v39  ;;  %v900_v27 = vadd.f32 %v899_v9, %v7869_v36  ;;  %v1627_v28 = vpop.f32.mrf.mxu0 }
 0x1e5   : > { %v1709_v63 = vadd.f32 %v1620_v23, %v814_v45  ;;  %v1626_v38 = vadd.f32 %v1625_v47, %v7860_v50  ;;  %v5179_v9 = vpack.i.bf16 %v4978_v25, %v4980_v15  ;;  %v820_v2 = vadd.f32 %v7686_v29, %v7863_v44 }
 0x1e6   : > { %v4938_v61 = vmul.f32 -1.442695, %v1712_v26  ;;  %5198 = vpow2.f32 %v4937_v1  ;;  %v1628_v3 = vadd.f32 %v1627_v28, %v7866_v18  ;;  %v1710_v32 = vadd.f32 %v1622_v54, %v900_v27 }
 0x1e7   : > { %5180 = vperm.xlu1 %5163, %v5179_v9   ;;  %v5189_v55 = vpack.i.bf16 %v4998_v12, %v5000_v13  ;;  %v906_v39 = vadd.f32 %v905_v6, %v7869_v36  ;;  %v1713_v26 = vadd.f32 %v1626_v38, %v820_v2  ;;  %v4935_v1 = vmul.f32 -1.442695, %v1709_v63 }
 0x1e8   : > { %5200 = vpow2.f32 %v4938_v61  ;;  %v4936_v23 = vmul.f32 -1.442695, %v1710_v32  ;;  %v525_v28 = vsub.s32 4, %v7433_v11  ;;  %v529_v38 = vsub.s32 5, %v7433_v11 }
 0x1e9   : > { %v1714_v47 = vadd.f32 %v1628_v3, %v906_v39  ;;  %v4939_v45 = vmul.f32 -1.442695, %v1713_v26  ;;  %5202 = vpow2.f32 %v4935_v1 }
 0x1ea   : > { %5204 = vpow2.f32 %v4936_v23  ;;  %v7892_v9 = vrot.slane %v7829_v30, %v525_v28  ;;  %v7895_v2 = vrot.slane %v7447_v59, %v525_v28  ;;  %v7902_v11 = vrot.slane %v7447_v59, %v529_v38 }
 0x1eb   : > { %5190 = vperm.xlu1 %5163, %v5189_v55   ;;  %v4940_v22 = vmul.f32 -1.442695, %v1714_v47  ;;  %5206 = vpow2.f32 %v4939_v45 }
 0x1ec   : > { %12218 = vst [vmem:[#allocation97_spill] sm:$0xff] %v7895_v2  ;;  %12220 = vst [vmem:[#allocation99_spill] sm:$0xff] %v7902_v11  ;;  %v981_v28 = vadd.f32 %v7689_v46, %v7895_v2 }
 0x1ed   : > { %5208 = vpow2.f32 %v4940_v22  ;;  %v1061_v22 = vadd.f32 %v7826_v60, %v7902_v11  ;;  %v1067_v60 = vadd.f32 %v7843_v34, %v7902_v11 }
 0x1ef   : > { %v5195_v61 = vpop.eup %5194 }
 0x1f0   : > { %v1739_v16 = vadd.f32 1.0, %v5195_v61  ;;  %v975_v61 = vadd.f32 %v7675_v37, %v7895_v2 }
 0x1f1   : > { %v5197_v25 = vpop.eup %5196 }
 0x1f2   : > { %v1740_v29 = vadd.f32 1.0, %v5197_v25  ;;  %5210 = vrcp.f32 %v1739_v16  ;;  %v7898_v16 = vrot.slane %v7829_v30, %v529_v38 }
 0x1f3   : > { %v5199_v15 = vpop.eup %5198 }
 0x1f4   : > { %v1743_v54 = vadd.f32 1.0, %v5199_v15  ;;  %5212 = vrcp.f32 %v1740_v29  ;;  %12219 = vst [vmem:[#allocation98_spill] sm:$0xff] %v7898_v16 }
 0x1f5   : > { %v5201_v27 = vpop.eup %5200 }
 0x1f6   : > { %v1744_v6 = vadd.f32 1.0, %v5201_v27  ;;  %5214 = vrcp.f32 %v1743_v54  ;;  %v5203_v63 = vpop.eup %5202 }
 0x1f7   : > { %v5205_v12 = vpop.eup %5204  ;;  %v1741_v3 = vadd.f32 1.0, %v5203_v63 }
 0x1f8   : > { %5216 = vrcp.f32 %v1744_v6  ;;  %v5207_v13 = vpop.eup %5206  ;;  %v1742_v39 = vadd.f32 1.0, %v5205_v12 }
 0x1f9   : > { %v1745_v47 = vadd.f32 1.0, %v5207_v13  ;;  %5218 = vrcp.f32 %v1741_v3 }
 0x1fa   : > { %v5209_v55 = vpop.eup %5208  ;;  %5220 = vrcp.f32 %v1742_v39  ;;  %v5155_v39 = vpop.permute.xlu0 %5154 }
 0x1fb   : > { %v1746_v15 = vadd.f32 1.0, %v5209_v55  ;;  %5222 = vrcp.f32 %v1745_v47  ;;  %v7917_v47 = vunpack.i.h.bf16 %v5155_v39 }
 0x1fd   : > { %12222 = vst [vmem:[#allocation101_spill] sm:$0xff] %v7917_v47 }
 0x1ff   : > { %v5211_v1 = vpop.eup %5210 }
 0x201   : > { %v5213_v30 = vpop.eup %5212 }
 0x203   : > { %v5215_v6 = vpop.eup %5214 }
 0x205   : > { %v5217_v13 = vpop.eup %5216 }
 0x206   : > { %v5219_v46 = vpop.eup %5218 }
 0x21b   : > { %v1696_v32 = vpop.f32.mrf.mxu1 }
 0x21c   : > { %v1697_v26 = vadd.f32 %v1696_v32, %v7892_v9 }
 0x21d   : > { %v1698_v23 = vpop.f32.mrf.mxu1 }
 0x21e   : > { %v1763_v45 = vmul.f32 %v5211_v1, %v1697_v26  ;;  %v1699_v25 = vadd.f32 %v1698_v23, %v7898_v16  ;;  %v7915_v26 = vunpack.i.l.bf16 %v5155_v39  ;;  %v5221_v1 = vpop.eup %5220 }
 0x21f   : > { %v1702_v29 = vpop.f32.mrf.mxu1  ;;  %v5223_v23 = vpop.eup %5222 }
 0x220   : > { %v1767_v27 = vadd.f32 %v1763_v45, %v975_v61  ;;  %v1764_v54 = vmul.f32 %v5213_v30, %v1699_v25  ;;  %v1703_v59 = vadd.f32 %v1702_v29, %v7892_v9  ;;  %12221 = vst [vmem:[#allocation100_spill] sm:$0xff] %v7915_v26  ;;  %v1775_v61 = vsub.f32 1.0, %v5219_v46  ;;  %v5160_v29 = vpop.permute.xlu0 %5159 }
 0x221   : > { %v1704_v37 = vpop.f32.mrf.mxu1  ;;  %v11541_v25 = vsub.f32 1.0, %v7915_v26  ;;  %v1776_v30 = vsub.f32 1.0, %v5221_v1 }
 0x222   : > { %5224 = vtanh.f32 %v1767_v27  ;;  %v1768_v63 = vadd.f32 %v1764_v54, %v1061_v22  ;;  %v1765_v38 = vmul.f32 %v5215_v6, %v1703_v59  ;;  %v1705_v12 = vadd.f32 %v1704_v37, %v7898_v16 }
 0x223   : > { %5226 = vrcp.f32 %v1746_v15  ;;  %v1783_v15 = vmul.f32 0.0, %v5219_v46  ;;  %v11540_v54 = vsub.f32 1.0, %v7917_v47  ;;  %v7921_v59 = vunpack.i.l.bf16 %v5160_v29 }
 0x224   : > { %5228 = vtanh.f32 %v1768_v63  ;;  %v1769_v3 = vadd.f32 %v1765_v38, %v981_v28  ;;  %v1766_v32 = vmul.f32 %v5217_v13, %v1705_v12  ;;  %v1784_v28 = vmul.f32 0.0, %v5221_v1  ;;  %v1847_v12 = vld [vmem:[%s6594_s9] sm:$0xff] }
 0x225   : > { %12223 = vst [vmem:[#allocation102_spill] sm:$0xff] %v7921_v59  ;;  %v1777_v63 = vsub.f32 1.0, %v5223_v23  ;;  %v1840_v13 = vmul.f32 0.0, %v11541_v25  ;;  %v1839_v1 = vmul.f32 0.0, %v11540_v54  ;;  %v4946_v25 = vld [vmem:[%s6594_s9 + $0x78] sm:$0xff] }
 0x226   : > { %5230 = vtanh.f32 %v1769_v3  ;;  %v1770_v55 = vadd.f32 %v1766_v32, %v1067_v60  ;;  %v7926_v60 = vunpack.i.h.bf16 %v5160_v29 }
 0x228   : > { %5232 = vtanh.f32 %v1770_v55  ;;  %12224 = vst [vmem:[#allocation103_spill] sm:$0xff] %v7926_v60 }
 0x22f   : > { %v5225_v45 = vpop.eup %5224 }
 0x230   : > { %v5227_v34 = vpop.eup %5226  ;;  %v1779_v22 = vmul.f32 %v5225_v45, %v1775_v61  ;;  %v4945_v61 = vld [vmem:[%s6594_s9 + $0x70] sm:$0xff]  ;;  %v1785_v45 = vmul.f32 0.0, %v5223_v23 }
 0x231   : > { %v5229_v27 = vpop.eup %5228  ;;  %v1778_v55 = vsub.f32 1.0, %v5227_v34 }
 0x232   : > { %v1780_v6 = vmul.f32 %v5229_v27, %v1776_v30  ;;  %v1787_v37 = vadd.f32 %v1783_v15, %v1779_v22  ;;  %v11542_v30 = vsub.f32 1.0, %v7921_v59  ;;  %v1786_v27 = vmul.f32 0.0, %v5227_v34 }
 0x233   : > { %v5231_v38 = vpop.eup %5230 }
 0x234   : > { %v1788_v3 = vadd.f32 %v1784_v28, %v1780_v6  ;;  %v1831_v32 = vmul.f32 %v7917_v47, %v1787_v37  ;;  %v1781_v39 = vmul.f32 %v5231_v38, %v1777_v63  ;;  %v1848_v63 = vld [vmem:[%s6594_s9 + $0x8] sm:$0xff]  ;;  %v11543_v38 = vsub.f32 1.0, %v7926_v60 }
 0x235   : > { %v5233_v46 = vpop.eup %5232  ;;  %v8057_v47 = vld [vmem:[%s6568_s29 + $0x1e8] sm:$0xff] }
 0x236   : > { %v1832_v22 = vmul.f32 %v7915_v26, %v1788_v3  ;;  %v1851_v15 = vadd.f32 %v1847_v12, %v1831_v32  ;;  %v1782_v29 = vmul.f32 %v5233_v46, %v1778_v55  ;;  %v1789_v6 = vadd.f32 %v1785_v45, %v1781_v39  ;;  %v7958_v39 = vld [vmem:[%s6568_s29 + $0x2f0] sm:$0xff]  ;;  %v7980_v45 = vld [vmem:[%s6568_s29 + $0x2c0] sm:$0xff]  ;;  %12229 = vst [vmem:[#allocation108_spill] sm:$0xff] %v8057_v47  ;;  %v8061_v26 = vld [vmem:[%s6568_s29 + $0x1a8] sm:$0xff] }
 0x237   : > { %v7940_v23 = vadd.f32 %v1839_v1, %v1831_v32  ;;  %v1842_v12 = vmul.f32 0.0, %v11542_v30  ;;  %v1841_v32 = vmul.f32 0.0, %v11543_v38  ;;  %v7962_v46 = vld [vmem:[%s6568_s29 + $0x2d0] sm:$0xff]  ;;  %v7972_v1 = vld [vmem:[%s6568_s29 + $0x2a8] sm:$0xff]  ;;  %v8041_v30 = vld [vmem:[%s6568_s29 + $0x218] sm:$0xff]  ;;  %12230 = vst [vmem:[#allocation109_spill] sm:$0xff] %v8061_v26 }
 0x238   : > { %v7934_v28 = vadd.f32 %v1840_v13, %v1832_v22  ;;  %1853 = vst.msk [vmem:[%s6594_s9] sm:$0xff] %vm537_vm0, %v1851_v15  ;;  %v1860_v37 = vadd.f32 %v4945_v61, %v1832_v22  ;;  %v1790_v54 = vadd.f32 %v1786_v27, %v1782_v29  ;;  %v1833_v3 = vmul.f32 %v7926_v60, %v1789_v6  ;;  %v7968_v61 = vld [vmem:[%s6568_s29 + $0x2c8] sm:$0xff]  ;;  %v7986_v22 = vld [vmem:[%s6568_s29 + $0x298] sm:$0xff]  ;;  %v7992_v15 = vld [vmem:[%s6568_s29 + $0x290] sm:$0xff] }
 0x239   : > { %v7997_v29 = vld [vmem:[%s6568_s29 + $0x268] sm:$0xff]  ;;  %v8001_v27 = vld [vmem:[%s6568_s29 + $0x2a0] sm:$0xff]  ;;  %12225 = vst [vmem:[#allocation104_spill] sm:$0xff] %v8041_v30  ;;  %v8045_v38 = vld [vmem:[%s6568_s29 + $0x1d8] sm:$0xff] }
 0x23a   : > { %4947 = vst.msk [vmem:[%s6594_s9 + $0x70] sm:$0xff] %vm537_vm0, %v1860_v37  ;;  %v1834_v34 = vmul.f32 %v7921_v59, %v1790_v54  ;;  %1964 = vmatprep.mubr.f32.mxu0 %v7934_v28  ;;  %2041 = vmatprep.mubr.f32.mxu1 %v7934_v28  ;;  %v1852_v13 = vadd.f32 %v1848_v63, %v1833_v3  ;;  %v8005_v6 = vld [vmem:[%s6568_s29 + $0x260] sm:$0xff]  ;;  %v8009_v37 = vld [vmem:[%s6568_s29 + $0x278] sm:$0xff]  ;;  %12226 = vst [vmem:[#allocation105_spill] sm:$0xff] %v8045_v38 }
 0x23b   : > { %1965 = vmatmul.mubr.f32.vlgmr.msra.gmra.mxu0 %v7940_v23  ;;  %2042 = vmatmul.mubr.f32.vlgmr.msra.gmra.mxu1 %v7940_v23  ;;  %v8013_v63 = vld [vmem:[%s6568_s29 + $0x238] sm:$0xff]  ;;  %v8049_v60 = vld [vmem:[%s6568_s29 + $0x210] sm:$0xff] }
 0x23c   : > { %v7955_v55 = vadd.f32 %v1842_v12, %v1834_v34  ;;  %v1861_v54 = vadd.f32 %v4946_v25, %v1834_v34  ;;  %2055 = vmatpush1.msra.mxu0 %v7958_v39  ;;  %2322 = vmatpush1.msra.mxu1 %v7962_v46  ;;  %1854 = vst.msk [vmem:[%s6594_s9 + $0x8] sm:$0xff] %vm537_vm0, %v1852_v13  ;;  %v8021_v34 = vld [vmem:[%s6568_s29 + $0x230] sm:$0xff]  ;;  %v8025_v12 = vld [vmem:[%s6568_s29 + $0x248] sm:$0xff]  ;;  %12227 = vst [vmem:[#allocation106_spill] sm:$0xff] %v8049_v60 }
 0x23d   : > { %2056 = vmatprep.subr.mxu0 %v7968_v61  ;;  %2323 = vmatprep.subr.mxu1 %v7972_v1  ;;  %v7975_v25 = vadd.f32 %v1841_v32, %v1833_v3  ;;  %v8017_v3 = vld [vmem:[%s6568_s29 + $0x270] sm:$0xff]  ;;  %v8029_v13 = vld [vmem:[%s6568_s29 + $0x208] sm:$0xff]  ;;  %v8033_v32 = vld [vmem:[%s6568_s29 + $0x240] sm:$0xff] }
 0x23e   : > { %4948 = vst.msk [vmem:[%s6594_s9 + $0x78] sm:$0xff] %vm537_vm0, %v1861_v54  ;;  %2057 = vmatpush1.msra.mxu0 %v7980_v45  ;;  %1970 = vmatprep.mubr.f32.mxu0 %v7955_v55  ;;  %v8037_v54 = vld [vmem:[%s6568_s29 + $0x200] sm:$0xff]  ;;  %v8053_v59 = vld [vmem:[%s6568_s29 + $0x1d0] sm:$0xff] }
 0x23f   : > { %2047 = vmatprep.mubr.f32.mxu1 %v7955_v55  ;;  %2058 = vmatprep.subr.mxu0 %v7986_v22  ;;  %12228 = vst [vmem:[#allocation107_spill] sm:$0xff] %v8053_v59 }
 0x240   : > { %1971 = vmatmul.mubr.f32.gmra.mxu0 %v7975_v25  ;;  %2048 = vmatmul.mubr.f32.gmra.mxu1 %v7975_v25 }
 0x241   : > { %2059 = vmatpush1.msra.mxu0 %v7992_v15  ;;  %2118 = vmatprep.mubr.f32.mxu0 %v7934_v28 }
 0x242   : > { %2060 = vmatprep.subr.mxu0 %v7997_v29  ;;  %2324 = vmatpush1.msra.mxu1 %v8001_v27 }
 0x243   : > { %2061 = vmatpush1.msra.mxu0 %v8005_v6  ;;  %2325 = vmatprep.subr.mxu1 %v8009_v37 }
 0x244   : > { %2062 = vmatprep.subr.mxu0 %v8013_v63  ;;  %2326 = vmatpush1.msra.mxu1 %v8017_v3 }
 0x245   : > { %2063 = vmatpush1.msra.mxu0 %v8021_v34  ;;  %2327 = vmatprep.subr.mxu1 %v8025_v12 }
 0x246   : > { %2064 = vmatprep.subr.mxu0 %v8029_v13  ;;  %2328 = vmatpush1.msra.mxu1 %v8033_v32 }
 0x247   : > { %2065 = vmatpush1.msra.mxu0 %v8037_v54  ;;  %2329 = vmatprep.subr.mxu1 %v8041_v30  ;;  %v8500_v30 = vld [vmem:[%s6568_s29 + $0x258] sm:$0xff] }
 0x248   : > { %2066 = vmatprep.subr.mxu0 %v8045_v38  ;;  %2330 = vmatpush1.msra.mxu1 %v8049_v60  ;;  %v8065_v38 = vld [vmem:[%s6568_s29 + $0x1e0] sm:$0xff] }
 0x249   : > { %2067 = vmatpush1.msra.mxu0 %v8053_v59  ;;  %2331 = vmatprep.subr.mxu1 %v8057_v47  ;;  %12231 = vst [vmem:[#allocation110_spill] sm:$0xff] %v8065_v38  ;;  %v8069_v60 = vld [vmem:[%s6568_s29 + $0x1a0] sm:$0xff]  ;;  %v8073_v59 = vld [vmem:[%s6568_s29 + $0x1b8] sm:$0xff] }
 0x24a   : > { %2068 = vmatprep.subr.mxu0 %v8061_v26  ;;  %2332 = vmatpush1.msra.mxu1 %v8065_v38  ;;  %12232 = vst [vmem:[#allocation111_spill] sm:$0xff] %v8069_v60  ;;  %12233 = vst [vmem:[#allocation112_spill] sm:$0xff] %v8073_v59  ;;  %v8077_v47 = vld [vmem:[%s6568_s29 + $0x178] sm:$0xff]  ;;  %v8081_v26 = vld [vmem:[%s6568_s29 + $0x1b0] sm:$0xff] }
 0x24b   : > { %2069 = vmatpush1.msra.mxu0 %v8069_v60  ;;  %2333 = vmatprep.subr.mxu1 %v8073_v59  ;;  %12234 = vst [vmem:[#allocation113_spill] sm:$0xff] %v8077_v47  ;;  %12235 = vst [vmem:[#allocation114_spill] sm:$0xff] %v8081_v26  ;;  %v8085_v38 = vld [vmem:[%s6568_s29 + $0x170] sm:$0xff]  ;;  %v8089_v60 = vld [vmem:[%s6568_s29 + $0x188] sm:$0xff] }
 0x24c   : > { %2070 = vmatprep.subr.mxu0 %v8077_v47  ;;  %2334 = vmatpush1.msra.mxu1 %v8081_v26  ;;  %12236 = vst [vmem:[#allocation115_spill] sm:$0xff] %v8085_v38  ;;  %12237 = vst [vmem:[#allocation116_spill] sm:$0xff] %v8089_v60  ;;  %v8093_v59 = vld [vmem:[%s6568_s29 + $0x148] sm:$0xff]  ;;  %v8097_v47 = vld [vmem:[%s6568_s29 + $0x180] sm:$0xff] }
 0x24d   : > { %2071 = vmatpush1.msra.mxu0 %v8085_v38  ;;  %2335 = vmatprep.subr.mxu1 %v8089_v60  ;;  %12238 = vst [vmem:[#allocation117_spill] sm:$0xff] %v8093_v59  ;;  %12239 = vst [vmem:[#allocation118_spill] sm:$0xff] %v8097_v47  ;;  %v8101_v26 = vld [vmem:[%s6568_s29 + $0x140] sm:$0xff]  ;;  %v8105_v38 = vld [vmem:[%s6568_s29 + $0x158] sm:$0xff] }
 0x24e   : > { %2072 = vmatprep.subr.mxu0 %v8093_v59  ;;  %2336 = vmatpush1.msra.mxu1 %v8097_v47  ;;  %12240 = vst [vmem:[#allocation119_spill] sm:$0xff] %v8101_v26  ;;  %12241 = vst [vmem:[#allocation120_spill] sm:$0xff] %v8105_v38  ;;  %v8109_v60 = vld [vmem:[%s6568_s29 + $0x118] sm:$0xff]  ;;  %v8113_v59 = vld [vmem:[%s6568_s29 + $0x150] sm:$0xff] }
 0x24f   : > { %2073 = vmatpush1.msra.mxu0 %v8101_v26  ;;  %2337 = vmatprep.subr.mxu1 %v8105_v38  ;;  %12242 = vst [vmem:[#allocation121_spill] sm:$0xff] %v8109_v60  ;;  %12243 = vst [vmem:[#allocation122_spill] sm:$0xff] %v8113_v59  ;;  %v8117_v47 = vld [vmem:[%s6568_s29 + $0x110] sm:$0xff]  ;;  %v8121_v26 = vld [vmem:[%s6568_s29 + $0x128] sm:$0xff] }
 0x250   : > { %2074 = vmatprep.subr.mxu0 %v8109_v60  ;;  %2338 = vmatpush1.msra.mxu1 %v8113_v59  ;;  %12244 = vst [vmem:[#allocation123_spill] sm:$0xff] %v8117_v47  ;;  %12245 = vst [vmem:[#allocation124_spill] sm:$0xff] %v8121_v26  ;;  %v8125_v38 = vld [vmem:[%s6568_s29 + $0xe8] sm:$0xff]  ;;  %v8129_v60 = vld [vmem:[%s6568_s29 + $0x120] sm:$0xff] }
 0x251   : > { %2075 = vmatpush1.msra.mxu0 %v8117_v47  ;;  %2339 = vmatprep.subr.mxu1 %v8121_v26  ;;  %12246 = vst [vmem:[#allocation125_spill] sm:$0xff] %v8125_v38  ;;  %12247 = vst [vmem:[#allocation126_spill] sm:$0xff] %v8129_v60  ;;  %v8133_v59 = vld [vmem:[%s6568_s29 + $0xe0] sm:$0xff]  ;;  %v8137_v47 = vld [vmem:[%s6568_s29 + $0xf8] sm:$0xff] }
 0x252   : > { %2076 = vmatprep.subr.mxu0 %v8125_v38  ;;  %2340 = vmatpush1.msra.mxu1 %v8129_v60  ;;  %12248 = vst [vmem:[#allocation127_spill] sm:$0xff] %v8133_v59  ;;  %12249 = vst [vmem:[#allocation128_spill] sm:$0xff] %v8137_v47  ;;  %v8141_v26 = vld [vmem:[%s6568_s29 + $0xb8] sm:$0xff]  ;;  %v8145_v38 = vld [vmem:[%s6568_s29 + $0xf0] sm:$0xff] }
 0x253   : > { %2077 = vmatpush1.msra.mxu0 %v8133_v59  ;;  %2341 = vmatprep.subr.mxu1 %v8137_v47  ;;  %12250 = vst [vmem:[#allocation129_spill] sm:$0xff] %v8141_v26  ;;  %12251 = vst [vmem:[#allocation130_spill] sm:$0xff] %v8145_v38  ;;  %v8149_v60 = vld [vmem:[%s6568_s29 + $0xb0] sm:$0xff]  ;;  %v8153_v59 = vld [vmem:[%s6568_s29 + $0xc8] sm:$0xff] }
 0x254   : > { %2078 = vmatprep.subr.mxu0 %v8141_v26  ;;  %2342 = vmatpush1.msra.mxu1 %v8145_v38  ;;  %12252 = vst [vmem:[#allocation131_spill] sm:$0xff] %v8149_v60  ;;  %12253 = vst [vmem:[#allocation132_spill] sm:$0xff] %v8153_v59  ;;  %v8157_v47 = vld [vmem:[%s6568_s29 + $0x88] sm:$0xff]  ;;  %v8161_v26 = vld [vmem:[%s6568_s29 + $0xc0] sm:$0xff] }
 0x255   : > { %2079 = vmatpush1.msra.mxu0 %v8149_v60  ;;  %2343 = vmatprep.subr.mxu1 %v8153_v59  ;;  %12254 = vst [vmem:[#allocation133_spill] sm:$0xff] %v8157_v47  ;;  %12255 = vst [vmem:[#allocation134_spill] sm:$0xff] %v8161_v26  ;;  %v8165_v38 = vld [vmem:[%s6568_s29 + $0x80] sm:$0xff]  ;;  %v8169_v60 = vld [vmem:[%s6568_s29 + $0x98] sm:$0xff] }
 0x256   : > { %2080 = vmatprep.subr.mxu0 %v8157_v47  ;;  %2344 = vmatpush1.msra.mxu1 %v8161_v26  ;;  %12256 = vst [vmem:[#allocation135_spill] sm:$0xff] %v8165_v38  ;;  %12257 = vst [vmem:[#allocation136_spill] sm:$0xff] %v8169_v60  ;;  %v8173_v59 = vld [vmem:[%s6568_s29 + $0x58] sm:$0xff]  ;;  %v8177_v47 = vld [vmem:[%s6568_s29 + $0x90] sm:$0xff] }
 0x257   : > { %2081 = vmatpush1.msra.mxu0 %v8165_v38  ;;  %2345 = vmatprep.subr.mxu1 %v8169_v60  ;;  %12258 = vst [vmem:[#allocation137_spill] sm:$0xff] %v8173_v59  ;;  %12259 = vst [vmem:[#allocation138_spill] sm:$0xff] %v8177_v47  ;;  %v8181_v26 = vld [vmem:[%s6568_s29 + $0x50] sm:$0xff]  ;;  %v8185_v38 = vld [vmem:[%s6568_s29 + $0x68] sm:$0xff] }
 0x258   : > { %2082 = vmatprep.subr.mxu0 %v8173_v59  ;;  %2346 = vmatpush1.msra.mxu1 %v8177_v47  ;;  %12260 = vst [vmem:[#allocation139_spill] sm:$0xff] %v8181_v26  ;;  %12261 = vst [vmem:[#allocation140_spill] sm:$0xff] %v8185_v38  ;;  %v8189_v60 = vld [vmem:[%s6568_s29 + $0x28] sm:$0xff]  ;;  %v8193_v59 = vld [vmem:[%s6568_s29 + $0x60] sm:$0xff] }
 0x259   : > { %2083 = vmatpush1.msra.mxu0 %v8181_v26  ;;  %2347 = vmatprep.subr.mxu1 %v8185_v38  ;;  %12262 = vst [vmem:[#allocation141_spill] sm:$0xff] %v8189_v60  ;;  %12263 = vst [vmem:[#allocation142_spill] sm:$0xff] %v8193_v59  ;;  %v8197_v47 = vld [vmem:[%s6568_s29 + $0x20] sm:$0xff]  ;;  %v8201_v26 = vld [vmem:[%s6568_s29 + $0x38] sm:$0xff] }
 0x25a   : > { %2084 = vmatprep.subr.mxu0 %v8189_v60  ;;  %2348 = vmatpush1.msra.mxu1 %v8193_v59  ;;  %12264 = vst [vmem:[#allocation143_spill] sm:$0xff] %v8197_v47  ;;  %12265 = vst [vmem:[#allocation144_spill] sm:$0xff] %v8201_v26  ;;  %v8205_v38 = vld [vmem:[%s6568_s29 + $0x5f8] sm:$0xff]  ;;  %v8209_v60 = vld [vmem:[%s6568_s29 + $0x30] sm:$0xff] }
 0x25b   : > { %2085 = vmatpush1.msra.mxu0 %v8197_v47  ;;  %2349 = vmatprep.subr.mxu1 %v8201_v26  ;;  %12266 = vst [vmem:[#allocation145_spill] sm:$0xff] %v8205_v38  ;;  %12267 = vst [vmem:[#allocation146_spill] sm:$0xff] %v8209_v60  ;;  %v8213_v59 = vld [vmem:[%s6568_s29 + $0x5f0] sm:$0xff]  ;;  %v8217_v47 = vld [vmem:[%s6568_s29 + $0x8] sm:$0xff] }
 0x25c   : > { %2086 = vmatprep.subr.mxu0 %v8205_v38  ;;  %2350 = vmatpush1.msra.mxu1 %v8209_v60  ;;  %12268 = vst [vmem:[#allocation147_spill] sm:$0xff] %v8213_v59  ;;  %12269 = vst [vmem:[#allocation148_spill] sm:$0xff] %v8217_v47  ;;  %v8221_v26 = vld [vmem:[%s6568_s29 + $0x5c8] sm:$0xff]  ;;  %v8225_v38 = vld [vmem:[%s6568_s29] sm:$0xff] }
 0x25d   : > { %2087 = vmatpush2.msra.mxu0 %v8213_v59  ;;  %2351 = vmatprep.subr.mxu1 %v8217_v47  ;;  %12270 = vst [vmem:[#allocation149_spill] sm:$0xff] %v8221_v26  ;;  %12271 = vst [vmem:[#allocation150_spill] sm:$0xff] %v8225_v38  ;;  %v8229_v60 = vld [vmem:[%s6568_s29 + $0x5c0] sm:$0xff]  ;;  %v8233_v59 = vld [vmem:[%s6568_s29 + $0x5d8] sm:$0xff] }
 0x25e   : > { %2088 = vmatprep.subr.mxu0 %v8221_v26  ;;  %2352 = vmatpush1.msra.mxu1 %v8225_v38  ;;  %12272 = vst [vmem:[#allocation151_spill] sm:$0xff] %v8229_v60  ;;  %12273 = vst [vmem:[#allocation152_spill] sm:$0xff] %v8233_v59  ;;  %v8237_v47 = vld [vmem:[%s6568_s29 + $0x598] sm:$0xff]  ;;  %v8241_v26 = vld [vmem:[%s6568_s29 + $0x5d0] sm:$0xff] }
 0x25f   : > { %2089 = vmatpush2.msra.mxu0 %v8229_v60  ;;  %2353 = vmatprep.subr.mxu1 %v8233_v59  ;;  %12274 = vst [vmem:[#allocation153_spill] sm:$0xff] %v8237_v47  ;;  %12275 = vst [vmem:[#allocation154_spill] sm:$0xff] %v8241_v26  ;;  %v8245_v38 = vld [vmem:[%s6568_s29 + $0x590] sm:$0xff]  ;;  %v8249_v60 = vld [vmem:[%s6568_s29 + $0x5a8] sm:$0xff] }
 0x260   : > { %2090 = vmatprep.subr.mxu0 %v8237_v47  ;;  %2354 = vmatpush2.msra.mxu1 %v8241_v26  ;;  %12276 = vst [vmem:[#allocation155_spill] sm:$0xff] %v8245_v38  ;;  %12277 = vst [vmem:[#allocation156_spill] sm:$0xff] %v8249_v60  ;;  %v8253_v59 = vld [vmem:[%s6568_s29 + $0x568] sm:$0xff]  ;;  %v8257_v47 = vld [vmem:[%s6568_s29 + $0x5a0] sm:$0xff] }
 0x261   : > { %2091 = vmatpush2.msra.mxu0 %v8245_v38  ;;  %2355 = vmatprep.subr.mxu1 %v8249_v60  ;;  %12278 = vst [vmem:[#allocation157_spill] sm:$0xff] %v8253_v59  ;;  %12279 = vst [vmem:[#allocation158_spill] sm:$0xff] %v8257_v47  ;;  %v8261_v26 = vld [vmem:[%s6568_s29 + $0x560] sm:$0xff]  ;;  %v8265_v38 = vld [vmem:[%s6568_s29 + $0x578] sm:$0xff] }
 0x262   : > { %2092 = vmatprep.subr.mxu0 %v8253_v59  ;;  %2356 = vmatpush2.msra.mxu1 %v8257_v47  ;;  %12280 = vst [vmem:[#allocation159_spill] sm:$0xff] %v8261_v26  ;;  %12281 = vst [vmem:[#allocation160_spill] sm:$0xff] %v8265_v38  ;;  %v8269_v60 = vld [vmem:[%s6568_s29 + $0x538] sm:$0xff]  ;;  %v8273_v59 = vld [vmem:[%s6568_s29 + $0x570] sm:$0xff] }
 0x263   : > { %2093 = vmatpush2.msra.mxu0 %v8261_v26  ;;  %2357 = vmatprep.subr.mxu1 %v8265_v38  ;;  %12282 = vst [vmem:[#allocation161_spill] sm:$0xff] %v8269_v60  ;;  %12283 = vst [vmem:[#allocation162_spill] sm:$0xff] %v8273_v59  ;;  %v8277_v47 = vld [vmem:[%s6568_s29 + $0x530] sm:$0xff]  ;;  %v8281_v26 = vld [vmem:[%s6568_s29 + $0x548] sm:$0xff] }
 0x264   : > { %2094 = vmatprep.subr.mxu0 %v8269_v60  ;;  %2358 = vmatpush2.msra.mxu1 %v8273_v59  ;;  %12284 = vst [vmem:[#allocation163_spill] sm:$0xff] %v8277_v47  ;;  %12285 = vst [vmem:[#allocation164_spill] sm:$0xff] %v8281_v26  ;;  %v8285_v38 = vld [vmem:[%s6568_s29 + $0x508] sm:$0xff]  ;;  %v8289_v60 = vld [vmem:[%s6568_s29 + $0x540] sm:$0xff] }
 0x265   : > { %2095 = vmatpush2.msra.mxu0 %v8277_v47  ;;  %2359 = vmatprep.subr.mxu1 %v8281_v26  ;;  %12286 = vst [vmem:[#allocation165_spill] sm:$0xff] %v8285_v38  ;;  %12287 = vst [vmem:[#allocation166_spill] sm:$0xff] %v8289_v60  ;;  %v8293_v59 = vld [vmem:[%s6568_s29 + $0x500] sm:$0xff]  ;;  %v8297_v47 = vld [vmem:[%s6568_s29 + $0x518] sm:$0xff] }
 0x266   : > { %2096 = vmatprep.subr.mxu0 %v8285_v38  ;;  %2360 = vmatpush2.msra.mxu1 %v8289_v60  ;;  %12288 = vst [vmem:[#allocation167_spill] sm:$0xff] %v8293_v59  ;;  %12289 = vst [vmem:[#allocation168_spill] sm:$0xff] %v8297_v47  ;;  %v8301_v26 = vld [vmem:[%s6568_s29 + $0x4d8] sm:$0xff]  ;;  %v8305_v38 = vld [vmem:[%s6568_s29 + $0x510] sm:$0xff] }
 0x267   : > { %2097 = vmatpush2.msra.mxu0 %v8293_v59  ;;  %2361 = vmatprep.subr.mxu1 %v8297_v47  ;;  %12290 = vst [vmem:[#allocation169_spill] sm:$0xff] %v8301_v26  ;;  %12291 = vst [vmem:[#allocation170_spill] sm:$0xff] %v8305_v38  ;;  %v8309_v60 = vld [vmem:[%s6568_s29 + $0x4d0] sm:$0xff]  ;;  %v8313_v59 = vld [vmem:[%s6568_s29 + $0x4e8] sm:$0xff] }
 0x268   : > { %2098 = vmatprep.subr.mxu0 %v8301_v26  ;;  %2362 = vmatpush2.msra.mxu1 %v8305_v38  ;;  %12292 = vst [vmem:[#allocation171_spill] sm:$0xff] %v8309_v60  ;;  %12293 = vst [vmem:[#allocation172_spill] sm:$0xff] %v8313_v59  ;;  %v8317_v47 = vld [vmem:[%s6568_s29 + $0x4a8] sm:$0xff]  ;;  %v8321_v26 = vld [vmem:[%s6568_s29 + $0x4e0] sm:$0xff] }
 0x269   : > { %2099 = vmatpush2.msra.mxu0 %v8309_v60  ;;  %2363 = vmatprep.subr.mxu1 %v8313_v59  ;;  %12294 = vst [vmem:[#allocation173_spill] sm:$0xff] %v8317_v47  ;;  %12295 = vst [vmem:[#allocation174_spill] sm:$0xff] %v8321_v26  ;;  %v8325_v38 = vld [vmem:[%s6568_s29 + $0x4a0] sm:$0xff]  ;;  %v8329_v60 = vld [vmem:[%s6568_s29 + $0x4b8] sm:$0xff] }
 0x26a   : > { %2100 = vmatprep.subr.mxu0 %v8317_v47  ;;  %2364 = vmatpush2.msra.mxu1 %v8321_v26  ;;  %12296 = vst [vmem:[#allocation175_spill] sm:$0xff] %v8325_v38  ;;  %12297 = vst [vmem:[#allocation176_spill] sm:$0xff] %v8329_v60  ;;  %v8333_v59 = vld [vmem:[%s6568_s29 + $0x478] sm:$0xff]  ;;  %v8337_v47 = vld [vmem:[%s6568_s29 + $0x4b0] sm:$0xff] }
 0x26b   : > { %2101 = vmatpush2.msra.mxu0 %v8325_v38  ;;  %2365 = vmatprep.subr.mxu1 %v8329_v60  ;;  %12298 = vst [vmem:[#allocation177_spill] sm:$0xff] %v8333_v59  ;;  %12299 = vst [vmem:[#allocation178_spill] sm:$0xff] %v8337_v47  ;;  %v8341_v26 = vld [vmem:[%s6568_s29 + $0x470] sm:$0xff]  ;;  %v8345_v38 = vld [vmem:[%s6568_s29 + $0x488] sm:$0xff] }
 0x26c   : > { %2102 = vmatprep.subr.mxu0 %v8333_v59  ;;  %2366 = vmatpush2.msra.mxu1 %v8337_v47  ;;  %12300 = vst [vmem:[#allocation179_spill] sm:$0xff] %v8341_v26  ;;  %12301 = vst [vmem:[#allocation180_spill] sm:$0xff] %v8345_v38  ;;  %v8349_v60 = vld [vmem:[%s6568_s29 + $0x448] sm:$0xff]  ;;  %v8353_v59 = vld [vmem:[%s6568_s29 + $0x480] sm:$0xff] }
 0x26d   : > { %2103 = vmatpush2.msra.mxu0 %v8341_v26  ;;  %2367 = vmatprep.subr.mxu1 %v8345_v38  ;;  %12302 = vst [vmem:[#allocation181_spill] sm:$0xff] %v8349_v60  ;;  %12303 = vst [vmem:[#allocation182_spill] sm:$0xff] %v8353_v59  ;;  %v8357_v47 = vld [vmem:[%s6568_s29 + $0x440] sm:$0xff]  ;;  %v8361_v26 = vld [vmem:[%s6568_s29 + $0x458] sm:$0xff] }
 0x26e   : > { %2104 = vmatprep.subr.mxu0 %v8349_v60  ;;  %2368 = vmatpush2.msra.mxu1 %v8353_v59  ;;  %12304 = vst [vmem:[#allocation183_spill] sm:$0xff] %v8357_v47  ;;  %12305 = vst [vmem:[#allocation184_spill] sm:$0xff] %v8361_v26  ;;  %v8365_v38 = vld [vmem:[%s6568_s29 + $0x418] sm:$0xff]  ;;  %v8369_v60 = vld [vmem:[%s6568_s29 + $0x450] sm:$0xff] }
 0x26f   : > { %2105 = vmatpush2.msra.mxu0 %v8357_v47  ;;  %2369 = vmatprep.subr.mxu1 %v8361_v26  ;;  %12306 = vst [vmem:[#allocation185_spill] sm:$0xff] %v8365_v38  ;;  %12307 = vst [vmem:[#allocation186_spill] sm:$0xff] %v8369_v60  ;;  %v8373_v59 = vld [vmem:[%s6568_s29 + $0x410] sm:$0xff]  ;;  %v8377_v47 = vld [vmem:[%s6568_s29 + $0x428] sm:$0xff] }
 0x270   : > { %2106 = vmatprep.subr.mxu0 %v8365_v38  ;;  %2370 = vmatpush2.msra.mxu1 %v8369_v60  ;;  %12308 = vst [vmem:[#allocation187_spill] sm:$0xff] %v8373_v59  ;;  %12309 = vst [vmem:[#allocation188_spill] sm:$0xff] %v8377_v47  ;;  %v8381_v26 = vld [vmem:[%s6568_s29 + $0x3e8] sm:$0xff]  ;;  %v8385_v38 = vld [vmem:[%s6568_s29 + $0x420] sm:$0xff] }
 0x271   : > { %2107 = vmatpush2.msra.mxu0 %v8373_v59  ;;  %2371 = vmatprep.subr.mxu1 %v8377_v47  ;;  %12310 = vst [vmem:[#allocation189_spill] sm:$0xff] %v8381_v26  ;;  %12311 = vst [vmem:[#allocation190_spill] sm:$0xff] %v8385_v38  ;;  %v8389_v60 = vld [vmem:[%s6568_s29 + $0x3e0] sm:$0xff]  ;;  %v8393_v59 = vld [vmem:[%s6568_s29 + $0x3f8] sm:$0xff] }
 0x272   : > { %2108 = vmatprep.subr.mxu0 %v8381_v26  ;;  %2372 = vmatpush2.msra.mxu1 %v8385_v38  ;;  %12312 = vst [vmem:[#allocation191_spill] sm:$0xff] %v8389_v60  ;;  %12313 = vst [vmem:[#allocation192_spill] sm:$0xff] %v8393_v59  ;;  %v8397_v47 = vld [vmem:[%s6568_s29 + $0x3b8] sm:$0xff]  ;;  %v8401_v26 = vld [vmem:[%s6568_s29 + $0x3f0] sm:$0xff] }
 0x273   : > { %2109 = vmatpush2.msra.mxu0 %v8389_v60  ;;  %2373 = vmatprep.subr.mxu1 %v8393_v59  ;;  %12314 = vst [vmem:[#allocation193_spill] sm:$0xff] %v8397_v47  ;;  %12315 = vst [vmem:[#allocation194_spill] sm:$0xff] %v8401_v26  ;;  %v8405_v38 = vld [vmem:[%s6568_s29 + $0x3b0] sm:$0xff]  ;;  %v8409_v60 = vld [vmem:[%s6568_s29 + $0x3c8] sm:$0xff] }
 0x274   : > { %2110 = vmatprep.subr.mxu0 %v8397_v47  ;;  %2374 = vmatpush2.msra.mxu1 %v8401_v26  ;;  %12316 = vst [vmem:[#allocation195_spill] sm:$0xff] %v8405_v38  ;;  %12317 = vst [vmem:[#allocation196_spill] sm:$0xff] %v8409_v60  ;;  %v8413_v59 = vld [vmem:[%s6568_s29 + $0x388] sm:$0xff]  ;;  %v8417_v47 = vld [vmem:[%s6568_s29 + $0x3c0] sm:$0xff] }
 0x275   : > { %2111 = vmatpush2.msra.mxu0 %v8405_v38  ;;  %2375 = vmatprep.subr.mxu1 %v8409_v60  ;;  %12318 = vst [vmem:[#allocation197_spill] sm:$0xff] %v8413_v59  ;;  %12319 = vst [vmem:[#allocation198_spill] sm:$0xff] %v8417_v47  ;;  %v8421_v26 = vld [vmem:[%s6568_s29 + $0x380] sm:$0xff]  ;;  %v8425_v38 = vld [vmem:[%s6568_s29 + $0x398] sm:$0xff] }
 0x276   : > { %2112 = vmatprep.subr.mxu0 %v8413_v59  ;;  %2376 = vmatpush2.msra.mxu1 %v8417_v47  ;;  %12320 = vst [vmem:[#allocation199_spill] sm:$0xff] %v8421_v26  ;;  %12321 = vst [vmem:[#allocation200_spill] sm:$0xff] %v8425_v38  ;;  %v8429_v60 = vld [vmem:[%s6568_s29 + $0x358] sm:$0xff]  ;;  %v8433_v59 = vld [vmem:[%s6568_s29 + $0x390] sm:$0xff] }
 0x277   : > { %2113 = vmatpush2.msra.mxu0 %v8421_v26  ;;  %2377 = vmatprep.subr.mxu1 %v8425_v38  ;;  %12322 = vst [vmem:[#allocation201_spill] sm:$0xff] %v8429_v60  ;;  %12323 = vst [vmem:[#allocation202_spill] sm:$0xff] %v8433_v59  ;;  %v8437_v47 = vld [vmem:[%s6568_s29 + $0x350] sm:$0xff]  ;;  %v8441_v26 = vld [vmem:[%s6568_s29 + $0x368] sm:$0xff] }
 0x278   : > { %2114 = vmatprep.subr.mxu0 %v8429_v60  ;;  %2378 = vmatpush2.msra.mxu1 %v8433_v59  ;;  %12324 = vst [vmem:[#allocation203_spill] sm:$0xff] %v8437_v47  ;;  %12325 = vst [vmem:[#allocation204_spill] sm:$0xff] %v8441_v26  ;;  %v8445_v38 = vld [vmem:[%s6568_s29 + $0x328] sm:$0xff]  ;;  %v8449_v60 = vld [vmem:[%s6568_s29 + $0x360] sm:$0xff] }
 0x279   : > { %2115 = vmatpush2.msra.mxu0 %v8437_v47  ;;  %2379 = vmatprep.subr.mxu1 %v8441_v26  ;;  %12326 = vst [vmem:[#allocation205_spill] sm:$0xff] %v8445_v38  ;;  %12327 = vst [vmem:[#allocation206_spill] sm:$0xff] %v8449_v60  ;;  %v8453_v59 = vld [vmem:[%s6568_s29 + $0x320] sm:$0xff]  ;;  %v8457_v47 = vld [vmem:[%s6568_s29 + $0x338] sm:$0xff] }
 0x27a   : > { %2116 = vmatprep.subr.mxu0 %v8445_v38  ;;  %2380 = vmatpush2.msra.mxu1 %v8449_v60  ;;  %12328 = vst [vmem:[#allocation207_spill] sm:$0xff] %v8453_v59  ;;  %12329 = vst [vmem:[#allocation208_spill] sm:$0xff] %v8457_v47  ;;  %v8462_v26 = vld [vmem:[%s6568_s29 + $0x2e8] sm:$0xff]  ;;  %v8467_v60 = vld [vmem:[%s6568_s29 + $0x2e0] sm:$0xff] }
 0x27b   : > { %2117 = vmatpush2.msra.mxu0 %v8453_v59  ;;  %2381 = vmatprep.subr.mxu1 %v8457_v47  ;;  %12330 = vst [vmem:[#allocation209_spill] sm:$0xff] %v8462_v26  ;;  %12331 = vst [vmem:[#allocation210_spill] sm:$0xff] %v8467_v60  ;;  %v8471_v59 = vld [vmem:[%s6568_s29 + $0x2b8] sm:$0xff]  ;;  %v8475_v47 = vld [vmem:[%s6568_s29 + $0x330] sm:$0xff] }
 0x27c   : > { %2119 = vmatmul.mubr.f32.vlgmr.msra.gmra.mxu0 %v7940_v23  ;;  %2398 = vmatprep.subr.mxu0 %v8462_v26  ;;  %12332 = vst [vmem:[#allocation211_spill] sm:$0xff] %v8471_v59  ;;  %12333 = vst [vmem:[#allocation212_spill] sm:$0xff] %v8475_v47  ;;  %v8479_v38 = vld [vmem:[%s6568_s29 + $0x2b0] sm:$0xff]  ;;  %v8483_v26 = vld [vmem:[%s6568_s29 + $0x308] sm:$0xff] }
 0x27d   : > { %2124 = vmatprep.mubr.f32.mxu0 %v7955_v55  ;;  %2399 = vmatpush1.msra.mxu0 %v8467_v60  ;;  %12334 = vst [vmem:[#allocation213_spill] sm:$0xff] %v8479_v38  ;;  %12335 = vst [vmem:[#allocation214_spill] sm:$0xff] %v8483_v26  ;;  %v8488_v60 = vld [vmem:[%s6568_s29 + $0x288] sm:$0xff] }
 0x27e   : > { %2400 = vmatprep.subr.mxu0 %v8471_v59  ;;  %2382 = vmatpush2.msra.mxu1 %v8475_v47  ;;  %v8492_v59 = vld [vmem:[%s6568_s29 + $0x280] sm:$0xff] }
 0x27f   : > { %2401 = vmatpush1.msra.mxu0 %v8479_v38  ;;  %2383 = vmatprep.subr.mxu1 %v8483_v26  ;;  %v8496_v47 = vld [vmem:[%s6568_s29 + $0x300] sm:$0xff]  ;;  %v8504_v38 = vld [vmem:[%s6568_s29 + $0x2f8] sm:$0xff]  ;;  %v8508_v26 = vld [vmem:[%s6568_s29 + $0x250] sm:$0xff] }
 0x280   : > { %2125 = vmatmul.mubr.f32.gmra.mxu0 %v7975_v25  ;;  %2402 = vmatprep.subr.mxu0 %v8488_v60 }
 0x281   : > { %2403 = vmatpush1.msra.mxu0 %v8492_v59  ;;  %2384 = vmatpush2.msra.mxu1 %v8496_v47 }
 0x282   : > { %2404 = vmatprep.subr.mxu0 %v8500_v30  ;;  %2475 = vmatprep.subr.mxu1 %v8504_v38 }
 0x283   : > { %2405 = vmatpush1.msra.mxu0 %v8508_v26 }
 0x284   : > { %2406 = vmatprep.subr.mxu0 %v7504_v5  ;;  %v8533_v5 = vld [vmem:[%s6568_s29 + $0x40] sm:$0xff] }
 0x285   : > { %2407 = vmatpush1.msra.mxu0 %v7509_v14  ;;  %v8537_v14 = vld [vmem:[%s6568_s29 + $0x18] sm:$0xff] }
 0x286   : > { %2408 = vmatprep.subr.mxu0 %v7520_v24  ;;  %v8541_v24 = vld [vmem:[%s6568_s29 + $0x10] sm:$0xff] }
 0x287   : > { %2409 = vmatpush1.msra.mxu0 %v7525_v35  ;;  %v8545_v35 = vld [vmem:[%s6568_s29 + $0x5e8] sm:$0xff] }
 0x288   : > { %2410 = vmatprep.subr.mxu0 %v7536_v53  ;;  %v8549_v53 = vld [vmem:[%s6568_s29 + $0x5e0] sm:$0xff] }
 0x289   : > { %2411 = vmatpush1.msra.mxu0 %v7541_v41  ;;  %v8553_v41 = vld [vmem:[%s6568_s29 + $0x5b8] sm:$0xff] }
 0x28a   : > { %2412 = vmatprep.subr.mxu0 %v7552_v10  ;;  %12336 = vst [vmem:[#allocation215_spill] sm:$0xff] %v8553_v41  ;;  %v8557_v10 = vld [vmem:[%s6568_s29 + $0x5b0] sm:$0xff] }
 0x28b   : > { %2413 = vmatpush1.msra.mxu0 %v7557_v51  ;;  %12337 = vst [vmem:[#allocation216_spill] sm:$0xff] %v8557_v10  ;;  %v8561_v51 = vld [vmem:[%s6568_s29 + $0x588] sm:$0xff] }
 0x28c   : > { %2414 = vmatprep.subr.mxu0 %v7568_v43  ;;  %12338 = vst [vmem:[#allocation217_spill] sm:$0xff] %v8561_v51  ;;  %v8565_v43 = vld [vmem:[%s6568_s29 + $0x580] sm:$0xff] }
 0x28d   : > { %2415 = vmatpush1.msra.mxu0 %v7573_v42  ;;  %12339 = vst [vmem:[#allocation218_spill] sm:$0xff] %v8565_v43  ;;  %v8569_v42 = vld [vmem:[%s6568_s29 + $0x558] sm:$0xff] }
 0x28e   : > { %2416 = vmatprep.subr.mxu0 %v7584_v0  ;;  %12340 = vst [vmem:[#allocation219_spill] sm:$0xff] %v8569_v42  ;;  %v8573_v0 = vld [vmem:[%s6568_s29 + $0x550] sm:$0xff] }
 0x28f   : > { %2417 = vmatpush1.msra.mxu0 %v7589_v56  ;;  %12341 = vst [vmem:[#allocation220_spill] sm:$0xff] %v8573_v0  ;;  %v8577_v56 = vld [vmem:[%s6568_s29 + $0x528] sm:$0xff] }
 0x290   : > { %2418 = vmatprep.subr.mxu0 %v7600_v7  ;;  %12342 = vst [vmem:[#allocation221_spill] sm:$0xff] %v8577_v56  ;;  %v8581_v7 = vld [vmem:[%s6568_s29 + $0x520] sm:$0xff] }
 0x291   : > { %2419 = vmatpush1.msra.mxu0 %v7604_v17  ;;  %12343 = vst [vmem:[#allocation222_spill] sm:$0xff] %v8581_v7  ;;  %v8585_v17 = vld [vmem:[%s6568_s29 + $0x4f8] sm:$0xff] }
 0x292   : > { %2420 = vmatprep.subr.mxu0 %v7614_v31  ;;  %12344 = vst [vmem:[#allocation223_spill] sm:$0xff] %v8585_v17  ;;  %v8589_v31 = vld [vmem:[%s6568_s29 + $0x4f0] sm:$0xff] }
 0x293   : > { %2421 = vmatpush1.msra.mxu0 %v7618_v57  ;;  %12345 = vst [vmem:[#allocation224_spill] sm:$0xff] %v8589_v31  ;;  %v8593_v57 = vld [vmem:[%s6568_s29 + $0x4c8] sm:$0xff] }
 0x294   : > { %2422 = vmatprep.subr.mxu0 %v7628_v20  ;;  %12346 = vst [vmem:[#allocation225_spill] sm:$0xff] %v8593_v57  ;;  %v8597_v20 = vld [vmem:[%s6568_s29 + $0x4c0] sm:$0xff] }
 0x295   : > { %2423 = vmatpush1.msra.mxu0 %v7632_v33  ;;  %12347 = vst [vmem:[#allocation226_spill] sm:$0xff] %v8597_v20  ;;  %v8601_v33 = vld [vmem:[%s6568_s29 + $0x498] sm:$0xff] }
 0x296   : > { %2424 = vmatprep.subr.mxu0 %v7642_v40  ;;  %12348 = vst [vmem:[#allocation227_spill] sm:$0xff] %v8601_v33  ;;  %v8605_v40 = vld [vmem:[%s6568_s29 + $0x490] sm:$0xff] }
 0x297   : > { %2425 = vmatpush1.msra.mxu0 %v7648_v52  ;;  %12349 = vst [vmem:[#allocation228_spill] sm:$0xff] %v8605_v40  ;;  %v8609_v52 = vld [vmem:[%s6568_s29 + $0x468] sm:$0xff] }
 0x298   : > { %2426 = vmatprep.subr.mxu0 %v7655_v58  ;;  %12350 = vst [vmem:[#allocation229_spill] sm:$0xff] %v8609_v52  ;;  %v8613_v58 = vld [vmem:[%s6568_s29 + $0x460] sm:$0xff] }
 0x299   : > { %2427 = vmatpush1.msra.mxu0 %v8533_v5  ;;  %12351 = vst [vmem:[#allocation230_spill] sm:$0xff] %v8613_v58 }
 0x29a   : > { %2428 = vmatprep.subr.mxu0 %v8537_v14 }
 0x29b   : > { %2429 = vmatpush1.msra.mxu0 %v8541_v24 }
 0x29c   : > { %2430 = vmatprep.subr.mxu0 %v8545_v35 }
 0x29d   : > { %2431 = vmatpush2.msra.mxu0 %v8549_v53 }
 0x29e   : > { %2432 = vmatprep.subr.mxu0 %v8553_v41 }
 0x29f   : > { %2433 = vmatpush2.msra.mxu0 %v8557_v10 }
 0x2a0   : > { %2434 = vmatprep.subr.mxu0 %v8561_v51 }
 0x2a1   : > { %2435 = vmatpush2.msra.mxu0 %v8565_v43 }
 0x2a2   : > { %2436 = vmatprep.subr.mxu0 %v8569_v42 }
 0x2a3   : > { %2437 = vmatpush2.msra.mxu0 %v8573_v0 }
 0x2a4   : > { %2438 = vmatprep.subr.mxu0 %v8577_v56 }
 0x2a5   : > { %2439 = vmatpush2.msra.mxu0 %v8581_v7 }
 0x2a6   : > { %2440 = vmatprep.subr.mxu0 %v8585_v17 }
 0x2a7   : > { %2441 = vmatpush2.msra.mxu0 %v8589_v31 }
 0x2a8   : > { %2442 = vmatprep.subr.mxu0 %v8593_v57  ;;  %v8649_v57 = vld [vmem:[%s6568_s29 + $0x378] sm:$0xff] }
 0x2a9   : > { %2443 = vmatpush2.msra.mxu0 %v8597_v20  ;;  %v8617_v20 = vld [vmem:[%s6568_s29 + $0x438] sm:$0xff]  ;;  %12360 = vst [vmem:[#allocation239_spill] sm:$0xff] %v8649_v57 }
 0x2aa   : > { %2444 = vmatprep.subr.mxu0 %v8601_v33  ;;  %12352 = vst [vmem:[#allocation231_spill] sm:$0xff] %v8617_v20  ;;  %v8621_v33 = vld [vmem:[%s6568_s29 + $0x430] sm:$0xff] }
 0x2ab   : > { %2445 = vmatpush2.msra.mxu0 %v8605_v40  ;;  %12353 = vst [vmem:[#allocation232_spill] sm:$0xff] %v8621_v33  ;;  %v8625_v40 = vld [vmem:[%s6568_s29 + $0x408] sm:$0xff] }
 0x2ac   : > { %2446 = vmatprep.subr.mxu0 %v8609_v52  ;;  %12354 = vst [vmem:[#allocation233_spill] sm:$0xff] %v8625_v40  ;;  %v8629_v52 = vld [vmem:[%s6568_s29 + $0x400] sm:$0xff] }
 0x2ad   : > { %2447 = vmatpush2.msra.mxu0 %v8613_v58  ;;  %12355 = vst [vmem:[#allocation234_spill] sm:$0xff] %v8629_v52  ;;  %v8633_v58 = vld [vmem:[%s6568_s29 + $0x3d8] sm:$0xff] }
 0x2ae   : > { %2448 = vmatprep.subr.mxu0 %v8617_v20  ;;  %12356 = vst [vmem:[#allocation235_spill] sm:$0xff] %v8633_v58  ;;  %v8637_v20 = vld [vmem:[%s6568_s29 + $0x3d0] sm:$0xff] }
 0x2af   : > { %2449 = vmatpush2.msra.mxu0 %v8621_v33  ;;  %12357 = vst [vmem:[#allocation236_spill] sm:$0xff] %v8637_v20  ;;  %v8641_v33 = vld [vmem:[%s6568_s29 + $0x3a8] sm:$0xff] }
 0x2b0   : > { %2450 = vmatprep.subr.mxu0 %v8625_v40  ;;  %12358 = vst [vmem:[#allocation237_spill] sm:$0xff] %v8641_v33  ;;  %v8645_v40 = vld [vmem:[%s6568_s29 + $0x3a0] sm:$0xff] }
 0x2b1   : > { %2451 = vmatpush2.msra.mxu0 %v8629_v52  ;;  %12359 = vst [vmem:[#allocation238_spill] sm:$0xff] %v8645_v40  ;;  %v8653_v52 = vld [vmem:[%s6568_s29 + $0x370] sm:$0xff] }
 0x2b2   : > { %2452 = vmatprep.subr.mxu0 %v8633_v58  ;;  %12361 = vst [vmem:[#allocation240_spill] sm:$0xff] %v8653_v52  ;;  %v8657_v58 = vld [vmem:[%s6568_s29 + $0x348] sm:$0xff] }
 0x2b3   : > { %2453 = vmatpush2.msra.mxu0 %v8637_v20  ;;  %12362 = vst [vmem:[#allocation241_spill] sm:$0xff] %v8657_v58  ;;  %v8661_v20 = vld [vmem:[%s6568_s29 + $0x340] sm:$0xff] }
 0x2b4   : > { %2454 = vmatprep.subr.mxu0 %v8641_v33  ;;  %12363 = vst [vmem:[#allocation242_spill] sm:$0xff] %v8661_v20  ;;  %v8665_v33 = vld [vmem:[%s6568_s29 + $0x318] sm:$0xff] }
 0x2b5   : > { %2455 = vmatpush2.msra.mxu0 %v8645_v40  ;;  %12364 = vst [vmem:[#allocation243_spill] sm:$0xff] %v8665_v33  ;;  %v8669_v40 = vld [vmem:[%s6568_s29 + $0x310] sm:$0xff] }
 0x2b6   : > { %2456 = vmatprep.subr.mxu0 %v8649_v57  ;;  %12365 = vst [vmem:[#allocation244_spill] sm:$0xff] %v8669_v40 }
 0x2b7   : > { %2457 = vmatpush2.msra.mxu0 %v8653_v52 }
 0x2b8   : > { %2458 = vmatprep.subr.mxu0 %v8657_v58 }
 0x2b9   : > { %2459 = vmatpush2.msra.mxu0 %v8661_v20 }
 0x2ba   : > { %2460 = vmatprep.subr.mxu0 %v8665_v33 }
 0x2bb   : > { %2461 = vmatpush2.msra.mxu0 %v8669_v40 }
 0x2bc   : > { %2742 = vmatprep.subr.mxu0 %v7749_v21 }
 0x2fb   : > { %v1966_v57 = vpop.f32.mrf.mxu0  ;;  %v2043_v56 = vpop.f32.mrf.mxu1 }
 0x2fc   : > { %v1967_v17 = vadd.f32 %v1966_v57, %v7836_v49  ;;  %v2044_v41 = vadd.f32 %v2043_v56, %v7860_v50  ;;  %v12369_v56 = vld [vmem:[#allocation87_spill] sm:$0xff] }
 0x2fd   : > { %v1968_v52 = vpop.f32.mrf.mxu0  ;;  %v2045_v43 = vpop.f32.mrf.mxu1 }
 0x2fe   : > { %v1969_v58 = vadd.f32 %v1968_v52, %v7841_v48  ;;  %v2131_v20 = vadd.f32 %v1967_v17, %v7514_v19  ;;  %v12366_v17 = vld [vmem:[#allocation22_spill] sm:$0xff] }
 0x300   : > { %v1972_v31 = vpop.f32.mrf.mxu0  ;;  %v2132_v33 = vadd.f32 %v1969_v58, %v7597_v62  ;;  %v4949_v40 = vmul.f32 -1.442695, %v2131_v20  ;;  %v2049_v52 = vpop.f32.mrf.mxu1  ;;  %v2046_v62 = vadd.f32 %v2045_v43, %v7866_v18 }
 0x301   : > { %v1973_v0 = vadd.f32 %v1972_v31, %v7836_v49  ;;  %v826_v31 = vadd.f32 %v12366_v17, %v7863_v44  ;;  %v2050_v20 = vadd.f32 %v2049_v52, %v7860_v50 }
 0x302   : > { %v1974_v7 = vpop.f32.mrf.mxu0  ;;  %v4950_v51 = vmul.f32 -1.442695, %v2132_v33  ;;  %5234 = vpow2.f32 %v4949_v40  ;;  %v894_v40 = vadd.f32 %v12369_v56, %v7869_v36 }
 0x303   : > { %v1975_v42 = vadd.f32 %v1974_v7, %v7841_v48  ;;  %v2135_v21 = vadd.f32 %v1973_v0, %v7546_v8  ;;  %v2051_v7 = vpop.f32.mrf.mxu1  ;;  %v12367_v8 = vld [vmem:[#allocation83_spill] sm:$0xff] }
 0x304   : > { %5236 = vpow2.f32 %v4950_v51  ;;  %v888_v0 = vadd.f32 %v12367_v8, %v7869_v36  ;;  %v2052_v51 = vadd.f32 %v2051_v7, %v7866_v18 }
 0x305   : > { %v2136_v10 = vadd.f32 %v1975_v42, %v7625_v4  ;;  %v4953_v57 = vmul.f32 -1.442695, %v2135_v21  ;;  %v2133_v4 = vadd.f32 %v2044_v41, %v826_v31  ;;  %v12368_v42 = vld [vmem:[#allocation26_spill] sm:$0xff] }
 0x306   : > { %v832_v33 = vadd.f32 %v12368_v42, %v7863_v44  ;;  %v2138_v21 = vadd.f32 %v2052_v51, %v894_v40 }
 0x307   : > { %v4954_v19 = vmul.f32 -1.442695, %v2136_v10  ;;  %5238 = vpow2.f32 %v4953_v57  ;;  %v2134_v10 = vadd.f32 %v2046_v62, %v888_v0  ;;  %v4951_v43 = vmul.f32 -1.442695, %v2133_v4 }
 0x308   : > { %v2137_v58 = vadd.f32 %v2050_v20, %v832_v33  ;;  %v4956_v8 = vmul.f32 -1.442695, %v2138_v21  ;;  %v12370_v21 = vld [vmem:[#allocation23_spill] sm:$0xff] }
 0x309   : > { %5240 = vpow2.f32 %v4954_v19  ;;  %v4952_v57 = vmul.f32 -1.442695, %v2134_v10 }
 0x30a   : > { %v4955_v52 = vmul.f32 -1.442695, %v2137_v58  ;;  %5242 = vpow2.f32 %v4951_v43 }
 0x30b   : > { %5244 = vpow2.f32 %v4952_v57  ;;  %v987_v57 = vadd.f32 %v12370_v21, %v7895_v2 }
 0x30c   : > { %5246 = vpow2.f32 %v4955_v52 }
 0x30d   : > { %5248 = vpow2.f32 %v4956_v8 }
 0x30f   : > { %v5235_v17 = vpop.eup %5234 }
 0x310   : > { %v2163_v41 = vadd.f32 1.0, %v5235_v17 }
 0x311   : > { %v5237_v50 = vpop.eup %5236 }
 0x312   : > { %v2164_v31 = vadd.f32 1.0, %v5237_v50  ;;  %5250 = vrcp.f32 %v2163_v41  ;;  %v12371_v41 = vld [vmem:[#allocation90_spill] sm:$0xff] }
 0x314   : > { %v5239_v19 = vpop.eup %5238  ;;  %5252 = vrcp.f32 %v2164_v31 }
 0x315   : > { %v2167_v62 = vadd.f32 1.0, %v5239_v19  ;;  %v1049_v19 = vadd.f32 %v12371_v41, %v7902_v11 }
 0x316   : > { %v5241_v42 = vpop.eup %5240 }
 0x317   : > { %v2168_v7 = vadd.f32 1.0, %v5241_v42  ;;  %5254 = vrcp.f32 %v2167_v62  ;;  %v5243_v20 = vpop.eup %5242 }
 0x318   : > { %v5245_v0 = vpop.eup %5244  ;;  %v2165_v33 = vadd.f32 1.0, %v5243_v20 }
 0x319   : > { %5256 = vrcp.f32 %v2168_v7  ;;  %v5247_v4 = vpop.eup %5246  ;;  %v2166_v56 = vadd.f32 1.0, %v5245_v0 }
 0x31a   : > { %v5249_v10 = vpop.eup %5248  ;;  %v2169_v43 = vadd.f32 1.0, %v5247_v4  ;;  %5258 = vrcp.f32 %v2165_v33  ;;  %v12372_v4 = vld [vmem:[#allocation27_spill] sm:$0xff] }
 0x31b   : > { %v2170_v31 = vadd.f32 1.0, %v5249_v10  ;;  %5260 = vrcp.f32 %v2166_v56  ;;  %v12373_v10 = vld [vmem:[#allocation93_spill] sm:$0xff] }
 0x31c   : > { %5262 = vrcp.f32 %v2169_v43  ;;  %v1055_v56 = vadd.f32 %v12373_v10, %v7902_v11 }
 0x31f   : > { %v5251_v58 = vpop.eup %5250 }
 0x321   : > { %v5253_v8 = vpop.eup %5252 }
 0x324   : > { %v5255_v0 = vpop.eup %5254 }
 0x326   : > { %v5257_v21 = vpop.eup %5256 }
 0x327   : > { %v5259_v41 = vpop.eup %5258 }
 0x328   : > { %v5261_v43 = vpop.eup %5260 }
 0x33c   : > { %v2120_v51 = vpop.f32.mrf.mxu0 }
 0x33d   : > { %v2121_v40 = vadd.f32 %v2120_v51, %v7892_v9  ;;  %v993_v51 = vadd.f32 %v12372_v4, %v7895_v2  ;;  %v2200_v4 = vsub.f32 1.0, %v5261_v43 }
 0x33e   : > { %v2122_v50 = vpop.f32.mrf.mxu0 }
 0x33f   : > { %v2187_v17 = vmul.f32 %v5251_v58, %v2121_v40  ;;  %v2123_v52 = vadd.f32 %v2122_v50, %v7898_v16 }
 0x340   : > { %v2126_v42 = vpop.f32.mrf.mxu0 }
 0x341   : > { %v2191_v62 = vadd.f32 %v2187_v17, %v987_v57  ;;  %v2188_v7 = vmul.f32 %v5253_v8, %v2123_v52  ;;  %v2127_v20 = vadd.f32 %v2126_v42, %v7892_v9  ;;  %v5166_v8 = vpop.permute.xlu1 %5165 }
 0x342   : > { %v2128_v33 = vpop.f32.mrf.mxu0  ;;  %v8705_v42 = vunpack.i.l.bf16 %v5166_v8 }
 0x343   : > { %5264 = vtanh.f32 %v2191_v62  ;;  %v2192_v40 = vadd.f32 %v2188_v7, %v1049_v19  ;;  %v2189_v58 = vmul.f32 %v5255_v0, %v2127_v20  ;;  %v2129_v50 = vadd.f32 %v2128_v33, %v7898_v16  ;;  %v5263_v19 = vpop.eup %5262  ;;  %v4961_v16 = vld [vmem:[%s6594_s9 + $0x10] sm:$0xff] }
 0x344   : > { %5266 = vrcp.f32 %v2170_v31  ;;  %12374 = vst [vmem:[#allocation22_spill] sm:$0xff] %v8705_v42  ;;  %v2199_v62 = vsub.f32 1.0, %v5259_v41  ;;  %v8707_v20 = vunpack.i.h.bf16 %v5166_v8 }
 0x345   : > { %5268 = vtanh.f32 %v2192_v40  ;;  %v2193_v57 = vadd.f32 %v2189_v58, %v993_v51  ;;  %v2190_v17 = vmul.f32 %v5257_v21, %v2129_v50  ;;  %v5171_v0 = vpop.permute.xlu1 %5170  ;;  %v2207_v51 = vmul.f32 %v5259_v41, %v7940_v23 }
 0x346   : > { %12375 = vst [vmem:[#allocation83_spill] sm:$0xff] %v8707_v20  ;;  %v8711_v50 = vunpack.i.l.bf16 %v5171_v0  ;;  %v2201_v21 = vsub.f32 1.0, %v5263_v19  ;;  %v8715_v8 = vunpack.i.h.bf16 %v5171_v0  ;;  %v4965_v0 = vld [vmem:[%s6594_s9 + $0x60] sm:$0xff] }
 0x347   : > { %5270 = vtanh.f32 %v2193_v57  ;;  %v2194_v52 = vadd.f32 %v2190_v17, %v1055_v56  ;;  %v2208_v56 = vmul.f32 %v5261_v43, %v7934_v28 }
 0x348   : > { %12376 = vst [vmem:[#allocation26_spill] sm:$0xff] %v8711_v50  ;;  %12377 = vst [vmem:[#allocation87_spill] sm:$0xff] %v8715_v8 }
 0x349   : > { %5272 = vtanh.f32 %v2194_v52  ;;  %v11702_v52 = vsub.f32 1.0, %v8707_v20 }
 0x350   : > { %v5265_v7 = vpop.eup %5264 }
 0x351   : > { %v5267_v31 = vpop.eup %5266  ;;  %v2203_v33 = vmul.f32 %v5265_v7, %v2199_v62  ;;  %v2209_v62 = vmul.f32 %v5263_v19, %v7975_v25 }
 0x352   : > { %v5269_v40 = vpop.eup %5268  ;;  %v2202_v7 = vsub.f32 1.0, %v5267_v31 }
 0x353   : > { %v2204_v10 = vmul.f32 %v5269_v40, %v2200_v4  ;;  %v2211_v57 = vadd.f32 %v2207_v51, %v2203_v33  ;;  %v12378_v4 = vsub.f32 1.0, %v8705_v42  ;;  %v2210_v51 = vmul.f32 %v5267_v31, %v7955_v55 }
 0x354   : > { %v5271_v17 = vpop.eup %5270 }
 0x355   : > { %v2205_v41 = vmul.f32 %v5271_v17, %v2201_v21  ;;  %v2212_v11 = vadd.f32 %v2208_v56, %v2204_v10  ;;  %v2251_v58 = vmul.f32 %v8707_v20, %v2211_v57  ;;  %v2260_v43 = vmul.f32 %v12378_v4, %v7934_v28  ;;  %v4962_v57 = vld [vmem:[%s6594_s9 + $0x18] sm:$0xff]  ;;  %v9209_v20 = vld [vmem:[%s6568_s29 + $0x1e8] sm:$0xff] }
 0x356   : > { %v5273_v2 = vpop.eup %5272  ;;  %v2259_v10 = vmul.f32 %v11702_v52, %v7940_v23  ;;  %v11701_v56 = vsub.f32 1.0, %v8715_v8 }
 0x357   : > { %v2213_v19 = vadd.f32 %v2209_v62, %v2205_v41  ;;  %v2206_v40 = vmul.f32 %v5273_v2, %v2202_v7  ;;  %v2252_v21 = vmul.f32 %v8705_v42, %v2212_v11  ;;  %v2272_v17 = vadd.f32 %v4961_v16, %v2251_v58  ;;  %v4966_v62 = vld [vmem:[%s6594_s9 + $0x68] sm:$0xff] }
 0x358   : > { %v8736_v2 = vadd.f32 %v2259_v10, %v2251_v58  ;;  %v12379_v11 = vsub.f32 1.0, %v8711_v50  ;;  %v2261_v58 = vmul.f32 %v11701_v56, %v7975_v25  ;;  %v12384_v25 = vld [vmem:[#allocation108_spill] sm:$0xff]  ;;  %v9213_v42 = vld [vmem:[%s6568_s29 + $0x1a8] sm:$0xff] }
 0x359   : > { %v2214_v28 = vadd.f32 %v2210_v51, %v2206_v40  ;;  %v2253_v4 = vmul.f32 %v8715_v8, %v2213_v19  ;;  %v8733_v33 = vadd.f32 %v2260_v43, %v2252_v21  ;;  %v2281_v31 = vadd.f32 %v4965_v0, %v2252_v21  ;;  %4963 = vst.msk [vmem:[%s6594_s9 + $0x10] sm:$0xff] %vm537_vm0, %v2272_v17  ;;  %v12399_v0 = vld [vmem:[#allocation123_spill] sm:$0xff]  ;;  %v12400_v51 = vld [vmem:[#allocation124_spill] sm:$0xff]  ;;  %v12401_v19 = vld [vmem:[#allocation125_spill] sm:$0xff] }
 0x35a   : > { %v2262_v23 = vmul.f32 %v12379_v11, %v7955_v55  ;;  %v12402_v40 = vld [vmem:[#allocation126_spill] sm:$0xff]  ;;  %v12403_v21 = vld [vmem:[#allocation127_spill] sm:$0xff]  ;;  %v12404_v10 = vld [vmem:[#allocation128_spill] sm:$0xff] }
 0x35b   : > { %v2254_v41 = vmul.f32 %v8711_v50, %v2214_v28  ;;  %v2273_v16 = vadd.f32 %v4962_v57, %v2253_v4  ;;  %4967 = vst.msk [vmem:[%s6594_s9 + $0x60] sm:$0xff] %vm537_vm0, %v2281_v31  ;;  %2385 = vmatprep.mubr.f32.mxu1 %v8733_v33  ;;  %2462 = vmatprep.mubr.f32.mxu0 %v8733_v33  ;;  %v12405_v57 = vld [vmem:[#allocation129_spill] sm:$0xff]  ;;  %v12406_v17 = vld [vmem:[#allocation130_spill] sm:$0xff]  ;;  %v12407_v28 = vld [vmem:[#allocation131_spill] sm:$0xff] }
 0x35c   : > { %2386 = vmatmul.mubr.f32.vlgmr.msra.gmra.mxu1 %v8736_v2  ;;  %2463 = vmatmul.mubr.f32.vlgmr.msra.gmra.mxu0 %v8736_v2  ;;  %v8761_v43 = vadd.f32 %v2261_v58, %v2253_v4  ;;  %v12408_v4 = vld [vmem:[#allocation132_spill] sm:$0xff]  ;;  %v12409_v31 = vld [vmem:[#allocation133_spill] sm:$0xff]  ;;  %v12411_v11 = vld [vmem:[#allocation135_spill] sm:$0xff] }
 0x35d   : > { %v8753_v7 = vadd.f32 %v2262_v23, %v2254_v41  ;;  %4964 = vst.msk [vmem:[%s6594_s9 + $0x18] sm:$0xff] %vm537_vm0, %v2273_v16  ;;  %v2282_v55 = vadd.f32 %v4966_v62, %v2254_v41  ;;  %2476 = vmatpush1.msra.mxu1 %v7958_v39  ;;  %2743 = vmatpush1.msra.mxu0 %v7962_v46  ;;  %v12380_v39 = vld [vmem:[#allocation104_spill] sm:$0xff]  ;;  %v12381_v46 = vld [vmem:[#allocation105_spill] sm:$0xff]  ;;  %v12410_v62 = vld [vmem:[#allocation134_spill] sm:$0xff] }
 0x35e   : > { %2477 = vmatprep.subr.mxu1 %v7968_v61  ;;  %2744 = vmatprep.subr.mxu0 %v7972_v1  ;;  %v12382_v61 = vld [vmem:[#allocation106_spill] sm:$0xff]  ;;  %v12383_v1 = vld [vmem:[#allocation107_spill] sm:$0xff]  ;;  %v12412_v23 = vld [vmem:[#allocation136_spill] sm:$0xff]  ;;  %12541 = vst [vmem:[#allocation104_spill] sm:$0xff] %v9209_v20 }
 0x35f   : > { %4968 = vst.msk [vmem:[%s6594_s9 + $0x68] sm:$0xff] %vm537_vm0, %v2282_v55  ;;  %2478 = vmatpush1.msra.mxu1 %v7980_v45  ;;  %2391 = vmatprep.mubr.f32.mxu1 %v8753_v7  ;;  %v12385_v45 = vld [vmem:[#allocation109_spill] sm:$0xff]  ;;  %v12414_v16 = vld [vmem:[#allocation138_spill] sm:$0xff]  ;;  %v12415_v58 = vld [vmem:[#allocation139_spill] sm:$0xff] }
 0x360   : > { %2468 = vmatprep.mubr.f32.mxu0 %v8753_v7  ;;  %2479 = vmatprep.subr.mxu1 %v7986_v22  ;;  %v12386_v22 = vld [vmem:[#allocation110_spill] sm:$0xff]  ;;  %v12413_v41 = vld [vmem:[#allocation137_spill] sm:$0xff]  ;;  %v12416_v55 = vld [vmem:[#allocation140_spill] sm:$0xff]  ;;  %12542 = vst [vmem:[#allocation105_spill] sm:$0xff] %v9213_v42 }
 0x361   : > { %2392 = vmatmul.mubr.f32.gmra.mxu1 %v8761_v43  ;;  %2469 = vmatmul.mubr.f32.gmra.mxu0 %v8761_v43  ;;  %v9205_v50 = vld [vmem:[%s6568_s29 + $0x1d0] sm:$0xff] }
 0x362   : > { %2480 = vmatpush1.msra.mxu1 %v7992_v15  ;;  %2539 = vmatprep.mubr.f32.mxu1 %v8733_v33  ;;  %v12387_v15 = vld [vmem:[#allocation111_spill] sm:$0xff] }
 0x363   : > { %2481 = vmatprep.subr.mxu1 %v7997_v29  ;;  %2745 = vmatpush1.msra.mxu0 %v8001_v27  ;;  %v12388_v29 = vld [vmem:[#allocation112_spill] sm:$0xff]  ;;  %v12389_v27 = vld [vmem:[#allocation113_spill] sm:$0xff] }
 0x364   : > { %2482 = vmatpush1.msra.mxu1 %v8005_v6  ;;  %2746 = vmatprep.subr.mxu0 %v8009_v37  ;;  %v12390_v6 = vld [vmem:[#allocation114_spill] sm:$0xff]  ;;  %v12391_v37 = vld [vmem:[#allocation115_spill] sm:$0xff] }
 0x365   : > { %2483 = vmatprep.subr.mxu1 %v8013_v63  ;;  %2747 = vmatpush1.msra.mxu0 %v8017_v3  ;;  %v12392_v63 = vld [vmem:[#allocation116_spill] sm:$0xff]  ;;  %v12393_v3 = vld [vmem:[#allocation117_spill] sm:$0xff] }
 0x366   : > { %2484 = vmatpush1.msra.mxu1 %v8021_v34  ;;  %2748 = vmatprep.subr.mxu0 %v8025_v12  ;;  %v12394_v34 = vld [vmem:[#allocation118_spill] sm:$0xff]  ;;  %v12395_v12 = vld [vmem:[#allocation119_spill] sm:$0xff] }
 0x367   : > { %2485 = vmatprep.subr.mxu1 %v8029_v13  ;;  %2749 = vmatpush1.msra.mxu0 %v8033_v32  ;;  %v12396_v13 = vld [vmem:[#allocation120_spill] sm:$0xff]  ;;  %v12397_v32 = vld [vmem:[#allocation121_spill] sm:$0xff] }
 0x368   : > { %2486 = vmatpush1.msra.mxu1 %v8037_v54  ;;  %2750 = vmatprep.subr.mxu0 %v12380_v39  ;;  %v12398_v54 = vld [vmem:[#allocation122_spill] sm:$0xff]  ;;  %v12417_v39 = vld [vmem:[#allocation141_spill] sm:$0xff] }
 0x369   : > { %2487 = vmatprep.subr.mxu1 %v12381_v46  ;;  %2751 = vmatpush1.msra.mxu0 %v12382_v61  ;;  %v12418_v46 = vld [vmem:[#allocation142_spill] sm:$0xff]  ;;  %v12419_v61 = vld [vmem:[#allocation143_spill] sm:$0xff] }
 0x36a   : > { %2488 = vmatpush1.msra.mxu1 %v12383_v1  ;;  %2752 = vmatprep.subr.mxu0 %v12384_v25  ;;  %v12420_v1 = vld [vmem:[#allocation144_spill] sm:$0xff]  ;;  %v12421_v25 = vld [vmem:[#allocation145_spill] sm:$0xff] }
 0x36b   : > { %2489 = vmatprep.subr.mxu1 %v12385_v45  ;;  %2753 = vmatpush1.msra.mxu0 %v12386_v22  ;;  %v12422_v45 = vld [vmem:[#allocation146_spill] sm:$0xff]  ;;  %v12423_v22 = vld [vmem:[#allocation147_spill] sm:$0xff] }
 0x36c   : > { %2490 = vmatpush1.msra.mxu1 %v12387_v15  ;;  %2754 = vmatprep.subr.mxu0 %v12388_v29  ;;  %v12424_v15 = vld [vmem:[#allocation148_spill] sm:$0xff]  ;;  %v12425_v29 = vld [vmem:[#allocation149_spill] sm:$0xff] }
 0x36d   : > { %2491 = vmatprep.subr.mxu1 %v12389_v27  ;;  %2755 = vmatpush1.msra.mxu0 %v12390_v6  ;;  %v12426_v27 = vld [vmem:[#allocation150_spill] sm:$0xff]  ;;  %v12427_v6 = vld [vmem:[#allocation151_spill] sm:$0xff] }
 0x36e   : > { %2492 = vmatpush1.msra.mxu1 %v12391_v37  ;;  %2756 = vmatprep.subr.mxu0 %v12392_v63  ;;  %v12428_v37 = vld [vmem:[#allocation152_spill] sm:$0xff]  ;;  %v12429_v63 = vld [vmem:[#allocation153_spill] sm:$0xff] }
 0x36f   : > { %2493 = vmatprep.subr.mxu1 %v12393_v3  ;;  %2757 = vmatpush1.msra.mxu0 %v12394_v34  ;;  %v12430_v3 = vld [vmem:[#allocation154_spill] sm:$0xff]  ;;  %v12431_v34 = vld [vmem:[#allocation155_spill] sm:$0xff] }
 0x370   : > { %2494 = vmatpush1.msra.mxu1 %v12395_v12  ;;  %2758 = vmatprep.subr.mxu0 %v12396_v13  ;;  %v12432_v12 = vld [vmem:[#allocation156_spill] sm:$0xff]  ;;  %v12433_v13 = vld [vmem:[#allocation157_spill] sm:$0xff] }
 0x371   : > { %2495 = vmatprep.subr.mxu1 %v12397_v32  ;;  %2759 = vmatpush1.msra.mxu0 %v12398_v54  ;;  %v12434_v32 = vld [vmem:[#allocation158_spill] sm:$0xff]  ;;  %v12435_v54 = vld [vmem:[#allocation159_spill] sm:$0xff] }
 0x372   : > { %2496 = vmatpush1.msra.mxu1 %v12399_v0  ;;  %2760 = vmatprep.subr.mxu0 %v12400_v51  ;;  %v12436_v0 = vld [vmem:[#allocation160_spill] sm:$0xff]  ;;  %v12437_v51 = vld [vmem:[#allocation161_spill] sm:$0xff] }
 0x373   : > { %2497 = vmatprep.subr.mxu1 %v12401_v19  ;;  %2761 = vmatpush1.msra.mxu0 %v12402_v40  ;;  %v12438_v19 = vld [vmem:[#allocation162_spill] sm:$0xff]  ;;  %v12439_v40 = vld [vmem:[#allocation163_spill] sm:$0xff] }
 0x374   : > { %2498 = vmatpush1.msra.mxu1 %v12403_v21  ;;  %2762 = vmatprep.subr.mxu0 %v12404_v10  ;;  %v12440_v21 = vld [vmem:[#allocation164_spill] sm:$0xff]  ;;  %v12441_v10 = vld [vmem:[#allocation165_spill] sm:$0xff] }
 0x375   : > { %2499 = vmatprep.subr.mxu1 %v12405_v57  ;;  %2763 = vmatpush1.msra.mxu0 %v12406_v17  ;;  %v12442_v57 = vld [vmem:[#allocation166_spill] sm:$0xff]  ;;  %v12443_v17 = vld [vmem:[#allocation167_spill] sm:$0xff] }
 0x376   : > { %2500 = vmatpush1.msra.mxu1 %v12407_v28  ;;  %2764 = vmatprep.subr.mxu0 %v12408_v4  ;;  %v12444_v28 = vld [vmem:[#allocation168_spill] sm:$0xff]  ;;  %v12445_v4 = vld [vmem:[#allocation169_spill] sm:$0xff] }
 0x377   : > { %2501 = vmatprep.subr.mxu1 %v12409_v31  ;;  %2765 = vmatpush1.msra.mxu0 %v12410_v62  ;;  %v12446_v31 = vld [vmem:[#allocation170_spill] sm:$0xff]  ;;  %v12447_v62 = vld [vmem:[#allocation171_spill] sm:$0xff] }
 0x378   : > { %2502 = vmatpush1.msra.mxu1 %v12411_v11  ;;  %2766 = vmatprep.subr.mxu0 %v12412_v23  ;;  %v12448_v11 = vld [vmem:[#allocation172_spill] sm:$0xff]  ;;  %v12449_v23 = vld [vmem:[#allocation173_spill] sm:$0xff] }
 0x379   : > { %2503 = vmatprep.subr.mxu1 %v12413_v41  ;;  %2767 = vmatpush1.msra.mxu0 %v12414_v16  ;;  %v12450_v41 = vld [vmem:[#allocation174_spill] sm:$0xff]  ;;  %v12451_v16 = vld [vmem:[#allocation175_spill] sm:$0xff] }
 0x37a   : > { %2504 = vmatpush1.msra.mxu1 %v12415_v58  ;;  %2768 = vmatprep.subr.mxu0 %v12416_v55  ;;  %v12452_v58 = vld [vmem:[#allocation176_spill] sm:$0xff]  ;;  %v12453_v55 = vld [vmem:[#allocation177_spill] sm:$0xff] }
 0x37b   : > { %2505 = vmatprep.subr.mxu1 %v12417_v39  ;;  %2769 = vmatpush1.msra.mxu0 %v12418_v46  ;;  %v12454_v39 = vld [vmem:[#allocation178_spill] sm:$0xff]  ;;  %v12455_v46 = vld [vmem:[#allocation179_spill] sm:$0xff] }
 0x37c   : > { %2506 = vmatpush1.msra.mxu1 %v12419_v61  ;;  %2770 = vmatprep.subr.mxu0 %v12420_v1  ;;  %v12456_v61 = vld [vmem:[#allocation180_spill] sm:$0xff]  ;;  %v12457_v1 = vld [vmem:[#allocation181_spill] sm:$0xff] }
 0x37d   : > { %2507 = vmatprep.subr.mxu1 %v12421_v25  ;;  %2771 = vmatpush1.msra.mxu0 %v12422_v45  ;;  %v12458_v25 = vld [vmem:[#allocation182_spill] sm:$0xff]  ;;  %v12459_v45 = vld [vmem:[#allocation183_spill] sm:$0xff] }
 0x37e   : > { %2508 = vmatpush2.msra.mxu1 %v12423_v22  ;;  %2772 = vmatprep.subr.mxu0 %v12424_v15  ;;  %v12460_v22 = vld [vmem:[#allocation184_spill] sm:$0xff]  ;;  %v12461_v15 = vld [vmem:[#allocation185_spill] sm:$0xff] }
 0x37f   : > { %2509 = vmatprep.subr.mxu1 %v12425_v29  ;;  %2773 = vmatpush1.msra.mxu0 %v12426_v27  ;;  %v12462_v29 = vld [vmem:[#allocation186_spill] sm:$0xff]  ;;  %v12463_v27 = vld [vmem:[#allocation187_spill] sm:$0xff] }
 0x380   : > { %2510 = vmatpush2.msra.mxu1 %v12427_v6  ;;  %2774 = vmatprep.subr.mxu0 %v12428_v37  ;;  %v12464_v6 = vld [vmem:[#allocation188_spill] sm:$0xff]  ;;  %v12465_v37 = vld [vmem:[#allocation189_spill] sm:$0xff] }
 0x381   : > { %2511 = vmatprep.subr.mxu1 %v12429_v63  ;;  %2775 = vmatpush2.msra.mxu0 %v12430_v3  ;;  %v12466_v63 = vld [vmem:[#allocation190_spill] sm:$0xff]  ;;  %v12467_v3 = vld [vmem:[#allocation191_spill] sm:$0xff] }
 0x382   : > { %2512 = vmatpush2.msra.mxu1 %v12431_v34  ;;  %2776 = vmatprep.subr.mxu0 %v12432_v12  ;;  %v12468_v34 = vld [vmem:[#allocation192_spill] sm:$0xff]  ;;  %v12469_v12 = vld [vmem:[#allocation193_spill] sm:$0xff] }
 0x383   : > { %2513 = vmatprep.subr.mxu1 %v12433_v13  ;;  %2777 = vmatpush2.msra.mxu0 %v12434_v32  ;;  %v12470_v13 = vld [vmem:[#allocation194_spill] sm:$0xff]  ;;  %v12471_v32 = vld [vmem:[#allocation195_spill] sm:$0xff] }
 0x384   : > { %2514 = vmatpush2.msra.mxu1 %v12435_v54  ;;  %2778 = vmatprep.subr.mxu0 %v12436_v0  ;;  %v12472_v54 = vld [vmem:[#allocation196_spill] sm:$0xff]  ;;  %v12473_v0 = vld [vmem:[#allocation197_spill] sm:$0xff] }
 0x385   : > { %2515 = vmatprep.subr.mxu1 %v12437_v51  ;;  %2779 = vmatpush2.msra.mxu0 %v12438_v19  ;;  %v12474_v51 = vld [vmem:[#allocation198_spill] sm:$0xff]  ;;  %v12475_v19 = vld [vmem:[#allocation199_spill] sm:$0xff] }
 0x386   : > { %2516 = vmatpush2.msra.mxu1 %v12439_v40  ;;  %2780 = vmatprep.subr.mxu0 %v12440_v21  ;;  %v12476_v40 = vld [vmem:[#allocation200_spill] sm:$0xff]  ;;  %v12477_v21 = vld [vmem:[#allocation201_spill] sm:$0xff] }
 0x387   : > { %2517 = vmatprep.subr.mxu1 %v12441_v10  ;;  %2781 = vmatpush2.msra.mxu0 %v12442_v57  ;;  %v12478_v10 = vld [vmem:[#allocation202_spill] sm:$0xff]  ;;  %v12479_v57 = vld [vmem:[#allocation203_spill] sm:$0xff] }
 0x388   : > { %2518 = vmatpush2.msra.mxu1 %v12443_v17  ;;  %2782 = vmatprep.subr.mxu0 %v12444_v28  ;;  %v12480_v17 = vld [vmem:[#allocation204_spill] sm:$0xff]  ;;  %v12481_v28 = vld [vmem:[#allocation205_spill] sm:$0xff] }
 0x389   : > { %2519 = vmatprep.subr.mxu1 %v12445_v4  ;;  %2783 = vmatpush2.msra.mxu0 %v12446_v31  ;;  %v12482_v4 = vld [vmem:[#allocation206_spill] sm:$0xff]  ;;  %v12483_v31 = vld [vmem:[#allocation207_spill] sm:$0xff] }
 0x38a   : > { %2520 = vmatpush2.msra.mxu1 %v12447_v62  ;;  %2784 = vmatprep.subr.mxu0 %v12448_v11  ;;  %v12484_v62 = vld [vmem:[#allocation208_spill] sm:$0xff]  ;;  %v12485_v11 = vld [vmem:[#allocation209_spill] sm:$0xff] }
 0x38b   : > { %2521 = vmatprep.subr.mxu1 %v12449_v23  ;;  %2785 = vmatpush2.msra.mxu0 %v12450_v41  ;;  %v12486_v23 = vld [vmem:[#allocation210_spill] sm:$0xff]  ;;  %v12487_v41 = vld [vmem:[#allocation211_spill] sm:$0xff] }
 0x38c   : > { %2522 = vmatpush2.msra.mxu1 %v12451_v16  ;;  %2786 = vmatprep.subr.mxu0 %v12452_v58  ;;  %v12488_v16 = vld [vmem:[#allocation212_spill] sm:$0xff]  ;;  %v12489_v58 = vld [vmem:[#allocation213_spill] sm:$0xff] }
 0x38d   : > { %2523 = vmatprep.subr.mxu1 %v12453_v55  ;;  %2787 = vmatpush2.msra.mxu0 %v12454_v39  ;;  %v12490_v55 = vld [vmem:[#allocation214_spill] sm:$0xff] }
 0x38e   : > { %2524 = vmatpush2.msra.mxu1 %v12455_v46  ;;  %2788 = vmatprep.subr.mxu0 %v12456_v61  ;;  %v8905_v39 = vld [vmem:[%s6568_s29 + $0x228] sm:$0xff]  ;;  %v8909_v46 = vld [vmem:[%s6568_s29 + $0x220] sm:$0xff] }
 0x38f   : > { %2525 = vmatprep.subr.mxu1 %v12457_v1  ;;  %2789 = vmatpush2.msra.mxu0 %v12458_v25  ;;  %v8937_v61 = vld [vmem:[%s6568_s29 + $0x168] sm:$0xff]  ;;  %v8941_v1 = vld [vmem:[%s6568_s29 + $0x160] sm:$0xff]  ;;  %v8945_v25 = vld [vmem:[%s6568_s29 + $0x138] sm:$0xff] }
 0x390   : > { %2526 = vmatpush2.msra.mxu1 %v12459_v45  ;;  %2790 = vmatprep.subr.mxu0 %v12460_v22  ;;  %v8949_v45 = vld [vmem:[%s6568_s29 + $0x130] sm:$0xff]  ;;  %v8953_v22 = vld [vmem:[%s6568_s29 + $0x108] sm:$0xff] }
 0x391   : > { %2527 = vmatprep.subr.mxu1 %v12461_v15  ;;  %2791 = vmatpush2.msra.mxu0 %v12462_v29  ;;  %v8957_v15 = vld [vmem:[%s6568_s29 + $0x100] sm:$0xff]  ;;  %v8961_v29 = vld [vmem:[%s6568_s29 + $0xd8] sm:$0xff] }
 0x392   : > { %2528 = vmatpush2.msra.mxu1 %v12463_v27  ;;  %2792 = vmatprep.subr.mxu0 %v12464_v6  ;;  %v8965_v27 = vld [vmem:[%s6568_s29 + $0xd0] sm:$0xff]  ;;  %v8969_v6 = vld [vmem:[%s6568_s29 + $0xa8] sm:$0xff] }
 0x393   : > { %2529 = vmatprep.subr.mxu1 %v12465_v37  ;;  %2793 = vmatpush2.msra.mxu0 %v12466_v63  ;;  %v8973_v37 = vld [vmem:[%s6568_s29 + $0xa0] sm:$0xff]  ;;  %v8977_v63 = vld [vmem:[%s6568_s29 + $0x78] sm:$0xff] }
 0x394   : > { %2530 = vmatpush2.msra.mxu1 %v12467_v3  ;;  %2794 = vmatprep.subr.mxu0 %v12468_v34  ;;  %v8981_v3 = vld [vmem:[%s6568_s29 + $0x70] sm:$0xff]  ;;  %v8985_v34 = vld [vmem:[%s6568_s29 + $0x48] sm:$0xff] }
 0x395   : > { %2531 = vmatprep.subr.mxu1 %v12469_v12  ;;  %2795 = vmatpush2.msra.mxu0 %v12470_v13  ;;  %v12491_v12 = vld [vmem:[#allocation215_spill] sm:$0xff]  ;;  %v12492_v13 = vld [vmem:[#allocation216_spill] sm:$0xff] }
 0x396   : > { %2532 = vmatpush2.msra.mxu1 %v12471_v32  ;;  %2796 = vmatprep.subr.mxu0 %v12472_v54  ;;  %v12493_v32 = vld [vmem:[#allocation217_spill] sm:$0xff]  ;;  %v12494_v54 = vld [vmem:[#allocation218_spill] sm:$0xff] }
 0x397   : > { %2533 = vmatprep.subr.mxu1 %v12473_v0  ;;  %2797 = vmatpush2.msra.mxu0 %v12474_v51  ;;  %v12495_v0 = vld [vmem:[#allocation219_spill] sm:$0xff]  ;;  %v12496_v51 = vld [vmem:[#allocation220_spill] sm:$0xff] }
 0x398   : > { %2534 = vmatpush2.msra.mxu1 %v12475_v19  ;;  %2798 = vmatprep.subr.mxu0 %v12476_v40  ;;  %v12502_v19 = vld [vmem:[#allocation226_spill] sm:$0xff]  ;;  %v12503_v40 = vld [vmem:[#allocation227_spill] sm:$0xff] }
 0x399   : > { %2535 = vmatprep.subr.mxu1 %v12477_v21  ;;  %2799 = vmatpush2.msra.mxu0 %v12478_v10  ;;  %v12504_v21 = vld [vmem:[#allocation228_spill] sm:$0xff]  ;;  %v12505_v10 = vld [vmem:[#allocation229_spill] sm:$0xff] }
 0x39a   : > { %2536 = vmatpush2.msra.mxu1 %v12479_v57  ;;  %2800 = vmatprep.subr.mxu0 %v12480_v17  ;;  %v12506_v57 = vld [vmem:[#allocation230_spill] sm:$0xff]  ;;  %v12507_v17 = vld [vmem:[#allocation231_spill] sm:$0xff] }
 0x39b   : > { %2537 = vmatprep.subr.mxu1 %v12481_v28  ;;  %2801 = vmatpush2.msra.mxu0 %v12482_v4  ;;  %v12508_v28 = vld [vmem:[#allocation232_spill] sm:$0xff]  ;;  %v12509_v4 = vld [vmem:[#allocation233_spill] sm:$0xff] }
 0x39c   : > { %2538 = vmatpush2.msra.mxu1 %v12483_v31  ;;  %2802 = vmatprep.subr.mxu0 %v12484_v62  ;;  %v12510_v31 = vld [vmem:[#allocation234_spill] sm:$0xff]  ;;  %v12511_v62 = vld [vmem:[#allocation235_spill] sm:$0xff] }
 0x39d   : > { %2540 = vmatmul.mubr.f32.vlgmr.msra.gmra.mxu1 %v8736_v2  ;;  %2819 = vmatprep.subr.mxu1 %v12485_v11  ;;  %v12512_v11 = vld [vmem:[#allocation236_spill] sm:$0xff] }
 0x39e   : > { %2545 = vmatprep.mubr.f32.mxu1 %v8753_v7  ;;  %2820 = vmatpush1.msra.mxu1 %v12486_v23  ;;  %v12513_v23 = vld [vmem:[#allocation237_spill] sm:$0xff] }
 0x39f   : > { %2821 = vmatprep.subr.mxu1 %v12487_v41  ;;  %2803 = vmatpush2.msra.mxu0 %v12488_v16  ;;  %v12514_v41 = vld [vmem:[#allocation238_spill] sm:$0xff]  ;;  %v12515_v16 = vld [vmem:[#allocation239_spill] sm:$0xff] }
 0x3a0   : > { %2822 = vmatpush1.msra.mxu1 %v12489_v58  ;;  %2804 = vmatprep.subr.mxu0 %v12490_v55  ;;  %v12516_v58 = vld [vmem:[#allocation240_spill] sm:$0xff]  ;;  %v12517_v55 = vld [vmem:[#allocation241_spill] sm:$0xff] }
 0x3a1   : > { %2546 = vmatmul.mubr.f32.gmra.mxu1 %v8761_v43  ;;  %2823 = vmatprep.subr.mxu1 %v8488_v60  ;;  %v8925_v60 = vld [vmem:[%s6568_s29 + $0x1c0] sm:$0xff] }
 0x3a2   : > { %2824 = vmatpush1.msra.mxu1 %v8492_v59  ;;  %2805 = vmatpush2.msra.mxu0 %v8496_v47  ;;  %v8913_v59 = vld [vmem:[%s6568_s29 + $0x1f8] sm:$0xff]  ;;  %v8917_v47 = vld [vmem:[%s6568_s29 + $0x1f0] sm:$0xff] }
 0x3a3   : > { %2825 = vmatprep.subr.mxu1 %v8500_v30  ;;  %2896 = vmatprep.subr.mxu0 %v8504_v38  ;;  %v8929_v30 = vld [vmem:[%s6568_s29 + $0x198] sm:$0xff]  ;;  %v8933_v38 = vld [vmem:[%s6568_s29 + $0x190] sm:$0xff] }
 0x3a4   : > { %2826 = vmatpush1.msra.mxu1 %v8508_v26  ;;  %v8921_v26 = vld [vmem:[%s6568_s29 + $0x1c8] sm:$0xff] }
 0x3a5   : > { %2827 = vmatprep.subr.mxu1 %v8905_v39 }
 0x3a6   : > { %2828 = vmatpush1.msra.mxu1 %v8909_v46 }
 0x3a7   : > { %2829 = vmatprep.subr.mxu1 %v8913_v59 }
 0x3a8   : > { %2830 = vmatpush1.msra.mxu1 %v8917_v47 }
 0x3a9   : > { %2831 = vmatprep.subr.mxu1 %v8921_v26 }
 0x3aa   : > { %2832 = vmatpush1.msra.mxu1 %v8925_v60 }
 0x3ab   : > { %2833 = vmatprep.subr.mxu1 %v8929_v30 }
 0x3ac   : > { %2834 = vmatpush1.msra.mxu1 %v8933_v38 }
 0x3ad   : > { %2835 = vmatprep.subr.mxu1 %v8937_v61 }
 0x3ae   : > { %2836 = vmatpush1.msra.mxu1 %v8941_v1 }
 0x3af   : > { %2837 = vmatprep.subr.mxu1 %v8945_v25 }
 0x3b0   : > { %2838 = vmatpush1.msra.mxu1 %v8949_v45 }
 0x3b1   : > { %2839 = vmatprep.subr.mxu1 %v8953_v22 }
 0x3b2   : > { %2840 = vmatpush1.msra.mxu1 %v8957_v15 }
 0x3b3   : > { %2841 = vmatprep.subr.mxu1 %v8961_v29 }
 0x3b4   : > { %2842 = vmatpush1.msra.mxu1 %v8965_v27 }
 0x3b5   : > { %2843 = vmatprep.subr.mxu1 %v8969_v6 }
 0x3b6   : > { %2844 = vmatpush1.msra.mxu1 %v8973_v37 }
 0x3b7   : > { %2845 = vmatprep.subr.mxu1 %v8977_v63 }
 0x3b8   : > { %2846 = vmatpush1.msra.mxu1 %v8981_v3 }
 0x3b9   : > { %2847 = vmatprep.subr.mxu1 %v8985_v34 }
 0x3ba   : > { %2848 = vmatpush1.msra.mxu1 %v8533_v5  ;;  %v12497_v5 = vld [vmem:[#allocation221_spill] sm:$0xff] }
 0x3bb   : > { %2849 = vmatprep.subr.mxu1 %v8537_v14  ;;  %v12498_v14 = vld [vmem:[#allocation222_spill] sm:$0xff] }
 0x3bc   : > { %2850 = vmatpush1.msra.mxu1 %v8541_v24  ;;  %v12499_v24 = vld [vmem:[#allocation223_spill] sm:$0xff] }
 0x3bd   : > { %2851 = vmatprep.subr.mxu1 %v8545_v35  ;;  %v12500_v35 = vld [vmem:[#allocation224_spill] sm:$0xff] }
 0x3be   : > { %2852 = vmatpush2.msra.mxu1 %v8549_v53  ;;  %v12501_v53 = vld [vmem:[#allocation225_spill] sm:$0xff] }
 0x3bf   : > { %2853 = vmatprep.subr.mxu1 %v12491_v12  ;;  %v12518_v12 = vld [vmem:[#allocation242_spill] sm:$0xff] }
 0x3c0   : > { %2854 = vmatpush2.msra.mxu1 %v12492_v13  ;;  %v12519_v13 = vld [vmem:[#allocation243_spill] sm:$0xff] }
 0x3c1   : > { %2855 = vmatprep.subr.mxu1 %v12493_v32  ;;  %v12520_v32 = vld [vmem:[#allocation244_spill] sm:$0xff] }
 0x3c2   : > { %2856 = vmatpush2.msra.mxu1 %v12494_v54  ;;  %v9024_v54 = vld [vmem:[%s6568_s29 + $0x2d8] sm:$0xff] }
 0x3c3   : > { %2857 = vmatprep.subr.mxu1 %v12495_v0 }
 0x3c4   : > { %2858 = vmatpush2.msra.mxu1 %v12496_v51 }
 0x3c5   : > { %2859 = vmatprep.subr.mxu1 %v12497_v5 }
 0x3c6   : > { %2860 = vmatpush2.msra.mxu1 %v12498_v14 }
 0x3c7   : > { %2861 = vmatprep.subr.mxu1 %v12499_v24 }
 0x3c8   : > { %2862 = vmatpush2.msra.mxu1 %v12500_v35 }
 0x3c9   : > { %2863 = vmatprep.subr.mxu1 %v12501_v53  ;;  %v12521_v53 = vld [vmem:[#allocation57_spill] sm:$0xff] }
 0x3ca   : > { %2864 = vmatpush2.msra.mxu1 %v12502_v19 }
 0x3cb   : > { %2865 = vmatprep.subr.mxu1 %v12503_v40 }
 0x3cc   : > { %2866 = vmatpush2.msra.mxu1 %v12504_v21 }
 0x3cd   : > { %2867 = vmatprep.subr.mxu1 %v12505_v10  ;;  %v12522_v10 = vld [vmem:[#allocation49_spill] sm:$0xff] }
 0x3ce   : > { %2868 = vmatpush2.msra.mxu1 %v12506_v57 }
 0x3cf   : > { %2869 = vmatprep.subr.mxu1 %v12507_v17 }
 0x3d0   : > { %2870 = vmatpush2.msra.mxu1 %v12508_v28 }
 0x3d1   : > { %2871 = vmatprep.subr.mxu1 %v12509_v4 }
 0x3d2   : > { %2872 = vmatpush2.msra.mxu1 %v12510_v31  ;;  %v12523_v31 = vld [vmem:[#allocation63_spill] sm:$0xff] }
 0x3d3   : > { %2873 = vmatprep.subr.mxu1 %v12511_v62 }
 0x3d4   : > { %2874 = vmatpush2.msra.mxu1 %v12512_v11 }
 0x3d5   : > { %2875 = vmatprep.subr.mxu1 %v12513_v23  ;;  %v12524_v23 = vld [vmem:[#allocation55_spill] sm:$0xff] }
 0x3d6   : > { %2876 = vmatpush2.msra.mxu1 %v12514_v41 }
 0x3d7   : > { %2877 = vmatprep.subr.mxu1 %v12515_v16 }
 0x3d8   : > { %2878 = vmatpush2.msra.mxu1 %v12516_v58 }
 0x3d9   : > { %2879 = vmatprep.subr.mxu1 %v12517_v55  ;;  %v12525_v55 = vld [vmem:[#allocation96_spill] sm:$0xff] }
 0x3da   : > { %2880 = vmatpush2.msra.mxu1 %v12518_v12 }
 0x3db   : > { %2881 = vmatprep.subr.mxu1 %v12519_v13 }
 0x3dc   : > { %2882 = vmatpush2.msra.mxu1 %v12520_v32  ;;  %v12526_v32 = vld [vmem:[#allocation30_spill] sm:$0xff] }
 0x3dd   : > { %3163 = vmatprep.subr.mxu1 %v9024_v54 }
 0x41c   : > { %v2387_v0 = vpop.f32.mrf.mxu1  ;;  %v2464_v40 = vpop.f32.mrf.mxu0 }
 0x41d   : > { %v2388_v14 = vadd.f32 %v2387_v0, %v7836_v49  ;;  %v2465_v12 = vadd.f32 %v2464_v40, %v12525_v55  ;;  %v838_v0 = vadd.f32 %v12526_v32, %v7863_v44 }
 0x41e   : > { %v2389_v51 = vpop.f32.mrf.mxu1  ;;  %v2466_v4 = vpop.f32.mrf.mxu0 }
 0x41f   : > { %v2390_v24 = vadd.f32 %v2389_v51, %v7841_v48  ;;  %v2552_v19 = vadd.f32 %v2388_v14, %v12521_v53  ;;  %v2467_v51 = vadd.f32 %v2466_v4, %v7866_v18  ;;  %v2554_v53 = vadd.f32 %v2465_v12, %v838_v0 }
 0x421   : > { %v2393_v5 = vpop.f32.mrf.mxu1  ;;  %v2553_v57 = vadd.f32 %v2390_v24, %v12522_v10  ;;  %v4969_v28 = vmul.f32 -1.442695, %v2552_v19  ;;  %v2470_v58 = vpop.f32.mrf.mxu0  ;;  %v12527_v24 = vld [vmem:[#allocation75_spill] sm:$0xff]  ;;  %v12528_v19 = vld [vmem:[#allocation36_spill] sm:$0xff]  ;;  %v4971_v4 = vmul.f32 -1.442695, %v2554_v53 }
 0x422   : > { %v2394_v21 = vadd.f32 %v2393_v5, %v7836_v49  ;;  %v2471_v14 = vadd.f32 %v2470_v58, %v12525_v55 }
 0x423   : > { %v2395_v35 = vpop.f32.mrf.mxu1  ;;  %v4970_v11 = vmul.f32 -1.442695, %v2553_v57  ;;  %5274 = vpow2.f32 %v4969_v28  ;;  %v2472_v5 = vpop.f32.mrf.mxu0  ;;  %v12529_v57 = vld [vmem:[#allocation79_spill] sm:$0xff] }
 0x424   : > { %v2396_v17 = vadd.f32 %v2395_v35, %v7841_v48  ;;  %v2556_v62 = vadd.f32 %v2394_v21, %v12523_v31  ;;  %v876_v35 = vadd.f32 %v12527_v24, %v7869_v36  ;;  %v844_v21 = vadd.f32 %v12528_v19, %v7863_v44 }
 0x425   : > { %5276 = vpow2.f32 %v4970_v11  ;;  %v2473_v40 = vadd.f32 %v2472_v5, %v7866_v18 }
 0x426   : > { %v2557_v41 = vadd.f32 %v2396_v17, %v12524_v23  ;;  %v4973_v16 = vmul.f32 -1.442695, %v2556_v62  ;;  %v2555_v10 = vadd.f32 %v2467_v51, %v876_v35  ;;  %v882_v17 = vadd.f32 %v12529_v57, %v7869_v36 }
 0x427   : > { %v2558_v28 = vadd.f32 %v2471_v14, %v844_v21 }
 0x428   : > { %v4974_v13 = vmul.f32 -1.442695, %v2557_v41  ;;  %5278 = vpow2.f32 %v4973_v16  ;;  %v2559_v31 = vadd.f32 %v2473_v40, %v882_v17  ;;  %v4972_v62 = vmul.f32 -1.442695, %v2555_v10 }
 0x429   : > { %v4975_v23 = vmul.f32 -1.442695, %v2558_v28  ;;  %v12530_v28 = vld [vmem:[#allocation97_spill] sm:$0xff] }
 0x42a   : > { %5280 = vpow2.f32 %v4974_v13  ;;  %v4976_v16 = vmul.f32 -1.442695, %v2559_v31 }
 0x42b   : > { %5282 = vpow2.f32 %v4971_v4  ;;  %v12531_v4 = vld [vmem:[#allocation31_spill] sm:$0xff] }
 0x42c   : > { %5284 = vpow2.f32 %v4972_v62  ;;  %v999_v31 = vadd.f32 %v12531_v4, %v12530_v28 }
 0x42d   : > { %5286 = vpow2.f32 %v4975_v23 }
 0x42e   : > { %5288 = vpow2.f32 %v4976_v16  ;;  %v12533_v16 = vld [vmem:[#allocation99_spill] sm:$0xff] }
 0x430   : > { %v5275_v11 = vpop.eup %5274 }
 0x431   : > { %v2584_v58 = vadd.f32 1.0, %v5275_v11  ;;  %v12532_v11 = vld [vmem:[#allocation98_spill] sm:$0xff] }
 0x432   : > { %v5277_v41 = vpop.eup %5276 }
 0x433   : > { %v2585_v13 = vadd.f32 1.0, %v5277_v41  ;;  %5290 = vrcp.f32 %v2584_v58  ;;  %v12534_v58 = vld [vmem:[#allocation82_spill] sm:$0xff] }
 0x435   : > { %v5279_v12 = vpop.eup %5278  ;;  %5292 = vrcp.f32 %v2585_v13 }
 0x436   : > { %v2588_v0 = vadd.f32 1.0, %v5279_v12  ;;  %v1037_v12 = vadd.f32 %v12534_v58, %v12533_v16 }
 0x437   : > { %v5281_v32 = vpop.eup %5280 }
 0x438   : > { %v2589_v51 = vadd.f32 1.0, %v5281_v32  ;;  %5294 = vrcp.f32 %v2588_v0  ;;  %v5283_v5 = vpop.eup %5282 }
 0x439   : > { %v5285_v14 = vpop.eup %5284  ;;  %v2586_v35 = vadd.f32 1.0, %v5283_v5 }
 0x43a   : > { %5296 = vrcp.f32 %v2589_v51  ;;  %v5287_v24 = vpop.eup %5286  ;;  %v2587_v21 = vadd.f32 1.0, %v5285_v14 }
 0x43b   : > { %v5289_v19 = vpop.eup %5288  ;;  %v2590_v57 = vadd.f32 1.0, %v5287_v24  ;;  %5298 = vrcp.f32 %v2586_v35  ;;  %v12535_v24 = vld [vmem:[#allocation40_spill] sm:$0xff] }
 0x43c   : > { %v2591_v13 = vadd.f32 1.0, %v5289_v19  ;;  %5300 = vrcp.f32 %v2587_v21  ;;  %v12536_v19 = vld [vmem:[#allocation86_spill] sm:$0xff] }
 0x43d   : > { %5302 = vrcp.f32 %v2590_v57  ;;  %v1043_v21 = vadd.f32 %v12536_v19, %v12533_v16 }
 0x440   : > { %v5291_v10 = vpop.eup %5290 }
 0x442   : > { %v5293_v41 = vpop.eup %5292 }
 0x445   : > { %v5295_v14 = vpop.eup %5294 }
 0x447   : > { %v5297_v4 = vpop.eup %5296 }
 0x45d   : > { %v2541_v53 = vpop.f32.mrf.mxu1 }
 0x45e   : > { %v2542_v40 = vadd.f32 %v2541_v53, %v7892_v9  ;;  %v1005_v53 = vadd.f32 %v12535_v24, %v12530_v28 }
 0x45f   : > { %v2543_v17 = vpop.f32.mrf.mxu1 }
 0x460   : > { %v2608_v62 = vmul.f32 %v5291_v10, %v2542_v40  ;;  %v2544_v23 = vadd.f32 %v2543_v17, %v12532_v11 }
 0x461   : > { %v2547_v32 = vpop.f32.mrf.mxu1 }
 0x462   : > { %v2612_v0 = vadd.f32 %v2608_v62, %v999_v31  ;;  %v2609_v51 = vmul.f32 %v5293_v41, %v2544_v23  ;;  %v2548_v5 = vadd.f32 %v2547_v32, %v7892_v9  ;;  %v5299_v41 = vpop.eup %5298  ;;  %v5176_v32 = vpop.permute.xlu0 %5175 }
 0x463   : > { %v2549_v35 = vpop.f32.mrf.mxu1  ;;  %v5301_v58 = vpop.eup %5300  ;;  %v2628_v24 = vmul.f32 %v5299_v41, %v8736_v2 }
 0x464   : > { %5304 = vtanh.f32 %v2612_v0  ;;  %v2613_v40 = vadd.f32 %v2609_v51, %v1037_v12  ;;  %v2610_v10 = vmul.f32 %v5295_v14, %v2548_v5  ;;  %v2550_v17 = vadd.f32 %v2549_v35, %v12532_v11  ;;  %v5303_v57 = vpop.eup %5302 }
 0x465   : > { %5306 = vrcp.f32 %v2591_v13  ;;  %v2620_v0 = vsub.f32 1.0, %v5299_v41  ;;  %v9059_v51 = vunpack.i.l.bf16 %v5176_v32  ;;  %v2621_v13 = vsub.f32 1.0, %v5301_v58 }
 0x466   : > { %5308 = vtanh.f32 %v2613_v40  ;;  %v2614_v31 = vadd.f32 %v2610_v10, %v1005_v53  ;;  %v2611_v62 = vmul.f32 %v5297_v4, %v2550_v17  ;;  %v9062_v53 = vunpack.i.h.bf16 %v5176_v32  ;;  %v5181_v40 = vpop.permute.xlu1 %5180 }
 0x467   : > { %12537 = vst [vmem:[#allocation23_spill] sm:$0xff] %v9059_v51  ;;  %v2629_v17 = vmul.f32 %v5301_v58, %v8733_v33  ;;  %v2622_v19 = vsub.f32 1.0, %v5303_v57 }
 0x468   : > { %5310 = vtanh.f32 %v2614_v31  ;;  %v2615_v23 = vadd.f32 %v2611_v62, %v1043_v21  ;;  %12538 = vst [vmem:[#allocation90_spill] sm:$0xff] %v9062_v53  ;;  %v11707_v31 = vsub.f32 1.0, %v9059_v51  ;;  %v9066_v62 = vunpack.i.l.bf16 %v5181_v40 }
 0x46a   : > { %5312 = vtanh.f32 %v2615_v23  ;;  %12539 = vst [vmem:[#allocation27_spill] sm:$0xff] %v9066_v62  ;;  %v4981_v23 = vld [vmem:[%s6594_s9 + $0x20] sm:$0xff]  ;;  %v2681_v58 = vmul.f32 %v11707_v31, %v8733_v33  ;;  %v11705_v52 = vsub.f32 1.0, %v9066_v62  ;;  %v9197_v31 = vld [vmem:[%s6568_s29 + $0x1d8] sm:$0xff] }
 0x471   : > { %v5305_v12 = vpop.eup %5304 }
 0x472   : > { %v5307_v5 = vpop.eup %5306  ;;  %v2624_v14 = vmul.f32 %v5305_v12, %v2620_v0 }
 0x473   : > { %v5309_v35 = vpop.eup %5308  ;;  %v2623_v41 = vsub.f32 1.0, %v5307_v5 }
 0x474   : > { %v2625_v10 = vmul.f32 %v5309_v35, %v2621_v13  ;;  %v2632_v4 = vadd.f32 %v2628_v24, %v2624_v14  ;;  %v11708_v13 = vsub.f32 1.0, %v9062_v53  ;;  %v9071_v35 = vunpack.i.h.bf16 %v5181_v40  ;;  %v4985_v14 = vld [vmem:[%s6594_s9 + $0x50] sm:$0xff] }
 0x475   : > { %v5311_v21 = vpop.eup %5310  ;;  %v2630_v24 = vmul.f32 %v5303_v57, %v8761_v43 }
 0x476   : > { %v2633_v56 = vadd.f32 %v2629_v17, %v2625_v10  ;;  %v2672_v0 = vmul.f32 %v9062_v53, %v2632_v4  ;;  %v2626_v12 = vmul.f32 %v5311_v21, %v2622_v19  ;;  %12540 = vst [vmem:[#allocation93_spill] sm:$0xff] %v9071_v35  ;;  %v2631_v19 = vmul.f32 %v5307_v5, %v8753_v7  ;;  %v9225_v53 = vld [vmem:[%s6568_s29 + $0x1b8] sm:$0xff] }
 0x477   : > { %v5313_v32 = vpop.eup %5312  ;;  %v2680_v40 = vmul.f32 %v11708_v13, %v8736_v2  ;;  %v2683_v2 = vmul.f32 %v11705_v52, %v8753_v7  ;;  %v9189_v52 = vld [vmem:[%s6568_s29 + $0x200] sm:$0xff]  ;;  %v9201_v13 = vld [vmem:[%s6568_s29 + $0x210] sm:$0xff]  ;;  %12545 = vst [vmem:[#allocation108_spill] sm:$0xff] %v9225_v53 }
 0x478   : > { %v2673_v10 = vmul.f32 %v9059_v51, %v2633_v56  ;;  %v2693_v17 = vadd.f32 %v4981_v23, %v2672_v0  ;;  %v2627_v4 = vmul.f32 %v5313_v32, %v2623_v41  ;;  %v2634_v21 = vadd.f32 %v2630_v24, %v2626_v12  ;;  %v4982_v56 = vld [vmem:[%s6594_s9 + $0x28] sm:$0xff]  ;;  %v4986_v41 = vld [vmem:[%s6594_s9 + $0x58] sm:$0xff] }
 0x479   : > { %v9089_v23 = vadd.f32 %v2680_v40, %v2672_v0  ;;  %v11706_v32 = vsub.f32 1.0, %v9071_v35  ;;  %v9138_v40 = vld [vmem:[%s6568_s29 + $0x298] sm:$0xff] }
 0x47a   : > { %v9084_v8 = vadd.f32 %v2681_v58, %v2673_v10  ;;  %v2702_v33 = vadd.f32 %v4985_v14, %v2673_v10  ;;  %4983 = vst.msk [vmem:[%s6594_s9 + $0x20] sm:$0xff] %vm537_vm0, %v2693_v17  ;;  %v2635_v57 = vadd.f32 %v2631_v19, %v2627_v4  ;;  %v2674_v5 = vmul.f32 %v9071_v35, %v2634_v21  ;;  %v9108_v58 = vld [vmem:[%s6568_s29 + $0x2f0] sm:$0xff]  ;;  %v9118_v17 = vld [vmem:[%s6568_s29 + $0x2c8] sm:$0xff]  ;;  %v9128_v4 = vld [vmem:[%s6568_s29 + $0x2c0] sm:$0xff] }
 0x47b   : > { %v2682_v7 = vmul.f32 %v11706_v32, %v8761_v43  ;;  %v9114_v10 = vld [vmem:[%s6568_s29 + $0x2d0] sm:$0xff]  ;;  %v9124_v43 = vld [vmem:[%s6568_s29 + $0x2a8] sm:$0xff]  ;;  %v9193_v32 = vld [vmem:[%s6568_s29 + $0x218] sm:$0xff] }
 0x47c   : > { %4987 = vst.msk [vmem:[%s6594_s9 + $0x50] sm:$0xff] %vm537_vm0, %v2702_v33  ;;  %2806 = vmatprep.mubr.f32.mxu0 %v9084_v8  ;;  %2883 = vmatprep.mubr.f32.mxu1 %v9084_v8  ;;  %v2675_v0 = vmul.f32 %v9066_v62, %v2635_v57  ;;  %v2694_v12 = vadd.f32 %v4982_v56, %v2674_v5  ;;  %v9144_v21 = vld [vmem:[%s6568_s29 + $0x290] sm:$0xff]  ;;  %v9149_v33 = vld [vmem:[%s6568_s29 + $0x268] sm:$0xff]  ;;  %v9153_v57 = vld [vmem:[%s6568_s29 + $0x2a0] sm:$0xff] }
 0x47d   : > { %2807 = vmatmul.mubr.f32.vlgmr.msra.gmra.mxu0 %v9089_v23  ;;  %2884 = vmatmul.mubr.f32.vlgmr.msra.gmra.mxu1 %v9089_v23  ;;  %v9134_v19 = vadd.f32 %v2682_v7, %v2674_v5  ;;  %v9157_v56 = vld [vmem:[%s6568_s29 + $0x260] sm:$0xff]  ;;  %v9165_v5 = vld [vmem:[%s6568_s29 + $0x238] sm:$0xff]  ;;  %v9181_v7 = vld [vmem:[%s6568_s29 + $0x208] sm:$0xff] }
 0x47e   : > { %2897 = vmatpush1.msra.mxu0 %v9108_v58  ;;  %v9111_v14 = vadd.f32 %v2683_v2, %v2675_v0  ;;  %v2703_v24 = vadd.f32 %v4986_v41, %v2675_v0  ;;  %3164 = vmatpush1.msra.mxu1 %v9114_v10  ;;  %4984 = vst.msk [vmem:[%s6594_s9 + $0x28] sm:$0xff] %vm537_vm0, %v2694_v12  ;;  %v9161_v41 = vld [vmem:[%s6568_s29 + $0x278] sm:$0xff]  ;;  %v9169_v2 = vld [vmem:[%s6568_s29 + $0x270] sm:$0xff]  ;;  %v9177_v12 = vld [vmem:[%s6568_s29 + $0x248] sm:$0xff] }
 0x47f   : > { %2898 = vmatprep.subr.mxu0 %v9118_v17  ;;  %3165 = vmatprep.subr.mxu1 %v9124_v43  ;;  %v9173_v0 = vld [vmem:[%s6568_s29 + $0x230] sm:$0xff]  ;;  %v9217_v35 = vld [vmem:[%s6568_s29 + $0x1e0] sm:$0xff]  ;;  %v9229_v51 = vld [vmem:[%s6568_s29 + $0x178] sm:$0xff] }
 0x480   : > { %2899 = vmatpush1.msra.mxu0 %v9128_v4  ;;  %4988 = vst.msk [vmem:[%s6594_s9 + $0x58] sm:$0xff] %vm537_vm0, %v2703_v24  ;;  %2812 = vmatprep.mubr.f32.mxu0 %v9111_v14  ;;  %v9185_v24 = vld [vmem:[%s6568_s29 + $0x240] sm:$0xff]  ;;  %12543 = vst [vmem:[#allocation106_spill] sm:$0xff] %v9217_v35 }
 0x481   : > { %2889 = vmatprep.mubr.f32.mxu1 %v9111_v14  ;;  %2900 = vmatprep.subr.mxu0 %v9138_v40  ;;  %v9221_v62 = vld [vmem:[%s6568_s29 + $0x1a0] sm:$0xff]  ;;  %12546 = vst [vmem:[#allocation109_spill] sm:$0xff] %v9229_v51 }
 0x482   : > { %2813 = vmatmul.mubr.f32.gmra.mxu0 %v9134_v19  ;;  %2890 = vmatmul.mubr.f32.gmra.mxu1 %v9134_v19  ;;  %12544 = vst [vmem:[#allocation107_spill] sm:$0xff] %v9221_v62 }
 0x483   : > { %2901 = vmatpush1.msra.mxu0 %v9144_v21  ;;  %2960 = vmatprep.mubr.f32.mxu0 %v9084_v8 }
 0x484   : > { %2902 = vmatprep.subr.mxu0 %v9149_v33  ;;  %3166 = vmatpush1.msra.mxu1 %v9153_v57 }
 0x485   : > { %2903 = vmatpush1.msra.mxu0 %v9157_v56  ;;  %3167 = vmatprep.subr.mxu1 %v9161_v41 }
 0x486   : > { %2904 = vmatprep.subr.mxu0 %v9165_v5  ;;  %3168 = vmatpush1.msra.mxu1 %v9169_v2 }
 0x487   : > { %2905 = vmatpush1.msra.mxu0 %v9173_v0  ;;  %3169 = vmatprep.subr.mxu1 %v9177_v12 }
 0x488   : > { %2906 = vmatprep.subr.mxu0 %v9181_v7  ;;  %3170 = vmatpush1.msra.mxu1 %v9185_v24 }
 0x489   : > { %2907 = vmatpush1.msra.mxu0 %v9189_v52  ;;  %3171 = vmatprep.subr.mxu1 %v9193_v32 }
 0x48a   : > { %2908 = vmatprep.subr.mxu0 %v9197_v31  ;;  %3172 = vmatpush1.msra.mxu1 %v9201_v13 }
 0x48b   : > { %2909 = vmatpush1.msra.mxu0 %v9205_v50  ;;  %3173 = vmatprep.subr.mxu1 %v9209_v20  ;;  %v9652_v20 = vld [vmem:[%s6568_s29 + $0x258] sm:$0xff] }
 0x48c   : > { %2910 = vmatprep.subr.mxu0 %v9213_v42  ;;  %3174 = vmatpush1.msra.mxu1 %v9217_v35  ;;  %v9233_v42 = vld [vmem:[%s6568_s29 + $0x1b0] sm:$0xff] }
 0x48d   : > { %2911 = vmatpush1.msra.mxu0 %v9221_v62  ;;  %3175 = vmatprep.subr.mxu1 %v9225_v53  ;;  %12547 = vst [vmem:[#allocation110_spill] sm:$0xff] %v9233_v42  ;;  %v9237_v35 = vld [vmem:[%s6568_s29 + $0x170] sm:$0xff]  ;;  %v9241_v62 = vld [vmem:[%s6568_s29 + $0x188] sm:$0xff] }
 0x48e   : > { %2912 = vmatprep.subr.mxu0 %v9229_v51  ;;  %3176 = vmatpush1.msra.mxu1 %v9233_v42  ;;  %12548 = vst [vmem:[#allocation111_spill] sm:$0xff] %v9237_v35  ;;  %12549 = vst [vmem:[#allocation112_spill] sm:$0xff] %v9241_v62  ;;  %v9245_v53 = vld [vmem:[%s6568_s29 + $0x148] sm:$0xff]  ;;  %v9249_v51 = vld [vmem:[%s6568_s29 + $0x180] sm:$0xff] }
 0x48f   : > { %2913 = vmatpush1.msra.mxu0 %v9237_v35  ;;  %3177 = vmatprep.subr.mxu1 %v9241_v62  ;;  %12550 = vst [vmem:[#allocation113_spill] sm:$0xff] %v9245_v53  ;;  %12551 = vst [vmem:[#allocation114_spill] sm:$0xff] %v9249_v51  ;;  %v9253_v42 = vld [vmem:[%s6568_s29 + $0x140] sm:$0xff]  ;;  %v9257_v35 = vld [vmem:[%s6568_s29 + $0x158] sm:$0xff] }
 0x490   : > { %2914 = vmatprep.subr.mxu0 %v9245_v53  ;;  %3178 = vmatpush1.msra.mxu1 %v9249_v51  ;;  %12552 = vst [vmem:[#allocation115_spill] sm:$0xff] %v9253_v42  ;;  %12553 = vst [vmem:[#allocation116_spill] sm:$0xff] %v9257_v35  ;;  %v9261_v62 = vld [vmem:[%s6568_s29 + $0x118] sm:$0xff]  ;;  %v9265_v53 = vld [vmem:[%s6568_s29 + $0x150] sm:$0xff] }
 0x491   : > { %2915 = vmatpush1.msra.mxu0 %v9253_v42  ;;  %3179 = vmatprep.subr.mxu1 %v9257_v35  ;;  %12554 = vst [vmem:[#allocation117_spill] sm:$0xff] %v9261_v62  ;;  %12555 = vst [vmem:[#allocation118_spill] sm:$0xff] %v9265_v53  ;;  %v9269_v51 = vld [vmem:[%s6568_s29 + $0x110] sm:$0xff]  ;;  %v9273_v42 = vld [vmem:[%s6568_s29 + $0x128] sm:$0xff] }
 0x492   : > { %2916 = vmatprep.subr.mxu0 %v9261_v62  ;;  %3180 = vmatpush1.msra.mxu1 %v9265_v53  ;;  %12556 = vst [vmem:[#allocation119_spill] sm:$0xff] %v9269_v51  ;;  %12557 = vst [vmem:[#allocation120_spill] sm:$0xff] %v9273_v42  ;;  %v9277_v35 = vld [vmem:[%s6568_s29 + $0xe8] sm:$0xff]  ;;  %v9281_v62 = vld [vmem:[%s6568_s29 + $0x120] sm:$0xff] }
 0x493   : > { %2917 = vmatpush1.msra.mxu0 %v9269_v51  ;;  %3181 = vmatprep.subr.mxu1 %v9273_v42  ;;  %12558 = vst [vmem:[#allocation121_spill] sm:$0xff] %v9277_v35  ;;  %12559 = vst [vmem:[#allocation122_spill] sm:$0xff] %v9281_v62  ;;  %v9285_v53 = vld [vmem:[%s6568_s29 + $0xe0] sm:$0xff]  ;;  %v9289_v51 = vld [vmem:[%s6568_s29 + $0xf8] sm:$0xff] }
 0x494   : > { %2918 = vmatprep.subr.mxu0 %v9277_v35  ;;  %3182 = vmatpush1.msra.mxu1 %v9281_v62  ;;  %12560 = vst [vmem:[#allocation123_spill] sm:$0xff] %v9285_v53  ;;  %12561 = vst [vmem:[#allocation124_spill] sm:$0xff] %v9289_v51  ;;  %v9293_v42 = vld [vmem:[%s6568_s29 + $0xb8] sm:$0xff]  ;;  %v9297_v35 = vld [vmem:[%s6568_s29 + $0xf0] sm:$0xff] }
 0x495   : > { %2919 = vmatpush1.msra.mxu0 %v9285_v53  ;;  %3183 = vmatprep.subr.mxu1 %v9289_v51  ;;  %12562 = vst [vmem:[#allocation125_spill] sm:$0xff] %v9293_v42  ;;  %12563 = vst [vmem:[#allocation126_spill] sm:$0xff] %v9297_v35  ;;  %v9301_v62 = vld [vmem:[%s6568_s29 + $0xb0] sm:$0xff]  ;;  %v9305_v53 = vld [vmem:[%s6568_s29 + $0xc8] sm:$0xff] }
 0x496   : > { %2920 = vmatprep.subr.mxu0 %v9293_v42  ;;  %3184 = vmatpush1.msra.mxu1 %v9297_v35  ;;  %12564 = vst [vmem:[#allocation127_spill] sm:$0xff] %v9301_v62  ;;  %12565 = vst [vmem:[#allocation128_spill] sm:$0xff] %v9305_v53  ;;  %v9309_v51 = vld [vmem:[%s6568_s29 + $0x88] sm:$0xff]  ;;  %v9313_v42 = vld [vmem:[%s6568_s29 + $0xc0] sm:$0xff] }
 0x497   : > { %2921 = vmatpush1.msra.mxu0 %v9301_v62  ;;  %3185 = vmatprep.subr.mxu1 %v9305_v53  ;;  %12566 = vst [vmem:[#allocation129_spill] sm:$0xff] %v9309_v51  ;;  %12567 = vst [vmem:[#allocation130_spill] sm:$0xff] %v9313_v42  ;;  %v9317_v35 = vld [vmem:[%s6568_s29 + $0x80] sm:$0xff]  ;;  %v9321_v62 = vld [vmem:[%s6568_s29 + $0x98] sm:$0xff] }
 0x498   : > { %2922 = vmatprep.subr.mxu0 %v9309_v51  ;;  %3186 = vmatpush1.msra.mxu1 %v9313_v42  ;;  %12568 = vst [vmem:[#allocation131_spill] sm:$0xff] %v9317_v35  ;;  %12569 = vst [vmem:[#allocation132_spill] sm:$0xff] %v9321_v62  ;;  %v9325_v53 = vld [vmem:[%s6568_s29 + $0x58] sm:$0xff]  ;;  %v9329_v51 = vld [vmem:[%s6568_s29 + $0x90] sm:$0xff] }
 0x499   : > { %2923 = vmatpush1.msra.mxu0 %v9317_v35  ;;  %3187 = vmatprep.subr.mxu1 %v9321_v62  ;;  %12570 = vst [vmem:[#allocation133_spill] sm:$0xff] %v9325_v53  ;;  %12571 = vst [vmem:[#allocation134_spill] sm:$0xff] %v9329_v51  ;;  %v9333_v42 = vld [vmem:[%s6568_s29 + $0x50] sm:$0xff]  ;;  %v9337_v35 = vld [vmem:[%s6568_s29 + $0x68] sm:$0xff] }
 0x49a   : > { %2924 = vmatprep.subr.mxu0 %v9325_v53  ;;  %3188 = vmatpush1.msra.mxu1 %v9329_v51  ;;  %12572 = vst [vmem:[#allocation135_spill] sm:$0xff] %v9333_v42  ;;  %12573 = vst [vmem:[#allocation136_spill] sm:$0xff] %v9337_v35  ;;  %v9341_v62 = vld [vmem:[%s6568_s29 + $0x28] sm:$0xff]  ;;  %v9345_v53 = vld [vmem:[%s6568_s29 + $0x60] sm:$0xff] }
 0x49b   : > { %2925 = vmatpush1.msra.mxu0 %v9333_v42  ;;  %3189 = vmatprep.subr.mxu1 %v9337_v35  ;;  %12574 = vst [vmem:[#allocation137_spill] sm:$0xff] %v9341_v62  ;;  %12575 = vst [vmem:[#allocation138_spill] sm:$0xff] %v9345_v53  ;;  %v9349_v51 = vld [vmem:[%s6568_s29 + $0x20] sm:$0xff]  ;;  %v9353_v42 = vld [vmem:[%s6568_s29 + $0x38] sm:$0xff] }
 0x49c   : > { %2926 = vmatprep.subr.mxu0 %v9341_v62  ;;  %3190 = vmatpush1.msra.mxu1 %v9345_v53  ;;  %12576 = vst [vmem:[#allocation139_spill] sm:$0xff] %v9349_v51  ;;  %12577 = vst [vmem:[#allocation140_spill] sm:$0xff] %v9353_v42  ;;  %v9357_v35 = vld [vmem:[%s6568_s29 + $0x5f8] sm:$0xff]  ;;  %v9361_v62 = vld [vmem:[%s6568_s29 + $0x30] sm:$0xff] }
 0x49d   : > { %2927 = vmatpush1.msra.mxu0 %v9349_v51  ;;  %3191 = vmatprep.subr.mxu1 %v9353_v42  ;;  %12578 = vst [vmem:[#allocation141_spill] sm:$0xff] %v9357_v35  ;;  %12579 = vst [vmem:[#allocation142_spill] sm:$0xff] %v9361_v62  ;;  %v9365_v53 = vld [vmem:[%s6568_s29 + $0x5f0] sm:$0xff]  ;;  %v9369_v51 = vld [vmem:[%s6568_s29 + $0x8] sm:$0xff] }
 0x49e   : > { %2928 = vmatprep.subr.mxu0 %v9357_v35  ;;  %3192 = vmatpush1.msra.mxu1 %v9361_v62  ;;  %12580 = vst [vmem:[#allocation143_spill] sm:$0xff] %v9365_v53  ;;  %12581 = vst [vmem:[#allocation144_spill] sm:$0xff] %v9369_v51  ;;  %v9373_v42 = vld [vmem:[%s6568_s29 + $0x5c8] sm:$0xff]  ;;  %v9377_v35 = vld [vmem:[%s6568_s29] sm:$0xff] }
 0x49f   : > { %2929 = vmatpush2.msra.mxu0 %v9365_v53  ;;  %3193 = vmatprep.subr.mxu1 %v9369_v51  ;;  %12582 = vst [vmem:[#allocation145_spill] sm:$0xff] %v9373_v42  ;;  %12583 = vst [vmem:[#allocation146_spill] sm:$0xff] %v9377_v35  ;;  %v9381_v62 = vld [vmem:[%s6568_s29 + $0x5c0] sm:$0xff]  ;;  %v9385_v53 = vld [vmem:[%s6568_s29 + $0x5d8] sm:$0xff] }
 0x4a0   : > { %2930 = vmatprep.subr.mxu0 %v9373_v42  ;;  %3194 = vmatpush1.msra.mxu1 %v9377_v35  ;;  %12584 = vst [vmem:[#allocation147_spill] sm:$0xff] %v9381_v62  ;;  %12585 = vst [vmem:[#allocation148_spill] sm:$0xff] %v9385_v53  ;;  %v9389_v51 = vld [vmem:[%s6568_s29 + $0x598] sm:$0xff]  ;;  %v9393_v42 = vld [vmem:[%s6568_s29 + $0x5d0] sm:$0xff] }
 0x4a1   : > { %2931 = vmatpush2.msra.mxu0 %v9381_v62  ;;  %3195 = vmatprep.subr.mxu1 %v9385_v53  ;;  %12586 = vst [vmem:[#allocation149_spill] sm:$0xff] %v9389_v51  ;;  %12587 = vst [vmem:[#allocation150_spill] sm:$0xff] %v9393_v42  ;;  %v9397_v35 = vld [vmem:[%s6568_s29 + $0x590] sm:$0xff]  ;;  %v9401_v62 = vld [vmem:[%s6568_s29 + $0x5a8] sm:$0xff] }
 0x4a2   : > { %2932 = vmatprep.subr.mxu0 %v9389_v51  ;;  %3196 = vmatpush2.msra.mxu1 %v9393_v42  ;;  %12588 = vst [vmem:[#allocation151_spill] sm:$0xff] %v9397_v35  ;;  %12589 = vst [vmem:[#allocation152_spill] sm:$0xff] %v9401_v62  ;;  %v9405_v53 = vld [vmem:[%s6568_s29 + $0x568] sm:$0xff]  ;;  %v9409_v51 = vld [vmem:[%s6568_s29 + $0x5a0] sm:$0xff] }
 0x4a3   : > { %2933 = vmatpush2.msra.mxu0 %v9397_v35  ;;  %3197 = vmatprep.subr.mxu1 %v9401_v62  ;;  %12590 = vst [vmem:[#allocation153_spill] sm:$0xff] %v9405_v53  ;;  %12591 = vst [vmem:[#allocation154_spill] sm:$0xff] %v9409_v51  ;;  %v9413_v42 = vld [vmem:[%s6568_s29 + $0x560] sm:$0xff]  ;;  %v9417_v35 = vld [vmem:[%s6568_s29 + $0x578] sm:$0xff] }
 0x4a4   : > { %2934 = vmatprep.subr.mxu0 %v9405_v53  ;;  %3198 = vmatpush2.msra.mxu1 %v9409_v51  ;;  %12592 = vst [vmem:[#allocation155_spill] sm:$0xff] %v9413_v42  ;;  %12593 = vst [vmem:[#allocation156_spill] sm:$0xff] %v9417_v35  ;;  %v9421_v62 = vld [vmem:[%s6568_s29 + $0x538] sm:$0xff]  ;;  %v9425_v53 = vld [vmem:[%s6568_s29 + $0x570] sm:$0xff] }
 0x4a5   : > { %2935 = vmatpush2.msra.mxu0 %v9413_v42  ;;  %3199 = vmatprep.subr.mxu1 %v9417_v35  ;;  %12594 = vst [vmem:[#allocation157_spill] sm:$0xff] %v9421_v62  ;;  %12595 = vst [vmem:[#allocation158_spill] sm:$0xff] %v9425_v53  ;;  %v9429_v51 = vld [vmem:[%s6568_s29 + $0x530] sm:$0xff]  ;;  %v9433_v42 = vld [vmem:[%s6568_s29 + $0x548] sm:$0xff] }
 0x4a6   : > { %2936 = vmatprep.subr.mxu0 %v9421_v62  ;;  %3200 = vmatpush2.msra.mxu1 %v9425_v53  ;;  %12596 = vst [vmem:[#allocation159_spill] sm:$0xff] %v9429_v51  ;;  %12597 = vst [vmem:[#allocation160_spill] sm:$0xff] %v9433_v42  ;;  %v9437_v35 = vld [vmem:[%s6568_s29 + $0x508] sm:$0xff]  ;;  %v9441_v62 = vld [vmem:[%s6568_s29 + $0x540] sm:$0xff] }
 0x4a7   : > { %2937 = vmatpush2.msra.mxu0 %v9429_v51  ;;  %3201 = vmatprep.subr.mxu1 %v9433_v42  ;;  %12598 = vst [vmem:[#allocation161_spill] sm:$0xff] %v9437_v35  ;;  %12599 = vst [vmem:[#allocation162_spill] sm:$0xff] %v9441_v62  ;;  %v9445_v53 = vld [vmem:[%s6568_s29 + $0x500] sm:$0xff]  ;;  %v9449_v51 = vld [vmem:[%s6568_s29 + $0x518] sm:$0xff] }
 0x4a8   : > { %2938 = vmatprep.subr.mxu0 %v9437_v35  ;;  %3202 = vmatpush2.msra.mxu1 %v9441_v62  ;;  %12600 = vst [vmem:[#allocation163_spill] sm:$0xff] %v9445_v53  ;;  %12601 = vst [vmem:[#allocation164_spill] sm:$0xff] %v9449_v51  ;;  %v9453_v42 = vld [vmem:[%s6568_s29 + $0x4d8] sm:$0xff]  ;;  %v9457_v35 = vld [vmem:[%s6568_s29 + $0x510] sm:$0xff] }
 0x4a9   : > { %2939 = vmatpush2.msra.mxu0 %v9445_v53  ;;  %3203 = vmatprep.subr.mxu1 %v9449_v51  ;;  %12602 = vst [vmem:[#allocation165_spill] sm:$0xff] %v9453_v42  ;;  %12603 = vst [vmem:[#allocation166_spill] sm:$0xff] %v9457_v35  ;;  %v9461_v62 = vld [vmem:[%s6568_s29 + $0x4d0] sm:$0xff]  ;;  %v9465_v53 = vld [vmem:[%s6568_s29 + $0x4e8] sm:$0xff] }
 0x4aa   : > { %2940 = vmatprep.subr.mxu0 %v9453_v42  ;;  %3204 = vmatpush2.msra.mxu1 %v9457_v35  ;;  %12604 = vst [vmem:[#allocation167_spill] sm:$0xff] %v9461_v62  ;;  %12605 = vst [vmem:[#allocation168_spill] sm:$0xff] %v9465_v53  ;;  %v9469_v51 = vld [vmem:[%s6568_s29 + $0x4a8] sm:$0xff]  ;;  %v9473_v42 = vld [vmem:[%s6568_s29 + $0x4e0] sm:$0xff] }
 0x4ab   : > { %2941 = vmatpush2.msra.mxu0 %v9461_v62  ;;  %3205 = vmatprep.subr.mxu1 %v9465_v53  ;;  %12606 = vst [vmem:[#allocation169_spill] sm:$0xff] %v9469_v51  ;;  %12607 = vst [vmem:[#allocation170_spill] sm:$0xff] %v9473_v42  ;;  %v9477_v35 = vld [vmem:[%s6568_s29 + $0x4a0] sm:$0xff]  ;;  %v9481_v62 = vld [vmem:[%s6568_s29 + $0x4b8] sm:$0xff] }
 0x4ac   : > { %2942 = vmatprep.subr.mxu0 %v9469_v51  ;;  %3206 = vmatpush2.msra.mxu1 %v9473_v42  ;;  %12608 = vst [vmem:[#allocation171_spill] sm:$0xff] %v9477_v35  ;;  %12609 = vst [vmem:[#allocation172_spill] sm:$0xff] %v9481_v62  ;;  %v9485_v53 = vld [vmem:[%s6568_s29 + $0x478] sm:$0xff]  ;;  %v9489_v51 = vld [vmem:[%s6568_s29 + $0x4b0] sm:$0xff] }
 0x4ad   : > { %2943 = vmatpush2.msra.mxu0 %v9477_v35  ;;  %3207 = vmatprep.subr.mxu1 %v9481_v62  ;;  %12610 = vst [vmem:[#allocation173_spill] sm:$0xff] %v9485_v53  ;;  %12611 = vst [vmem:[#allocation174_spill] sm:$0xff] %v9489_v51  ;;  %v9493_v42 = vld [vmem:[%s6568_s29 + $0x470] sm:$0xff]  ;;  %v9497_v35 = vld [vmem:[%s6568_s29 + $0x488] sm:$0xff] }
 0x4ae   : > { %2944 = vmatprep.subr.mxu0 %v9485_v53  ;;  %3208 = vmatpush2.msra.mxu1 %v9489_v51  ;;  %12612 = vst [vmem:[#allocation175_spill] sm:$0xff] %v9493_v42  ;;  %12613 = vst [vmem:[#allocation176_spill] sm:$0xff] %v9497_v35  ;;  %v9501_v62 = vld [vmem:[%s6568_s29 + $0x448] sm:$0xff]  ;;  %v9505_v53 = vld [vmem:[%s6568_s29 + $0x480] sm:$0xff] }
 0x4af   : > { %2945 = vmatpush2.msra.mxu0 %v9493_v42  ;;  %3209 = vmatprep.subr.mxu1 %v9497_v35  ;;  %12614 = vst [vmem:[#allocation177_spill] sm:$0xff] %v9501_v62  ;;  %12615 = vst [vmem:[#allocation178_spill] sm:$0xff] %v9505_v53  ;;  %v9509_v51 = vld [vmem:[%s6568_s29 + $0x440] sm:$0xff]  ;;  %v9513_v42 = vld [vmem:[%s6568_s29 + $0x458] sm:$0xff] }
 0x4b0   : > { %2946 = vmatprep.subr.mxu0 %v9501_v62  ;;  %3210 = vmatpush2.msra.mxu1 %v9505_v53  ;;  %12616 = vst [vmem:[#allocation179_spill] sm:$0xff] %v9509_v51  ;;  %12617 = vst [vmem:[#allocation180_spill] sm:$0xff] %v9513_v42  ;;  %v9517_v35 = vld [vmem:[%s6568_s29 + $0x418] sm:$0xff]  ;;  %v9521_v62 = vld [vmem:[%s6568_s29 + $0x450] sm:$0xff] }
 0x4b1   : > { %2947 = vmatpush2.msra.mxu0 %v9509_v51  ;;  %3211 = vmatprep.subr.mxu1 %v9513_v42  ;;  %12618 = vst [vmem:[#allocation181_spill] sm:$0xff] %v9517_v35  ;;  %12619 = vst [vmem:[#allocation182_spill] sm:$0xff] %v9521_v62  ;;  %v9525_v53 = vld [vmem:[%s6568_s29 + $0x410] sm:$0xff]  ;;  %v9529_v51 = vld [vmem:[%s6568_s29 + $0x428] sm:$0xff] }
 0x4b2   : > { %2948 = vmatprep.subr.mxu0 %v9517_v35  ;;  %3212 = vmatpush2.msra.mxu1 %v9521_v62  ;;  %12620 = vst [vmem:[#allocation183_spill] sm:$0xff] %v9525_v53  ;;  %12621 = vst [vmem:[#allocation184_spill] sm:$0xff] %v9529_v51  ;;  %v9533_v42 = vld [vmem:[%s6568_s29 + $0x3e8] sm:$0xff]  ;;  %v9537_v35 = vld [vmem:[%s6568_s29 + $0x420] sm:$0xff] }
 0x4b3   : > { %2949 = vmatpush2.msra.mxu0 %v9525_v53  ;;  %3213 = vmatprep.subr.mxu1 %v9529_v51  ;;  %12622 = vst [vmem:[#allocation185_spill] sm:$0xff] %v9533_v42  ;;  %12623 = vst [vmem:[#allocation186_spill] sm:$0xff] %v9537_v35  ;;  %v9541_v62 = vld [vmem:[%s6568_s29 + $0x3e0] sm:$0xff]  ;;  %v9545_v53 = vld [vmem:[%s6568_s29 + $0x3f8] sm:$0xff] }
 0x4b4   : > { %2950 = vmatprep.subr.mxu0 %v9533_v42  ;;  %3214 = vmatpush2.msra.mxu1 %v9537_v35  ;;  %12624 = vst [vmem:[#allocation187_spill] sm:$0xff] %v9541_v62  ;;  %12625 = vst [vmem:[#allocation188_spill] sm:$0xff] %v9545_v53  ;;  %v9549_v51 = vld [vmem:[%s6568_s29 + $0x3b8] sm:$0xff]  ;;  %v9553_v42 = vld [vmem:[%s6568_s29 + $0x3f0] sm:$0xff] }
 0x4b5   : > { %2951 = vmatpush2.msra.mxu0 %v9541_v62  ;;  %3215 = vmatprep.subr.mxu1 %v9545_v53  ;;  %12626 = vst [vmem:[#allocation189_spill] sm:$0xff] %v9549_v51  ;;  %12627 = vst [vmem:[#allocation190_spill] sm:$0xff] %v9553_v42  ;;  %v9557_v35 = vld [vmem:[%s6568_s29 + $0x3b0] sm:$0xff]  ;;  %v9561_v62 = vld [vmem:[%s6568_s29 + $0x3c8] sm:$0xff] }
 0x4b6   : > { %2952 = vmatprep.subr.mxu0 %v9549_v51  ;;  %3216 = vmatpush2.msra.mxu1 %v9553_v42  ;;  %12628 = vst [vmem:[#allocation191_spill] sm:$0xff] %v9557_v35  ;;  %12629 = vst [vmem:[#allocation192_spill] sm:$0xff] %v9561_v62  ;;  %v9565_v53 = vld [vmem:[%s6568_s29 + $0x388] sm:$0xff]  ;;  %v9569_v51 = vld [vmem:[%s6568_s29 + $0x3c0] sm:$0xff] }
 0x4b7   : > { %2953 = vmatpush2.msra.mxu0 %v9557_v35  ;;  %3217 = vmatprep.subr.mxu1 %v9561_v62  ;;  %12630 = vst [vmem:[#allocation193_spill] sm:$0xff] %v9565_v53  ;;  %12631 = vst [vmem:[#allocation194_spill] sm:$0xff] %v9569_v51  ;;  %v9573_v42 = vld [vmem:[%s6568_s29 + $0x380] sm:$0xff]  ;;  %v9577_v35 = vld [vmem:[%s6568_s29 + $0x398] sm:$0xff] }
 0x4b8   : > { %2954 = vmatprep.subr.mxu0 %v9565_v53  ;;  %3218 = vmatpush2.msra.mxu1 %v9569_v51  ;;  %12632 = vst [vmem:[#allocation195_spill] sm:$0xff] %v9573_v42  ;;  %12633 = vst [vmem:[#allocation196_spill] sm:$0xff] %v9577_v35  ;;  %v9581_v62 = vld [vmem:[%s6568_s29 + $0x358] sm:$0xff]  ;;  %v9585_v53 = vld [vmem:[%s6568_s29 + $0x390] sm:$0xff] }
 0x4b9   : > { %2955 = vmatpush2.msra.mxu0 %v9573_v42  ;;  %3219 = vmatprep.subr.mxu1 %v9577_v35  ;;  %12634 = vst [vmem:[#allocation197_spill] sm:$0xff] %v9581_v62  ;;  %12635 = vst [vmem:[#allocation198_spill] sm:$0xff] %v9585_v53  ;;  %v9589_v51 = vld [vmem:[%s6568_s29 + $0x350] sm:$0xff]  ;;  %v9593_v42 = vld [vmem:[%s6568_s29 + $0x368] sm:$0xff] }
 0x4ba   : > { %2956 = vmatprep.subr.mxu0 %v9581_v62  ;;  %3220 = vmatpush2.msra.mxu1 %v9585_v53  ;;  %12636 = vst [vmem:[#allocation199_spill] sm:$0xff] %v9589_v51  ;;  %12637 = vst [vmem:[#allocation200_spill] sm:$0xff] %v9593_v42  ;;  %v9597_v35 = vld [vmem:[%s6568_s29 + $0x328] sm:$0xff]  ;;  %v9601_v62 = vld [vmem:[%s6568_s29 + $0x360] sm:$0xff] }
 0x4bb   : > { %2957 = vmatpush2.msra.mxu0 %v9589_v51  ;;  %3221 = vmatprep.subr.mxu1 %v9593_v42  ;;  %12638 = vst [vmem:[#allocation201_spill] sm:$0xff] %v9597_v35  ;;  %12639 = vst [vmem:[#allocation202_spill] sm:$0xff] %v9601_v62  ;;  %v9605_v53 = vld [vmem:[%s6568_s29 + $0x320] sm:$0xff]  ;;  %v9609_v51 = vld [vmem:[%s6568_s29 + $0x338] sm:$0xff] }
 0x4bc   : > { %2958 = vmatprep.subr.mxu0 %v9597_v35  ;;  %3222 = vmatpush2.msra.mxu1 %v9601_v62  ;;  %12640 = vst [vmem:[#allocation203_spill] sm:$0xff] %v9605_v53  ;;  %12641 = vst [vmem:[#allocation204_spill] sm:$0xff] %v9609_v51  ;;  %v9614_v42 = vld [vmem:[%s6568_s29 + $0x2e8] sm:$0xff]  ;;  %v9619_v62 = vld [vmem:[%s6568_s29 + $0x2e0] sm:$0xff] }
 0x4bd   : > { %2959 = vmatpush2.msra.mxu0 %v9605_v53  ;;  %3223 = vmatprep.subr.mxu1 %v9609_v51  ;;  %12642 = vst [vmem:[#allocation205_spill] sm:$0xff] %v9614_v42  ;;  %12643 = vst [vmem:[#allocation206_spill] sm:$0xff] %v9619_v62  ;;  %v9623_v53 = vld [vmem:[%s6568_s29 + $0x2b8] sm:$0xff]  ;;  %v9627_v51 = vld [vmem:[%s6568_s29 + $0x330] sm:$0xff] }
 0x4be   : > { %2961 = vmatmul.mubr.f32.vlgmr.msra.gmra.mxu0 %v9089_v23  ;;  %3240 = vmatprep.subr.mxu0 %v9614_v42  ;;  %12644 = vst [vmem:[#allocation207_spill] sm:$0xff] %v9623_v53  ;;  %12645 = vst [vmem:[#allocation208_spill] sm:$0xff] %v9627_v51  ;;  %v9631_v35 = vld [vmem:[%s6568_s29 + $0x2b0] sm:$0xff]  ;;  %v9635_v42 = vld [vmem:[%s6568_s29 + $0x308] sm:$0xff] }
 0x4bf   : > { %2966 = vmatprep.mubr.f32.mxu0 %v9111_v14  ;;  %3241 = vmatpush1.msra.mxu0 %v9619_v62  ;;  %12646 = vst [vmem:[#allocation209_spill] sm:$0xff] %v9631_v35  ;;  %12647 = vst [vmem:[#allocation210_spill] sm:$0xff] %v9635_v42  ;;  %v9640_v62 = vld [vmem:[%s6568_s29 + $0x288] sm:$0xff] }
 0x4c0   : > { %3242 = vmatprep.subr.mxu0 %v9623_v53  ;;  %3224 = vmatpush2.msra.mxu1 %v9627_v51  ;;  %v9644_v53 = vld [vmem:[%s6568_s29 + $0x280] sm:$0xff] }
 0x4c1   : > { %3243 = vmatpush1.msra.mxu0 %v9631_v35  ;;  %3225 = vmatprep.subr.mxu1 %v9635_v42  ;;  %v9648_v51 = vld [vmem:[%s6568_s29 + $0x300] sm:$0xff]  ;;  %v9656_v35 = vld [vmem:[%s6568_s29 + $0x2f8] sm:$0xff]  ;;  %v9660_v42 = vld [vmem:[%s6568_s29 + $0x250] sm:$0xff] }
 0x4c2   : > { %2967 = vmatmul.mubr.f32.gmra.mxu0 %v9134_v19  ;;  %3244 = vmatprep.subr.mxu0 %v9640_v62 }
 0x4c3   : > { %3245 = vmatpush1.msra.mxu0 %v9644_v53  ;;  %3226 = vmatpush2.msra.mxu1 %v9648_v51 }
 0x4c4   : > { %3246 = vmatprep.subr.mxu0 %v9652_v20  ;;  %3317 = vmatprep.subr.mxu1 %v9656_v35 }
 0x4c5   : > { %3247 = vmatpush1.msra.mxu0 %v9660_v42 }
 0x4c6   : > { %3248 = vmatprep.subr.mxu0 %v8905_v39  ;;  %v9685_v39 = vld [vmem:[%s6568_s29 + $0x40] sm:$0xff] }
 0x4c7   : > { %3249 = vmatpush1.msra.mxu0 %v8909_v46  ;;  %v9689_v46 = vld [vmem:[%s6568_s29 + $0x18] sm:$0xff] }
 0x4c8   : > { %3250 = vmatprep.subr.mxu0 %v8913_v59  ;;  %12648 = vst [vmem:[#allocation211_spill] sm:$0xff] %v9689_v46  ;;  %v9693_v59 = vld [vmem:[%s6568_s29 + $0x10] sm:$0xff] }
 0x4c9   : > { %3251 = vmatpush1.msra.mxu0 %v8917_v47  ;;  %12649 = vst [vmem:[#allocation212_spill] sm:$0xff] %v9693_v59  ;;  %v9697_v47 = vld [vmem:[%s6568_s29 + $0x5e8] sm:$0xff] }
 0x4ca   : > { %3252 = vmatprep.subr.mxu0 %v8921_v26  ;;  %12650 = vst [vmem:[#allocation213_spill] sm:$0xff] %v9697_v47  ;;  %v9701_v26 = vld [vmem:[%s6568_s29 + $0x5e0] sm:$0xff] }
 0x4cb   : > { %3253 = vmatpush1.msra.mxu0 %v8925_v60  ;;  %12651 = vst [vmem:[#allocation214_spill] sm:$0xff] %v9701_v26  ;;  %v9705_v60 = vld [vmem:[%s6568_s29 + $0x5b8] sm:$0xff] }
 0x4cc   : > { %3254 = vmatprep.subr.mxu0 %v8929_v30  ;;  %12652 = vst [vmem:[#allocation215_spill] sm:$0xff] %v9705_v60  ;;  %v9709_v30 = vld [vmem:[%s6568_s29 + $0x5b0] sm:$0xff] }
 0x4cd   : > { %3255 = vmatpush1.msra.mxu0 %v8933_v38  ;;  %12653 = vst [vmem:[#allocation216_spill] sm:$0xff] %v9709_v30  ;;  %v9713_v38 = vld [vmem:[%s6568_s29 + $0x588] sm:$0xff] }
 0x4ce   : > { %3256 = vmatprep.subr.mxu0 %v8937_v61  ;;  %12654 = vst [vmem:[#allocation217_spill] sm:$0xff] %v9713_v38  ;;  %v9717_v61 = vld [vmem:[%s6568_s29 + $0x580] sm:$0xff] }
 0x4cf   : > { %3257 = vmatpush1.msra.mxu0 %v8941_v1  ;;  %12655 = vst [vmem:[#allocation218_spill] sm:$0xff] %v9717_v61  ;;  %v9721_v1 = vld [vmem:[%s6568_s29 + $0x558] sm:$0xff] }
 0x4d0   : > { %3258 = vmatprep.subr.mxu0 %v8945_v25  ;;  %12656 = vst [vmem:[#allocation219_spill] sm:$0xff] %v9721_v1  ;;  %v9725_v25 = vld [vmem:[%s6568_s29 + $0x550] sm:$0xff] }
 0x4d1   : > { %3259 = vmatpush1.msra.mxu0 %v8949_v45  ;;  %12657 = vst [vmem:[#allocation220_spill] sm:$0xff] %v9725_v25  ;;  %v9729_v45 = vld [vmem:[%s6568_s29 + $0x528] sm:$0xff] }
 0x4d2   : > { %3260 = vmatprep.subr.mxu0 %v8953_v22  ;;  %12658 = vst [vmem:[#allocation221_spill] sm:$0xff] %v9729_v45  ;;  %v9733_v22 = vld [vmem:[%s6568_s29 + $0x520] sm:$0xff] }
 0x4d3   : > { %3261 = vmatpush1.msra.mxu0 %v8957_v15  ;;  %12659 = vst [vmem:[#allocation222_spill] sm:$0xff] %v9733_v22  ;;  %v9737_v15 = vld [vmem:[%s6568_s29 + $0x4f8] sm:$0xff] }
 0x4d4   : > { %3262 = vmatprep.subr.mxu0 %v8961_v29  ;;  %12660 = vst [vmem:[#allocation223_spill] sm:$0xff] %v9737_v15  ;;  %v9741_v29 = vld [vmem:[%s6568_s29 + $0x4f0] sm:$0xff] }
 0x4d5   : > { %3263 = vmatpush1.msra.mxu0 %v8965_v27  ;;  %12661 = vst [vmem:[#allocation224_spill] sm:$0xff] %v9741_v29  ;;  %v9745_v27 = vld [vmem:[%s6568_s29 + $0x4c8] sm:$0xff] }
 0x4d6   : > { %3264 = vmatprep.subr.mxu0 %v8969_v6  ;;  %12662 = vst [vmem:[#allocation225_spill] sm:$0xff] %v9745_v27  ;;  %v9749_v6 = vld [vmem:[%s6568_s29 + $0x4c0] sm:$0xff] }
 0x4d7   : > { %3265 = vmatpush1.msra.mxu0 %v8973_v37  ;;  %12663 = vst [vmem:[#allocation226_spill] sm:$0xff] %v9749_v6  ;;  %v9753_v37 = vld [vmem:[%s6568_s29 + $0x498] sm:$0xff] }
 0x4d8   : > { %3266 = vmatprep.subr.mxu0 %v8977_v63  ;;  %12664 = vst [vmem:[#allocation227_spill] sm:$0xff] %v9753_v37  ;;  %v9757_v63 = vld [vmem:[%s6568_s29 + $0x490] sm:$0xff] }
 0x4d9   : > { %3267 = vmatpush1.msra.mxu0 %v8981_v3  ;;  %12665 = vst [vmem:[#allocation228_spill] sm:$0xff] %v9757_v63  ;;  %v9761_v3 = vld [vmem:[%s6568_s29 + $0x468] sm:$0xff] }
 0x4da   : > { %3268 = vmatprep.subr.mxu0 %v8985_v34  ;;  %12666 = vst [vmem:[#allocation229_spill] sm:$0xff] %v9761_v3  ;;  %v9765_v34 = vld [vmem:[%s6568_s29 + $0x460] sm:$0xff] }
 0x4db   : > { %3269 = vmatpush1.msra.mxu0 %v9685_v39  ;;  %12667 = vst [vmem:[#allocation230_spill] sm:$0xff] %v9765_v34 }
 0x4dc   : > { %3270 = vmatprep.subr.mxu0 %v9689_v46 }
 0x4dd   : > { %3271 = vmatpush1.msra.mxu0 %v9693_v59 }
 0x4de   : > { %3272 = vmatprep.subr.mxu0 %v9697_v47  ;;  %v12685_v47 = vld [vmem:[#allocation43_spill] sm:$0xff] }
 0x4df   : > { %3273 = vmatpush2.msra.mxu0 %v9701_v26 }
 0x4e0   : > { %3274 = vmatprep.subr.mxu0 %v9705_v60 }
 0x4e1   : > { %3275 = vmatpush2.msra.mxu0 %v9709_v30 }
 0x4e2   : > { %3276 = vmatprep.subr.mxu0 %v9713_v38 }
 0x4e3   : > { %3277 = vmatpush2.msra.mxu0 %v9717_v61 }
 0x4e4   : > { %3278 = vmatprep.subr.mxu0 %v9721_v1 }
 0x4e5   : > { %3279 = vmatpush2.msra.mxu0 %v9725_v25 }
 0x4e6   : > { %3280 = vmatprep.subr.mxu0 %v9729_v45  ;;  %v12682_v45 = vld [vmem:[#allocation69_spill] sm:$0xff] }
 0x4e7   : > { %3281 = vmatpush2.msra.mxu0 %v9733_v22 }
 0x4e8   : > { %3282 = vmatprep.subr.mxu0 %v9737_v15 }
 0x4e9   : > { %3283 = vmatpush2.msra.mxu0 %v9741_v29 }
 0x4ea   : > { %3284 = vmatprep.subr.mxu0 %v9745_v27  ;;  %v9801_v27 = vld [vmem:[%s6568_s29 + $0x378] sm:$0xff] }
 0x4eb   : > { %3285 = vmatpush2.msra.mxu0 %v9749_v6  ;;  %v9769_v6 = vld [vmem:[%s6568_s29 + $0x438] sm:$0xff]  ;;  %12676 = vst [vmem:[#allocation239_spill] sm:$0xff] %v9801_v27 }
 0x4ec   : > { %3286 = vmatprep.subr.mxu0 %v9753_v37  ;;  %12668 = vst [vmem:[#allocation231_spill] sm:$0xff] %v9769_v6  ;;  %v9773_v37 = vld [vmem:[%s6568_s29 + $0x430] sm:$0xff] }
 0x4ed   : > { %3287 = vmatpush2.msra.mxu0 %v9757_v63  ;;  %12669 = vst [vmem:[#allocation232_spill] sm:$0xff] %v9773_v37  ;;  %v9777_v63 = vld [vmem:[%s6568_s29 + $0x408] sm:$0xff] }
 0x4ee   : > { %3288 = vmatprep.subr.mxu0 %v9761_v3  ;;  %12670 = vst [vmem:[#allocation233_spill] sm:$0xff] %v9777_v63  ;;  %v9781_v3 = vld [vmem:[%s6568_s29 + $0x400] sm:$0xff] }
 0x4ef   : > { %3289 = vmatpush2.msra.mxu0 %v9765_v34  ;;  %12671 = vst [vmem:[#allocation234_spill] sm:$0xff] %v9781_v3  ;;  %v9785_v34 = vld [vmem:[%s6568_s29 + $0x3d8] sm:$0xff] }
 0x4f0   : > { %3290 = vmatprep.subr.mxu0 %v9769_v6  ;;  %12672 = vst [vmem:[#allocation235_spill] sm:$0xff] %v9785_v34  ;;  %v9789_v6 = vld [vmem:[%s6568_s29 + $0x3d0] sm:$0xff] }
 0x4f1   : > { %3291 = vmatpush2.msra.mxu0 %v9773_v37  ;;  %12673 = vst [vmem:[#allocation236_spill] sm:$0xff] %v9789_v6  ;;  %v9793_v37 = vld [vmem:[%s6568_s29 + $0x3a8] sm:$0xff] }
 0x4f2   : > { %3292 = vmatprep.subr.mxu0 %v9777_v63  ;;  %12674 = vst [vmem:[#allocation237_spill] sm:$0xff] %v9793_v37  ;;  %v9797_v63 = vld [vmem:[%s6568_s29 + $0x3a0] sm:$0xff] }
 0x4f3   : > { %3293 = vmatpush2.msra.mxu0 %v9781_v3  ;;  %12675 = vst [vmem:[#allocation238_spill] sm:$0xff] %v9797_v63  ;;  %v9805_v3 = vld [vmem:[%s6568_s29 + $0x370] sm:$0xff] }
 0x4f4   : > { %3294 = vmatprep.subr.mxu0 %v9785_v34  ;;  %12677 = vst [vmem:[#allocation240_spill] sm:$0xff] %v9805_v3  ;;  %v9809_v34 = vld [vmem:[%s6568_s29 + $0x348] sm:$0xff] }
 0x4f5   : > { %3295 = vmatpush2.msra.mxu0 %v9789_v6  ;;  %12678 = vst [vmem:[#allocation241_spill] sm:$0xff] %v9809_v34  ;;  %v9813_v6 = vld [vmem:[%s6568_s29 + $0x340] sm:$0xff] }
 0x4f6   : > { %3296 = vmatprep.subr.mxu0 %v9793_v37  ;;  %12679 = vst [vmem:[#allocation242_spill] sm:$0xff] %v9813_v6  ;;  %v9817_v37 = vld [vmem:[%s6568_s29 + $0x318] sm:$0xff] }
 0x4f7   : > { %3297 = vmatpush2.msra.mxu0 %v9797_v63  ;;  %12680 = vst [vmem:[#allocation243_spill] sm:$0xff] %v9817_v37  ;;  %v9821_v63 = vld [vmem:[%s6568_s29 + $0x310] sm:$0xff] }
 0x4f8   : > { %3298 = vmatprep.subr.mxu0 %v9801_v27  ;;  %12681 = vst [vmem:[#allocation244_spill] sm:$0xff] %v9821_v63 }
 0x4f9   : > { %3299 = vmatpush2.msra.mxu0 %v9805_v3 }
 0x4fa   : > { %3300 = vmatprep.subr.mxu0 %v9809_v34 }
 0x4fb   : > { %3301 = vmatpush2.msra.mxu0 %v9813_v6 }
 0x4fc   : > { %3302 = vmatprep.subr.mxu0 %v9817_v37  ;;  %v12683_v37 = vld [vmem:[#allocation37_spill] sm:$0xff] }
 0x4fd   : > { %3303 = vmatpush2.msra.mxu0 %v9821_v63 }
 0x4fe   : > { %3550 = vmatprep.subr.mxu0 %v9024_v54  ;;  %v12684_v54 = vld [vmem:[#allocation16_spill] sm:$0xff] }
 0x53d   : > { %v2808_v27 = vpop.f32.mrf.mxu0  ;;  %v2885_v25 = vpop.f32.mrf.mxu1 }
 0x53e   : > { %v2809_v15 = vadd.f32 %v2808_v27, %v7836_v49  ;;  %v2886_v46 = vadd.f32 %v2885_v25, %v12525_v55  ;;  %v12689_v25 = vld [vmem:[#allocation66_spill] sm:$0xff] }
 0x53f   : > { %v2810_v3 = vpop.f32.mrf.mxu0  ;;  %v2887_v30 = vpop.f32.mrf.mxu1 }
 0x540   : > { %v2811_v34 = vadd.f32 %v2810_v3, %v7841_v48  ;;  %v2973_v6 = vadd.f32 %v2809_v15, %v12682_v45  ;;  %v12686_v15 = vld [vmem:[#allocation42_spill] sm:$0xff] }
 0x542   : > { %v2814_v29 = vpop.f32.mrf.mxu0  ;;  %v2974_v61 = vadd.f32 %v2811_v34, %v12683_v37  ;;  %v4989_v63 = vmul.f32 -1.442695, %v2973_v6  ;;  %v2891_v3 = vpop.f32.mrf.mxu1  ;;  %v2888_v37 = vadd.f32 %v2887_v30, %v7866_v18 }
 0x543   : > { %v2815_v1 = vadd.f32 %v2814_v29, %v7836_v49  ;;  %v850_v29 = vadd.f32 %v12686_v15, %v7863_v44  ;;  %v2892_v6 = vadd.f32 %v2891_v3, %v12525_v55 }
 0x544   : > { %v2816_v22 = vpop.f32.mrf.mxu0  ;;  %v4990_v26 = vmul.f32 -1.442695, %v2974_v61  ;;  %5314 = vpow2.f32 %v4989_v63  ;;  %v12687_v61 = vld [vmem:[#allocation60_spill] sm:$0xff]  ;;  %v870_v63 = vadd.f32 %v12689_v25, %v7869_v36 }
 0x545   : > { %v2817_v38 = vadd.f32 %v2816_v22, %v7841_v48  ;;  %v2977_v60 = vadd.f32 %v2815_v1, %v12684_v54  ;;  %v2893_v22 = vpop.f32.mrf.mxu1  ;;  %v864_v1 = vadd.f32 %v12687_v61, %v7869_v36 }
 0x546   : > { %5316 = vpow2.f32 %v4990_v26  ;;  %v2894_v26 = vadd.f32 %v2893_v22, %v7866_v18 }
 0x547   : > { %v2978_v59 = vadd.f32 %v2817_v38, %v12685_v47  ;;  %v4993_v27 = vmul.f32 -1.442695, %v2977_v60  ;;  %v2975_v47 = vadd.f32 %v2886_v46, %v850_v29  ;;  %v12688_v60 = vld [vmem:[#allocation50_spill] sm:$0xff] }
 0x548   : > { %v856_v38 = vadd.f32 %v12688_v60, %v7863_v44  ;;  %v2980_v54 = vadd.f32 %v2894_v26, %v870_v63 }
 0x549   : > { %v4994_v45 = vmul.f32 -1.442695, %v2978_v59  ;;  %5318 = vpow2.f32 %v4993_v27  ;;  %v2976_v59 = vadd.f32 %v2888_v37, %v864_v1  ;;  %v4991_v30 = vmul.f32 -1.442695, %v2975_v47 }
 0x54a   : > { %v2979_v34 = vadd.f32 %v2892_v6, %v856_v38  ;;  %v4996_v61 = vmul.f32 -1.442695, %v2980_v54  ;;  %v12690_v54 = vld [vmem:[#allocation48_spill] sm:$0xff] }
 0x54b   : > { %5320 = vpow2.f32 %v4994_v45  ;;  %v4992_v27 = vmul.f32 -1.442695, %v2976_v59 }
 0x54c   : > { %v4995_v3 = vmul.f32 -1.442695, %v2979_v34  ;;  %5322 = vpow2.f32 %v4991_v30 }
 0x54d   : > { %5324 = vpow2.f32 %v4992_v27  ;;  %v1011_v27 = vadd.f32 %v12690_v54, %v12530_v28 }
 0x54e   : > { %5326 = vpow2.f32 %v4995_v3 }
 0x54f   : > { %5328 = vpow2.f32 %v4996_v61 }
 0x551   : > { %v5315_v15 = vpop.eup %5314 }
 0x552   : > { %v3005_v46 = vadd.f32 1.0, %v5315_v15 }
 0x553   : > { %v5317_v55 = vpop.eup %5316 }
 0x554   : > { %v3006_v29 = vadd.f32 1.0, %v5317_v55  ;;  %5330 = vrcp.f32 %v3005_v46  ;;  %v12691_v46 = vld [vmem:[#allocation74_spill] sm:$0xff] }
 0x556   : > { %v5319_v45 = vpop.eup %5318  ;;  %5332 = vrcp.f32 %v3006_v29 }
 0x557   : > { %v3009_v37 = vadd.f32 1.0, %v5319_v45  ;;  %v1025_v45 = vadd.f32 %v12691_v46, %v12533_v16  ;;  %v5186_v46 = vpop.permute.xlu0 %5185 }
 0x558   : > { %v5321_v60 = vpop.eup %5320 }
 0x559   : > { %v3010_v22 = vadd.f32 1.0, %v5321_v60  ;;  %5334 = vrcp.f32 %v3009_v37  ;;  %v5323_v6 = vpop.eup %5322 }
 0x55a   : > { %v5325_v1 = vpop.eup %5324  ;;  %v3007_v38 = vadd.f32 1.0, %v5323_v6 }
 0x55b   : > { %5336 = vrcp.f32 %v3010_v22  ;;  %v5327_v47 = vpop.eup %5326  ;;  %v3008_v25 = vadd.f32 1.0, %v5325_v1 }
 0x55c   : > { %v5329_v59 = vpop.eup %5328  ;;  %v3011_v30 = vadd.f32 1.0, %v5327_v47  ;;  %5338 = vrcp.f32 %v3007_v38  ;;  %v12692_v47 = vld [vmem:[#allocation58_spill] sm:$0xff] }
 0x55d   : > { %v3012_v29 = vadd.f32 1.0, %v5329_v59  ;;  %5340 = vrcp.f32 %v3008_v25  ;;  %v12693_v59 = vld [vmem:[#allocation78_spill] sm:$0xff] }
 0x55e   : > { %5342 = vrcp.f32 %v3011_v30  ;;  %v1031_v25 = vadd.f32 %v12693_v59, %v12533_v16 }
 0x561   : > { %v5331_v34 = vpop.eup %5330 }
 0x563   : > { %v5333_v61 = vpop.eup %5332 }
 0x566   : > { %v5335_v1 = vpop.eup %5334 }
 0x568   : > { %v5337_v54 = vpop.eup %5336 }
 0x57e   : > { %v2962_v26 = vpop.f32.mrf.mxu0 }
 0x57f   : > { %v2963_v63 = vadd.f32 %v2962_v26, %v7892_v9  ;;  %v1017_v26 = vadd.f32 %v12692_v47, %v12530_v28 }
 0x580   : > { %v2964_v55 = vpop.f32.mrf.mxu0 }
 0x581   : > { %v3029_v15 = vmul.f32 %v5331_v34, %v2963_v63  ;;  %v2965_v3 = vadd.f32 %v2964_v55, %v12532_v11 }
 0x582   : > { %v2968_v60 = vpop.f32.mrf.mxu0 }
 0x583   : > { %v3033_v37 = vadd.f32 %v3029_v15, %v1011_v27  ;;  %v3030_v22 = vmul.f32 %v5333_v61, %v2965_v3  ;;  %v2969_v6 = vadd.f32 %v2968_v60, %v7892_v9  ;;  %v5339_v61 = vpop.eup %5338 }
 0x584   : > { %v2970_v38 = vpop.f32.mrf.mxu0  ;;  %v5341_v30 = vpop.eup %5340 }
 0x585   : > { %5344 = vtanh.f32 %v3033_v37  ;;  %v3034_v63 = vadd.f32 %v3030_v22, %v1025_v45  ;;  %v3031_v34 = vmul.f32 %v5335_v1, %v2969_v6  ;;  %v2971_v55 = vadd.f32 %v2970_v38, %v12532_v11  ;;  %v5343_v60 = vpop.eup %5342 }
 0x586   : > { %5346 = vrcp.f32 %v3012_v29  ;;  %v3041_v37 = vsub.f32 1.0, %v5339_v61  ;;  %v9857_v22 = vunpack.i.l.bf16 %v5186_v46  ;;  %v5191_v29 = vpop.permute.xlu1 %5190  ;;  %v3042_v1 = vsub.f32 1.0, %v5341_v30 }
 0x587   : > { %5348 = vtanh.f32 %v3034_v63  ;;  %v3035_v27 = vadd.f32 %v3031_v34, %v1017_v26  ;;  %v3032_v15 = vmul.f32 %v5337_v54, %v2971_v55  ;;  %v3049_v38 = vmul.f32 %v5339_v61, %v9089_v23 }
 0x588   : > { %v9860_v63 = vunpack.i.h.bf16 %v5186_v46  ;;  %v3050_v55 = vmul.f32 %v5341_v30, %v9084_v8  ;;  %v3043_v59 = vsub.f32 1.0, %v5343_v60 }
 0x589   : > { %5350 = vtanh.f32 %v3035_v27  ;;  %v3036_v3 = vadd.f32 %v3032_v15, %v1031_v25  ;;  %v11868_v27 = vsub.f32 1.0, %v9857_v22  ;;  %v9864_v15 = vunpack.i.l.bf16 %v5191_v29 }
 0x58b   : > { %5352 = vtanh.f32 %v3036_v3  ;;  %v5001_v3 = vld [vmem:[%s6594_s9 + $0x30] sm:$0xff]  ;;  %v3102_v30 = vmul.f32 %v11868_v27, %v9084_v8  ;;  %v11869_v11 = vsub.f32 1.0, %v9864_v15  ;;  %v5002_v27 = vld [vmem:[%s6594_s9 + $0x38] sm:$0xff] }
 0x592   : > { %v5345_v45 = vpop.eup %5344 }
 0x593   : > { %v5347_v6 = vpop.eup %5346  ;;  %v3045_v47 = vmul.f32 %v5345_v45, %v3041_v37 }
 0x594   : > { %v5349_v26 = vpop.eup %5348  ;;  %v3044_v45 = vsub.f32 1.0, %v5347_v6 }
 0x595   : > { %v3046_v34 = vmul.f32 %v5349_v26, %v3042_v1  ;;  %v3053_v54 = vadd.f32 %v3049_v38, %v3045_v47  ;;  %v3097_v1 = vsub.f32 1.0, %v9860_v63  ;;  %v9869_v26 = vunpack.i.h.bf16 %v5191_v29  ;;  %v5005_v47 = vld [vmem:[%s6594_s9 + $0x40] sm:$0xff] }
 0x596   : > { %v5351_v25 = vpop.eup %5350  ;;  %v3051_v38 = vmul.f32 %v5343_v60, %v9134_v19 }
 0x597   : > { %v3054_v16 = vadd.f32 %v3050_v55, %v3046_v34  ;;  %v3093_v37 = vmul.f32 %v9860_v63, %v3053_v54  ;;  %v3047_v61 = vmul.f32 %v5351_v25, %v3043_v59  ;;  %v3052_v59 = vmul.f32 %v5347_v6, %v9111_v14 }
 0x598   : > { %v5353_v46 = vpop.eup %5352  ;;  %v3101_v29 = vmul.f32 %v3097_v1, %v9089_v23  ;;  %v3099_v6 = vsub.f32 1.0, %v9869_v26 }
 0x599   : > { %v3094_v34 = vmul.f32 %v9857_v22, %v3054_v16  ;;  %v3114_v55 = vadd.f32 %v5001_v3, %v3093_v37  ;;  %v3048_v54 = vmul.f32 %v5353_v46, %v3044_v45  ;;  %v3055_v25 = vadd.f32 %v3051_v38, %v3047_v61  ;;  %v5006_v3 = vld [vmem:[%s6594_s9 + $0x48] sm:$0xff]  ;;  %v12718_v38 = vld [vmem:[#allocation128_spill] sm:$0xff] }
 0x59a   : > { %v9887_v16 = vadd.f32 %v3101_v29, %v3093_v37  ;;  %v3104_v37 = vmul.f32 %v11869_v11, %v9111_v14  ;;  %v12694_v14 = vld [vmem:[#allocation104_spill] sm:$0xff]  ;;  %v12723_v29 = vld [vmem:[#allocation133_spill] sm:$0xff] }
 0x59b   : > { %v9882_v28 = vadd.f32 %v3102_v30, %v3094_v34  ;;  %v3123_v8 = vadd.f32 %v5005_v47, %v3094_v34  ;;  %5003 = vst.msk [vmem:[%s6594_s9 + $0x30] sm:$0xff] %vm537_vm0, %v3114_v55  ;;  %v3056_v60 = vadd.f32 %v3052_v59, %v3048_v54  ;;  %v3095_v45 = vmul.f32 %v9869_v26, %v3055_v25  ;;  %v12719_v34 = vld [vmem:[#allocation129_spill] sm:$0xff]  ;;  %v12720_v55 = vld [vmem:[#allocation130_spill] sm:$0xff]  ;;  %v12721_v54 = vld [vmem:[#allocation131_spill] sm:$0xff] }
 0x59c   : > { %v3103_v47 = vmul.f32 %v3099_v6, %v9134_v19  ;;  %v12699_v19 = vld [vmem:[#allocation109_spill] sm:$0xff]  ;;  %v12722_v59 = vld [vmem:[#allocation132_spill] sm:$0xff]  ;;  %v12724_v25 = vld [vmem:[#allocation134_spill] sm:$0xff] }
 0x59d   : > { %5007 = vst.msk [vmem:[%s6594_s9 + $0x40] sm:$0xff] %vm537_vm0, %v3123_v8  ;;  %3227 = vmatprep.mubr.f32.mxu1 %v9882_v28  ;;  %3304 = vmatprep.mubr.f32.mxu0 %v9882_v28  ;;  %v3096_v23 = vmul.f32 %v9864_v15, %v3056_v60  ;;  %v3115_v61 = vadd.f32 %v5002_v27, %v3095_v45  ;;  %v12717_v27 = vld [vmem:[#allocation127_spill] sm:$0xff]  ;;  %v12726_v60 = vld [vmem:[#allocation136_spill] sm:$0xff] }
 0x59e   : > { %3228 = vmatmul.mubr.f32.vlgmr.msra.gmra.mxu1 %v9887_v16  ;;  %3305 = vmatmul.mubr.f32.vlgmr.msra.gmra.mxu0 %v9887_v16  ;;  %v12725_v8 = vld [vmem:[#allocation135_spill] sm:$0xff] }
 0x59f   : > { %3318 = vmatpush1.msra.mxu1 %v9108_v58  ;;  %v9903_v46 = vadd.f32 %v3104_v37, %v3096_v23  ;;  %v3124_v30 = vadd.f32 %v5006_v3, %v3096_v23  ;;  %3551 = vmatpush1.msra.mxu0 %v9114_v10  ;;  %5004 = vst.msk [vmem:[%s6594_s9 + $0x38] sm:$0xff] %vm537_vm0, %v3115_v61  ;;  %v12695_v10 = vld [vmem:[#allocation105_spill] sm:$0xff]  ;;  %v12729_v23 = vld [vmem:[#allocation139_spill] sm:$0xff]  ;;  %v12730_v37 = vld [vmem:[#allocation140_spill] sm:$0xff] }
 0x5a0   : > { %3319 = vmatprep.subr.mxu1 %v9118_v17  ;;  %3552 = vmatprep.subr.mxu0 %v9124_v43  ;;  %v9917_v58 = vadd.f32 %v3103_v47, %v3095_v45  ;;  %v12696_v17 = vld [vmem:[#allocation106_spill] sm:$0xff]  ;;  %v12697_v43 = vld [vmem:[#allocation107_spill] sm:$0xff]  ;;  %v12727_v3 = vld [vmem:[#allocation137_spill] sm:$0xff] }
 0x5a1   : > { %3320 = vmatpush1.msra.mxu1 %v9128_v4  ;;  %5008 = vst.msk [vmem:[%s6594_s9 + $0x48] sm:$0xff] %vm537_vm0, %v3124_v30  ;;  %3233 = vmatprep.mubr.f32.mxu1 %v9903_v46  ;;  %v12698_v4 = vld [vmem:[#allocation108_spill] sm:$0xff]  ;;  %v12728_v45 = vld [vmem:[#allocation138_spill] sm:$0xff]  ;;  %v12731_v61 = vld [vmem:[#allocation141_spill] sm:$0xff] }
 0x5a2   : > { %3310 = vmatprep.mubr.f32.mxu0 %v9903_v46  ;;  %3321 = vmatprep.subr.mxu1 %v9138_v40  ;;  %v12705_v40 = vld [vmem:[#allocation115_spill] sm:$0xff]  ;;  %v12732_v30 = vld [vmem:[#allocation142_spill] sm:$0xff] }
 0x5a3   : > { %3234 = vmatmul.mubr.f32.gmra.mxu1 %v9917_v58  ;;  %3311 = vmatmul.mubr.f32.gmra.mxu0 %v9917_v58  ;;  %v12733_v47 = vld [vmem:[#allocation143_spill] sm:$0xff] }
 0x5a4   : > { %3322 = vmatpush1.msra.mxu1 %v9144_v21  ;;  %3381 = vmatprep.mubr.f32.mxu1 %v9882_v28  ;;  %v12706_v21 = vld [vmem:[#allocation116_spill] sm:$0xff] }
 0x5a5   : > { %3323 = vmatprep.subr.mxu1 %v9149_v33  ;;  %3553 = vmatpush1.msra.mxu0 %v9153_v57  ;;  %v12707_v33 = vld [vmem:[#allocation117_spill] sm:$0xff]  ;;  %v12708_v57 = vld [vmem:[#allocation118_spill] sm:$0xff] }
 0x5a6   : > { %3324 = vmatpush1.msra.mxu1 %v9157_v56  ;;  %3554 = vmatprep.subr.mxu0 %v9161_v41  ;;  %v12709_v56 = vld [vmem:[#allocation119_spill] sm:$0xff]  ;;  %v12710_v41 = vld [vmem:[#allocation120_spill] sm:$0xff] }
 0x5a7   : > { %3325 = vmatprep.subr.mxu1 %v9165_v5  ;;  %3555 = vmatpush1.msra.mxu0 %v9169_v2  ;;  %v12711_v5 = vld [vmem:[#allocation121_spill] sm:$0xff]  ;;  %v12712_v2 = vld [vmem:[#allocation122_spill] sm:$0xff] }
 0x5a8   : > { %3326 = vmatpush1.msra.mxu1 %v9173_v0  ;;  %3556 = vmatprep.subr.mxu0 %v9177_v12  ;;  %v12713_v0 = vld [vmem:[#allocation123_spill] sm:$0xff]  ;;  %v12714_v12 = vld [vmem:[#allocation124_spill] sm:$0xff] }
 0x5a9   : > { %3327 = vmatprep.subr.mxu1 %v9181_v7  ;;  %3557 = vmatpush1.msra.mxu0 %v9185_v24  ;;  %v12715_v7 = vld [vmem:[#allocation125_spill] sm:$0xff]  ;;  %v12716_v24 = vld [vmem:[#allocation126_spill] sm:$0xff] }
 0x5aa   : > { %3328 = vmatpush1.msra.mxu1 %v9189_v52  ;;  %3558 = vmatprep.subr.mxu0 %v9193_v32  ;;  %v12700_v52 = vld [vmem:[#allocation110_spill] sm:$0xff]  ;;  %v12701_v32 = vld [vmem:[#allocation111_spill] sm:$0xff] }
 0x5ab   : > { %3329 = vmatprep.subr.mxu1 %v9197_v31  ;;  %3559 = vmatpush1.msra.mxu0 %v9201_v13  ;;  %v12702_v31 = vld [vmem:[#allocation112_spill] sm:$0xff]  ;;  %v12703_v13 = vld [vmem:[#allocation113_spill] sm:$0xff] }
 0x5ac   : > { %3330 = vmatpush1.msra.mxu1 %v9205_v50  ;;  %3560 = vmatprep.subr.mxu0 %v12694_v14  ;;  %v12704_v50 = vld [vmem:[#allocation114_spill] sm:$0xff]  ;;  %v12734_v14 = vld [vmem:[#allocation144_spill] sm:$0xff] }
 0x5ad   : > { %3331 = vmatprep.subr.mxu1 %v12695_v10  ;;  %3561 = vmatpush1.msra.mxu0 %v12696_v17  ;;  %v12735_v10 = vld [vmem:[#allocation145_spill] sm:$0xff]  ;;  %v12736_v17 = vld [vmem:[#allocation146_spill] sm:$0xff] }
 0x5ae   : > { %3332 = vmatpush1.msra.mxu1 %v12697_v43  ;;  %3562 = vmatprep.subr.mxu0 %v12698_v4  ;;  %v12737_v43 = vld [vmem:[#allocation147_spill] sm:$0xff]  ;;  %v12738_v4 = vld [vmem:[#allocation148_spill] sm:$0xff] }
 0x5af   : > { %3333 = vmatprep.subr.mxu1 %v12699_v19  ;;  %3563 = vmatpush1.msra.mxu0 %v12700_v52  ;;  %v12739_v19 = vld [vmem:[#allocation149_spill] sm:$0xff]  ;;  %v12740_v52 = vld [vmem:[#allocation150_spill] sm:$0xff] }
 0x5b0   : > { %3334 = vmatpush1.msra.mxu1 %v12701_v32  ;;  %3564 = vmatprep.subr.mxu0 %v12702_v31  ;;  %v12741_v32 = vld [vmem:[#allocation151_spill] sm:$0xff]  ;;  %v12742_v31 = vld [vmem:[#allocation152_spill] sm:$0xff] }
 0x5b1   : > { %3335 = vmatprep.subr.mxu1 %v12703_v13  ;;  %3565 = vmatpush1.msra.mxu0 %v12704_v50  ;;  %v12743_v13 = vld [vmem:[#allocation153_spill] sm:$0xff]  ;;  %v12744_v50 = vld [vmem:[#allocation154_spill] sm:$0xff] }
 0x5b2   : > { %3336 = vmatpush1.msra.mxu1 %v12705_v40  ;;  %3566 = vmatprep.subr.mxu0 %v12706_v21  ;;  %v12745_v40 = vld [vmem:[#allocation155_spill] sm:$0xff]  ;;  %v12746_v21 = vld [vmem:[#allocation156_spill] sm:$0xff] }
 0x5b3   : > { %3337 = vmatprep.subr.mxu1 %v12707_v33  ;;  %3567 = vmatpush1.msra.mxu0 %v12708_v57  ;;  %v12747_v33 = vld [vmem:[#allocation157_spill] sm:$0xff]  ;;  %v12748_v57 = vld [vmem:[#allocation158_spill] sm:$0xff] }
 0x5b4   : > { %3338 = vmatpush1.msra.mxu1 %v12709_v56  ;;  %3568 = vmatprep.subr.mxu0 %v12710_v41  ;;  %v12749_v56 = vld [vmem:[#allocation159_spill] sm:$0xff]  ;;  %v12750_v41 = vld [vmem:[#allocation160_spill] sm:$0xff] }
 0x5b5   : > { %3339 = vmatprep.subr.mxu1 %v12711_v5  ;;  %3569 = vmatpush1.msra.mxu0 %v12712_v2  ;;  %v12751_v5 = vld [vmem:[#allocation161_spill] sm:$0xff]  ;;  %v12752_v2 = vld [vmem:[#allocation162_spill] sm:$0xff] }
 0x5b6   : > { %3340 = vmatpush1.msra.mxu1 %v12713_v0  ;;  %3570 = vmatprep.subr.mxu0 %v12714_v12  ;;  %v12753_v0 = vld [vmem:[#allocation163_spill] sm:$0xff]  ;;  %v12754_v12 = vld [vmem:[#allocation164_spill] sm:$0xff] }
 0x5b7   : > { %3341 = vmatprep.subr.mxu1 %v12715_v7  ;;  %3571 = vmatpush1.msra.mxu0 %v12716_v24  ;;  %v12755_v7 = vld [vmem:[#allocation165_spill] sm:$0xff]  ;;  %v12756_v24 = vld [vmem:[#allocation166_spill] sm:$0xff] }
 0x5b8   : > { %3342 = vmatpush1.msra.mxu1 %v12717_v27  ;;  %3572 = vmatprep.subr.mxu0 %v12718_v38  ;;  %v12757_v27 = vld [vmem:[#allocation167_spill] sm:$0xff]  ;;  %v12758_v38 = vld [vmem:[#allocation168_spill] sm:$0xff] }
 0x5b9   : > { %3343 = vmatprep.subr.mxu1 %v12719_v34  ;;  %3573 = vmatpush1.msra.mxu0 %v12720_v55  ;;  %v12759_v34 = vld [vmem:[#allocation169_spill] sm:$0xff]  ;;  %v12760_v55 = vld [vmem:[#allocation170_spill] sm:$0xff] }
 0x5ba   : > { %3344 = vmatpush1.msra.mxu1 %v12721_v54  ;;  %3574 = vmatprep.subr.mxu0 %v12722_v59  ;;  %v12761_v54 = vld [vmem:[#allocation171_spill] sm:$0xff]  ;;  %v12762_v59 = vld [vmem:[#allocation172_spill] sm:$0xff] }
 0x5bb   : > { %3345 = vmatprep.subr.mxu1 %v12723_v29  ;;  %3575 = vmatpush1.msra.mxu0 %v12724_v25  ;;  %v12763_v29 = vld [vmem:[#allocation173_spill] sm:$0xff]  ;;  %v12764_v25 = vld [vmem:[#allocation174_spill] sm:$0xff] }
 0x5bc   : > { %3346 = vmatpush1.msra.mxu1 %v12725_v8  ;;  %3576 = vmatprep.subr.mxu0 %v12726_v60  ;;  %v12765_v8 = vld [vmem:[#allocation175_spill] sm:$0xff]  ;;  %v12766_v60 = vld [vmem:[#allocation176_spill] sm:$0xff] }
 0x5bd   : > { %3347 = vmatprep.subr.mxu1 %v12727_v3  ;;  %3577 = vmatpush1.msra.mxu0 %v12728_v45  ;;  %v12767_v3 = vld [vmem:[#allocation177_spill] sm:$0xff]  ;;  %v12768_v45 = vld [vmem:[#allocation178_spill] sm:$0xff] }
 0x5be   : > { %3348 = vmatpush1.msra.mxu1 %v12729_v23  ;;  %3578 = vmatprep.subr.mxu0 %v12730_v37  ;;  %v12769_v23 = vld [vmem:[#allocation179_spill] sm:$0xff]  ;;  %v12770_v37 = vld [vmem:[#allocation180_spill] sm:$0xff] }
 0x5bf   : > { %3349 = vmatprep.subr.mxu1 %v12731_v61  ;;  %3579 = vmatpush1.msra.mxu0 %v12732_v30  ;;  %v12771_v61 = vld [vmem:[#allocation181_spill] sm:$0xff]  ;;  %v12772_v30 = vld [vmem:[#allocation182_spill] sm:$0xff] }
 0x5c0   : > { %3350 = vmatpush2.msra.mxu1 %v12733_v47  ;;  %3580 = vmatprep.subr.mxu0 %v12734_v14  ;;  %v12773_v47 = vld [vmem:[#allocation183_spill] sm:$0xff]  ;;  %v12774_v14 = vld [vmem:[#allocation184_spill] sm:$0xff] }
 0x5c1   : > { %3351 = vmatprep.subr.mxu1 %v12735_v10  ;;  %3581 = vmatpush1.msra.mxu0 %v12736_v17  ;;  %v12775_v10 = vld [vmem:[#allocation185_spill] sm:$0xff]  ;;  %v12776_v17 = vld [vmem:[#allocation186_spill] sm:$0xff] }
 0x5c2   : > { %3352 = vmatpush2.msra.mxu1 %v12737_v43  ;;  %3582 = vmatprep.subr.mxu0 %v12738_v4  ;;  %v12777_v43 = vld [vmem:[#allocation187_spill] sm:$0xff]  ;;  %v12778_v4 = vld [vmem:[#allocation188_spill] sm:$0xff] }
 0x5c3   : > { %3353 = vmatprep.subr.mxu1 %v12739_v19  ;;  %3583 = vmatpush2.msra.mxu0 %v12740_v52  ;;  %v12779_v19 = vld [vmem:[#allocation189_spill] sm:$0xff]  ;;  %v12780_v52 = vld [vmem:[#allocation190_spill] sm:$0xff] }
 0x5c4   : > { %3354 = vmatpush2.msra.mxu1 %v12741_v32  ;;  %3584 = vmatprep.subr.mxu0 %v12742_v31  ;;  %v12781_v32 = vld [vmem:[#allocation191_spill] sm:$0xff]  ;;  %v12782_v31 = vld [vmem:[#allocation192_spill] sm:$0xff] }
 0x5c5   : > { %3355 = vmatprep.subr.mxu1 %v12743_v13  ;;  %3585 = vmatpush2.msra.mxu0 %v12744_v50  ;;  %v12783_v13 = vld [vmem:[#allocation193_spill] sm:$0xff]  ;;  %v12784_v50 = vld [vmem:[#allocation194_spill] sm:$0xff] }
 0x5c6   : > { %3356 = vmatpush2.msra.mxu1 %v12745_v40  ;;  %3586 = vmatprep.subr.mxu0 %v12746_v21  ;;  %v12785_v40 = vld [vmem:[#allocation195_spill] sm:$0xff]  ;;  %v12786_v21 = vld [vmem:[#allocation196_spill] sm:$0xff] }
 0x5c7   : > { %3357 = vmatprep.subr.mxu1 %v12747_v33  ;;  %3587 = vmatpush2.msra.mxu0 %v12748_v57  ;;  %v12787_v33 = vld [vmem:[#allocation197_spill] sm:$0xff]  ;;  %v12788_v57 = vld [vmem:[#allocation198_spill] sm:$0xff] }
 0x5c8   : > { %3358 = vmatpush2.msra.mxu1 %v12749_v56  ;;  %3588 = vmatprep.subr.mxu0 %v12750_v41  ;;  %v12789_v56 = vld [vmem:[#allocation199_spill] sm:$0xff]  ;;  %v12790_v41 = vld [vmem:[#allocation200_spill] sm:$0xff] }
 0x5c9   : > { %3359 = vmatprep.subr.mxu1 %v12751_v5  ;;  %3589 = vmatpush2.msra.mxu0 %v12752_v2  ;;  %v12791_v5 = vld [vmem:[#allocation201_spill] sm:$0xff]  ;;  %v12792_v2 = vld [vmem:[#allocation202_spill] sm:$0xff] }
 0x5ca   : > { %3360 = vmatpush2.msra.mxu1 %v12753_v0  ;;  %3590 = vmatprep.subr.mxu0 %v12754_v12  ;;  %v12793_v0 = vld [vmem:[#allocation203_spill] sm:$0xff]  ;;  %v12794_v12 = vld [vmem:[#allocation204_spill] sm:$0xff] }
 0x5cb   : > { %3361 = vmatprep.subr.mxu1 %v12755_v7  ;;  %3591 = vmatpush2.msra.mxu0 %v12756_v24  ;;  %v12795_v7 = vld [vmem:[#allocation205_spill] sm:$0xff]  ;;  %v12796_v24 = vld [vmem:[#allocation206_spill] sm:$0xff] }
 0x5cc   : > { %3362 = vmatpush2.msra.mxu1 %v12757_v27  ;;  %3592 = vmatprep.subr.mxu0 %v12758_v38  ;;  %v12797_v27 = vld [vmem:[#allocation207_spill] sm:$0xff]  ;;  %v12798_v38 = vld [vmem:[#allocation208_spill] sm:$0xff] }
 0x5cd   : > { %3363 = vmatprep.subr.mxu1 %v12759_v34  ;;  %3593 = vmatpush2.msra.mxu0 %v12760_v55  ;;  %v12799_v34 = vld [vmem:[#allocation209_spill] sm:$0xff]  ;;  %v12800_v55 = vld [vmem:[#allocation210_spill] sm:$0xff] }
 0x5ce   : > { %3364 = vmatpush2.msra.mxu1 %v12761_v54  ;;  %3594 = vmatprep.subr.mxu0 %v12762_v59  ;;  %v10057_v54 = vld [vmem:[%s6568_s29 + $0x228] sm:$0xff]  ;;  %v10061_v59 = vld [vmem:[%s6568_s29 + $0x220] sm:$0xff] }
 0x5cf   : > { %3365 = vmatprep.subr.mxu1 %v12763_v29  ;;  %3595 = vmatpush2.msra.mxu0 %v12764_v25  ;;  %v10089_v29 = vld [vmem:[%s6568_s29 + $0x168] sm:$0xff]  ;;  %v10093_v25 = vld [vmem:[%s6568_s29 + $0x160] sm:$0xff] }
 0x5d0   : > { %3366 = vmatpush2.msra.mxu1 %v12765_v8  ;;  %3596 = vmatprep.subr.mxu0 %v12766_v60  ;;  %v10097_v8 = vld [vmem:[%s6568_s29 + $0x138] sm:$0xff]  ;;  %v10101_v60 = vld [vmem:[%s6568_s29 + $0x130] sm:$0xff] }
 0x5d1   : > { %3367 = vmatprep.subr.mxu1 %v12767_v3  ;;  %3597 = vmatpush2.msra.mxu0 %v12768_v45  ;;  %v10105_v3 = vld [vmem:[%s6568_s29 + $0x108] sm:$0xff]  ;;  %v10109_v45 = vld [vmem:[%s6568_s29 + $0x100] sm:$0xff] }
 0x5d2   : > { %3368 = vmatpush2.msra.mxu1 %v12769_v23  ;;  %3598 = vmatprep.subr.mxu0 %v12770_v37  ;;  %v10113_v23 = vld [vmem:[%s6568_s29 + $0xd8] sm:$0xff]  ;;  %v10117_v37 = vld [vmem:[%s6568_s29 + $0xd0] sm:$0xff] }
 0x5d3   : > { %3369 = vmatprep.subr.mxu1 %v12771_v61  ;;  %3599 = vmatpush2.msra.mxu0 %v12772_v30  ;;  %v10121_v61 = vld [vmem:[%s6568_s29 + $0xa8] sm:$0xff]  ;;  %v10125_v30 = vld [vmem:[%s6568_s29 + $0xa0] sm:$0xff] }
 0x5d4   : > { %3370 = vmatpush2.msra.mxu1 %v12773_v47  ;;  %3600 = vmatprep.subr.mxu0 %v12774_v14  ;;  %v10129_v47 = vld [vmem:[%s6568_s29 + $0x78] sm:$0xff]  ;;  %v10133_v14 = vld [vmem:[%s6568_s29 + $0x70] sm:$0xff] }
 0x5d5   : > { %3371 = vmatprep.subr.mxu1 %v12775_v10  ;;  %3601 = vmatpush2.msra.mxu0 %v12776_v17  ;;  %v10137_v10 = vld [vmem:[%s6568_s29 + $0x48] sm:$0xff]  ;;  %v12801_v17 = vld [vmem:[#allocation211_spill] sm:$0xff] }
 0x5d6   : > { %3372 = vmatpush2.msra.mxu1 %v12777_v43  ;;  %3602 = vmatprep.subr.mxu0 %v12778_v4  ;;  %v12802_v43 = vld [vmem:[#allocation212_spill] sm:$0xff]  ;;  %v12803_v4 = vld [vmem:[#allocation213_spill] sm:$0xff] }
 0x5d7   : > { %3373 = vmatprep.subr.mxu1 %v12779_v19  ;;  %3603 = vmatpush2.msra.mxu0 %v12780_v52  ;;  %v12804_v19 = vld [vmem:[#allocation214_spill] sm:$0xff]  ;;  %v12805_v52 = vld [vmem:[#allocation215_spill] sm:$0xff] }
 0x5d8   : > { %3374 = vmatpush2.msra.mxu1 %v12781_v32  ;;  %3604 = vmatprep.subr.mxu0 %v12782_v31  ;;  %v12806_v32 = vld [vmem:[#allocation216_spill] sm:$0xff]  ;;  %v12807_v31 = vld [vmem:[#allocation217_spill] sm:$0xff] }
 0x5d9   : > { %3375 = vmatprep.subr.mxu1 %v12783_v13  ;;  %3605 = vmatpush2.msra.mxu0 %v12784_v50  ;;  %v12808_v13 = vld [vmem:[#allocation218_spill] sm:$0xff]  ;;  %v12809_v50 = vld [vmem:[#allocation219_spill] sm:$0xff] }
 0x5da   : > { %3376 = vmatpush2.msra.mxu1 %v12785_v40  ;;  %3606 = vmatprep.subr.mxu0 %v12786_v21  ;;  %v12810_v40 = vld [vmem:[#allocation220_spill] sm:$0xff]  ;;  %v12812_v21 = vld [vmem:[#allocation222_spill] sm:$0xff] }
 0x5db   : > { %3377 = vmatprep.subr.mxu1 %v12787_v33  ;;  %3607 = vmatpush2.msra.mxu0 %v12788_v57  ;;  %v12813_v33 = vld [vmem:[#allocation223_spill] sm:$0xff]  ;;  %v12814_v57 = vld [vmem:[#allocation224_spill] sm:$0xff] }
 0x5dc   : > { %3378 = vmatpush2.msra.mxu1 %v12789_v56  ;;  %3608 = vmatprep.subr.mxu0 %v12790_v41  ;;  %v12815_v56 = vld [vmem:[#allocation225_spill] sm:$0xff]  ;;  %v12816_v41 = vld [vmem:[#allocation226_spill] sm:$0xff] }
 0x5dd   : > { %3379 = vmatprep.subr.mxu1 %v12791_v5  ;;  %3609 = vmatpush2.msra.mxu0 %v12792_v2  ;;  %v12817_v5 = vld [vmem:[#allocation227_spill] sm:$0xff]  ;;  %v12818_v2 = vld [vmem:[#allocation228_spill] sm:$0xff] }
 0x5de   : > { %3380 = vmatpush2.msra.mxu1 %v12793_v0  ;;  %3610 = vmatprep.subr.mxu0 %v12794_v12  ;;  %v12819_v0 = vld [vmem:[#allocation229_spill] sm:$0xff]  ;;  %v12820_v12 = vld [vmem:[#allocation230_spill] sm:$0xff] }
 0x5df   : > { %3382 = vmatmul.mubr.f32.vlgmr.msra.gmra.mxu1 %v9887_v16  ;;  %3627 = vmatprep.subr.mxu1 %v12795_v7  ;;  %v12821_v7 = vld [vmem:[#allocation231_spill] sm:$0xff] }
 0x5e0   : > { %3387 = vmatprep.mubr.f32.mxu1 %v9903_v46  ;;  %3628 = vmatpush1.msra.mxu1 %v12796_v24  ;;  %v12822_v24 = vld [vmem:[#allocation232_spill] sm:$0xff] }
 0x5e1   : > { %3629 = vmatprep.subr.mxu1 %v12797_v27  ;;  %3611 = vmatpush2.msra.mxu0 %v12798_v38  ;;  %v12823_v27 = vld [vmem:[#allocation233_spill] sm:$0xff]  ;;  %v12824_v38 = vld [vmem:[#allocation234_spill] sm:$0xff] }
 0x5e2   : > { %3630 = vmatpush1.msra.mxu1 %v12799_v34  ;;  %3612 = vmatprep.subr.mxu0 %v12800_v55  ;;  %v12825_v34 = vld [vmem:[#allocation235_spill] sm:$0xff]  ;;  %v12826_v55 = vld [vmem:[#allocation236_spill] sm:$0xff] }
 0x5e3   : > { %3388 = vmatmul.mubr.f32.gmra.mxu1 %v9917_v58  ;;  %3631 = vmatprep.subr.mxu1 %v9640_v62  ;;  %v10081_v62 = vld [vmem:[%s6568_s29 + $0x198] sm:$0xff] }
 0x5e4   : > { %3632 = vmatpush1.msra.mxu1 %v9644_v53  ;;  %3613 = vmatpush2.msra.mxu0 %v9648_v51  ;;  %v10065_v53 = vld [vmem:[%s6568_s29 + $0x1f8] sm:$0xff]  ;;  %v10077_v51 = vld [vmem:[%s6568_s29 + $0x1c0] sm:$0xff] }
 0x5e5   : > { %3633 = vmatprep.subr.mxu1 %v9652_v20  ;;  %3704 = vmatprep.subr.mxu0 %v9656_v35  ;;  %v10069_v20 = vld [vmem:[%s6568_s29 + $0x1f0] sm:$0xff] }
 0x5e6   : > { %3634 = vmatpush1.msra.mxu1 %v9660_v42  ;;  %v10073_v42 = vld [vmem:[%s6568_s29 + $0x1c8] sm:$0xff]  ;;  %v10085_v35 = vld [vmem:[%s6568_s29 + $0x190] sm:$0xff] }
 0x5e7   : > { %3635 = vmatprep.subr.mxu1 %v10057_v54 }
 0x5e8   : > { %3636 = vmatpush1.msra.mxu1 %v10061_v59 }
 0x5e9   : > { %3637 = vmatprep.subr.mxu1 %v10065_v53 }
 0x5ea   : > { %3638 = vmatpush1.msra.mxu1 %v10069_v20 }
 0x5eb   : > { %3639 = vmatprep.subr.mxu1 %v10073_v42 }
 0x5ec   : > { %3640 = vmatpush1.msra.mxu1 %v10077_v51 }
 0x5ed   : > { %3641 = vmatprep.subr.mxu1 %v10081_v62 }
 0x5ee   : > { %3642 = vmatpush1.msra.mxu1 %v10085_v35 }
 0x5ef   : > { %3643 = vmatprep.subr.mxu1 %v10089_v29 }
 0x5f0   : > { %3644 = vmatpush1.msra.mxu1 %v10093_v25 }
 0x5f1   : > { %3645 = vmatprep.subr.mxu1 %v10097_v8 }
 0x5f2   : > { %3646 = vmatpush1.msra.mxu1 %v10101_v60 }
 0x5f3   : > { %3647 = vmatprep.subr.mxu1 %v10105_v3 }
 0x5f4   : > { %3648 = vmatpush1.msra.mxu1 %v10109_v45 }
 0x5f5   : > { %3649 = vmatprep.subr.mxu1 %v10113_v23 }
 0x5f6   : > { %3650 = vmatpush1.msra.mxu1 %v10117_v37 }
 0x5f7   : > { %3651 = vmatprep.subr.mxu1 %v10121_v61 }
 0x5f8   : > { %3652 = vmatpush1.msra.mxu1 %v10125_v30 }
 0x5f9   : > { %3653 = vmatprep.subr.mxu1 %v10129_v47 }
 0x5fa   : > { %3654 = vmatpush1.msra.mxu1 %v10133_v14 }
 0x5fb   : > { %3655 = vmatprep.subr.mxu1 %v10137_v10 }
 0x5fc   : > { %3656 = vmatpush1.msra.mxu1 %v9685_v39  ;;  %v12811_v39 = vld [vmem:[#allocation221_spill] sm:$0xff] }
 0x5fd   : > { %3657 = vmatprep.subr.mxu1 %v12801_v17  ;;  %v12827_v17 = vld [vmem:[#allocation237_spill] sm:$0xff] }
 0x5fe   : > { %3658 = vmatpush1.msra.mxu1 %v12802_v43  ;;  %v12828_v43 = vld [vmem:[#allocation238_spill] sm:$0xff] }
 0x5ff   : > { %3659 = vmatprep.subr.mxu1 %v12803_v4  ;;  %v12829_v4 = vld [vmem:[#allocation239_spill] sm:$0xff] }
 0x600   : > { %3660 = vmatpush2.msra.mxu1 %v12804_v19  ;;  %v12830_v19 = vld [vmem:[#allocation240_spill] sm:$0xff] }
 0x601   : > { %3661 = vmatprep.subr.mxu1 %v12805_v52  ;;  %v12831_v52 = vld [vmem:[#allocation241_spill] sm:$0xff] }
 0x602   : > { %3662 = vmatpush2.msra.mxu1 %v12806_v32  ;;  %v12832_v32 = vld [vmem:[#allocation242_spill] sm:$0xff] }
 0x603   : > { %3663 = vmatprep.subr.mxu1 %v12807_v31  ;;  %v12833_v31 = vld [vmem:[#allocation243_spill] sm:$0xff] }
 0x604   : > { %3664 = vmatpush2.msra.mxu1 %v12808_v13  ;;  %v12834_v13 = vld [vmem:[#allocation244_spill] sm:$0xff] }
 0x605   : > { %3665 = vmatprep.subr.mxu1 %v12809_v50  ;;  %v10176_v50 = vld [vmem:[%s6568_s29 + $0x2d8] sm:$0xff] }
 0x606   : > { %3666 = vmatpush2.msra.mxu1 %v12810_v40 }
 0x607   : > { %3667 = vmatprep.subr.mxu1 %v12811_v39 }
 0x608   : > { %3668 = vmatpush2.msra.mxu1 %v12812_v21 }
 0x609   : > { %3669 = vmatprep.subr.mxu1 %v12813_v33 }
 0x60a   : > { %3670 = vmatpush2.msra.mxu1 %v12814_v57 }
 0x60b   : > { %3671 = vmatprep.subr.mxu1 %v12815_v56 }
 0x60c   : > { %3672 = vmatpush2.msra.mxu1 %v12816_v41  ;;  %v12835_v41 = vld [vmem:[#allocation33_spill] sm:$0xff] }
 0x60d   : > { %3673 = vmatprep.subr.mxu1 %v12817_v5 }
 0x60e   : > { %3674 = vmatpush2.msra.mxu1 %v12818_v2 }
 0x60f   : > { %3675 = vmatprep.subr.mxu1 %v12819_v0 }
 0x610   : > { %3676 = vmatpush2.msra.mxu1 %v12820_v12  ;;  %v12836_v12 = vld [vmem:[#allocation71_spill] sm:$0xff] }
 0x611   : > { %3677 = vmatprep.subr.mxu1 %v12821_v7 }
 0x612   : > { %3678 = vmatpush2.msra.mxu1 %v12822_v24 }
 0x613   : > { %3679 = vmatprep.subr.mxu1 %v12823_v27 }
 0x614   : > { %3680 = vmatpush2.msra.mxu1 %v12824_v38 }
 0x615   : > { %3681 = vmatprep.subr.mxu1 %v12825_v34  ;;  %v12837_v34 = vld [vmem:[#allocation39_spill] sm:$0xff] }
 0x616   : > { %3682 = vmatpush2.msra.mxu1 %v12826_v55 }
 0x617   : > { %3683 = vmatprep.subr.mxu1 %v12827_v17 }
 0x618   : > { %3684 = vmatpush2.msra.mxu1 %v12828_v43  ;;  %v12838_v43 = vld [vmem:[#allocation17_spill] sm:$0xff] }
 0x619   : > { %3685 = vmatprep.subr.mxu1 %v12829_v4 }
 0x61a   : > { %3686 = vmatpush2.msra.mxu1 %v12830_v19 }
 0x61b   : > { %3687 = vmatprep.subr.mxu1 %v12831_v52 }
 0x61c   : > { %3688 = vmatpush2.msra.mxu1 %v12832_v32  ;;  %v12839_v32 = vld [vmem:[#allocation96_spill] sm:$0xff] }
 0x61d   : > { %3689 = vmatprep.subr.mxu1 %v12833_v31 }
 0x61e   : > { %3690 = vmatpush2.msra.mxu1 %v12834_v13 }
 0x61f   : > { %3937 = vmatprep.subr.mxu1 %v10176_v50 }
 0x65e   : > { %v3229_v40 = vpop.f32.mrf.mxu1  ;;  %v3306_v2 = vpop.f32.mrf.mxu0 }
 0x65f   : > { %v3230_v33 = vadd.f32 %v3229_v40, %v7836_v49  ;;  %v3307_v31 = vadd.f32 %v3306_v2, %v12839_v32  ;;  %v12840_v40 = vld [vmem:[#allocation56_spill] sm:$0xff] }
 0x660   : > { %v3231_v39 = vpop.f32.mrf.mxu1  ;;  %v3308_v38 = vpop.f32.mrf.mxu0 }
 0x661   : > { %v3232_v57 = vadd.f32 %v3231_v39, %v7841_v48  ;;  %v3394_v5 = vadd.f32 %v3230_v33, %v12835_v41  ;;  %v862_v39 = vadd.f32 %v12840_v40, %v7863_v44 }
 0x663   : > { %v3235_v21 = vpop.f32.mrf.mxu1  ;;  %v3395_v7 = vadd.f32 %v3232_v57, %v12836_v12  ;;  %v5009_v27 = vmul.f32 -1.442695, %v3394_v5  ;;  %v3312_v52 = vpop.f32.mrf.mxu0  ;;  %v3396_v5 = vadd.f32 %v3307_v31, %v862_v39 }
 0x664   : > { %v3236_v0 = vadd.f32 %v3235_v21, %v7836_v49  ;;  %v3309_v21 = vadd.f32 %v3308_v38, %v7866_v18  ;;  %v3313_v57 = vadd.f32 %v3312_v52, %v12839_v32 }
 0x665   : > { %v3237_v56 = vpop.f32.mrf.mxu1  ;;  %v5010_v17 = vmul.f32 -1.442695, %v3395_v7  ;;  %5354 = vpow2.f32 %v5009_v27  ;;  %v3314_v33 = vpop.f32.mrf.mxu0  ;;  %v5011_v38 = vmul.f32 -1.442695, %v3396_v5 }
 0x666   : > { %v3238_v24 = vadd.f32 %v3237_v56, %v7841_v48  ;;  %v3398_v55 = vadd.f32 %v3236_v0, %v12837_v34  ;;  %v12841_v56 = vld [vmem:[#allocation46_spill] sm:$0xff]  ;;  %v12842_v0 = vld [vmem:[#allocation64_spill] sm:$0xff]  ;;  %v3315_v2 = vadd.f32 %v3314_v33, %v7866_v18 }
 0x667   : > { %5356 = vpow2.f32 %v5010_v17  ;;  %v852_v41 = vadd.f32 %v12841_v56, %v7869_v36  ;;  %v868_v12 = vadd.f32 %v12842_v0, %v7863_v44 }
 0x668   : > { %v3399_v4 = vadd.f32 %v3238_v24, %v12838_v43  ;;  %v5013_v19 = vmul.f32 -1.442695, %v3398_v55  ;;  %v12843_v24 = vld [vmem:[#allocation52_spill] sm:$0xff] }
 0x669   : > { %v3397_v7 = vadd.f32 %v3309_v21, %v852_v41  ;;  %v858_v27 = vadd.f32 %v12843_v24, %v7869_v36  ;;  %v3400_v34 = vadd.f32 %v3313_v57, %v868_v12 }
 0x66a   : > { %v5014_v13 = vmul.f32 -1.442695, %v3399_v4  ;;  %5358 = vpow2.f32 %v5013_v19 }
 0x66b   : > { %v3401_v55 = vadd.f32 %v3315_v2, %v858_v27  ;;  %v5012_v17 = vmul.f32 -1.442695, %v3397_v7  ;;  %v5015_v4 = vmul.f32 -1.442695, %v3400_v34 }
 0x66c   : > { %5360 = vpow2.f32 %v5014_v13 }
 0x66d   : > { %5362 = vpow2.f32 %v5011_v38  ;;  %v5016_v52 = vmul.f32 -1.442695, %v3401_v55  ;;  %v12844_v38 = vld [vmem:[#allocation97_spill] sm:$0xff]  ;;  %v12845_v55 = vld [vmem:[#allocation67_spill] sm:$0xff] }
 0x66e   : > { %5364 = vpow2.f32 %v5012_v17  ;;  %v1023_v17 = vadd.f32 %v12845_v55, %v12844_v38 }
 0x66f   : > { %5366 = vpow2.f32 %v5015_v4  ;;  %v12846_v4 = vld [vmem:[#allocation98_spill] sm:$0xff] }
 0x670   : > { %5368 = vpow2.f32 %v5016_v52 }
 0x672   : > { %v5355_v43 = vpop.eup %5354 }
 0x673   : > { %v3426_v31 = vadd.f32 1.0, %v5355_v43 }
 0x674   : > { %v5357_v19 = vpop.eup %5356 }
 0x675   : > { %v3427_v40 = vadd.f32 1.0, %v5357_v19  ;;  %5370 = vrcp.f32 %v3426_v31  ;;  %v12847_v31 = vld [vmem:[#allocation99_spill] sm:$0xff] }
 0x677   : > { %v5359_v13 = vpop.eup %5358  ;;  %5372 = vrcp.f32 %v3427_v40 }
 0x678   : > { %v3430_v21 = vadd.f32 1.0, %v5359_v13  ;;  %v12848_v13 = vld [vmem:[#allocation54_spill] sm:$0xff] }
 0x679   : > { %v5361_v39 = vpop.eup %5360  ;;  %v1013_v40 = vadd.f32 %v12848_v13, %v12847_v31 }
 0x67a   : > { %v3431_v33 = vadd.f32 1.0, %v5361_v39  ;;  %5374 = vrcp.f32 %v3430_v21  ;;  %v5363_v57 = vpop.eup %5362 }
 0x67b   : > { %v5365_v56 = vpop.eup %5364  ;;  %v3428_v5 = vadd.f32 1.0, %v5363_v57 }
 0x67c   : > { %5376 = vrcp.f32 %v3431_v33  ;;  %v5367_v41 = vpop.eup %5366  ;;  %v3429_v2 = vadd.f32 1.0, %v5365_v56 }
 0x67d   : > { %v5369_v12 = vpop.eup %5368  ;;  %v3432_v27 = vadd.f32 1.0, %v5367_v41  ;;  %5378 = vrcp.f32 %v3428_v5 }
 0x67e   : > { %v3433_v39 = vadd.f32 1.0, %v5369_v12  ;;  %5380 = vrcp.f32 %v3429_v2  ;;  %v12850_v12 = vld [vmem:[#allocation62_spill] sm:$0xff] }
 0x67f   : > { %5382 = vrcp.f32 %v3432_v27  ;;  %v1019_v2 = vadd.f32 %v12850_v12, %v12847_v31 }
 0x682   : > { %v5371_v24 = vpop.eup %5370 }
 0x684   : > { %v5373_v52 = vpop.eup %5372 }
 0x687   : > { %v5375_v41 = vpop.eup %5374 }
 0x689   : > { %v5377_v55 = vpop.eup %5376 }
 0x69f   : > { %v3383_v0 = vpop.f32.mrf.mxu1 }
 0x6a0   : > { %v3384_v7 = vadd.f32 %v3383_v0, %v7892_v9  ;;  %v12849_v0 = vld [vmem:[#allocation76_spill] sm:$0xff] }
 0x6a1   : > { %v3385_v34 = vpop.f32.mrf.mxu1  ;;  %v1029_v11 = vadd.f32 %v12849_v0, %v12844_v38 }
 0x6a2   : > { %v3450_v43 = vmul.f32 %v5371_v24, %v3384_v7  ;;  %v3386_v19 = vadd.f32 %v3385_v34, %v12846_v4 }
 0x6a3   : > { %v3389_v21 = vpop.f32.mrf.mxu1 }
 0x6a4   : > { %v3454_v33 = vadd.f32 %v3450_v43, %v1023_v17  ;;  %v3451_v57 = vmul.f32 %v5373_v52, %v3386_v19  ;;  %v3390_v56 = vadd.f32 %v3389_v21, %v7892_v9  ;;  %v5379_v52 = vpop.eup %5378 }
 0x6a5   : > { %v3391_v5 = vpop.f32.mrf.mxu1  ;;  %v5381_v13 = vpop.eup %5380  ;;  %v3462_v21 = vsub.f32 1.0, %v5379_v52 }
 0x6a6   : > { %5384 = vtanh.f32 %v3454_v33  ;;  %v3455_v7 = vadd.f32 %v3451_v57, %v1013_v40  ;;  %v3452_v24 = vmul.f32 %v5375_v41, %v3390_v56  ;;  %v3392_v34 = vadd.f32 %v3391_v5, %v12846_v4  ;;  %v5383_v27 = vpop.eup %5382 }
 0x6a7   : > { %5386 = vrcp.f32 %v3433_v39  ;;  %v3463_v57 = vsub.f32 1.0, %v5381_v13  ;;  %v3470_v39 = vmul.f32 %v5379_v52, %v9887_v16  ;;  %v3471_v5 = vmul.f32 %v5381_v13, %v9882_v28 }
 0x6a8   : > { %5388 = vtanh.f32 %v3455_v7  ;;  %v3456_v17 = vadd.f32 %v3452_v24, %v1029_v11  ;;  %v3453_v43 = vmul.f32 %v5377_v55, %v3392_v34  ;;  %v3464_v7 = vsub.f32 1.0, %v5383_v27 }
 0x6a9   : > { %v3472_v52 = vmul.f32 %v5383_v27, %v9917_v58 }
 0x6aa   : > { %5390 = vtanh.f32 %v3456_v17  ;;  %v3457_v19 = vadd.f32 %v3453_v43, %v1019_v2  ;;  %v3491_v43 = vmul.f32 %v9882_v28, %v3097_v1 }
 0x6ac   : > { %5392 = vtanh.f32 %v3457_v19  ;;  %v5017_v19 = vld [vmem:[%s6594_s9 + $0x40] sm:$0xff] }
 0x6b3   : > { %v5385_v33 = vpop.eup %5384 }
 0x6b4   : > { %v5387_v40 = vpop.eup %5386  ;;  %v3466_v56 = vmul.f32 %v5385_v33, %v3462_v21 }
 0x6b5   : > { %v5389_v41 = vpop.eup %5388  ;;  %v3465_v12 = vsub.f32 1.0, %v5387_v40 }
 0x6b6   : > { %v3467_v0 = vmul.f32 %v5389_v41, %v3463_v57  ;;  %v3474_v11 = vadd.f32 %v3470_v39, %v3466_v56  ;;  %v3473_v57 = vmul.f32 %v5387_v40, %v9903_v46  ;;  %v5021_v56 = vld [vmem:[%s6594_s9 + $0x30] sm:$0xff]  ;;  %v12851_v39 = vsub.f32 1.0, %v9857_v22  ;;  %v5018_v40 = vld [vmem:[%s6594_s9 + $0x48] sm:$0xff] }
 0x6b7   : > { %v5391_v24 = vpop.eup %5390 }
 0x6b8   : > { %v3475_v34 = vadd.f32 %v3471_v5, %v3467_v0  ;;  %v3482_v55 = vmul.f32 %v9857_v22, %v3474_v11  ;;  %v3468_v2 = vmul.f32 %v5391_v24, %v3464_v7  ;;  %v3490_v41 = vmul.f32 %v9887_v16, %v12851_v39  ;;  %v5022_v11 = vld [vmem:[%s6594_s9 + $0x38] sm:$0xff]  ;;  %v10245_v24 = vld [vmem:[%s6568_s29 + $0x2f0] sm:$0xff]  ;;  %v10317_v39 = vld [vmem:[%s6568_s29 + $0x248] sm:$0xff] }
 0x6b9   : > { %v5393_v17 = vpop.eup %5392  ;;  %v3493_v16 = vmul.f32 %v9903_v46, %v3099_v6  ;;  %v12852_v6 = vsub.f32 1.0, %v9864_v15 }
 0x6ba   : > { %v3483_v13 = vmul.f32 %v9860_v63, %v3475_v34  ;;  %v3502_v21 = vadd.f32 %v5017_v19, %v3482_v55  ;;  %v3469_v33 = vmul.f32 %v5393_v17, %v3465_v12  ;;  %v3476_v0 = vadd.f32 %v3472_v52, %v3468_v2  ;;  %v10258_v12 = vld [vmem:[%s6568_s29 + $0x2c8] sm:$0xff]  ;;  %v10278_v17 = vld [vmem:[%s6568_s29 + $0x298] sm:$0xff]  ;;  %v10293_v52 = vld [vmem:[%s6568_s29 + $0x2a0] sm:$0xff] }
 0x6bb   : > { %v10229_v63 = vadd.f32 %v3490_v41, %v3482_v55  ;;  %v3492_v46 = vmul.f32 %v9917_v58, %v12852_v6  ;;  %v10254_v55 = vld [vmem:[%s6568_s29 + $0x2d0] sm:$0xff]  ;;  %v10264_v2 = vld [vmem:[%s6568_s29 + $0x2a8] sm:$0xff]  ;;  %v10365_v6 = vld [vmem:[%s6568_s29 + $0x1b8] sm:$0xff] }
 0x6bc   : > { %v10225_v5 = vadd.f32 %v3491_v43, %v3483_v13  ;;  %v3510_v28 = vadd.f32 %v5021_v56, %v3483_v13  ;;  %5019 = vst.msk [vmem:[%s6594_s9 + $0x40] sm:$0xff] %vm537_vm0, %v3502_v21  ;;  %v3477_v1 = vadd.f32 %v3473_v57, %v3469_v33  ;;  %v3484_v27 = vmul.f32 %v9864_v15, %v3476_v0  ;;  %v10268_v15 = vld [vmem:[%s6568_s29 + $0x2c0] sm:$0xff]  ;;  %v10284_v43 = vld [vmem:[%s6568_s29 + $0x290] sm:$0xff]  ;;  %v10289_v19 = vld [vmem:[%s6568_s29 + $0x268] sm:$0xff] }
 0x6bd   : > { %v10297_v13 = vld [vmem:[%s6568_s29 + $0x260] sm:$0xff]  ;;  %v10301_v21 = vld [vmem:[%s6568_s29 + $0x278] sm:$0xff]  ;;  %v10309_v57 = vld [vmem:[%s6568_s29 + $0x270] sm:$0xff]  ;;  %12857 = vst [vmem:[#allocation30_spill] sm:$0xff] %v10365_v6 }
 0x6be   : > { %5023 = vst.msk [vmem:[%s6594_s9 + $0x30] sm:$0xff] %vm537_vm0, %v3510_v28  ;;  %3614 = vmatprep.mubr.f32.mxu0 %v10225_v5  ;;  %3691 = vmatprep.mubr.f32.mxu1 %v10225_v5  ;;  %v3485_v22 = vmul.f32 %v9869_v26, %v3477_v1  ;;  %v3503_v7 = vadd.f32 %v5018_v40, %v3484_v27  ;;  %v10305_v33 = vld [vmem:[%s6568_s29 + $0x238] sm:$0xff]  ;;  %v10313_v56 = vld [vmem:[%s6568_s29 + $0x230] sm:$0xff]  ;;  %v10321_v41 = vld [vmem:[%s6568_s29 + $0x208] sm:$0xff] }
 0x6bf   : > { %3615 = vmatmul.mubr.f32.vlgmr.msra.gmra.mxu0 %v10229_v63  ;;  %3692 = vmatmul.mubr.f32.vlgmr.msra.gmra.mxu1 %v10229_v63  ;;  %v10274_v58 = vadd.f32 %v3492_v46, %v3484_v27  ;;  %v10325_v0 = vld [vmem:[%s6568_s29 + $0x240] sm:$0xff]  ;;  %v10333_v1 = vld [vmem:[%s6568_s29 + $0x218] sm:$0xff]  ;;  %v10349_v40 = vld [vmem:[%s6568_s29 + $0x1e8] sm:$0xff] }
 0x6c0   : > { %3705 = vmatpush1.msra.mxu0 %v10245_v24  ;;  %v10248_v34 = vadd.f32 %v3493_v16, %v3485_v22  ;;  %v3511_v26 = vadd.f32 %v5022_v11, %v3485_v22  ;;  %3938 = vmatpush1.msra.mxu1 %v10254_v55  ;;  %5020 = vst.msk [vmem:[%s6594_s9 + $0x48] sm:$0xff] %vm537_vm0, %v3503_v7  ;;  %v10329_v28 = vld [vmem:[%s6568_s29 + $0x200] sm:$0xff]  ;;  %v10337_v27 = vld [vmem:[%s6568_s29 + $0x1d8] sm:$0xff]  ;;  %v10341_v22 = vld [vmem:[%s6568_s29 + $0x210] sm:$0xff] }
 0x6c1   : > { %3706 = vmatprep.subr.mxu0 %v10258_v12  ;;  %3939 = vmatprep.subr.mxu1 %v10264_v2  ;;  %v10345_v16 = vld [vmem:[%s6568_s29 + $0x1d0] sm:$0xff]  ;;  %12853 = vst [vmem:[#allocation57_spill] sm:$0xff] %v10349_v40  ;;  %v10353_v11 = vld [vmem:[%s6568_s29 + $0x1a8] sm:$0xff]  ;;  %v10357_v7 = vld [vmem:[%s6568_s29 + $0x1e0] sm:$0xff] }
 0x6c2   : > { %3707 = vmatpush1.msra.mxu0 %v10268_v15  ;;  %5024 = vst.msk [vmem:[%s6594_s9 + $0x38] sm:$0xff] %vm537_vm0, %v3511_v26  ;;  %3620 = vmatprep.mubr.f32.mxu0 %v10248_v34  ;;  %12854 = vst [vmem:[#allocation49_spill] sm:$0xff] %v10353_v11  ;;  %v10361_v26 = vld [vmem:[%s6568_s29 + $0x1a0] sm:$0xff]  ;;  %v10369_v46 = vld [vmem:[%s6568_s29 + $0x178] sm:$0xff] }
 0x6c3   : > { %3697 = vmatprep.mubr.f32.mxu1 %v10248_v34  ;;  %3708 = vmatprep.subr.mxu0 %v10278_v17  ;;  %12855 = vst [vmem:[#allocation63_spill] sm:$0xff] %v10357_v7  ;;  %12856 = vst [vmem:[#allocation55_spill] sm:$0xff] %v10361_v26 }
 0x6c4   : > { %3621 = vmatmul.mubr.f32.gmra.mxu0 %v10274_v58  ;;  %3698 = vmatmul.mubr.f32.gmra.mxu1 %v10274_v58  ;;  %12858 = vst [vmem:[#allocation75_spill] sm:$0xff] %v10369_v46 }
 0x6c5   : > { %3709 = vmatpush1.msra.mxu0 %v10284_v43  ;;  %3768 = vmatprep.mubr.f32.mxu0 %v10225_v5 }
 0x6c6   : > { %3710 = vmatprep.subr.mxu0 %v10289_v19  ;;  %3940 = vmatpush1.msra.mxu1 %v10293_v52 }
 0x6c7   : > { %3711 = vmatpush1.msra.mxu0 %v10297_v13  ;;  %3941 = vmatprep.subr.mxu1 %v10301_v21 }
 0x6c8   : > { %3712 = vmatprep.subr.mxu0 %v10305_v33  ;;  %3942 = vmatpush1.msra.mxu1 %v10309_v57 }
 0x6c9   : > { %3713 = vmatpush1.msra.mxu0 %v10313_v56  ;;  %3943 = vmatprep.subr.mxu1 %v10317_v39 }
 0x6ca   : > { %3714 = vmatprep.subr.mxu0 %v10321_v41  ;;  %3944 = vmatpush1.msra.mxu1 %v10325_v0 }
 0x6cb   : > { %3715 = vmatpush1.msra.mxu0 %v10329_v28  ;;  %3945 = vmatprep.subr.mxu1 %v10333_v1 }
 0x6cc   : > { %3716 = vmatprep.subr.mxu0 %v10337_v27  ;;  %3946 = vmatpush1.msra.mxu1 %v10341_v22 }
 0x6cd   : > { %3717 = vmatpush1.msra.mxu0 %v10345_v16  ;;  %3947 = vmatprep.subr.mxu1 %v10349_v40  ;;  %v10792_v40 = vld [vmem:[%s6568_s29 + $0x258] sm:$0xff] }
 0x6ce   : > { %3718 = vmatprep.subr.mxu0 %v10353_v11  ;;  %3948 = vmatpush1.msra.mxu1 %v10357_v7  ;;  %v10373_v11 = vld [vmem:[%s6568_s29 + $0x1b0] sm:$0xff] }
 0x6cf   : > { %3719 = vmatpush1.msra.mxu0 %v10361_v26  ;;  %3949 = vmatprep.subr.mxu1 %v10365_v6  ;;  %12859 = vst [vmem:[#allocation36_spill] sm:$0xff] %v10373_v11  ;;  %v10377_v7 = vld [vmem:[%s6568_s29 + $0x170] sm:$0xff]  ;;  %v10381_v26 = vld [vmem:[%s6568_s29 + $0x188] sm:$0xff] }
 0x6d0   : > { %3720 = vmatprep.subr.mxu0 %v10369_v46  ;;  %3950 = vmatpush1.msra.mxu1 %v10373_v11  ;;  %12860 = vst [vmem:[#allocation79_spill] sm:$0xff] %v10377_v7  ;;  %12861 = vst [vmem:[#allocation31_spill] sm:$0xff] %v10381_v26  ;;  %v10385_v6 = vld [vmem:[%s6568_s29 + $0x148] sm:$0xff]  ;;  %v10389_v46 = vld [vmem:[%s6568_s29 + $0x180] sm:$0xff] }
 0x6d1   : > { %3721 = vmatpush1.msra.mxu0 %v10377_v7  ;;  %3951 = vmatprep.subr.mxu1 %v10381_v26  ;;  %12862 = vst [vmem:[#allocation82_spill] sm:$0xff] %v10385_v6  ;;  %12863 = vst [vmem:[#allocation40_spill] sm:$0xff] %v10389_v46  ;;  %v10393_v11 = vld [vmem:[%s6568_s29 + $0x140] sm:$0xff]  ;;  %v10397_v7 = vld [vmem:[%s6568_s29 + $0x158] sm:$0xff] }
 0x6d2   : > { %3722 = vmatprep.subr.mxu0 %v10385_v6  ;;  %3952 = vmatpush1.msra.mxu1 %v10389_v46  ;;  %12864 = vst [vmem:[#allocation86_spill] sm:$0xff] %v10393_v11  ;;  %12865 = vst [vmem:[#allocation69_spill] sm:$0xff] %v10397_v7  ;;  %v10401_v26 = vld [vmem:[%s6568_s29 + $0x118] sm:$0xff]  ;;  %v10405_v6 = vld [vmem:[%s6568_s29 + $0x150] sm:$0xff] }
 0x6d3   : > { %3723 = vmatpush1.msra.mxu0 %v10393_v11  ;;  %3953 = vmatprep.subr.mxu1 %v10397_v7  ;;  %12866 = vst [vmem:[#allocation37_spill] sm:$0xff] %v10401_v26  ;;  %12867 = vst [vmem:[#allocation16_spill] sm:$0xff] %v10405_v6  ;;  %v10409_v46 = vld [vmem:[%s6568_s29 + $0x110] sm:$0xff]  ;;  %v10413_v11 = vld [vmem:[%s6568_s29 + $0x128] sm:$0xff] }
 0x6d4   : > { %3724 = vmatprep.subr.mxu0 %v10401_v26  ;;  %3954 = vmatpush1.msra.mxu1 %v10405_v6  ;;  %12868 = vst [vmem:[#allocation43_spill] sm:$0xff] %v10409_v46  ;;  %12869 = vst [vmem:[#allocation42_spill] sm:$0xff] %v10413_v11  ;;  %v10417_v7 = vld [vmem:[%s6568_s29 + $0xe8] sm:$0xff]  ;;  %v10421_v26 = vld [vmem:[%s6568_s29 + $0x120] sm:$0xff] }
 0x6d5   : > { %3725 = vmatpush1.msra.mxu0 %v10409_v46  ;;  %3955 = vmatprep.subr.mxu1 %v10413_v11  ;;  %12870 = vst [vmem:[#allocation60_spill] sm:$0xff] %v10417_v7  ;;  %12871 = vst [vmem:[#allocation50_spill] sm:$0xff] %v10421_v26  ;;  %v10425_v6 = vld [vmem:[%s6568_s29 + $0xe0] sm:$0xff]  ;;  %v10429_v46 = vld [vmem:[%s6568_s29 + $0xf8] sm:$0xff] }
 0x6d6   : > { %3726 = vmatprep.subr.mxu0 %v10417_v7  ;;  %3956 = vmatpush1.msra.mxu1 %v10421_v26  ;;  %12872 = vst [vmem:[#allocation66_spill] sm:$0xff] %v10425_v6  ;;  %12873 = vst [vmem:[#allocation48_spill] sm:$0xff] %v10429_v46  ;;  %v10433_v11 = vld [vmem:[%s6568_s29 + $0xb8] sm:$0xff]  ;;  %v10437_v7 = vld [vmem:[%s6568_s29 + $0xf0] sm:$0xff] }
 0x6d7   : > { %3727 = vmatpush1.msra.mxu0 %v10425_v6  ;;  %3957 = vmatprep.subr.mxu1 %v10429_v46  ;;  %12874 = vst [vmem:[#allocation74_spill] sm:$0xff] %v10433_v11  ;;  %12875 = vst [vmem:[#allocation58_spill] sm:$0xff] %v10437_v7  ;;  %v10441_v26 = vld [vmem:[%s6568_s29 + $0xb0] sm:$0xff]  ;;  %v10445_v6 = vld [vmem:[%s6568_s29 + $0xc8] sm:$0xff] }
 0x6d8   : > { %3728 = vmatprep.subr.mxu0 %v10433_v11  ;;  %3958 = vmatpush1.msra.mxu1 %v10437_v7  ;;  %12876 = vst [vmem:[#allocation78_spill] sm:$0xff] %v10441_v26  ;;  %12877 = vst [vmem:[#allocation104_spill] sm:$0xff] %v10445_v6  ;;  %v10449_v46 = vld [vmem:[%s6568_s29 + $0x88] sm:$0xff]  ;;  %v10453_v11 = vld [vmem:[%s6568_s29 + $0xc0] sm:$0xff] }
 0x6d9   : > { %3729 = vmatpush1.msra.mxu0 %v10441_v26  ;;  %3959 = vmatprep.subr.mxu1 %v10445_v6  ;;  %12878 = vst [vmem:[#allocation105_spill] sm:$0xff] %v10449_v46  ;;  %12879 = vst [vmem:[#allocation106_spill] sm:$0xff] %v10453_v11  ;;  %v10457_v7 = vld [vmem:[%s6568_s29 + $0x80] sm:$0xff]  ;;  %v10461_v26 = vld [vmem:[%s6568_s29 + $0x98] sm:$0xff] }
 0x6da   : > { %3730 = vmatprep.subr.mxu0 %v10449_v46  ;;  %3960 = vmatpush1.msra.mxu1 %v10453_v11  ;;  %12880 = vst [vmem:[#allocation107_spill] sm:$0xff] %v10457_v7  ;;  %12881 = vst [vmem:[#allocation108_spill] sm:$0xff] %v10461_v26  ;;  %v10465_v6 = vld [vmem:[%s6568_s29 + $0x58] sm:$0xff]  ;;  %v10469_v46 = vld [vmem:[%s6568_s29 + $0x90] sm:$0xff] }
 0x6db   : > { %3731 = vmatpush1.msra.mxu0 %v10457_v7  ;;  %3961 = vmatprep.subr.mxu1 %v10461_v26  ;;  %12882 = vst [vmem:[#allocation109_spill] sm:$0xff] %v10465_v6  ;;  %12883 = vst [vmem:[#allocation110_spill] sm:$0xff] %v10469_v46  ;;  %v10473_v11 = vld [vmem:[%s6568_s29 + $0x50] sm:$0xff]  ;;  %v10477_v7 = vld [vmem:[%s6568_s29 + $0x68] sm:$0xff] }
 0x6dc   : > { %3732 = vmatprep.subr.mxu0 %v10465_v6  ;;  %3962 = vmatpush1.msra.mxu1 %v10469_v46  ;;  %12884 = vst [vmem:[#allocation111_spill] sm:$0xff] %v10473_v11  ;;  %12885 = vst [vmem:[#allocation112_spill] sm:$0xff] %v10477_v7  ;;  %v10481_v26 = vld [vmem:[%s6568_s29 + $0x28] sm:$0xff]  ;;  %v10485_v6 = vld [vmem:[%s6568_s29 + $0x60] sm:$0xff] }
 0x6dd   : > { %3733 = vmatpush1.msra.mxu0 %v10473_v11  ;;  %3963 = vmatprep.subr.mxu1 %v10477_v7  ;;  %12886 = vst [vmem:[#allocation113_spill] sm:$0xff] %v10481_v26  ;;  %12887 = vst [vmem:[#allocation114_spill] sm:$0xff] %v10485_v6  ;;  %v10489_v46 = vld [vmem:[%s6568_s29 + $0x20] sm:$0xff]  ;;  %v10493_v11 = vld [vmem:[%s6568_s29 + $0x38] sm:$0xff] }
 0x6de   : > { %3734 = vmatprep.subr.mxu0 %v10481_v26  ;;  %3964 = vmatpush1.msra.mxu1 %v10485_v6  ;;  %12888 = vst [vmem:[#allocation115_spill] sm:$0xff] %v10489_v46  ;;  %12889 = vst [vmem:[#allocation116_spill] sm:$0xff] %v10493_v11  ;;  %v10497_v7 = vld [vmem:[%s6568_s29 + $0x5f8] sm:$0xff]  ;;  %v10501_v26 = vld [vmem:[%s6568_s29 + $0x30] sm:$0xff] }
 0x6df   : > { %3735 = vmatpush1.msra.mxu0 %v10489_v46  ;;  %3965 = vmatprep.subr.mxu1 %v10493_v11  ;;  %12890 = vst [vmem:[#allocation117_spill] sm:$0xff] %v10497_v7  ;;  %12891 = vst [vmem:[#allocation118_spill] sm:$0xff] %v10501_v26  ;;  %v10505_v6 = vld [vmem:[%s6568_s29 + $0x5f0] sm:$0xff]  ;;  %v10509_v46 = vld [vmem:[%s6568_s29 + $0x8] sm:$0xff] }
 0x6e0   : > { %3736 = vmatprep.subr.mxu0 %v10497_v7  ;;  %3966 = vmatpush1.msra.mxu1 %v10501_v26  ;;  %12892 = vst [vmem:[#allocation119_spill] sm:$0xff] %v10505_v6  ;;  %12893 = vst [vmem:[#allocation120_spill] sm:$0xff] %v10509_v46  ;;  %v10513_v11 = vld [vmem:[%s6568_s29 + $0x5c8] sm:$0xff]  ;;  %v10517_v7 = vld [vmem:[%s6568_s29] sm:$0xff] }
 0x6e1   : > { %3737 = vmatpush2.msra.mxu0 %v10505_v6  ;;  %3967 = vmatprep.subr.mxu1 %v10509_v46  ;;  %12894 = vst [vmem:[#allocation121_spill] sm:$0xff] %v10513_v11  ;;  %12895 = vst [vmem:[#allocation122_spill] sm:$0xff] %v10517_v7  ;;  %v10521_v26 = vld [vmem:[%s6568_s29 + $0x5c0] sm:$0xff]  ;;  %v10525_v6 = vld [vmem:[%s6568_s29 + $0x5d8] sm:$0xff] }
 0x6e2   : > { %3738 = vmatprep.subr.mxu0 %v10513_v11  ;;  %3968 = vmatpush1.msra.mxu1 %v10517_v7  ;;  %12896 = vst [vmem:[#allocation123_spill] sm:$0xff] %v10521_v26  ;;  %12897 = vst [vmem:[#allocation124_spill] sm:$0xff] %v10525_v6  ;;  %v10529_v46 = vld [vmem:[%s6568_s29 + $0x598] sm:$0xff]  ;;  %v10533_v11 = vld [vmem:[%s6568_s29 + $0x5d0] sm:$0xff] }
 0x6e3   : > { %3739 = vmatpush2.msra.mxu0 %v10521_v26  ;;  %3969 = vmatprep.subr.mxu1 %v10525_v6  ;;  %12898 = vst [vmem:[#allocation125_spill] sm:$0xff] %v10529_v46  ;;  %12899 = vst [vmem:[#allocation126_spill] sm:$0xff] %v10533_v11  ;;  %v10537_v7 = vld [vmem:[%s6568_s29 + $0x590] sm:$0xff]  ;;  %v10541_v26 = vld [vmem:[%s6568_s29 + $0x5a8] sm:$0xff] }
 0x6e4   : > { %3740 = vmatprep.subr.mxu0 %v10529_v46  ;;  %3970 = vmatpush2.msra.mxu1 %v10533_v11  ;;  %12900 = vst [vmem:[#allocation127_spill] sm:$0xff] %v10537_v7  ;;  %12901 = vst [vmem:[#allocation128_spill] sm:$0xff] %v10541_v26  ;;  %v10545_v6 = vld [vmem:[%s6568_s29 + $0x568] sm:$0xff]  ;;  %v10549_v46 = vld [vmem:[%s6568_s29 + $0x5a0] sm:$0xff] }
 0x6e5   : > { %3741 = vmatpush2.msra.mxu0 %v10537_v7  ;;  %3971 = vmatprep.subr.mxu1 %v10541_v26  ;;  %12902 = vst [vmem:[#allocation129_spill] sm:$0xff] %v10545_v6  ;;  %12903 = vst [vmem:[#allocation130_spill] sm:$0xff] %v10549_v46  ;;  %v10553_v11 = vld [vmem:[%s6568_s29 + $0x560] sm:$0xff]  ;;  %v10557_v7 = vld [vmem:[%s6568_s29 + $0x578] sm:$0xff] }
 0x6e6   : > { %3742 = vmatprep.subr.mxu0 %v10545_v6  ;;  %3972 = vmatpush2.msra.mxu1 %v10549_v46  ;;  %12904 = vst [vmem:[#allocation131_spill] sm:$0xff] %v10553_v11  ;;  %12905 = vst [vmem:[#allocation132_spill] sm:$0xff] %v10557_v7  ;;  %v10561_v26 = vld [vmem:[%s6568_s29 + $0x538] sm:$0xff]  ;;  %v10565_v6 = vld [vmem:[%s6568_s29 + $0x570] sm:$0xff] }
 0x6e7   : > { %3743 = vmatpush2.msra.mxu0 %v10553_v11  ;;  %3973 = vmatprep.subr.mxu1 %v10557_v7  ;;  %12906 = vst [vmem:[#allocation133_spill] sm:$0xff] %v10561_v26  ;;  %12907 = vst [vmem:[#allocation134_spill] sm:$0xff] %v10565_v6  ;;  %v10569_v46 = vld [vmem:[%s6568_s29 + $0x530] sm:$0xff]  ;;  %v10573_v11 = vld [vmem:[%s6568_s29 + $0x548] sm:$0xff] }
 0x6e8   : > { %3744 = vmatprep.subr.mxu0 %v10561_v26  ;;  %3974 = vmatpush2.msra.mxu1 %v10565_v6  ;;  %12908 = vst [vmem:[#allocation135_spill] sm:$0xff] %v10569_v46  ;;  %12909 = vst [vmem:[#allocation136_spill] sm:$0xff] %v10573_v11  ;;  %v10577_v7 = vld [vmem:[%s6568_s29 + $0x508] sm:$0xff]  ;;  %v10581_v26 = vld [vmem:[%s6568_s29 + $0x540] sm:$0xff] }
 0x6e9   : > { %3745 = vmatpush2.msra.mxu0 %v10569_v46  ;;  %3975 = vmatprep.subr.mxu1 %v10573_v11  ;;  %12910 = vst [vmem:[#allocation137_spill] sm:$0xff] %v10577_v7  ;;  %12911 = vst [vmem:[#allocation138_spill] sm:$0xff] %v10581_v26  ;;  %v10585_v6 = vld [vmem:[%s6568_s29 + $0x500] sm:$0xff]  ;;  %v10589_v46 = vld [vmem:[%s6568_s29 + $0x518] sm:$0xff] }
 0x6ea   : > { %3746 = vmatprep.subr.mxu0 %v10577_v7  ;;  %3976 = vmatpush2.msra.mxu1 %v10581_v26  ;;  %12912 = vst [vmem:[#allocation139_spill] sm:$0xff] %v10585_v6  ;;  %12913 = vst [vmem:[#allocation140_spill] sm:$0xff] %v10589_v46  ;;  %v10593_v11 = vld [vmem:[%s6568_s29 + $0x4d8] sm:$0xff]  ;;  %v10597_v7 = vld [vmem:[%s6568_s29 + $0x510] sm:$0xff] }
 0x6eb   : > { %3747 = vmatpush2.msra.mxu0 %v10585_v6  ;;  %3977 = vmatprep.subr.mxu1 %v10589_v46  ;;  %12914 = vst [vmem:[#allocation141_spill] sm:$0xff] %v10593_v11  ;;  %12915 = vst [vmem:[#allocation142_spill] sm:$0xff] %v10597_v7  ;;  %v10601_v26 = vld [vmem:[%s6568_s29 + $0x4d0] sm:$0xff]  ;;  %v10605_v6 = vld [vmem:[%s6568_s29 + $0x4e8] sm:$0xff] }
 0x6ec   : > { %3748 = vmatprep.subr.mxu0 %v10593_v11  ;;  %3978 = vmatpush2.msra.mxu1 %v10597_v7  ;;  %12916 = vst [vmem:[#allocation143_spill] sm:$0xff] %v10601_v26  ;;  %12917 = vst [vmem:[#allocation144_spill] sm:$0xff] %v10605_v6  ;;  %v10609_v46 = vld [vmem:[%s6568_s29 + $0x4a8] sm:$0xff]  ;;  %v10613_v11 = vld [vmem:[%s6568_s29 + $0x4e0] sm:$0xff] }
 0x6ed   : > { %3749 = vmatpush2.msra.mxu0 %v10601_v26  ;;  %3979 = vmatprep.subr.mxu1 %v10605_v6  ;;  %12918 = vst [vmem:[#allocation145_spill] sm:$0xff] %v10609_v46  ;;  %12919 = vst [vmem:[#allocation146_spill] sm:$0xff] %v10613_v11  ;;  %v10617_v7 = vld [vmem:[%s6568_s29 + $0x4a0] sm:$0xff]  ;;  %v10621_v26 = vld [vmem:[%s6568_s29 + $0x4b8] sm:$0xff] }
 0x6ee   : > { %3750 = vmatprep.subr.mxu0 %v10609_v46  ;;  %3980 = vmatpush2.msra.mxu1 %v10613_v11  ;;  %12920 = vst [vmem:[#allocation147_spill] sm:$0xff] %v10617_v7  ;;  %12921 = vst [vmem:[#allocation148_spill] sm:$0xff] %v10621_v26  ;;  %v10625_v6 = vld [vmem:[%s6568_s29 + $0x478] sm:$0xff]  ;;  %v10629_v46 = vld [vmem:[%s6568_s29 + $0x4b0] sm:$0xff] }
 0x6ef   : > { %3751 = vmatpush2.msra.mxu0 %v10617_v7  ;;  %3981 = vmatprep.subr.mxu1 %v10621_v26  ;;  %12922 = vst [vmem:[#allocation149_spill] sm:$0xff] %v10625_v6  ;;  %12923 = vst [vmem:[#allocation150_spill] sm:$0xff] %v10629_v46  ;;  %v10633_v11 = vld [vmem:[%s6568_s29 + $0x470] sm:$0xff]  ;;  %v10637_v7 = vld [vmem:[%s6568_s29 + $0x488] sm:$0xff] }
 0x6f0   : > { %3752 = vmatprep.subr.mxu0 %v10625_v6  ;;  %3982 = vmatpush2.msra.mxu1 %v10629_v46  ;;  %12924 = vst [vmem:[#allocation151_spill] sm:$0xff] %v10633_v11  ;;  %12925 = vst [vmem:[#allocation152_spill] sm:$0xff] %v10637_v7  ;;  %v10641_v26 = vld [vmem:[%s6568_s29 + $0x448] sm:$0xff]  ;;  %v10645_v6 = vld [vmem:[%s6568_s29 + $0x480] sm:$0xff] }
 0x6f1   : > { %3753 = vmatpush2.msra.mxu0 %v10633_v11  ;;  %3983 = vmatprep.subr.mxu1 %v10637_v7  ;;  %12926 = vst [vmem:[#allocation153_spill] sm:$0xff] %v10641_v26  ;;  %12927 = vst [vmem:[#allocation154_spill] sm:$0xff] %v10645_v6  ;;  %v10649_v46 = vld [vmem:[%s6568_s29 + $0x440] sm:$0xff]  ;;  %v10653_v11 = vld [vmem:[%s6568_s29 + $0x458] sm:$0xff] }
 0x6f2   : > { %3754 = vmatprep.subr.mxu0 %v10641_v26  ;;  %3984 = vmatpush2.msra.mxu1 %v10645_v6  ;;  %12928 = vst [vmem:[#allocation155_spill] sm:$0xff] %v10649_v46  ;;  %12929 = vst [vmem:[#allocation156_spill] sm:$0xff] %v10653_v11  ;;  %v10657_v7 = vld [vmem:[%s6568_s29 + $0x418] sm:$0xff]  ;;  %v10661_v26 = vld [vmem:[%s6568_s29 + $0x450] sm:$0xff] }
 0x6f3   : > { %3755 = vmatpush2.msra.mxu0 %v10649_v46  ;;  %3985 = vmatprep.subr.mxu1 %v10653_v11  ;;  %12930 = vst [vmem:[#allocation157_spill] sm:$0xff] %v10657_v7  ;;  %12931 = vst [vmem:[#allocation158_spill] sm:$0xff] %v10661_v26  ;;  %v10665_v6 = vld [vmem:[%s6568_s29 + $0x410] sm:$0xff]  ;;  %v10669_v46 = vld [vmem:[%s6568_s29 + $0x428] sm:$0xff] }
 0x6f4   : > { %3756 = vmatprep.subr.mxu0 %v10657_v7  ;;  %3986 = vmatpush2.msra.mxu1 %v10661_v26  ;;  %12932 = vst [vmem:[#allocation159_spill] sm:$0xff] %v10665_v6  ;;  %12933 = vst [vmem:[#allocation160_spill] sm:$0xff] %v10669_v46  ;;  %v10673_v11 = vld [vmem:[%s6568_s29 + $0x3e8] sm:$0xff]  ;;  %v10677_v7 = vld [vmem:[%s6568_s29 + $0x420] sm:$0xff] }
 0x6f5   : > { %3757 = vmatpush2.msra.mxu0 %v10665_v6  ;;  %3987 = vmatprep.subr.mxu1 %v10669_v46  ;;  %12934 = vst [vmem:[#allocation161_spill] sm:$0xff] %v10673_v11  ;;  %12935 = vst [vmem:[#allocation162_spill] sm:$0xff] %v10677_v7  ;;  %v10681_v26 = vld [vmem:[%s6568_s29 + $0x3e0] sm:$0xff]  ;;  %v10685_v6 = vld [vmem:[%s6568_s29 + $0x3f8] sm:$0xff] }
 0x6f6   : > { %3758 = vmatprep.subr.mxu0 %v10673_v11  ;;  %3988 = vmatpush2.msra.mxu1 %v10677_v7  ;;  %12936 = vst [vmem:[#allocation163_spill] sm:$0xff] %v10681_v26  ;;  %12937 = vst [vmem:[#allocation164_spill] sm:$0xff] %v10685_v6  ;;  %v10689_v46 = vld [vmem:[%s6568_s29 + $0x3b8] sm:$0xff]  ;;  %v10693_v11 = vld [vmem:[%s6568_s29 + $0x3f0] sm:$0xff] }
 0x6f7   : > { %3759 = vmatpush2.msra.mxu0 %v10681_v26  ;;  %3989 = vmatprep.subr.mxu1 %v10685_v6  ;;  %12938 = vst [vmem:[#allocation165_spill] sm:$0xff] %v10689_v46  ;;  %12939 = vst [vmem:[#allocation166_spill] sm:$0xff] %v10693_v11  ;;  %v10697_v7 = vld [vmem:[%s6568_s29 + $0x3b0] sm:$0xff]  ;;  %v10701_v26 = vld [vmem:[%s6568_s29 + $0x3c8] sm:$0xff] }
 0x6f8   : > { %3760 = vmatprep.subr.mxu0 %v10689_v46  ;;  %3990 = vmatpush2.msra.mxu1 %v10693_v11  ;;  %12940 = vst [vmem:[#allocation167_spill] sm:$0xff] %v10697_v7  ;;  %12941 = vst [vmem:[#allocation168_spill] sm:$0xff] %v10701_v26  ;;  %v10705_v6 = vld [vmem:[%s6568_s29 + $0x388] sm:$0xff]  ;;  %v10709_v46 = vld [vmem:[%s6568_s29 + $0x3c0] sm:$0xff] }
 0x6f9   : > { %3761 = vmatpush2.msra.mxu0 %v10697_v7  ;;  %3991 = vmatprep.subr.mxu1 %v10701_v26  ;;  %12942 = vst [vmem:[#allocation169_spill] sm:$0xff] %v10705_v6  ;;  %12943 = vst [vmem:[#allocation170_spill] sm:$0xff] %v10709_v46  ;;  %v10713_v11 = vld [vmem:[%s6568_s29 + $0x380] sm:$0xff]  ;;  %v10717_v7 = vld [vmem:[%s6568_s29 + $0x398] sm:$0xff] }
 0x6fa   : > { %3762 = vmatprep.subr.mxu0 %v10705_v6  ;;  %3992 = vmatpush2.msra.mxu1 %v10709_v46  ;;  %12944 = vst [vmem:[#allocation171_spill] sm:$0xff] %v10713_v11  ;;  %12945 = vst [vmem:[#allocation172_spill] sm:$0xff] %v10717_v7  ;;  %v10721_v26 = vld [vmem:[%s6568_s29 + $0x358] sm:$0xff]  ;;  %v10725_v6 = vld [vmem:[%s6568_s29 + $0x390] sm:$0xff] }
 0x6fb   : > { %3763 = vmatpush2.msra.mxu0 %v10713_v11  ;;  %3993 = vmatprep.subr.mxu1 %v10717_v7  ;;  %12946 = vst [vmem:[#allocation173_spill] sm:$0xff] %v10721_v26  ;;  %12947 = vst [vmem:[#allocation174_spill] sm:$0xff] %v10725_v6  ;;  %v10729_v46 = vld [vmem:[%s6568_s29 + $0x350] sm:$0xff]  ;;  %v10733_v11 = vld [vmem:[%s6568_s29 + $0x368] sm:$0xff] }
 0x6fc   : > { %3764 = vmatprep.subr.mxu0 %v10721_v26  ;;  %3994 = vmatpush2.msra.mxu1 %v10725_v6  ;;  %12948 = vst [vmem:[#allocation175_spill] sm:$0xff] %v10729_v46  ;;  %12949 = vst [vmem:[#allocation176_spill] sm:$0xff] %v10733_v11  ;;  %v10737_v7 = vld [vmem:[%s6568_s29 + $0x328] sm:$0xff]  ;;  %v10741_v26 = vld [vmem:[%s6568_s29 + $0x360] sm:$0xff] }
 0x6fd   : > { %3765 = vmatpush2.msra.mxu0 %v10729_v46  ;;  %3995 = vmatprep.subr.mxu1 %v10733_v11  ;;  %12950 = vst [vmem:[#allocation177_spill] sm:$0xff] %v10737_v7  ;;  %12951 = vst [vmem:[#allocation178_spill] sm:$0xff] %v10741_v26  ;;  %v10745_v6 = vld [vmem:[%s6568_s29 + $0x320] sm:$0xff]  ;;  %v10749_v46 = vld [vmem:[%s6568_s29 + $0x338] sm:$0xff] }
 0x6fe   : > { %3766 = vmatprep.subr.mxu0 %v10737_v7  ;;  %3996 = vmatpush2.msra.mxu1 %v10741_v26  ;;  %12952 = vst [vmem:[#allocation179_spill] sm:$0xff] %v10745_v6  ;;  %12953 = vst [vmem:[#allocation180_spill] sm:$0xff] %v10749_v46  ;;  %v10754_v11 = vld [vmem:[%s6568_s29 + $0x2e8] sm:$0xff]  ;;  %v10759_v26 = vld [vmem:[%s6568_s29 + $0x2e0] sm:$0xff] }
 0x6ff   : > { %3767 = vmatpush2.msra.mxu0 %v10745_v6  ;;  %3997 = vmatprep.subr.mxu1 %v10749_v46  ;;  %12954 = vst [vmem:[#allocation181_spill] sm:$0xff] %v10754_v11  ;;  %12955 = vst [vmem:[#allocation182_spill] sm:$0xff] %v10759_v26  ;;  %v10763_v6 = vld [vmem:[%s6568_s29 + $0x2b8] sm:$0xff]  ;;  %v10767_v46 = vld [vmem:[%s6568_s29 + $0x330] sm:$0xff] }
 0x700   : > { %3769 = vmatmul.mubr.f32.vlgmr.msra.gmra.mxu0 %v10229_v63  ;;  %4014 = vmatprep.subr.mxu0 %v10754_v11  ;;  %12956 = vst [vmem:[#allocation183_spill] sm:$0xff] %v10763_v6  ;;  %12957 = vst [vmem:[#allocation184_spill] sm:$0xff] %v10767_v46  ;;  %v10771_v7 = vld [vmem:[%s6568_s29 + $0x2b0] sm:$0xff]  ;;  %v10775_v11 = vld [vmem:[%s6568_s29 + $0x308] sm:$0xff] }
 0x701   : > { %3774 = vmatprep.mubr.f32.mxu0 %v10248_v34  ;;  %4015 = vmatpush1.msra.mxu0 %v10759_v26  ;;  %12958 = vst [vmem:[#allocation185_spill] sm:$0xff] %v10771_v7  ;;  %12959 = vst [vmem:[#allocation186_spill] sm:$0xff] %v10775_v11  ;;  %v10780_v26 = vld [vmem:[%s6568_s29 + $0x288] sm:$0xff] }
 0x702   : > { %4016 = vmatprep.subr.mxu0 %v10763_v6  ;;  %3998 = vmatpush2.msra.mxu1 %v10767_v46  ;;  %v10784_v6 = vld [vmem:[%s6568_s29 + $0x280] sm:$0xff] }
 0x703   : > { %4017 = vmatpush1.msra.mxu0 %v10771_v7  ;;  %3999 = vmatprep.subr.mxu1 %v10775_v11  ;;  %v10788_v46 = vld [vmem:[%s6568_s29 + $0x300] sm:$0xff]  ;;  %v10796_v7 = vld [vmem:[%s6568_s29 + $0x2f8] sm:$0xff]  ;;  %v10800_v11 = vld [vmem:[%s6568_s29 + $0x250] sm:$0xff] }
 0x704   : > { %3775 = vmatmul.mubr.f32.gmra.mxu0 %v10274_v58  ;;  %4018 = vmatprep.subr.mxu0 %v10780_v26 }
 0x705   : > { %4019 = vmatpush1.msra.mxu0 %v10784_v6  ;;  %4000 = vmatpush2.msra.mxu1 %v10788_v46 }
 0x706   : > { %4020 = vmatprep.subr.mxu0 %v10792_v40  ;;  %4091 = vmatprep.subr.mxu1 %v10796_v7 }
 0x707   : > { %4021 = vmatpush1.msra.mxu0 %v10800_v11 }
 0x708   : > { %4022 = vmatprep.subr.mxu0 %v10057_v54  ;;  %v10825_v54 = vld [vmem:[%s6568_s29 + $0x40] sm:$0xff] }
 0x709   : > { %4023 = vmatpush1.msra.mxu0 %v10061_v59  ;;  %v10829_v59 = vld [vmem:[%s6568_s29 + $0x18] sm:$0xff] }
 0x70a   : > { %4024 = vmatprep.subr.mxu0 %v10065_v53  ;;  %12960 = vst [vmem:[#allocation187_spill] sm:$0xff] %v10829_v59  ;;  %v10833_v53 = vld [vmem:[%s6568_s29 + $0x10] sm:$0xff] }
 0x70b   : > { %4025 = vmatpush1.msra.mxu0 %v10069_v20  ;;  %12961 = vst [vmem:[#allocation188_spill] sm:$0xff] %v10833_v53  ;;  %v10837_v20 = vld [vmem:[%s6568_s29 + $0x5e8] sm:$0xff] }
 0x70c   : > { %4026 = vmatprep.subr.mxu0 %v10073_v42  ;;  %12962 = vst [vmem:[#allocation189_spill] sm:$0xff] %v10837_v20  ;;  %v10841_v42 = vld [vmem:[%s6568_s29 + $0x5e0] sm:$0xff] }
 0x70d   : > { %4027 = vmatpush1.msra.mxu0 %v10077_v51  ;;  %12963 = vst [vmem:[#allocation190_spill] sm:$0xff] %v10841_v42  ;;  %v10845_v51 = vld [vmem:[%s6568_s29 + $0x5b8] sm:$0xff] }
 0x70e   : > { %4028 = vmatprep.subr.mxu0 %v10081_v62  ;;  %12964 = vst [vmem:[#allocation191_spill] sm:$0xff] %v10845_v51  ;;  %v10849_v62 = vld [vmem:[%s6568_s29 + $0x5b0] sm:$0xff] }
 0x70f   : > { %4029 = vmatpush1.msra.mxu0 %v10085_v35  ;;  %12965 = vst [vmem:[#allocation192_spill] sm:$0xff] %v10849_v62  ;;  %v10853_v35 = vld [vmem:[%s6568_s29 + $0x588] sm:$0xff] }
 0x710   : > { %4030 = vmatprep.subr.mxu0 %v10089_v29  ;;  %12966 = vst [vmem:[#allocation193_spill] sm:$0xff] %v10853_v35  ;;  %v10857_v29 = vld [vmem:[%s6568_s29 + $0x580] sm:$0xff] }
 0x711   : > { %4031 = vmatpush1.msra.mxu0 %v10093_v25  ;;  %12967 = vst [vmem:[#allocation194_spill] sm:$0xff] %v10857_v29  ;;  %v10861_v25 = vld [vmem:[%s6568_s29 + $0x558] sm:$0xff] }
 0x712   : > { %4032 = vmatprep.subr.mxu0 %v10097_v8  ;;  %12968 = vst [vmem:[#allocation195_spill] sm:$0xff] %v10861_v25  ;;  %v10865_v8 = vld [vmem:[%s6568_s29 + $0x550] sm:$0xff] }
 0x713   : > { %4033 = vmatpush1.msra.mxu0 %v10101_v60  ;;  %12969 = vst [vmem:[#allocation196_spill] sm:$0xff] %v10865_v8  ;;  %v10869_v60 = vld [vmem:[%s6568_s29 + $0x528] sm:$0xff] }
 0x714   : > { %4034 = vmatprep.subr.mxu0 %v10105_v3  ;;  %12970 = vst [vmem:[#allocation197_spill] sm:$0xff] %v10869_v60  ;;  %v10873_v3 = vld [vmem:[%s6568_s29 + $0x520] sm:$0xff] }
 0x715   : > { %4035 = vmatpush1.msra.mxu0 %v10109_v45  ;;  %12971 = vst [vmem:[#allocation198_spill] sm:$0xff] %v10873_v3  ;;  %v10877_v45 = vld [vmem:[%s6568_s29 + $0x4f8] sm:$0xff] }
 0x716   : > { %4036 = vmatprep.subr.mxu0 %v10113_v23  ;;  %12972 = vst [vmem:[#allocation199_spill] sm:$0xff] %v10877_v45  ;;  %v10881_v23 = vld [vmem:[%s6568_s29 + $0x4f0] sm:$0xff] }
 0x717   : > { %4037 = vmatpush1.msra.mxu0 %v10117_v37  ;;  %12973 = vst [vmem:[#allocation200_spill] sm:$0xff] %v10881_v23  ;;  %v10885_v37 = vld [vmem:[%s6568_s29 + $0x4c8] sm:$0xff] }
 0x718   : > { %4038 = vmatprep.subr.mxu0 %v10121_v61  ;;  %12974 = vst [vmem:[#allocation201_spill] sm:$0xff] %v10885_v37  ;;  %v10889_v61 = vld [vmem:[%s6568_s29 + $0x4c0] sm:$0xff] }
 0x719   : > { %4039 = vmatpush1.msra.mxu0 %v10125_v30  ;;  %12975 = vst [vmem:[#allocation202_spill] sm:$0xff] %v10889_v61  ;;  %v10893_v30 = vld [vmem:[%s6568_s29 + $0x498] sm:$0xff] }
 0x71a   : > { %4040 = vmatprep.subr.mxu0 %v10129_v47  ;;  %12976 = vst [vmem:[#allocation203_spill] sm:$0xff] %v10893_v30  ;;  %v10897_v47 = vld [vmem:[%s6568_s29 + $0x490] sm:$0xff] }
 0x71b   : > { %4041 = vmatpush1.msra.mxu0 %v10133_v14  ;;  %12977 = vst [vmem:[#allocation204_spill] sm:$0xff] %v10897_v47  ;;  %v10901_v14 = vld [vmem:[%s6568_s29 + $0x468] sm:$0xff] }
 0x71c   : > { %4042 = vmatprep.subr.mxu0 %v10137_v10  ;;  %12978 = vst [vmem:[#allocation205_spill] sm:$0xff] %v10901_v14  ;;  %v10905_v10 = vld [vmem:[%s6568_s29 + $0x460] sm:$0xff] }
 0x71d   : > { %4043 = vmatpush1.msra.mxu0 %v10825_v54  ;;  %12979 = vst [vmem:[#allocation206_spill] sm:$0xff] %v10905_v10 }
 0x71e   : > { %4044 = vmatprep.subr.mxu0 %v10829_v59 }
 0x71f   : > { %4045 = vmatpush1.msra.mxu0 %v10833_v53 }
 0x720   : > { %4046 = vmatprep.subr.mxu0 %v10837_v20  ;;  %v12997_v20 = vld [vmem:[#allocation68_spill] sm:$0xff] }
 0x721   : > { %4047 = vmatpush2.msra.mxu0 %v10841_v42 }
 0x722   : > { %4048 = vmatprep.subr.mxu0 %v10845_v51 }
 0x723   : > { %4049 = vmatpush2.msra.mxu0 %v10849_v62 }
 0x724   : > { %4050 = vmatprep.subr.mxu0 %v10853_v35 }
 0x725   : > { %4051 = vmatpush2.msra.mxu0 %v10857_v29 }
 0x726   : > { %4052 = vmatprep.subr.mxu0 %v10861_v25 }
 0x727   : > { %4053 = vmatpush2.msra.mxu0 %v10865_v8 }
 0x728   : > { %4054 = vmatprep.subr.mxu0 %v10869_v60  ;;  %v12994_v60 = vld [vmem:[#allocation45_spill] sm:$0xff] }
 0x729   : > { %4055 = vmatpush2.msra.mxu0 %v10873_v3 }
 0x72a   : > { %4056 = vmatprep.subr.mxu0 %v10877_v45 }
 0x72b   : > { %4057 = vmatpush2.msra.mxu0 %v10881_v23 }
 0x72c   : > { %4058 = vmatprep.subr.mxu0 %v10885_v37  ;;  %v10941_v37 = vld [vmem:[%s6568_s29 + $0x378] sm:$0xff] }
 0x72d   : > { %4059 = vmatpush2.msra.mxu0 %v10889_v61  ;;  %v10909_v61 = vld [vmem:[%s6568_s29 + $0x438] sm:$0xff]  ;;  %12988 = vst [vmem:[#allocation215_spill] sm:$0xff] %v10941_v37 }
 0x72e   : > { %4060 = vmatprep.subr.mxu0 %v10893_v30  ;;  %12980 = vst [vmem:[#allocation207_spill] sm:$0xff] %v10909_v61  ;;  %v10913_v30 = vld [vmem:[%s6568_s29 + $0x430] sm:$0xff] }
 0x72f   : > { %4061 = vmatpush2.msra.mxu0 %v10897_v47  ;;  %12981 = vst [vmem:[#allocation208_spill] sm:$0xff] %v10913_v30  ;;  %v10917_v47 = vld [vmem:[%s6568_s29 + $0x408] sm:$0xff] }
 0x730   : > { %4062 = vmatprep.subr.mxu0 %v10901_v14  ;;  %12982 = vst [vmem:[#allocation209_spill] sm:$0xff] %v10917_v47  ;;  %v10921_v14 = vld [vmem:[%s6568_s29 + $0x400] sm:$0xff] }
 0x731   : > { %4063 = vmatpush2.msra.mxu0 %v10905_v10  ;;  %12983 = vst [vmem:[#allocation210_spill] sm:$0xff] %v10921_v14  ;;  %v10925_v10 = vld [vmem:[%s6568_s29 + $0x3d8] sm:$0xff] }
 0x732   : > { %4064 = vmatprep.subr.mxu0 %v10909_v61  ;;  %12984 = vst [vmem:[#allocation211_spill] sm:$0xff] %v10925_v10  ;;  %v10929_v61 = vld [vmem:[%s6568_s29 + $0x3d0] sm:$0xff] }
 0x733   : > { %4065 = vmatpush2.msra.mxu0 %v10913_v30  ;;  %12985 = vst [vmem:[#allocation212_spill] sm:$0xff] %v10929_v61  ;;  %v10933_v30 = vld [vmem:[%s6568_s29 + $0x3a8] sm:$0xff] }
 0x734   : > { %4066 = vmatprep.subr.mxu0 %v10917_v47  ;;  %12986 = vst [vmem:[#allocation213_spill] sm:$0xff] %v10933_v30  ;;  %v10937_v47 = vld [vmem:[%s6568_s29 + $0x3a0] sm:$0xff] }
 0x735   : > { %4067 = vmatpush2.msra.mxu0 %v10921_v14  ;;  %12987 = vst [vmem:[#allocation214_spill] sm:$0xff] %v10937_v47  ;;  %v10945_v14 = vld [vmem:[%s6568_s29 + $0x370] sm:$0xff] }
 0x736   : > { %4068 = vmatprep.subr.mxu0 %v10925_v10  ;;  %12989 = vst [vmem:[#allocation216_spill] sm:$0xff] %v10945_v14  ;;  %v10949_v10 = vld [vmem:[%s6568_s29 + $0x348] sm:$0xff] }
 0x737   : > { %4069 = vmatpush2.msra.mxu0 %v10929_v61  ;;  %12990 = vst [vmem:[#allocation217_spill] sm:$0xff] %v10949_v10  ;;  %v10953_v61 = vld [vmem:[%s6568_s29 + $0x340] sm:$0xff] }
 0x738   : > { %4070 = vmatprep.subr.mxu0 %v10933_v30  ;;  %12991 = vst [vmem:[#allocation218_spill] sm:$0xff] %v10953_v61  ;;  %v10957_v30 = vld [vmem:[%s6568_s29 + $0x318] sm:$0xff] }
 0x739   : > { %4071 = vmatpush2.msra.mxu0 %v10937_v47  ;;  %12992 = vst [vmem:[#allocation219_spill] sm:$0xff] %v10957_v30  ;;  %v10961_v47 = vld [vmem:[%s6568_s29 + $0x310] sm:$0xff] }
 0x73a   : > { %4072 = vmatprep.subr.mxu0 %v10941_v37  ;;  %12993 = vst [vmem:[#allocation220_spill] sm:$0xff] %v10961_v47 }
 0x73b   : > { %4073 = vmatpush2.msra.mxu0 %v10945_v14 }
 0x73c   : > { %4074 = vmatprep.subr.mxu0 %v10949_v10 }
 0x73d   : > { %4075 = vmatpush2.msra.mxu0 %v10953_v61 }
 0x73e   : > { %4076 = vmatprep.subr.mxu0 %v10957_v30  ;;  %v12995_v30 = vld [vmem:[#allocation61_spill] sm:$0xff] }
 0x73f   : > { %4077 = vmatpush2.msra.mxu0 %v10961_v47 }
 0x740   : > { %4324 = vmatprep.subr.mxu0 %v10176_v50  ;;  %v12996_v50 = vld [vmem:[#allocation51_spill] sm:$0xff] }
 0x77f   : > { %v3616_v37 = vpop.f32.mrf.mxu0  ;;  %v3693_v8 = vpop.f32.mrf.mxu1 }
 0x780   : > { %v3617_v45 = vadd.f32 %v3616_v37, %v7836_v49  ;;  %v3694_v59 = vadd.f32 %v3693_v8, %v12839_v32  ;;  %v13001_v8 = vld [vmem:[#allocation38_spill] sm:$0xff] }
 0x781   : > { %v3618_v14 = vpop.f32.mrf.mxu0  ;;  %v3695_v62 = vpop.f32.mrf.mxu1 }
 0x782   : > { %v3619_v10 = vadd.f32 %v3618_v14, %v7841_v48  ;;  %v3781_v61 = vadd.f32 %v3617_v45, %v12994_v60  ;;  %v12998_v45 = vld [vmem:[#allocation73_spill] sm:$0xff] }
 0x784   : > { %v3622_v23 = vpop.f32.mrf.mxu0  ;;  %v3782_v29 = vadd.f32 %v3619_v10, %v12995_v30  ;;  %v5025_v47 = vmul.f32 -1.442695, %v3781_v61  ;;  %v3699_v14 = vpop.f32.mrf.mxu1  ;;  %v3696_v30 = vadd.f32 %v3695_v62, %v7866_v18 }
 0x785   : > { %v3623_v25 = vadd.f32 %v3622_v23, %v7836_v49  ;;  %v874_v23 = vadd.f32 %v12998_v45, %v7863_v44  ;;  %v3700_v61 = vadd.f32 %v3699_v14, %v12839_v32 }
 0x786   : > { %v3624_v3 = vpop.f32.mrf.mxu0  ;;  %v5026_v42 = vmul.f32 -1.442695, %v3782_v29  ;;  %5394 = vpow2.f32 %v5025_v47  ;;  %v12999_v29 = vld [vmem:[#allocation32_spill] sm:$0xff]  ;;  %v846_v47 = vadd.f32 %v13001_v8, %v7869_v36 }
 0x787   : > { %v3625_v35 = vadd.f32 %v3624_v3, %v7841_v48  ;;  %v3785_v51 = vadd.f32 %v3623_v25, %v12996_v50  ;;  %v3701_v3 = vpop.f32.mrf.mxu1  ;;  %v840_v25 = vadd.f32 %v12999_v29, %v7869_v36 }
 0x788   : > { %5396 = vpow2.f32 %v5026_v42  ;;  %v3702_v42 = vadd.f32 %v3701_v3, %v7866_v18 }
 0x789   : > { %v3786_v53 = vadd.f32 %v3625_v35, %v12997_v20  ;;  %v5029_v37 = vmul.f32 -1.442695, %v3785_v51  ;;  %v3783_v20 = vadd.f32 %v3694_v59, %v874_v23  ;;  %v13000_v51 = vld [vmem:[#allocation77_spill] sm:$0xff] }
 0x78a   : > { %v880_v35 = vadd.f32 %v13000_v51, %v7863_v44  ;;  %v3788_v50 = vadd.f32 %v3702_v42, %v846_v47 }
 0x78b   : > { %v5030_v60 = vmul.f32 -1.442695, %v3786_v53  ;;  %5398 = vpow2.f32 %v5029_v37  ;;  %v3784_v53 = vadd.f32 %v3696_v30, %v840_v25  ;;  %v5027_v62 = vmul.f32 -1.442695, %v3783_v20 }
 0x78c   : > { %v3787_v10 = vadd.f32 %v3700_v61, %v880_v35  ;;  %v5032_v29 = vmul.f32 -1.442695, %v3788_v50  ;;  %v13002_v50 = vld [vmem:[#allocation80_spill] sm:$0xff] }
 0x78d   : > { %5400 = vpow2.f32 %v5030_v60  ;;  %v5028_v37 = vmul.f32 -1.442695, %v3784_v53 }
 0x78e   : > { %v5031_v14 = vmul.f32 -1.442695, %v3787_v10  ;;  %5402 = vpow2.f32 %v5027_v62 }
 0x78f   : > { %5404 = vpow2.f32 %v5028_v37  ;;  %v1035_v37 = vadd.f32 %v13002_v50, %v12844_v38 }
 0x790   : > { %5406 = vpow2.f32 %v5031_v14 }
 0x791   : > { %5408 = vpow2.f32 %v5032_v29 }
 0x793   : > { %v5395_v45 = vpop.eup %5394 }
 0x794   : > { %v3813_v59 = vadd.f32 1.0, %v5395_v45 }
 0x795   : > { %v5397_v32 = vpop.eup %5396 }
 0x796   : > { %v3814_v23 = vadd.f32 1.0, %v5397_v32  ;;  %5410 = vrcp.f32 %v3813_v59  ;;  %v13003_v59 = vld [vmem:[#allocation34_spill] sm:$0xff] }
 0x798   : > { %v5399_v60 = vpop.eup %5398  ;;  %5412 = vrcp.f32 %v3814_v23 }
 0x799   : > { %v3817_v30 = vadd.f32 1.0, %v5399_v60  ;;  %v1001_v60 = vadd.f32 %v13003_v59, %v12847_v31 }
 0x79a   : > { %v5401_v51 = vpop.eup %5400 }
 0x79b   : > { %v3818_v3 = vadd.f32 1.0, %v5401_v51  ;;  %5414 = vrcp.f32 %v3817_v30  ;;  %v5403_v61 = vpop.eup %5402 }
 0x79c   : > { %v5405_v25 = vpop.eup %5404  ;;  %v3815_v35 = vadd.f32 1.0, %v5403_v61 }
 0x79d   : > { %5416 = vrcp.f32 %v3818_v3  ;;  %v5407_v20 = vpop.eup %5406  ;;  %v3816_v8 = vadd.f32 1.0, %v5405_v25 }
 0x79e   : > { %v5409_v53 = vpop.eup %5408  ;;  %v3819_v62 = vadd.f32 1.0, %v5407_v20  ;;  %5418 = vrcp.f32 %v3815_v35  ;;  %v13004_v20 = vld [vmem:[#allocation84_spill] sm:$0xff] }
 0x79f   : > { %v3820_v23 = vadd.f32 1.0, %v5409_v53  ;;  %5420 = vrcp.f32 %v3816_v8  ;;  %v13005_v53 = vld [vmem:[#allocation44_spill] sm:$0xff] }
 0x7a0   : > { %5422 = vrcp.f32 %v3819_v62  ;;  %v1007_v8 = vadd.f32 %v13005_v53, %v12847_v31 }
 0x7a3   : > { %v5411_v10 = vpop.eup %5410 }
 0x7a5   : > { %v5413_v29 = vpop.eup %5412 }
 0x7a8   : > { %v5415_v25 = vpop.eup %5414 }
 0x7aa   : > { %v5417_v50 = vpop.eup %5416 }
 0x7c0   : > { %v3770_v42 = vpop.f32.mrf.mxu0 }
 0x7c1   : > { %v3771_v47 = vadd.f32 %v3770_v42, %v7892_v9  ;;  %v1041_v42 = vadd.f32 %v13004_v20, %v12844_v38 }
 0x7c2   : > { %v3772_v32 = vpop.f32.mrf.mxu0 }
 0x7c3   : > { %v3837_v45 = vmul.f32 %v5411_v10, %v3771_v47  ;;  %v3773_v14 = vadd.f32 %v3772_v32, %v12846_v4 }
 0x7c4   : > { %v3776_v51 = vpop.f32.mrf.mxu0 }
 0x7c5   : > { %v3841_v30 = vadd.f32 %v3837_v45, %v1035_v37  ;;  %v3838_v3 = vmul.f32 %v5413_v29, %v3773_v14  ;;  %v3777_v61 = vadd.f32 %v3776_v51, %v7892_v9  ;;  %v5419_v29 = vpop.eup %5418 }
 0x7c6   : > { %v3778_v35 = vpop.f32.mrf.mxu0  ;;  %v5421_v59 = vpop.eup %5420  ;;  %v3849_v51 = vsub.f32 1.0, %v5419_v29 }
 0x7c7   : > { %5424 = vtanh.f32 %v3841_v30  ;;  %v3842_v47 = vadd.f32 %v3838_v3, %v1001_v60  ;;  %v3839_v10 = vmul.f32 %v5415_v25, %v3777_v61  ;;  %v3779_v32 = vadd.f32 %v3778_v35, %v12846_v4  ;;  %v5423_v62 = vpop.eup %5422 }
 0x7c8   : > { %5426 = vrcp.f32 %v3820_v23  ;;  %v3850_v3 = vsub.f32 1.0, %v5421_v59  ;;  %v3857_v23 = vmul.f32 %v5419_v29, %v10229_v63  ;;  %v3858_v35 = vmul.f32 %v5421_v59, %v10225_v5  ;;  %v5033_v29 = vld [vmem:[%s6594_s9 + $0x50] sm:$0xff] }
 0x7c9   : > { %5428 = vtanh.f32 %v3842_v47  ;;  %v3843_v37 = vadd.f32 %v3839_v10, %v1041_v42  ;;  %v3840_v45 = vmul.f32 %v5417_v50, %v3779_v32  ;;  %v3851_v47 = vsub.f32 1.0, %v5423_v62  ;;  %v13006_v50 = vld [vmem:[#allocation23_spill] sm:$0xff] }
 0x7cb   : > { %5430 = vtanh.f32 %v3843_v37  ;;  %v3844_v14 = vadd.f32 %v3840_v45, %v1007_v8 }
 0x7cd   : > { %5432 = vtanh.f32 %v3844_v14  ;;  %v13007_v14 = vld [vmem:[#allocation90_spill] sm:$0xff] }
 0x7ce   : > { %v13008_v31 = vsub.f32 1.0, %v13007_v14 }
 0x7d4   : > { %v5425_v30 = vpop.eup %5424 }
 0x7d5   : > { %v5427_v60 = vpop.eup %5426  ;;  %v3853_v61 = vmul.f32 %v5425_v30, %v3849_v51  ;;  %v3878_v51 = vmul.f32 %v10225_v5, %v13008_v31  ;;  %v3859_v30 = vmul.f32 %v5423_v62, %v10274_v58 }
 0x7d6   : > { %v5429_v25 = vpop.eup %5428  ;;  %v3852_v8 = vsub.f32 1.0, %v5427_v60 }
 0x7d7   : > { %v3854_v20 = vmul.f32 %v5429_v25, %v3850_v3  ;;  %v3861_v42 = vadd.f32 %v3857_v23, %v3853_v61  ;;  %v3860_v23 = vmul.f32 %v5427_v60, %v10248_v34  ;;  %v5037_v25 = vld [vmem:[%s6594_s9 + $0x20] sm:$0xff] }
 0x7d8   : > { %v5431_v10 = vpop.eup %5430 }
 0x7d9   : > { %v3862_v32 = vadd.f32 %v3858_v35, %v3854_v20  ;;  %v3869_v53 = vmul.f32 %v13006_v50, %v3861_v42  ;;  %v3855_v37 = vmul.f32 %v5431_v10, %v3851_v47  ;;  %v13009_v20 = vsub.f32 1.0, %v13006_v50  ;;  %v13010_v10 = vld [vmem:[#allocation27_spill] sm:$0xff] }
 0x7da   : > { %v5433_v45 = vpop.eup %5432 }
 0x7db   : > { %v3870_v59 = vmul.f32 %v13007_v14, %v3862_v32  ;;  %v3889_v3 = vadd.f32 %v5033_v29, %v3869_v53  ;;  %v3856_v61 = vmul.f32 %v5433_v45, %v3852_v8  ;;  %v3877_v35 = vmul.f32 %v10229_v63, %v13009_v20  ;;  %v13011_v63 = vld [vmem:[#allocation93_spill] sm:$0xff]  ;;  %v13042_v20 = vld [vmem:[#allocation108_spill] sm:$0xff] }
 0x7dc   : > { %v3863_v42 = vadd.f32 %v3859_v30, %v3855_v37  ;;  %v13012_v50 = vsub.f32 1.0, %v13011_v63  ;;  %v5034_v37 = vld [vmem:[%s6594_s9 + $0x58] sm:$0xff]  ;;  %v13013_v29 = vsub.f32 1.0, %v13010_v10 }
 0x7dd   : > { %v11011_v47 = vadd.f32 %v3878_v51, %v3870_v59  ;;  %v3897_v31 = vadd.f32 %v5037_v25, %v3870_v59  ;;  %5035 = vst.msk [vmem:[%s6594_s9 + $0x50] sm:$0xff] %vm537_vm0, %v3889_v3  ;;  %v3864_v5 = vadd.f32 %v3860_v23, %v3856_v61  ;;  %v11015_v62 = vadd.f32 %v3877_v35, %v3869_v53  ;;  %v5038_v53 = vld [vmem:[%s6594_s9 + $0x28] sm:$0xff]  ;;  %v13038_v3 = vld [vmem:[#allocation104_spill] sm:$0xff]  ;;  %v13039_v61 = vld [vmem:[#allocation105_spill] sm:$0xff] }
 0x7de   : > { %v3871_v32 = vmul.f32 %v13010_v10, %v3863_v42  ;;  %v3880_v8 = vmul.f32 %v10248_v34, %v13012_v50  ;;  %v3879_v30 = vmul.f32 %v10274_v58, %v13013_v29  ;;  %v13014_v34 = vld [vmem:[#allocation57_spill] sm:$0xff]  ;;  %v13019_v58 = vld [vmem:[#allocation75_spill] sm:$0xff]  ;;  %v13037_v59 = vld [vmem:[#allocation78_spill] sm:$0xff] }
 0x7df   : > { %5039 = vst.msk [vmem:[%s6594_s9 + $0x20] sm:$0xff] %vm537_vm0, %v3897_v31  ;;  %4001 = vmatprep.mubr.f32.mxu1 %v11011_v47  ;;  %4078 = vmatprep.mubr.f32.mxu0 %v11011_v47  ;;  %v3872_v60 = vmul.f32 %v13011_v63, %v3864_v5  ;;  %v13040_v23 = vld [vmem:[#allocation106_spill] sm:$0xff]  ;;  %v13041_v25 = vld [vmem:[#allocation107_spill] sm:$0xff]  ;;  %v13043_v35 = vld [vmem:[#allocation109_spill] sm:$0xff] }
 0x7e0   : > { %4002 = vmatmul.mubr.f32.vlgmr.msra.gmra.mxu1 %v11015_v62  ;;  %4079 = vmatmul.mubr.f32.vlgmr.msra.gmra.mxu0 %v11015_v62  ;;  %v3890_v45 = vadd.f32 %v5034_v37, %v3871_v32  ;;  %v13044_v42 = vld [vmem:[#allocation110_spill] sm:$0xff]  ;;  %v13045_v31 = vld [vmem:[#allocation111_spill] sm:$0xff]  ;;  %v13046_v5 = vld [vmem:[#allocation112_spill] sm:$0xff] }
 0x7e1   : > { %4092 = vmatpush1.msra.mxu1 %v10245_v24  ;;  %v11031_v14 = vadd.f32 %v3880_v8, %v3872_v60  ;;  %v3898_v51 = vadd.f32 %v5038_v53, %v3872_v60  ;;  %4325 = vmatpush1.msra.mxu0 %v10254_v55  ;;  %v11045_v24 = vadd.f32 %v3879_v30, %v3871_v32  ;;  %v13015_v55 = vld [vmem:[#allocation49_spill] sm:$0xff]  ;;  %v13048_v32 = vld [vmem:[#allocation114_spill] sm:$0xff]  ;;  %v13049_v63 = vld [vmem:[#allocation115_spill] sm:$0xff] }
 0x7e2   : > { %4093 = vmatprep.subr.mxu1 %v10258_v12  ;;  %5036 = vst.msk [vmem:[%s6594_s9 + $0x58] sm:$0xff] %vm537_vm0, %v3890_v45  ;;  %4326 = vmatprep.subr.mxu0 %v10264_v2  ;;  %v13016_v12 = vld [vmem:[#allocation63_spill] sm:$0xff]  ;;  %v13047_v10 = vld [vmem:[#allocation113_spill] sm:$0xff]  ;;  %v13050_v60 = vld [vmem:[#allocation116_spill] sm:$0xff] }
 0x7e3   : > { %4094 = vmatpush1.msra.mxu1 %v10268_v15  ;;  %5040 = vst.msk [vmem:[%s6594_s9 + $0x28] sm:$0xff] %vm537_vm0, %v3898_v51  ;;  %4007 = vmatprep.mubr.f32.mxu1 %v11031_v14  ;;  %v13017_v2 = vld [vmem:[#allocation55_spill] sm:$0xff]  ;;  %v13018_v15 = vld [vmem:[#allocation30_spill] sm:$0xff]  ;;  %v13051_v50 = vld [vmem:[#allocation117_spill] sm:$0xff] }
 0x7e4   : > { %4084 = vmatprep.mubr.f32.mxu0 %v11031_v14  ;;  %4095 = vmatprep.subr.mxu1 %v10278_v17  ;;  %v13020_v17 = vld [vmem:[#allocation36_spill] sm:$0xff]  ;;  %v13052_v8 = vld [vmem:[#allocation118_spill] sm:$0xff]  ;;  %v13053_v37 = vld [vmem:[#allocation119_spill] sm:$0xff] }
 0x7e5   : > { %4008 = vmatmul.mubr.f32.gmra.mxu1 %v11045_v24  ;;  %4085 = vmatmul.mubr.f32.gmra.mxu0 %v11045_v24  ;;  %v13054_v53 = vld [vmem:[#allocation120_spill] sm:$0xff]  ;;  %v13055_v45 = vld [vmem:[#allocation121_spill] sm:$0xff]  ;;  %v13056_v51 = vld [vmem:[#allocation122_spill] sm:$0xff] }
 0x7e6   : > { %4096 = vmatpush1.msra.mxu1 %v10284_v43  ;;  %4155 = vmatprep.mubr.f32.mxu1 %v11011_v47  ;;  %v13021_v43 = vld [vmem:[#allocation79_spill] sm:$0xff]  ;;  %v13058_v30 = vld [vmem:[#allocation124_spill] sm:$0xff] }
 0x7e7   : > { %4097 = vmatprep.subr.mxu1 %v10289_v19  ;;  %4327 = vmatpush1.msra.mxu0 %v10293_v52  ;;  %v13022_v19 = vld [vmem:[#allocation31_spill] sm:$0xff]  ;;  %v13023_v52 = vld [vmem:[#allocation82_spill] sm:$0xff] }
 0x7e8   : > { %4098 = vmatpush1.msra.mxu1 %v10297_v13  ;;  %4328 = vmatprep.subr.mxu0 %v10301_v21  ;;  %v13024_v13 = vld [vmem:[#allocation40_spill] sm:$0xff]  ;;  %v13025_v21 = vld [vmem:[#allocation86_spill] sm:$0xff]  ;;  %v13057_v29 = vld [vmem:[#allocation123_spill] sm:$0xff] }
 0x7e9   : > { %4099 = vmatprep.subr.mxu1 %v10305_v33  ;;  %4329 = vmatpush1.msra.mxu0 %v10309_v57  ;;  %v13026_v33 = vld [vmem:[#allocation69_spill] sm:$0xff] }
 0x7ea   : > { %4100 = vmatpush1.msra.mxu1 %v10313_v56  ;;  %4330 = vmatprep.subr.mxu0 %v10317_v39  ;;  %v13027_v57 = vld [vmem:[#allocation37_spill] sm:$0xff]  ;;  %v13028_v56 = vld [vmem:[#allocation16_spill] sm:$0xff]  ;;  %v13029_v39 = vld [vmem:[#allocation43_spill] sm:$0xff] }
 0x7eb   : > { %4101 = vmatprep.subr.mxu1 %v10321_v41  ;;  %4331 = vmatpush1.msra.mxu0 %v10325_v0  ;;  %v13030_v41 = vld [vmem:[#allocation42_spill] sm:$0xff]  ;;  %v13031_v0 = vld [vmem:[#allocation60_spill] sm:$0xff] }
 0x7ec   : > { %4102 = vmatpush1.msra.mxu1 %v10329_v28  ;;  %4332 = vmatprep.subr.mxu0 %v10333_v1  ;;  %v13032_v28 = vld [vmem:[#allocation50_spill] sm:$0xff] }
 0x7ed   : > { %4103 = vmatprep.subr.mxu1 %v10337_v27  ;;  %4333 = vmatpush1.msra.mxu0 %v10341_v22  ;;  %v13033_v1 = vld [vmem:[#allocation66_spill] sm:$0xff]  ;;  %v13034_v27 = vld [vmem:[#allocation48_spill] sm:$0xff] }
 0x7ee   : > { %4104 = vmatpush1.msra.mxu1 %v10345_v16  ;;  %4334 = vmatprep.subr.mxu0 %v13014_v34  ;;  %v13035_v22 = vld [vmem:[#allocation74_spill] sm:$0xff]  ;;  %v13059_v34 = vld [vmem:[#allocation125_spill] sm:$0xff] }
 0x7ef   : > { %4105 = vmatprep.subr.mxu1 %v13015_v55  ;;  %4335 = vmatpush1.msra.mxu0 %v13016_v12  ;;  %v13036_v16 = vld [vmem:[#allocation58_spill] sm:$0xff]  ;;  %v13061_v12 = vld [vmem:[#allocation127_spill] sm:$0xff] }
 0x7f0   : > { %4106 = vmatpush1.msra.mxu1 %v13017_v2  ;;  %4336 = vmatprep.subr.mxu0 %v13018_v15  ;;  %v13060_v55 = vld [vmem:[#allocation126_spill] sm:$0xff]  ;;  %v13062_v2 = vld [vmem:[#allocation128_spill] sm:$0xff]  ;;  %v13063_v15 = vld [vmem:[#allocation129_spill] sm:$0xff] }
 0x7f1   : > { %4107 = vmatprep.subr.mxu1 %v13019_v58  ;;  %4337 = vmatpush1.msra.mxu0 %v13020_v17  ;;  %v13064_v58 = vld [vmem:[#allocation130_spill] sm:$0xff]  ;;  %v13065_v17 = vld [vmem:[#allocation131_spill] sm:$0xff] }
 0x7f2   : > { %4108 = vmatpush1.msra.mxu1 %v13021_v43  ;;  %4338 = vmatprep.subr.mxu0 %v13022_v19  ;;  %v13066_v43 = vld [vmem:[#allocation132_spill] sm:$0xff]  ;;  %v13067_v19 = vld [vmem:[#allocation133_spill] sm:$0xff] }
 0x7f3   : > { %4109 = vmatprep.subr.mxu1 %v13023_v52  ;;  %4339 = vmatpush1.msra.mxu0 %v13024_v13  ;;  %v13068_v52 = vld [vmem:[#allocation134_spill] sm:$0xff]  ;;  %v13069_v13 = vld [vmem:[#allocation135_spill] sm:$0xff] }
 0x7f4   : > { %4110 = vmatpush1.msra.mxu1 %v13025_v21  ;;  %4340 = vmatprep.subr.mxu0 %v13026_v33  ;;  %v13070_v21 = vld [vmem:[#allocation136_spill] sm:$0xff]  ;;  %v13071_v33 = vld [vmem:[#allocation137_spill] sm:$0xff] }
 0x7f5   : > { %4111 = vmatprep.subr.mxu1 %v13027_v57  ;;  %4341 = vmatpush1.msra.mxu0 %v13028_v56  ;;  %v13072_v57 = vld [vmem:[#allocation138_spill] sm:$0xff]  ;;  %v13073_v56 = vld [vmem:[#allocation139_spill] sm:$0xff] }
 0x7f6   : > { %4112 = vmatpush1.msra.mxu1 %v13029_v39  ;;  %4342 = vmatprep.subr.mxu0 %v13030_v41  ;;  %v13074_v39 = vld [vmem:[#allocation140_spill] sm:$0xff]  ;;  %v13075_v41 = vld [vmem:[#allocation141_spill] sm:$0xff] }
 0x7f7   : > { %4113 = vmatprep.subr.mxu1 %v13031_v0  ;;  %4343 = vmatpush1.msra.mxu0 %v13032_v28  ;;  %v13076_v0 = vld [vmem:[#allocation142_spill] sm:$0xff]  ;;  %v13077_v28 = vld [vmem:[#allocation143_spill] sm:$0xff] }
 0x7f8   : > { %4114 = vmatpush1.msra.mxu1 %v13033_v1  ;;  %4344 = vmatprep.subr.mxu0 %v13034_v27  ;;  %v13078_v1 = vld [vmem:[#allocation144_spill] sm:$0xff]  ;;  %v13079_v27 = vld [vmem:[#allocation145_spill] sm:$0xff] }
 0x7f9   : > { %4115 = vmatprep.subr.mxu1 %v13035_v22  ;;  %4345 = vmatpush1.msra.mxu0 %v13036_v16  ;;  %v13080_v22 = vld [vmem:[#allocation146_spill] sm:$0xff]  ;;  %v13081_v16 = vld [vmem:[#allocation147_spill] sm:$0xff] }
 0x7fa   : > { %4116 = vmatpush1.msra.mxu1 %v13037_v59  ;;  %4346 = vmatprep.subr.mxu0 %v13038_v3  ;;  %v13082_v59 = vld [vmem:[#allocation148_spill] sm:$0xff]  ;;  %v13083_v3 = vld [vmem:[#allocation149_spill] sm:$0xff] }
 0x7fb   : > { %4117 = vmatprep.subr.mxu1 %v13039_v61  ;;  %4347 = vmatpush1.msra.mxu0 %v13040_v23  ;;  %v13084_v61 = vld [vmem:[#allocation150_spill] sm:$0xff]  ;;  %v13085_v23 = vld [vmem:[#allocation151_spill] sm:$0xff] }
 0x7fc   : > { %4118 = vmatpush1.msra.mxu1 %v13041_v25  ;;  %4348 = vmatprep.subr.mxu0 %v13042_v20  ;;  %v13086_v25 = vld [vmem:[#allocation152_spill] sm:$0xff]  ;;  %v13087_v20 = vld [vmem:[#allocation153_spill] sm:$0xff] }
 0x7fd   : > { %4119 = vmatprep.subr.mxu1 %v13043_v35  ;;  %4349 = vmatpush1.msra.mxu0 %v13044_v42  ;;  %v13088_v35 = vld [vmem:[#allocation154_spill] sm:$0xff]  ;;  %v13089_v42 = vld [vmem:[#allocation155_spill] sm:$0xff] }
 0x7fe   : > { %4120 = vmatpush1.msra.mxu1 %v13045_v31  ;;  %4350 = vmatprep.subr.mxu0 %v13046_v5  ;;  %v13090_v31 = vld [vmem:[#allocation156_spill] sm:$0xff]  ;;  %v13091_v5 = vld [vmem:[#allocation157_spill] sm:$0xff] }
 0x7ff   : > { %4121 = vmatprep.subr.mxu1 %v13047_v10  ;;  %4351 = vmatpush1.msra.mxu0 %v13048_v32  ;;  %v13092_v10 = vld [vmem:[#allocation158_spill] sm:$0xff]  ;;  %v13093_v32 = vld [vmem:[#allocation159_spill] sm:$0xff] }
 0x800   : > { %4122 = vmatpush1.msra.mxu1 %v13049_v63  ;;  %4352 = vmatprep.subr.mxu0 %v13050_v60  ;;  %v13094_v63 = vld [vmem:[#allocation160_spill] sm:$0xff]  ;;  %v13095_v60 = vld [vmem:[#allocation161_spill] sm:$0xff] }
 0x801   : > { %4123 = vmatprep.subr.mxu1 %v13051_v50  ;;  %4353 = vmatpush1.msra.mxu0 %v13052_v8  ;;  %v13096_v50 = vld [vmem:[#allocation162_spill] sm:$0xff]  ;;  %v13097_v8 = vld [vmem:[#allocation163_spill] sm:$0xff] }
 0x802   : > { %4124 = vmatpush2.msra.mxu1 %v13053_v37  ;;  %4354 = vmatprep.subr.mxu0 %v13054_v53  ;;  %v13098_v37 = vld [vmem:[#allocation164_spill] sm:$0xff]  ;;  %v13099_v53 = vld [vmem:[#allocation165_spill] sm:$0xff] }
 0x803   : > { %4125 = vmatprep.subr.mxu1 %v13055_v45  ;;  %4355 = vmatpush1.msra.mxu0 %v13056_v51  ;;  %v13100_v45 = vld [vmem:[#allocation166_spill] sm:$0xff]  ;;  %v13101_v51 = vld [vmem:[#allocation167_spill] sm:$0xff] }
 0x804   : > { %4126 = vmatpush2.msra.mxu1 %v13057_v29  ;;  %4356 = vmatprep.subr.mxu0 %v13058_v30  ;;  %v13102_v29 = vld [vmem:[#allocation168_spill] sm:$0xff]  ;;  %v13103_v30 = vld [vmem:[#allocation169_spill] sm:$0xff] }
 0x805   : > { %4127 = vmatprep.subr.mxu1 %v13059_v34  ;;  %4357 = vmatpush2.msra.mxu0 %v13060_v55  ;;  %v13104_v34 = vld [vmem:[#allocation170_spill] sm:$0xff]  ;;  %v13105_v55 = vld [vmem:[#allocation171_spill] sm:$0xff] }
 0x806   : > { %4128 = vmatpush2.msra.mxu1 %v13061_v12  ;;  %4358 = vmatprep.subr.mxu0 %v13062_v2  ;;  %v13106_v12 = vld [vmem:[#allocation172_spill] sm:$0xff]  ;;  %v13107_v2 = vld [vmem:[#allocation173_spill] sm:$0xff] }
 0x807   : > { %4129 = vmatprep.subr.mxu1 %v13063_v15  ;;  %4359 = vmatpush2.msra.mxu0 %v13064_v58  ;;  %v13108_v15 = vld [vmem:[#allocation174_spill] sm:$0xff]  ;;  %v13109_v58 = vld [vmem:[#allocation175_spill] sm:$0xff] }
 0x808   : > { %4130 = vmatpush2.msra.mxu1 %v13065_v17  ;;  %4360 = vmatprep.subr.mxu0 %v13066_v43  ;;  %v13110_v17 = vld [vmem:[#allocation176_spill] sm:$0xff]  ;;  %v13111_v43 = vld [vmem:[#allocation177_spill] sm:$0xff] }
 0x809   : > { %4131 = vmatprep.subr.mxu1 %v13067_v19  ;;  %4361 = vmatpush2.msra.mxu0 %v13068_v52  ;;  %v13112_v19 = vld [vmem:[#allocation178_spill] sm:$0xff]  ;;  %v13113_v52 = vld [vmem:[#allocation179_spill] sm:$0xff] }
 0x80a   : > { %4132 = vmatpush2.msra.mxu1 %v13069_v13  ;;  %4362 = vmatprep.subr.mxu0 %v13070_v21  ;;  %v13114_v13 = vld [vmem:[#allocation180_spill] sm:$0xff]  ;;  %v13115_v21 = vld [vmem:[#allocation181_spill] sm:$0xff] }
 0x80b   : > { %4133 = vmatprep.subr.mxu1 %v13071_v33  ;;  %4363 = vmatpush2.msra.mxu0 %v13072_v57  ;;  %v13116_v33 = vld [vmem:[#allocation182_spill] sm:$0xff]  ;;  %v13117_v57 = vld [vmem:[#allocation183_spill] sm:$0xff] }
 0x80c   : > { %4134 = vmatpush2.msra.mxu1 %v13073_v56  ;;  %4364 = vmatprep.subr.mxu0 %v13074_v39  ;;  %v13118_v56 = vld [vmem:[#allocation184_spill] sm:$0xff]  ;;  %v13119_v39 = vld [vmem:[#allocation185_spill] sm:$0xff] }
 0x80d   : > { %4135 = vmatprep.subr.mxu1 %v13075_v41  ;;  %4365 = vmatpush2.msra.mxu0 %v13076_v0  ;;  %v13120_v41 = vld [vmem:[#allocation186_spill] sm:$0xff] }
 0x80e   : > { %4136 = vmatpush2.msra.mxu1 %v13077_v28  ;;  %4366 = vmatprep.subr.mxu0 %v13078_v1  ;;  %v6098_v0 = vld [vmem:[%s6568_s29 + $0x228] sm:$0xff]  ;;  %v6099_v28 = vld [vmem:[%s6568_s29 + $0x220] sm:$0xff] }
 0x80f   : > { %4137 = vmatprep.subr.mxu1 %v13079_v27  ;;  %4367 = vmatpush2.msra.mxu0 %v13080_v22  ;;  %v6106_v1 = vld [vmem:[%s6568_s29 + $0x168] sm:$0xff]  ;;  %v6107_v27 = vld [vmem:[%s6568_s29 + $0x160] sm:$0xff]  ;;  %v6108_v22 = vld [vmem:[%s6568_s29 + $0x138] sm:$0xff] }
 0x810   : > { %4138 = vmatpush2.msra.mxu1 %v13081_v16  ;;  %4368 = vmatprep.subr.mxu0 %v13082_v59  ;;  %v6109_v16 = vld [vmem:[%s6568_s29 + $0x130] sm:$0xff]  ;;  %v6110_v59 = vld [vmem:[%s6568_s29 + $0x108] sm:$0xff] }
 0x811   : > { %4139 = vmatprep.subr.mxu1 %v13083_v3  ;;  %4369 = vmatpush2.msra.mxu0 %v13084_v61  ;;  %v6111_v3 = vld [vmem:[%s6568_s29 + $0x100] sm:$0xff]  ;;  %v6112_v61 = vld [vmem:[%s6568_s29 + $0xd8] sm:$0xff] }
 0x812   : > { %4140 = vmatpush2.msra.mxu1 %v13085_v23  ;;  %4370 = vmatprep.subr.mxu0 %v13086_v25  ;;  %v6113_v23 = vld [vmem:[%s6568_s29 + $0xd0] sm:$0xff]  ;;  %v6114_v25 = vld [vmem:[%s6568_s29 + $0xa8] sm:$0xff] }
 0x813   : > { %4141 = vmatprep.subr.mxu1 %v13087_v20  ;;  %4371 = vmatpush2.msra.mxu0 %v13088_v35  ;;  %v6115_v20 = vld [vmem:[%s6568_s29 + $0xa0] sm:$0xff]  ;;  %v6116_v35 = vld [vmem:[%s6568_s29 + $0x78] sm:$0xff] }
 0x814   : > { %4142 = vmatpush2.msra.mxu1 %v13089_v42  ;;  %4372 = vmatprep.subr.mxu0 %v13090_v31  ;;  %v6117_v42 = vld [vmem:[%s6568_s29 + $0x70] sm:$0xff]  ;;  %v6118_v31 = vld [vmem:[%s6568_s29 + $0x48] sm:$0xff] }
 0x815   : > { %4143 = vmatprep.subr.mxu1 %v13091_v5  ;;  %4373 = vmatpush2.msra.mxu0 %v13092_v10  ;;  %v13121_v5 = vld [vmem:[#allocation187_spill] sm:$0xff]  ;;  %v13122_v10 = vld [vmem:[#allocation188_spill] sm:$0xff] }
 0x816   : > { %4144 = vmatpush2.msra.mxu1 %v13093_v32  ;;  %4374 = vmatprep.subr.mxu0 %v13094_v63  ;;  %v13123_v32 = vld [vmem:[#allocation189_spill] sm:$0xff]  ;;  %v13124_v63 = vld [vmem:[#allocation190_spill] sm:$0xff] }
 0x817   : > { %4145 = vmatprep.subr.mxu1 %v13095_v60  ;;  %4375 = vmatpush2.msra.mxu0 %v13096_v50  ;;  %v13125_v60 = vld [vmem:[#allocation191_spill] sm:$0xff]  ;;  %v13126_v50 = vld [vmem:[#allocation192_spill] sm:$0xff] }
 0x818   : > { %4146 = vmatpush2.msra.mxu1 %v13097_v8  ;;  %4376 = vmatprep.subr.mxu0 %v13098_v37  ;;  %v13127_v8 = vld [vmem:[#allocation193_spill] sm:$0xff]  ;;  %v13128_v37 = vld [vmem:[#allocation194_spill] sm:$0xff] }
 0x819   : > { %4147 = vmatprep.subr.mxu1 %v13099_v53  ;;  %4377 = vmatpush2.msra.mxu0 %v13100_v45  ;;  %v13129_v53 = vld [vmem:[#allocation195_spill] sm:$0xff]  ;;  %v13130_v45 = vld [vmem:[#allocation196_spill] sm:$0xff] }
 0x81a   : > { %4148 = vmatpush2.msra.mxu1 %v13101_v51  ;;  %4378 = vmatprep.subr.mxu0 %v13102_v29  ;;  %v13132_v51 = vld [vmem:[#allocation198_spill] sm:$0xff]  ;;  %v13133_v29 = vld [vmem:[#allocation199_spill] sm:$0xff] }
 0x81b   : > { %4149 = vmatprep.subr.mxu1 %v13103_v30  ;;  %4379 = vmatpush2.msra.mxu0 %v13104_v34  ;;  %v13134_v30 = vld [vmem:[#allocation200_spill] sm:$0xff]  ;;  %v13135_v34 = vld [vmem:[#allocation201_spill] sm:$0xff] }
 0x81c   : > { %4150 = vmatpush2.msra.mxu1 %v13105_v55  ;;  %4380 = vmatprep.subr.mxu0 %v13106_v12  ;;  %v13136_v55 = vld [vmem:[#allocation202_spill] sm:$0xff]  ;;  %v13137_v12 = vld [vmem:[#allocation203_spill] sm:$0xff] }
 0x81d   : > { %4151 = vmatprep.subr.mxu1 %v13107_v2  ;;  %4381 = vmatpush2.msra.mxu0 %v13108_v15  ;;  %v13138_v2 = vld [vmem:[#allocation204_spill] sm:$0xff]  ;;  %v13139_v15 = vld [vmem:[#allocation205_spill] sm:$0xff] }
 0x81e   : > { %4152 = vmatpush2.msra.mxu1 %v13109_v58  ;;  %4382 = vmatprep.subr.mxu0 %v13110_v17  ;;  %v13140_v58 = vld [vmem:[#allocation206_spill] sm:$0xff]  ;;  %v13141_v17 = vld [vmem:[#allocation207_spill] sm:$0xff] }
 0x81f   : > { %4153 = vmatprep.subr.mxu1 %v13111_v43  ;;  %4383 = vmatpush2.msra.mxu0 %v13112_v19  ;;  %v13142_v43 = vld [vmem:[#allocation208_spill] sm:$0xff]  ;;  %v13143_v19 = vld [vmem:[#allocation209_spill] sm:$0xff] }
 0x820   : > { %4154 = vmatpush2.msra.mxu1 %v13113_v52  ;;  %4384 = vmatprep.subr.mxu0 %v13114_v13  ;;  %v13144_v52 = vld [vmem:[#allocation210_spill] sm:$0xff]  ;;  %v13145_v13 = vld [vmem:[#allocation211_spill] sm:$0xff] }
 0x821   : > { %4156 = vmatmul.mubr.f32.vlgmr.msra.gmra.mxu1 %v11015_v62  ;;  %4401 = vmatprep.subr.mxu1 %v13115_v21  ;;  %v13146_v21 = vld [vmem:[#allocation212_spill] sm:$0xff] }
 0x822   : > { %4161 = vmatprep.mubr.f32.mxu1 %v11031_v14  ;;  %4402 = vmatpush1.msra.mxu1 %v13116_v33  ;;  %v13147_v33 = vld [vmem:[#allocation213_spill] sm:$0xff] }
 0x823   : > { %4403 = vmatprep.subr.mxu1 %v13117_v57  ;;  %4385 = vmatpush2.msra.mxu0 %v13118_v56  ;;  %v13148_v57 = vld [vmem:[#allocation214_spill] sm:$0xff]  ;;  %v13149_v56 = vld [vmem:[#allocation215_spill] sm:$0xff] }
 0x824   : > { %4404 = vmatpush1.msra.mxu1 %v13119_v39  ;;  %4386 = vmatprep.subr.mxu0 %v13120_v41  ;;  %v13150_v39 = vld [vmem:[#allocation216_spill] sm:$0xff]  ;;  %v13151_v41 = vld [vmem:[#allocation217_spill] sm:$0xff] }
 0x825   : > { %4162 = vmatmul.mubr.f32.gmra.mxu1 %v11045_v24  ;;  %4405 = vmatprep.subr.mxu1 %v10780_v26  ;;  %v6100_v26 = vld [vmem:[%s6568_s29 + $0x1f8] sm:$0xff] }
 0x826   : > { %4406 = vmatpush1.msra.mxu1 %v10784_v6  ;;  %4387 = vmatpush2.msra.mxu0 %v10788_v46  ;;  %v6101_v6 = vld [vmem:[%s6568_s29 + $0x1f0] sm:$0xff]  ;;  %v6102_v46 = vld [vmem:[%s6568_s29 + $0x1c8] sm:$0xff] }
 0x827   : > { %4407 = vmatprep.subr.mxu1 %v10792_v40  ;;  %4478 = vmatprep.subr.mxu0 %v10796_v7  ;;  %v6103_v40 = vld [vmem:[%s6568_s29 + $0x1c0] sm:$0xff]  ;;  %v6104_v7 = vld [vmem:[%s6568_s29 + $0x198] sm:$0xff] }
 0x828   : > { %4408 = vmatpush1.msra.mxu1 %v10800_v11  ;;  %v6105_v11 = vld [vmem:[%s6568_s29 + $0x190] sm:$0xff] }
 0x829   : > { %4409 = vmatprep.subr.mxu1 %v6098_v0  ;;  %v13152_v0 = vld [vmem:[#allocation218_spill] sm:$0xff] }
 0x82a   : > { %4410 = vmatpush1.msra.mxu1 %v6099_v28  ;;  %v13153_v28 = vld [vmem:[#allocation219_spill] sm:$0xff] }
 0x82b   : > { %4411 = vmatprep.subr.mxu1 %v6100_v26  ;;  %v13154_v26 = vld [vmem:[#allocation220_spill] sm:$0xff] }
 0x82c   : > { %4412 = vmatpush1.msra.mxu1 %v6101_v6 }
 0x82d   : > { %4413 = vmatprep.subr.mxu1 %v6102_v46 }
 0x82e   : > { %4414 = vmatpush1.msra.mxu1 %v6103_v40 }
 0x82f   : > { %4415 = vmatprep.subr.mxu1 %v6104_v7 }
 0x830   : > { %4416 = vmatpush1.msra.mxu1 %v6105_v11 }
 0x831   : > { %4417 = vmatprep.subr.mxu1 %v6106_v1 }
 0x832   : > { %4418 = vmatpush1.msra.mxu1 %v6107_v27  ;;  %v13155_v27 = vld [vmem:[#allocation59_spill] sm:$0xff] }
 0x833   : > { %4419 = vmatprep.subr.mxu1 %v6108_v22 }
 0x834   : > { %4420 = vmatpush1.msra.mxu1 %v6109_v16 }
 0x835   : > { %4421 = vmatprep.subr.mxu1 %v6110_v59 }
 0x836   : > { %4422 = vmatpush1.msra.mxu1 %v6111_v3  ;;  %v13156_v3 = vld [vmem:[#allocation47_spill] sm:$0xff] }
 0x837   : > { %4423 = vmatprep.subr.mxu1 %v6112_v61 }
 0x838   : > { %4424 = vmatpush1.msra.mxu1 %v6113_v23 }
 0x839   : > { %4425 = vmatprep.subr.mxu1 %v6114_v25 }
 0x83a   : > { %4426 = vmatpush1.msra.mxu1 %v6115_v20 }
 0x83b   : > { %4427 = vmatprep.subr.mxu1 %v6116_v35  ;;  %v13157_v35 = vld [vmem:[#allocation65_spill] sm:$0xff] }
 0x83c   : > { %4428 = vmatpush1.msra.mxu1 %v6117_v42 }
 0x83d   : > { %4429 = vmatprep.subr.mxu1 %v6118_v31 }
 0x83e   : > { %4430 = vmatpush1.msra.mxu1 %v10825_v54  ;;  %v13131_v54 = vld [vmem:[#allocation197_spill] sm:$0xff] }
 0x83f   : > { %4431 = vmatprep.subr.mxu1 %v13121_v5  ;;  %v13158_v5 = vld [vmem:[#allocation53_spill] sm:$0xff] }
 0x840   : > { %4432 = vmatpush1.msra.mxu1 %v13122_v10 }
 0x841   : > { %4433 = vmatprep.subr.mxu1 %v13123_v32 }
 0x842   : > { %4434 = vmatpush2.msra.mxu1 %v13124_v63 }
 0x843   : > { %4435 = vmatprep.subr.mxu1 %v13125_v60  ;;  %v13159_v60 = vld [vmem:[#allocation96_spill] sm:$0xff] }
 0x844   : > { %4436 = vmatpush2.msra.mxu1 %v13126_v50 }
 0x845   : > { %4437 = vmatprep.subr.mxu1 %v13127_v8 }
 0x846   : > { %4438 = vmatpush2.msra.mxu1 %v13128_v37  ;;  %v13160_v37 = vld [vmem:[#allocation81_spill] sm:$0xff] }
 0x847   : > { %4439 = vmatprep.subr.mxu1 %v13129_v53  ;;  %v886_v53 = vadd.f32 %v13160_v37, %v7863_v44 }
 0x848   : > { %4440 = vmatpush2.msra.mxu1 %v13130_v45 }
 0x849   : > { %4441 = vmatprep.subr.mxu1 %v13131_v54 }
 0x84a   : > { %4442 = vmatpush2.msra.mxu1 %v13132_v51 }
 0x84b   : > { %4443 = vmatprep.subr.mxu1 %v13133_v29  ;;  %v13161_v29 = vld [vmem:[#allocation24_spill] sm:$0xff] }
 0x84c   : > { %4444 = vmatpush2.msra.mxu1 %v13134_v30  ;;  %v828_v30 = vadd.f32 %v13161_v29, %v7869_v36 }
 0x84d   : > { %4445 = vmatprep.subr.mxu1 %v13135_v34 }
 0x84e   : > { %4446 = vmatpush2.msra.mxu1 %v13136_v55  ;;  %v13162_v55 = vld [vmem:[#allocation85_spill] sm:$0xff] }
 0x84f   : > { %4447 = vmatprep.subr.mxu1 %v13137_v12  ;;  %v892_v12 = vadd.f32 %v13162_v55, %v7863_v44 }
 0x850   : > { %4448 = vmatpush2.msra.mxu1 %v13138_v2 }
 0x851   : > { %4449 = vmatprep.subr.mxu1 %v13139_v15 }
 0x852   : > { %4450 = vmatpush2.msra.mxu1 %v13140_v58  ;;  %v13163_v58 = vld [vmem:[#allocation28_spill] sm:$0xff] }
 0x853   : > { %4451 = vmatprep.subr.mxu1 %v13141_v17  ;;  %v834_v17 = vadd.f32 %v13163_v58, %v7869_v36 }
 0x854   : > { %4452 = vmatpush2.msra.mxu1 %v13142_v43 }
 0x855   : > { %4453 = vmatprep.subr.mxu1 %v13143_v19 }
 0x856   : > { %4454 = vmatpush2.msra.mxu1 %v13144_v52 }
 0x857   : > { %4455 = vmatprep.subr.mxu1 %v13145_v13 }
 0x858   : > { %4456 = vmatpush2.msra.mxu1 %v13146_v21 }
 0x859   : > { %4457 = vmatprep.subr.mxu1 %v13147_v33 }
 0x85a   : > { %4458 = vmatpush2.msra.mxu1 %v13148_v57 }
 0x85b   : > { %4459 = vmatprep.subr.mxu1 %v13149_v56 }
 0x85c   : > { %4460 = vmatpush2.msra.mxu1 %v13150_v39 }
 0x85d   : > { %4461 = vmatprep.subr.mxu1 %v13151_v41 }
 0x85e   : > { %4462 = vmatpush2.msra.mxu1 %v13152_v0 }
 0x85f   : > { %4463 = vmatprep.subr.mxu1 %v13153_v28 }
 0x860   : > { %4464 = vmatpush2.msra.mxu1 %v13154_v26 }
 0x8a0   : > { %v4003_v6 = vpop.f32.mrf.mxu1  ;;  %v4080_v16 = vpop.f32.mrf.mxu0 }
 0x8a1   : > { %v4004_v7 = vadd.f32 %v4003_v6, %v7836_v49  ;;  %v4081_v50 = vadd.f32 %v4080_v16, %v13159_v60 }
 0x8a2   : > { %v4005_v46 = vpop.f32.mrf.mxu1  ;;  %v4082_v20 = vpop.f32.mrf.mxu0 }
 0x8a3   : > { %v4006_v11 = vadd.f32 %v4005_v46, %v7841_v48  ;;  %v4168_v22 = vadd.f32 %v4004_v7, %v13155_v27  ;;  %v4083_v45 = vadd.f32 %v4082_v20, %v7866_v18  ;;  %v4170_v34 = vadd.f32 %v4081_v50, %v886_v53 }
 0x8a5   : > { %v4009_v40 = vpop.f32.mrf.mxu1  ;;  %v4169_v61 = vadd.f32 %v4006_v11, %v13156_v3  ;;  %v5041_v25 = vmul.f32 -1.442695, %v4168_v22  ;;  %v4086_v63 = vpop.f32.mrf.mxu0  ;;  %v4171_v15 = vadd.f32 %v4083_v45, %v828_v30  ;;  %v5043_v19 = vmul.f32 -1.442695, %v4170_v34  ;;  %v13167_v45 = vld [vmem:[#allocation91_spill] sm:$0xff] }
 0x8a6   : > { %v4010_v59 = vadd.f32 %v4009_v40, %v7836_v49  ;;  %v4087_v51 = vadd.f32 %v4086_v63, %v13159_v60 }
 0x8a7   : > { %v4011_v1 = vpop.f32.mrf.mxu1  ;;  %v5042_v31 = vmul.f32 -1.442695, %v4169_v61  ;;  %5434 = vpow2.f32 %v5041_v25  ;;  %v4088_v54 = vpop.f32.mrf.mxu0  ;;  %v5044_v13 = vmul.f32 -1.442695, %v4171_v15 }
 0x8a8   : > { %v4012_v23 = vadd.f32 %v4011_v1, %v7841_v48  ;;  %v4172_v42 = vadd.f32 %v4010_v59, %v13157_v35  ;;  %v4089_v2 = vadd.f32 %v4088_v54, %v7866_v18  ;;  %v4174_v43 = vadd.f32 %v4087_v51, %v892_v12  ;;  %v13168_v12 = vld [vmem:[#allocation29_spill] sm:$0xff] }
 0x8a9   : > { %5436 = vpow2.f32 %v5042_v31  ;;  %v13165_v31 = vld [vmem:[#allocation99_spill] sm:$0xff]  ;;  %v1053_v54 = vadd.f32 %v13167_v45, %v12844_v38 }
 0x8aa   : > { %v4173_v10 = vadd.f32 %v4012_v23, %v13158_v5  ;;  %v5045_v32 = vmul.f32 -1.442695, %v4172_v42  ;;  %v4175_v52 = vadd.f32 %v4089_v2, %v834_v17  ;;  %v5047_v33 = vmul.f32 -1.442695, %v4174_v43  ;;  %v13164_v23 = vld [vmem:[#allocation88_spill] sm:$0xff]  ;;  %v13166_v5 = vld [vmem:[#allocation25_spill] sm:$0xff] }
 0x8ab   : > { %v1047_v25 = vadd.f32 %v13164_v23, %v12844_v38  ;;  %v995_v2 = vadd.f32 %v13168_v12, %v13165_v31  ;;  %v6119_v12 = vld [vmem:[%s6568_s29 + $0x2f0] sm:$0xff] }
 0x8ac   : > { %v5046_v8 = vmul.f32 -1.442695, %v4173_v10  ;;  %5438 = vpow2.f32 %v5045_v32  ;;  %v5048_v56 = vmul.f32 -1.442695, %v4175_v52  ;;  %v989_v10 = vadd.f32 %v13166_v5, %v13165_v31  ;;  %v5053_v5 = vld [vmem:[%s6594_s9 + $0x10] sm:$0xff] }
 0x8ae   : > { %5440 = vpow2.f32 %v5046_v8 }
 0x8af   : > { %5442 = vpow2.f32 %v5043_v19 }
 0x8b0   : > { %5444 = vpow2.f32 %v5044_v13 }
 0x8b1   : > { %5446 = vpow2.f32 %v5047_v33 }
 0x8b2   : > { %5448 = vpow2.f32 %v5048_v56 }
 0x8b4   : > { %v5435_v21 = vpop.eup %5434 }
 0x8b5   : > { %v4200_v39 = vadd.f32 1.0, %v5435_v21 }
 0x8b6   : > { %v5437_v57 = vpop.eup %5436 }
 0x8b7   : > { %v4201_v0 = vadd.f32 1.0, %v5437_v57  ;;  %5450 = vrcp.f32 %v4200_v39 }
 0x8b9   : > { %v5439_v41 = vpop.eup %5438  ;;  %5452 = vrcp.f32 %v4201_v0 }
 0x8ba   : > { %v4204_v26 = vadd.f32 1.0, %v5439_v41 }
 0x8bb   : > { %v5441_v28 = vpop.eup %5440 }
 0x8bc   : > { %v4205_v6 = vadd.f32 1.0, %v5441_v28  ;;  %5454 = vrcp.f32 %v4204_v26  ;;  %v5443_v46 = vpop.eup %5442 }
 0x8bd   : > { %v5445_v40 = vpop.eup %5444  ;;  %v4202_v11 = vadd.f32 1.0, %v5443_v46 }
 0x8be   : > { %5456 = vrcp.f32 %v4205_v6  ;;  %v5447_v7 = vpop.eup %5446  ;;  %v4203_v22 = vadd.f32 1.0, %v5445_v40 }
 0x8bf   : > { %v5449_v27 = vpop.eup %5448  ;;  %v4206_v3 = vadd.f32 1.0, %v5447_v7  ;;  %5458 = vrcp.f32 %v4202_v11  ;;  %v13169_v7 = vld [vmem:[#allocation22_spill] sm:$0xff] }
 0x8c0   : > { %v4207_v32 = vadd.f32 1.0, %v5449_v27  ;;  %5460 = vrcp.f32 %v4203_v22 }
 0x8c1   : > { %5462 = vrcp.f32 %v4206_v3 }
 0x8c4   : > { %v5451_v59 = vpop.eup %5450 }
 0x8c6   : > { %v5453_v42 = vpop.eup %5452 }
 0x8c9   : > { %v5455_v53 = vpop.eup %5454 }
 0x8cb   : > { %v5457_v55 = vpop.eup %5456 }
 0x8cc   : > { %v5459_v43 = vpop.eup %5458 }
 0x8cd   : > { %v5461_v19 = vpop.eup %5460  ;;  %v4236_v13 = vsub.f32 1.0, %v5459_v43  ;;  %v4244_v39 = vmul.f32 %v5459_v43, %v11015_v62  ;;  %v6121_v43 = vld [vmem:[%s6568_s29 + $0x2c0] sm:$0xff] }
 0x8ce   : > { %v5463_v52 = vpop.eup %5462  ;;  %v4237_v57 = vsub.f32 1.0, %v5461_v19  ;;  %v4245_v28 = vmul.f32 %v5461_v19, %v11011_v47 }
 0x8cf   : > { %v4238_v6 = vsub.f32 1.0, %v5463_v52  ;;  %v4246_v23 = vmul.f32 %v5463_v52, %v11045_v24  ;;  %v6123_v52 = vld [vmem:[%s6568_s29 + $0x290] sm:$0xff] }
 0x8e1   : > { %v4157_v1 = vpop.f32.mrf.mxu1 }
 0x8e2   : > { %v4158_v16 = vadd.f32 %v4157_v1, %v7892_v9 }
 0x8e3   : > { %v4159_v61 = vpop.f32.mrf.mxu1 }
 0x8e4   : > { %v4224_v20 = vmul.f32 %v5451_v59, %v4158_v16  ;;  %v4160_v35 = vadd.f32 %v4159_v61, %v12846_v4  ;;  %v13170_v16 = vld [vmem:[#allocation83_spill] sm:$0xff]  ;;  %v5049_v61 = vld [vmem:[%s6594_s9 + $0x60] sm:$0xff] }
 0x8e5   : > { %v4163_v63 = vpop.f32.mrf.mxu1  ;;  %v13171_v59 = vsub.f32 1.0, %v13170_v16 }
 0x8e6   : > { %v4228_v50 = vadd.f32 %v4224_v20, %v1047_v25  ;;  %v4225_v8 = vmul.f32 %v5453_v42, %v4160_v35  ;;  %v4164_v37 = vadd.f32 %v4163_v63, %v7892_v9 }
 0x8e7   : > { %v4165_v51 = vpop.f32.mrf.mxu1  ;;  %v4265_v3 = vmul.f32 %v11011_v47, %v13171_v59  ;;  %v6143_v59 = vld [vmem:[%s6568_s29 + $0xb0] sm:$0xff] }
 0x8e8   : > { %5464 = vtanh.f32 %v4228_v50  ;;  %v4229_v29 = vadd.f32 %v4225_v8, %v989_v10  ;;  %v4226_v30 = vmul.f32 %v5455_v53, %v4164_v37  ;;  %v4166_v34 = vadd.f32 %v4165_v51, %v12846_v4  ;;  %v13173_v53 = vld [vmem:[#allocation26_spill] sm:$0xff] }
 0x8e9   : > { %5466 = vrcp.f32 %v4207_v32  ;;  %v13172_v10 = vsub.f32 1.0, %v13169_v7 }
 0x8ea   : > { %5468 = vtanh.f32 %v4229_v29  ;;  %v4230_v15 = vadd.f32 %v4226_v30, %v1053_v54  ;;  %v4227_v58 = vmul.f32 %v5457_v55, %v4166_v34  ;;  %v5050_v30 = vld [vmem:[%s6594_s9 + $0x68] sm:$0xff]  ;;  %v5054_v34 = vld [vmem:[%s6594_s9 + $0x18] sm:$0xff] }
 0x8eb   : > { %v4264_v32 = vmul.f32 %v11015_v62, %v13172_v10  ;;  %v13174_v62 = vld [vmem:[#allocation87_spill] sm:$0xff]  ;;  %v6152_v10 = vld [vmem:[%s6568_s29 + $0x5c8] sm:$0xff] }
 0x8ec   : > { %5470 = vtanh.f32 %v4230_v15  ;;  %v4231_v17 = vadd.f32 %v4227_v58, %v995_v2  ;;  %v13175_v51 = vsub.f32 1.0, %v13174_v62  ;;  %v13176_v58 = vsub.f32 1.0, %v13173_v53 }
 0x8ee   : > { %5472 = vtanh.f32 %v4231_v17  ;;  %v4267_v29 = vmul.f32 %v11031_v14, %v13175_v51  ;;  %v4266_v17 = vmul.f32 %v11045_v24, %v13176_v58  ;;  %v6122_v24 = vld [vmem:[%s6568_s29 + $0x298] sm:$0xff]  ;;  %v6161_v51 = vld [vmem:[%s6568_s29 + $0x500] sm:$0xff]  ;;  %v6168_v58 = vld [vmem:[%s6568_s29 + $0x448] sm:$0xff] }
 0x8f5   : > { %v5465_v21 = vpop.eup %5464 }
 0x8f6   : > { %v5467_v33 = vpop.eup %5466  ;;  %v4240_v56 = vmul.f32 %v5465_v21, %v4236_v13  ;;  %v6124_v13 = vld [vmem:[%s6568_s29 + $0x268] sm:$0xff]  ;;  %v6125_v21 = vld [vmem:[%s6568_s29 + $0x260] sm:$0xff] }
 0x8f7   : > { %v5469_v41 = vpop.eup %5468  ;;  %v4239_v1 = vsub.f32 1.0, %v5467_v33  ;;  %v4247_v42 = vmul.f32 %v5467_v33, %v11031_v14  ;;  %v6120_v14 = vld [vmem:[%s6568_s29 + $0x2c8] sm:$0xff]  ;;  %v6126_v33 = vld [vmem:[%s6568_s29 + $0x238] sm:$0xff] }
 0x8f8   : > { %v4241_v0 = vmul.f32 %v5469_v41, %v4237_v57  ;;  %v4248_v26 = vadd.f32 %v4244_v39, %v4240_v56  ;;  %v6127_v57 = vld [vmem:[%s6568_s29 + $0x230] sm:$0xff]  ;;  %v6128_v56 = vld [vmem:[%s6568_s29 + $0x208] sm:$0xff]  ;;  %v6129_v39 = vld [vmem:[%s6568_s29 + $0x200] sm:$0xff] }
 0x8f9   : > { %v5471_v46 = vpop.eup %5470  ;;  %v6130_v41 = vld [vmem:[%s6568_s29 + $0x1d8] sm:$0xff] }
 0x8fa   : > { %v4249_v40 = vadd.f32 %v4245_v28, %v4241_v0  ;;  %v4256_v11 = vmul.f32 %v13169_v7, %v4248_v26  ;;  %v4242_v27 = vmul.f32 %v5471_v46, %v4238_v6  ;;  %v6131_v0 = vld [vmem:[%s6568_s29 + $0x1d0] sm:$0xff]  ;;  %v6132_v28 = vld [vmem:[%s6568_s29 + $0x1a8] sm:$0xff]  ;;  %v6133_v26 = vld [vmem:[%s6568_s29 + $0x1a0] sm:$0xff] }
 0x8fb   : > { %v5473_v22 = vpop.eup %5472  ;;  %v6134_v6 = vld [vmem:[%s6568_s29 + $0x178] sm:$0xff]  ;;  %v6135_v46 = vld [vmem:[%s6568_s29 + $0x170] sm:$0xff]  ;;  %v6137_v7 = vld [vmem:[%s6568_s29 + $0x140] sm:$0xff] }
 0x8fc   : > { %v4257_v25 = vmul.f32 %v13170_v16, %v4249_v40  ;;  %v4276_v20 = vadd.f32 %v5049_v61, %v4256_v11  ;;  %v4243_v35 = vmul.f32 %v5473_v22, %v4239_v1  ;;  %v4250_v63 = vadd.f32 %v4246_v23, %v4242_v27  ;;  %v6136_v40 = vld [vmem:[%s6568_s29 + $0x148] sm:$0xff]  ;;  %v6139_v1 = vld [vmem:[%s6568_s29 + $0x110] sm:$0xff]  ;;  %v6141_v22 = vld [vmem:[%s6568_s29 + $0xe0] sm:$0xff] }
 0x8fd   : > { %v11290_v37 = vadd.f32 %v4264_v32, %v4256_v11  ;;  %v6138_v11 = vld [vmem:[%s6568_s29 + $0x118] sm:$0xff]  ;;  %v6140_v27 = vld [vmem:[%s6568_s29 + $0xe8] sm:$0xff]  ;;  %v6145_v61 = vld [vmem:[%s6568_s29 + $0x80] sm:$0xff] }
 0x8fe   : > { %v11286_v50 = vadd.f32 %v4265_v3, %v4257_v25  ;;  %v4284_v47 = vadd.f32 %v5053_v5, %v4257_v25  ;;  %5051 = vst.msk [vmem:[%s6594_s9 + $0x60] sm:$0xff] %vm537_vm0, %v4276_v20  ;;  %v4251_v8 = vadd.f32 %v4247_v42, %v4243_v35  ;;  %v4258_v45 = vmul.f32 %v13173_v53, %v4250_v63  ;;  %v6142_v16 = vld [vmem:[%s6568_s29 + $0xb8] sm:$0xff]  ;;  %v6144_v3 = vld [vmem:[%s6568_s29 + $0x88] sm:$0xff]  ;;  %v6147_v25 = vld [vmem:[%s6568_s29 + $0x50] sm:$0xff] }
 0x8ff   : > { %v6146_v23 = vld [vmem:[%s6568_s29 + $0x58] sm:$0xff]  ;;  %v6148_v20 = vld [vmem:[%s6568_s29 + $0x28] sm:$0xff]  ;;  %v6149_v35 = vld [vmem:[%s6568_s29 + $0x20] sm:$0xff] }
 0x900   : > { %5055 = vst.msk [vmem:[%s6594_s9 + $0x10] sm:$0xff] %vm537_vm0, %v4284_v47  ;;  %4388 = vmatprep.mubr.f32.mxu0 %v11286_v50  ;;  %4465 = vmatprep.mubr.f32.mxu1 %v11286_v50  ;;  %v4259_v54 = vmul.f32 %v13174_v62, %v4251_v8  ;;  %v4277_v55 = vadd.f32 %v5050_v30, %v4258_v45  ;;  %v6150_v42 = vld [vmem:[%s6568_s29 + $0x5f8] sm:$0xff]  ;;  %v6151_v5 = vld [vmem:[%s6568_s29 + $0x5f0] sm:$0xff]  ;;  %v6153_v32 = vld [vmem:[%s6568_s29 + $0x5c0] sm:$0xff] }
 0x901   : > { %4389 = vmatmul.mubr.f32.vlgmr.msra.gmra.mxu0 %v11290_v37  ;;  %4466 = vmatmul.mubr.f32.vlgmr.msra.gmra.mxu1 %v11290_v37  ;;  %v11318_v19 = vadd.f32 %v4266_v17, %v4258_v45  ;;  %v6154_v63 = vld [vmem:[%s6568_s29 + $0x598] sm:$0xff]  ;;  %v6155_v47 = vld [vmem:[%s6568_s29 + $0x590] sm:$0xff]  ;;  %v6156_v8 = vld [vmem:[%s6568_s29 + $0x568] sm:$0xff] }
 0x902   : > { %4479 = vmatpush1.msra.mxu0 %v6119_v12  ;;  %v11306_v2 = vadd.f32 %v4267_v29, %v4259_v54  ;;  %v4285_v15 = vadd.f32 %v5054_v34, %v4259_v54  ;;  %5052 = vst.msk [vmem:[%s6594_s9 + $0x68] sm:$0xff] %vm537_vm0, %v4277_v55  ;;  %v6157_v53 = vld [vmem:[%s6568_s29 + $0x560] sm:$0xff]  ;;  %v6158_v45 = vld [vmem:[%s6568_s29 + $0x538] sm:$0xff]  ;;  %v6159_v62 = vld [vmem:[%s6568_s29 + $0x530] sm:$0xff] }
 0x903   : > { %4480 = vmatprep.subr.mxu0 %v6120_v14  ;;  %v6160_v54 = vld [vmem:[%s6568_s29 + $0x508] sm:$0xff]  ;;  %v6162_v29 = vld [vmem:[%s6568_s29 + $0x4d8] sm:$0xff]  ;;  %v6163_v30 = vld [vmem:[%s6568_s29 + $0x4d0] sm:$0xff] }
 0x904   : > { %4481 = vmatpush1.msra.mxu0 %v6121_v43  ;;  %5056 = vst.msk [vmem:[%s6594_s9 + $0x18] sm:$0xff] %vm537_vm0, %v4285_v15  ;;  %4394 = vmatprep.mubr.f32.mxu0 %v11306_v2  ;;  %v6164_v34 = vld [vmem:[%s6568_s29 + $0x4a8] sm:$0xff]  ;;  %v6165_v55 = vld [vmem:[%s6568_s29 + $0x4a0] sm:$0xff]  ;;  %v6166_v12 = vld [vmem:[%s6568_s29 + $0x478] sm:$0xff] }
 0x905   : > { %4471 = vmatprep.mubr.f32.mxu1 %v11306_v2  ;;  %4482 = vmatprep.subr.mxu0 %v6122_v24  ;;  %v6167_v15 = vld [vmem:[%s6568_s29 + $0x470] sm:$0xff]  ;;  %v6169_v17 = vld [vmem:[%s6568_s29 + $0x440] sm:$0xff]  ;;  %v6170_v14 = vld [vmem:[%s6568_s29 + $0x418] sm:$0xff] }
 0x906   : > { %4395 = vmatmul.mubr.f32.gmra.mxu0 %v11318_v19  ;;  %4472 = vmatmul.mubr.f32.gmra.mxu1 %v11318_v19  ;;  %v6171_v43 = vld [vmem:[%s6568_s29 + $0x410] sm:$0xff]  ;;  %v6172_v24 = vld [vmem:[%s6568_s29 + $0x3e8] sm:$0xff] }
 0x907   : > { %4483 = vmatpush1.msra.mxu0 %v6123_v52  ;;  %4542 = vmatprep.mubr.f32.mxu0 %v11286_v50  ;;  %v6173_v52 = vld [vmem:[%s6568_s29 + $0x3e0] sm:$0xff] }
 0x908   : > { %4484 = vmatprep.subr.mxu0 %v6124_v13  ;;  %v6174_v13 = vld [vmem:[%s6568_s29 + $0x3b8] sm:$0xff] }
 0x909   : > { %4485 = vmatpush1.msra.mxu0 %v6125_v21  ;;  %v6175_v21 = vld [vmem:[%s6568_s29 + $0x3b0] sm:$0xff] }
 0x90a   : > { %4486 = vmatprep.subr.mxu0 %v6126_v33  ;;  %v6176_v33 = vld [vmem:[%s6568_s29 + $0x388] sm:$0xff] }
 0x90b   : > { %4487 = vmatpush1.msra.mxu0 %v6127_v57  ;;  %v6177_v57 = vld [vmem:[%s6568_s29 + $0x380] sm:$0xff] }
 0x90c   : > { %4488 = vmatprep.subr.mxu0 %v6128_v56  ;;  %v6178_v56 = vld [vmem:[%s6568_s29 + $0x358] sm:$0xff] }
 0x90d   : > { %4489 = vmatpush1.msra.mxu0 %v6129_v39  ;;  %v6179_v39 = vld [vmem:[%s6568_s29 + $0x350] sm:$0xff] }
 0x90e   : > { %4490 = vmatprep.subr.mxu0 %v6130_v41  ;;  %v6180_v41 = vld [vmem:[%s6568_s29 + $0x328] sm:$0xff] }
 0x90f   : > { %4491 = vmatpush1.msra.mxu0 %v6131_v0  ;;  %v6181_v0 = vld [vmem:[%s6568_s29 + $0x320] sm:$0xff] }
 0x910   : > { %4492 = vmatprep.subr.mxu0 %v6132_v28 }
 0x911   : > { %4493 = vmatpush1.msra.mxu0 %v6133_v26 }
 0x912   : > { %4494 = vmatprep.subr.mxu0 %v6134_v6 }
 0x913   : > { %4495 = vmatpush1.msra.mxu0 %v6135_v46 }
 0x914   : > { %4496 = vmatprep.subr.mxu0 %v6136_v40 }
 0x915   : > { %4497 = vmatpush1.msra.mxu0 %v6137_v7 }
 0x916   : > { %4498 = vmatprep.subr.mxu0 %v6138_v11  ;;  %v13177_v11 = vld [vmem:[#allocation70_spill] sm:$0xff] }
 0x917   : > { %4499 = vmatpush1.msra.mxu0 %v6139_v1 }
 0x918   : > { %4500 = vmatprep.subr.mxu0 %v6140_v27 }
 0x919   : > { %4501 = vmatpush1.msra.mxu0 %v6141_v22 }
 0x91a   : > { %4502 = vmatprep.subr.mxu0 %v6142_v16  ;;  %v13178_v16 = vld [vmem:[#allocation35_spill] sm:$0xff] }
 0x91b   : > { %4503 = vmatpush1.msra.mxu0 %v6143_v59 }
 0x91c   : > { %4504 = vmatprep.subr.mxu0 %v6144_v3 }
 0x91d   : > { %4505 = vmatpush1.msra.mxu0 %v6145_v61 }
 0x91e   : > { %4506 = vmatprep.subr.mxu0 %v6146_v23  ;;  %v13179_v23 = vld [vmem:[#allocation72_spill] sm:$0xff] }
 0x91f   : > { %4507 = vmatpush1.msra.mxu0 %v6147_v25 }
 0x920   : > { %4508 = vmatprep.subr.mxu0 %v6148_v20 }
 0x921   : > { %4509 = vmatpush1.msra.mxu0 %v6149_v35 }
 0x922   : > { %4510 = vmatprep.subr.mxu0 %v6150_v42  ;;  %v13180_v42 = vld [vmem:[#allocation41_spill] sm:$0xff] }
 0x923   : > { %4511 = vmatpush2.msra.mxu0 %v6151_v5 }
 0x924   : > { %4512 = vmatprep.subr.mxu0 %v6152_v10 }
 0x925   : > { %4513 = vmatpush2.msra.mxu0 %v6153_v32 }
 0x926   : > { %4514 = vmatprep.subr.mxu0 %v6154_v63 }
 0x927   : > { %4515 = vmatpush2.msra.mxu0 %v6155_v47 }
 0x928   : > { %4516 = vmatprep.subr.mxu0 %v6156_v8 }
 0x929   : > { %4517 = vmatpush2.msra.mxu0 %v6157_v53 }
 0x92a   : > { %4518 = vmatprep.subr.mxu0 %v6158_v45  ;;  %v13182_v45 = vld [vmem:[#allocation18_spill] sm:$0xff] }
 0x92b   : > { %4519 = vmatpush2.msra.mxu0 %v6159_v62  ;;  %v816_v62 = vadd.f32 %v13182_v45, %v7869_v36 }
 0x92c   : > { %4520 = vmatprep.subr.mxu0 %v6160_v54 }
 0x92d   : > { %4521 = vmatpush2.msra.mxu0 %v6161_v51 }
 0x92e   : > { %4522 = vmatprep.subr.mxu0 %v6162_v29  ;;  %v13183_v29 = vld [vmem:[#allocation92_spill] sm:$0xff] }
 0x92f   : > { %4523 = vmatpush2.msra.mxu0 %v6163_v30  ;;  %v904_v30 = vadd.f32 %v13183_v29, %v7863_v44 }
 0x930   : > { %4524 = vmatprep.subr.mxu0 %v6164_v34 }
 0x931   : > { %4525 = vmatpush2.msra.mxu0 %v6165_v55 }
 0x932   : > { %4526 = vmatprep.subr.mxu0 %v6166_v12 }
 0x933   : > { %4527 = vmatpush2.msra.mxu0 %v6167_v15 }
 0x934   : > { %4528 = vmatprep.subr.mxu0 %v6168_v58  ;;  %v13184_v58 = vld [vmem:[#allocation20_spill] sm:$0xff] }
 0x935   : > { %4529 = vmatpush2.msra.mxu0 %v6169_v17  ;;  %v822_v17 = vadd.f32 %v13184_v58, %v7869_v36 }
 0x936   : > { %4530 = vmatprep.subr.mxu0 %v6170_v14 }
 0x937   : > { %4531 = vmatpush2.msra.mxu0 %v6171_v43 }
 0x938   : > { %4532 = vmatprep.subr.mxu0 %v6172_v24 }
 0x939   : > { %4533 = vmatpush2.msra.mxu0 %v6173_v52 }
 0x93a   : > { %4534 = vmatprep.subr.mxu0 %v6174_v13 }
 0x93b   : > { %4535 = vmatpush2.msra.mxu0 %v6175_v21 }
 0x93c   : > { %4536 = vmatprep.subr.mxu0 %v6176_v33 }
 0x93d   : > { %4537 = vmatpush2.msra.mxu0 %v6177_v57 }
 0x93e   : > { %4538 = vmatprep.subr.mxu0 %v6178_v56 }
 0x93f   : > { %4539 = vmatpush2.msra.mxu0 %v6179_v39 }
 0x940   : > { %4540 = vmatprep.subr.mxu0 %v6180_v41 }
 0x941   : > { %4541 = vmatpush2.msra.mxu0 %v6181_v0 }
 0x942   : > { %4543 = vmatmul.mubr.f32.vlgmr.msra.gmra.mxu0 %v11290_v37 }
 0x943   : > { %4548 = vmatprep.mubr.f32.mxu0 %v11306_v2 }
 0x946   : > { %4549 = vmatmul.mubr.f32.gmra.mxu0 %v11318_v19 }
 0x9c1   : > { %v4390_v28 = vpop.f32.mrf.mxu0  ;;  %v4467_v22 = vpop.f32.mrf.mxu1 }
 0x9c2   : > { %v4391_v46 = vadd.f32 %v4390_v28, %v7836_v49  ;;  %v4468_v32 = vadd.f32 %v4467_v22, %v13159_v60 }
 0x9c3   : > { %v4392_v26 = vpop.f32.mrf.mxu0  ;;  %v4469_v35 = vpop.f32.mrf.mxu1 }
 0x9c4   : > { %v4393_v40 = vadd.f32 %v4392_v26, %v7841_v48  ;;  %v4555_v1 = vadd.f32 %v4391_v46, %v13177_v11  ;;  %v4470_v53 = vadd.f32 %v4469_v35, %v7866_v18 }
 0x9c6   : > { %v4396_v6 = vpop.f32.mrf.mxu0  ;;  %v4556_v59 = vadd.f32 %v4393_v40, %v13178_v16  ;;  %v5057_v61 = vmul.f32 -1.442695, %v4555_v1  ;;  %v4473_v63 = vpop.f32.mrf.mxu1  ;;  %v4558_v34 = vadd.f32 %v4470_v53, %v816_v62  ;;  %v13185_v1 = vld [vmem:[#allocation94_spill] sm:$0xff] }
 0x9c7   : > { %v4397_v27 = vadd.f32 %v4396_v6, %v7836_v49  ;;  %v13181_v49 = vld [vmem:[#allocation89_spill] sm:$0xff] }
 0x9c8   : > { %v4398_v7 = vpop.f32.mrf.mxu0  ;;  %v5058_v20 = vmul.f32 -1.442695, %v4556_v59  ;;  %5474 = vpow2.f32 %v5057_v61  ;;  %v898_v8 = vadd.f32 %v13181_v49, %v7863_v44  ;;  %v4475_v51 = vpop.f32.mrf.mxu1  ;;  %v5060_v14 = vmul.f32 -1.442695, %v4558_v34 }
 0x9c9   : > { %v4399_v3 = vadd.f32 %v4398_v7, %v7841_v48  ;;  %v4559_v25 = vadd.f32 %v4397_v27, %v13179_v23  ;;  %v4474_v48 = vadd.f32 %v4473_v63, %v13159_v60  ;;  %v4476_v12 = vadd.f32 %v4475_v51, %v7866_v18 }
 0x9ca   : > { %5476 = vpow2.f32 %v5058_v20  ;;  %v4557_v54 = vadd.f32 %v4468_v32, %v898_v8  ;;  %v1059_v27 = vadd.f32 %v13185_v1, %v12844_v38 }
 0x9cb   : > { %v4560_v5 = vadd.f32 %v4399_v3, %v13180_v42  ;;  %v5061_v10 = vmul.f32 -1.442695, %v4559_v25  ;;  %v4561_v55 = vadd.f32 %v4474_v48, %v904_v30  ;;  %v4562_v24 = vadd.f32 %v4476_v12, %v822_v17  ;;  %v13186_v3 = vld [vmem:[#allocation19_spill] sm:$0xff]  ;;  %v13188_v48 = vld [vmem:[#allocation21_spill] sm:$0xff] }
 0x9cc   : > { %v5059_v15 = vmul.f32 -1.442695, %v4557_v54  ;;  %v977_v61 = vadd.f32 %v13186_v3, %v13165_v31  ;;  %v983_v45 = vadd.f32 %v13188_v48, %v13165_v31 }
 0x9cd   : > { %v5062_v47 = vmul.f32 -1.442695, %v4560_v5  ;;  %5478 = vpow2.f32 %v5061_v10  ;;  %v5063_v60 = vmul.f32 -1.442695, %v4561_v55  ;;  %v5064_v33 = vmul.f32 -1.442695, %v4562_v24 }
 0x9ce   : > { %v13187_v5 = vld [vmem:[#allocation95_spill] sm:$0xff] }
 0x9cf   : > { %5480 = vpow2.f32 %v5062_v47  ;;  %v1065_v10 = vadd.f32 %v13187_v5, %v12844_v38  ;;  %v4668_v5 = vld [vmem:[%s6594_s9 + $0x8] sm:$0xff] }
 0x9d0   : > { %5482 = vpow2.f32 %v5059_v15 }
 0x9d1   : > { %5484 = vpow2.f32 %v5060_v14 }
 0x9d2   : > { %5486 = vpow2.f32 %v5063_v60 }
 0x9d5   : > { %v5475_v43 = vpop.eup %5474 }
 0x9d6   : > { %v4587_v13 = vadd.f32 1.0, %v5475_v43 }
 0x9d7   : > { %v5477_v52 = vpop.eup %5476 }
 0x9d8   : > { %v4588_v44 = vadd.f32 1.0, %v5477_v52  ;;  %5488 = vrcp.f32 %v4587_v13  ;;  %v13189_v52 = vld [vmem:[#allocation100_spill] sm:$0xff] }
 0x9d9   : > { %5490 = vpow2.f32 %v5064_v33 }
 0x9da   : > { %v5479_v21 = vpop.eup %5478  ;;  %5492 = vrcp.f32 %v4588_v44 }
 0x9db   : > { %v4591_v56 = vadd.f32 1.0, %v5479_v21 }
 0x9dc   : > { %v5481_v57 = vpop.eup %5480 }
 0x9dd   : > { %v4592_v18 = vadd.f32 1.0, %v5481_v57  ;;  %5494 = vrcp.f32 %v4591_v56  ;;  %v5483_v36 = vpop.eup %5482  ;;  %v13190_v57 = vsub.f32 1.0, %v13189_v52 }
 0x9de   : > { %v5485_v39 = vpop.eup %5484  ;;  %v4589_v0 = vadd.f32 1.0, %v5483_v36 }
 0x9df   : > { %5496 = vrcp.f32 %v4592_v18  ;;  %v5487_v41 = vpop.eup %5486  ;;  %v4590_v26 = vadd.f32 1.0, %v5485_v39  ;;  %v4651_v56 = vmul.f32 %v11290_v37, %v13190_v57  ;;  %v5065_v18 = vld [vmem:[%s6594_s9 + $0x70] sm:$0xff]  ;;  %v13191_v39 = vld [vmem:[#allocation101_spill] sm:$0xff] }
 0x9e0   : > { %v4593_v40 = vadd.f32 1.0, %v5487_v41  ;;  %5498 = vrcp.f32 %v4589_v0  ;;  %v13192_v41 = vsub.f32 1.0, %v13191_v39 }
 0x9e1   : > { %5500 = vrcp.f32 %v4590_v26 }
 0x9e2   : > { %5502 = vrcp.f32 %v4593_v40  ;;  %v4652_v0 = vmul.f32 %v11286_v50, %v13192_v41  ;;  %v4667_v40 = vld [vmem:[%s6594_s9] sm:$0xff] }
 0x9e5   : > { %v5489_v46 = vpop.eup %5488 }
 0x9e6   : > { %v5491_v11 = vpop.eup %5490 }
 0x9e7   : > { %v5493_v59 = vpop.eup %5492  ;;  %v4594_v32 = vadd.f32 1.0, %v5491_v11 }
 0x9ea   : > { %v5495_v42 = vpop.eup %5494 }
 0x9ec   : > { %v5497_v53 = vpop.eup %5496 }
 0x9ed   : > { %v5499_v38 = vpop.eup %5498 }
 0x9ee   : > { %v5501_v51 = vpop.eup %5500  ;;  %v4623_v30 = vsub.f32 1.0, %v5499_v38  ;;  %v4631_v55 = vmul.f32 %v5499_v38, %v11290_v37 }
 0x9ef   : > { %v5503_v29 = vpop.eup %5502  ;;  %v4624_v12 = vsub.f32 1.0, %v5501_v51  ;;  %v4632_v31 = vmul.f32 %v5501_v51, %v11286_v50  ;;  %v5066_v50 = vld [vmem:[%s6594_s9 + $0x78] sm:$0xff] }
 0x9f0   : > { %v4625_v43 = vsub.f32 1.0, %v5503_v29  ;;  %v4633_v24 = vmul.f32 %v5503_v29, %v11318_v19 }
 0xa02   : > { %v4544_v28 = vpop.f32.mrf.mxu0 }
 0xa03   : > { %v4545_v6 = vadd.f32 %v4544_v28, %v7892_v9 }
 0xa04   : > { %v4546_v7 = vpop.f32.mrf.mxu0 }
 0xa05   : > { %v4611_v22 = vmul.f32 %v5489_v46, %v4545_v6  ;;  %v4547_v16 = vadd.f32 %v4546_v7, %v12846_v4 }
 0xa06   : > { %v4550_v23 = vpop.f32.mrf.mxu0 }
 0xa07   : > { %v4615_v25 = vadd.f32 %v4611_v22, %v1059_v27  ;;  %v4612_v20 = vmul.f32 %v5493_v59, %v4547_v16  ;;  %v4551_v35 = vadd.f32 %v4550_v23, %v7892_v9  ;;  %v13193_v27 = vld [vmem:[#allocation102_spill] sm:$0xff] }
 0xa08   : > { %v4552_v63 = vpop.f32.mrf.mxu0 }
 0xa09   : > { %5504 = vtanh.f32 %v4615_v25  ;;  %v4616_v47 = vadd.f32 %v4612_v20, %v977_v61  ;;  %v4613_v49 = vmul.f32 %v5495_v42, %v4551_v35  ;;  %v4553_v8 = vadd.f32 %v4552_v63, %v12846_v4  ;;  %v13194_v61 = vld [vmem:[#allocation103_spill] sm:$0xff] }
 0xa0a   : > { %v13195_v23 = vsub.f32 1.0, %v13194_v61  ;;  %v13196_v20 = vsub.f32 1.0, %v13193_v27 }
 0xa0b   : > { %5506 = vtanh.f32 %v4616_v47  ;;  %v4617_v62 = vadd.f32 %v4613_v49, %v1065_v10  ;;  %v4614_v54 = vmul.f32 %v5497_v53, %v4553_v8 }
 0xa0c   : > { %5508 = vrcp.f32 %v4594_v32  ;;  %v4654_v25 = vmul.f32 %v11306_v2, %v13195_v23  ;;  %v4653_v35 = vmul.f32 %v11318_v19, %v13196_v20 }
 0xa0d   : > { %5510 = vtanh.f32 %v4617_v62  ;;  %v4618_v9 = vadd.f32 %v4614_v54, %v983_v45 }
 0xa0f   : > { %5512 = vtanh.f32 %v4618_v9 }
 0xa16   : > { %v5505_v34 = vpop.eup %5504 }
 0xa17   : > { %v4627_v4 = vmul.f32 %v5505_v34, %v4623_v30 }
 0xa18   : > { %v5507_v15 = vpop.eup %5506 }
 0xa19   : > { %v5509_v58 = vpop.eup %5508  ;;  %v4635_v17 = vadd.f32 %v4631_v55, %v4627_v4  ;;  %v4628_v14 = vmul.f32 %v5507_v15, %v4624_v12 }
 0xa1a   : > { %v5511_v60 = vpop.eup %5510  ;;  %v4626_v36 = vsub.f32 1.0, %v5509_v58  ;;  %v4634_v46 = vmul.f32 %v5509_v58, %v11306_v2 }
 0xa1b   : > { %v4643_v13 = vmul.f32 %v13189_v52, %v4635_v17  ;;  %v4636_v21 = vadd.f32 %v4632_v31, %v4628_v14  ;;  %v4629_v33 = vmul.f32 %v5511_v60, %v4625_v43 }
 0xa1c   : > { %v5513_v44 = vpop.eup %5512 }
 0xa1d   : > { %v4663_v28 = vadd.f32 %v5065_v18, %v4643_v13  ;;  %v4644_v26 = vmul.f32 %v13191_v39, %v4636_v21  ;;  %v4637_v6 = vadd.f32 %v4633_v24, %v4629_v33  ;;  %v4630_v7 = vmul.f32 %v5513_v44, %v4626_v36 }
 0xa1e   : > { %v4655_v11 = vadd.f32 %v4651_v56, %v4643_v13 }
 0xa1f   : > { %5067 = vst.msk [vmem:[%s6594_s9 + $0x70] sm:$0xff] %vm537_vm0, %v4663_v28  ;;  %v4656_v37 = vadd.f32 %v4652_v0, %v4644_v26  ;;  %v4671_v1 = vadd.f32 %v4667_v40, %v4644_v26  ;;  %v4645_v22 = vmul.f32 %v13193_v27, %v4637_v6  ;;  %v4638_v16 = vadd.f32 %v4634_v46, %v4630_v7 }
 0xa21   : > { %4673 = vst.msk [vmem:[%s6594_s9] sm:$0xff] %vm537_vm0, %v4671_v1  ;;  %v4675_v59 = vadd.f32 %v4656_v37, %v4655_v11  ;;  %v4664_v3 = vadd.f32 %v5066_v50, %v4645_v22  ;;  %v4646_v42 = vmul.f32 %v13194_v61, %v4638_v16  ;;  %v4657_v10 = vadd.f32 %v4653_v35, %v4645_v22 }
 0xa23   : > { %4677 = vst.msk [vmem:[%s464_s26] sm:$0xff] %vm537_vm0, %v4675_v59  ;;  %5068 = vst.msk [vmem:[%s6594_s9 + $0x78] sm:$0xff] %vm537_vm0, %v4664_v3  ;;  %v4658_v32 = vadd.f32 %v4654_v25, %v4646_v42  ;;  %v4672_v63 = vadd.f32 %v4668_v5, %v4646_v42 }
 0xa25   : > { %4674 = vst.msk [vmem:[%s6594_s9 + $0x8] sm:$0xff] %vm537_vm0, %v4672_v63  ;;  %v4676_v47 = vadd.f32 %v4658_v32, %v4657_v10 }
 0xa27   : > { %4678 = vst.msk [vmem:[%s464_s26 + $0x8] sm:$0xff] %vm537_vm0, %v4676_v47 }
 0xa28 PF: > { %s13197_s27 = sld [smem:[#allocation14_spill]]  ;;  %s13200_s24 = smov %s6328_s25 }
 0xa29   : > { %s13198_s28 = sld [smem:[#allocation13_spill]] }
 0xa2a   : > { %s13199_s26 = sld [smem:[#allocation15_spill]] }
 0xa2e   : > { %p24_p6 = scmp.ge.s32.totalorder %s13197_s27, 5  }
 0xa2f   : > { %s13201_s25 = smov %s13198_s28 }
 0xa30   :  { %26 = sbr.rel (!%p24_p6) target bundleno = 10 (0xa), region = 146 }
 0xa35   :  { %4716 = vsyncpa [#allocation4], 1 }
 0xa36   :  { %4718 = vsyncpa [#allocation4 + $0x1], 1 }
 0xa37   :  { %4719 = vsyncpa [#allocation6], 1 }
 0xa38   :  { %4721 = vsyncpa [#allocation6 + $0x1], 1 }
 0xa39   :  { %4722 = vsyncpa [#allocation9], 1 }
 0xa3a   :  { %4724 = vsyncpa [#allocation9 + $0x1], 1 }

</bundles_post_ra>
